<compile_context>
chip_gen: v6e
topology: v6e:2x2x1
jax: 0.10.0
libtpu: 0.0.40
codegen_flags: <defaults>
</compile_context>

<pallas_src>
import functools

import jax
import jax.numpy as jnp
from jax.experimental import pallas as pl
from jax.experimental.pallas import tpu as pltpu


_VMEM_LIMIT = 32 * 1024 * 1024     # fits the scoped-VMEM default on v5e/v6e/v7x
_ROW_TILE_TARGET = 256             # 256-512 keeps double buffering alive on v7x (64 MiB VMEM)


def _compiler_params():
    return pltpu.CompilerParams(dimension_semantics=("parallel",),
                                vmem_limit_bytes=_VMEM_LIMIT)


def _row_tile(rows, target=_ROW_TILE_TARGET):
    """Largest multiple-of-8 divisor of `rows` that is <= target (else full rows)."""
    if rows <= target:
        return rows
    for t in range(target, 7, -8):
        if rows % t == 0:
            return t
    return rows


# ---------------------------------------------------------------------------
# In-kernel math helpers (all f32, all Mosaic-lowerable ops)
# ---------------------------------------------------------------------------
def _ln(x, g, b, eps=1e-5):
    mean = jnp.mean(x, axis=-1, keepdims=True)
    var = jnp.mean(jnp.square(x - mean), axis=-1, keepdims=True)
    return (x - mean) * jax.lax.rsqrt(var + eps) * g + b


def _erf(x):
    # Abramowitz & Stegun 7.1.26, |err| < 1.5e-7 (f32-exact): only exp / mul / div.
    p = 0.3275911
    a1, a2, a3, a4, a5 = 0.254829592, -0.284496736, 1.421413741, -1.453152027, 1.061405429
    ax = jnp.abs(x)
    t = 1.0 / (1.0 + p * ax)
    poly = ((((a5 * t + a4) * t + a3) * t + a2) * t + a1) * t
    y = 1.0 - poly * jnp.exp(-ax * ax)
    return jnp.where(x >= 0, y, -y)


def _gelu(x):
    # exact (erf-based) GELU like torch.nn.GELU(), via in-kernel erf approximation
    return 0.5 * x * (1.0 + _erf(x * 0.7071067811865476))


def _sigmoid(x):
    # numerically stable: z = exp(-|x|) in (0, 1], never overflows
    z = jnp.exp(-jnp.abs(x))
    return jnp.where(x >= 0, 1.0 / (1.0 + z), z / (1.0 + z))


# ---------------------------------------------------------------------------
# Fused Pallas kernels
# ---------------------------------------------------------------------------
def _ln_kernel(x_ref, g_ref, b_ref, o_ref):
    x = x_ref[...].astype(jnp.float32)
    o_ref[...] = _ln(x, g_ref[...], b_ref[...]).astype(o_ref.dtype)


def _ln_linear_ln_kernel(*refs, add_pos):
    # LN -> Linear(+bias) -> LN (-> +pos_emb)   (patch / from-patch embedding)
    if add_pos:
        x_ref, g1_ref, b1_ref, w_ref, bw_ref, g2_ref, b2_ref, pos_ref, o_ref = refs
    else:
        x_ref, g1_ref, b1_ref, w_ref, bw_ref, g2_ref, b2_ref, o_ref = refs
        pos_ref = None
    x = x_ref[...].astype(jnp.float32)
    h = _ln(x, g1_ref[...], b1_ref[...])
    y = jnp.dot(h, w_ref[...], preferred_element_type=jnp.float32) + bw_ref[...]
    y = _ln(y, g2_ref[...], b2_ref[...])
    if pos_ref is not None:
        y = y + pos_ref[...].astype(jnp.float32)
    o_ref[...] = y.astype(o_ref.dtype)


def _attn_block_kernel(x_ref, g_ref, b_ref, wqkv_ref, wout_ref, o_ref, *,
                       heads, dim_head, scale):
    # Fused: LN -> to_qkv -> per-head softmax attention -> to_out -> +residual
    x = x_ref[0].astype(jnp.float32)                                   # (N, E)
    h = _ln(x, g_ref[...], b_ref[...])
    qkv = jnp.dot(h, wqkv_ref[...], preferred_element_type=jnp.float32)  # (N, 3*inner)
    inner = heads * dim_head
    y = jnp.zeros(x.shape, jnp.float32)
    for hh in range(heads):                                            # small static unroll
        q = qkv[:, hh * dim_head:(hh + 1) * dim_head]
        k = qkv[:, inner + hh * dim_head:inner + (hh + 1) * dim_head]
        v = qkv[:, 2 * inner + hh * dim_head:2 * inner + (hh + 1) * dim_head]
        s = jax.lax.dot_general(q, k, (((1,), (1,)), ((), ())),
                                preferred_element_type=jnp.float32) * scale
        s = s - jnp.max(s, axis=-1, keepdims=True)
        p = jnp.exp(s)
        p = p * pl.reciprocal(jnp.sum(p, axis=-1, keepdims=True), approx=True)
        oh = jnp.dot(p, v, preferred_element_type=jnp.float32)          # (N, dh)
        # accumulate the per-head slice of the output projection (avoids lane concat)
        y = y + jnp.dot(oh, wout_ref[hh * dim_head:(hh + 1) * dim_head, :],
                        preferred_element_type=jnp.float32)
    o_ref[0] = (x + y).astype(o_ref.dtype)


def _ff_block_kernel(x_ref, g_ref, b_ref, w1_ref, b1_ref, w2_ref, b2_ref, o_ref):
    # Fused: LN -> Linear -> GELU -> Linear -> +residual
    x = x_ref[...].astype(jnp.float32)
    h = _ln(x, g_ref[...], b_ref[...])
    h = jnp.dot(h, w1_ref[...], preferred_element_type=jnp.float32) + b1_ref[...]
    h = _gelu(h)
    y = jnp.dot(h, w2_ref[...], preferred_element_type=jnp.float32) + b2_ref[...]
    o_ref[...] = (x + y).astype(o_ref.dtype)


def _convT_sigmoid_kernel(xp_ref, w_ref, b_ref, o_ref, *, C, Cout, H, W):
    # ConvTranspose2d(C, C, 3, stride=1, padding=1) + Sigmoid for one batch element.
    # xp_ref: (1, C, H+2, W+2) padded image in VMEM; w_ref: (Cout, C*9) in SMEM;
    # b_ref: (Cout,) in SMEM; o_ref: (1, Cout, H, W).
    # Taps are built in-kernel from the padded tile -> no im2col in HBM.
    accs = [jnp.zeros((H, W), jnp.float32) for _ in range(Cout)]
    for ci in range(C):
        for kh in range(3):
            for kw in range(3):
                tap = xp_ref[0, ci, kh:kh + H, kw:kw + W].astype(jnp.float32)
                r = ci * 9 + kh * 3 + kw
                for co in range(Cout):
                    accs[co] = accs[co] + w_ref[co, r] * tap
    for co in range(Cout):
        o_ref[0, co, :, :] = _sigmoid(accs[co] + b_ref[co]).astype(o_ref.dtype)


# ---------------------------------------------------------------------------
# pallas_call wrappers
# ---------------------------------------------------------------------------
def layer_norm_rows(x2d, gamma, beta):
    R, D = x2d.shape
    tr = _row_tile(R)
    return pl.pallas_call(
        _ln_kernel,
        out_shape=jax.ShapeDtypeStruct((R, D), x2d.dtype),
        grid=(R // tr,),
        in_specs=[pl.BlockSpec((tr, D), lambda i: (i, 0)),
                  pl.BlockSpec((1, D), lambda i: (0, 0)),
                  pl.BlockSpec((1, D), lambda i: (0, 0))],
        out_specs=pl.BlockSpec((tr, D), lambda i: (i, 0)),
        compiler_params=_compiler_params(),
    )(x2d, gamma.reshape(1, D), beta.reshape(1, D))


def ln_linear_ln(x2d, g1, b1, w, bw, g2, b2, pos2d=None):
    R, Din = x2d.shape
    Dout = w.shape[1]
    tr = _row_tile(R)
    add_pos = pos2d is not None
    kern = functools.partial(_ln_linear_ln_kernel, add_pos=add_pos)
    in_specs = [pl.BlockSpec((tr, Din), lambda i: (i, 0)),
                pl.BlockSpec((1, Din), lambda i: (0, 0)),
                pl.BlockSpec((1, Din), lambda i: (0, 0)),
                pl.BlockSpec((Din, Dout), lambda i: (0, 0)),
                pl.BlockSpec((1, Dout), lambda i: (0, 0)),
                pl.BlockSpec((1, Dout), lambda i: (0, 0)),
                pl.BlockSpec((1, Dout), lambda i: (0, 0))]
    args = [x2d, g1.reshape(1, Din), b1.reshape(1, Din), w, bw.reshape(1, Dout),
            g2.reshape(1, Dout), b2.reshape(1, Dout)]
    if add_pos:
        in_specs.append(pl.BlockSpec((tr, Dout), lambda i: (i, 0)))
        args.append(pos2d)
    return pl.pallas_call(
        kern,
        out_shape=jax.ShapeDtypeStruct((R, Dout), x2d.dtype),
        grid=(R // tr,),
        in_specs=in_specs,
        out_specs=pl.BlockSpec((tr, Dout), lambda i: (i, 0)),
        compiler_params=_compiler_params(),
    )(*args)


def attn_block(x, g, b, w_qkv, w_out, heads, dim_head):
    B, N, E = x.shape
    inner = heads * dim_head
    kern = functools.partial(_attn_block_kernel, heads=heads, dim_head=dim_head,
                             scale=dim_head ** -0.5)
    return pl.pallas_call(
        kern,
        out_shape=jax.ShapeDtypeStruct((B, N, E), x.dtype),
        grid=(B,),
        in_specs=[pl.BlockSpec((1, N, E), lambda bb: (bb, 0, 0)),
                  pl.BlockSpec((1, E), lambda bb: (0, 0)),
                  pl.BlockSpec((1, E), lambda bb: (0, 0)),
                  pl.BlockSpec((E, 3 * inner), lambda bb: (0, 0)),
                  pl.BlockSpec((inner, E), lambda bb: (0, 0))],
        out_specs=pl.BlockSpec((1, N, E), lambda bb: (bb, 0, 0)),
        compiler_params=_compiler_params(),
    )(x, g.reshape(1, E), b.reshape(1, E), w_qkv, w_out)


def ff_block(x2d, g, b, w1, b1, w2, b2):
    R, E = x2d.shape
    M = w1.shape[1]
    tr = _row_tile(R)
    return pl.pallas_call(
        _ff_block_kernel,
        out_shape=jax.ShapeDtypeStruct((R, E), x2d.dtype),
        grid=(R // tr,),
        in_specs=[pl.BlockSpec((tr, E), lambda i: (i, 0)),
                  pl.BlockSpec((1, E), lambda i: (0, 0)),
                  pl.BlockSpec((1, E), lambda i: (0, 0)),
                  pl.BlockSpec((E, M), lambda i: (0, 0)),
                  pl.BlockSpec((1, M), lambda i: (0, 0)),
                  pl.BlockSpec((M, E), lambda i: (0, 0)),
                  pl.BlockSpec((1, E), lambda i: (0, 0))],
        out_specs=pl.BlockSpec((tr, E), lambda i: (i, 0)),
        compiler_params=_compiler_params(),
    )(x2d, g.reshape(1, E), b.reshape(1, E), w1, b1.reshape(1, M), w2, b2.reshape(1, E))


def conv_transpose3x3_sigmoid(x, w, b):
    # ConvTranspose2d(C, C, k=3, stride=1, padding=1) + Sigmoid.
    # Equivalent to a standard 3x3 conv (padding 1) with flipped / transposed weights.
    B, C, H, W = x.shape
    Cout = w.shape[1]
    w_std = jnp.flip(w, axis=(2, 3)).transpose(1, 0, 2, 3)        # (Cout, Cin, 3, 3)
    wmat = w_std.reshape(Cout, C * 9)                             # [co, ci*9 + kh*3 + kw]
    x_pad = jnp.pad(x, ((0, 0), (0, 0), (1, 1), (1, 1)))
    kern = functools.partial(_convT_sigmoid_kernel, C=C, Cout=Cout, H=H, W=W)
    return pl.pallas_call(
        kern,
        out_shape=jax.ShapeDtypeStruct((B, Cout, H, W), x.dtype),
        grid=(B,),
        in_specs=[pl.BlockSpec((1, C, H + 2, W + 2), lambda bb: (bb, 0, 0, 0)),
                  pl.BlockSpec(memory_space=pltpu.MemorySpace.SMEM),
                  pl.BlockSpec(memory_space=pltpu.MemorySpace.SMEM)],
        out_specs=pl.BlockSpec((1, Cout, H, W), lambda bb: (bb, 0, 0, 0)),
        compiler_params=_compiler_params(),
    )(x_pad, wmat, b)


# ---------------------------------------------------------------------------
# Plain-JAX glue (rearranges, parameter init, sincos pos-emb)
# ---------------------------------------------------------------------------
def posemb_sincos_2d(h, w, dim, temperature=10000.0, dtype=jnp.float32):
    assert dim % 4 == 0
    y, x = jnp.meshgrid(jnp.arange(h, dtype=jnp.float32),
                        jnp.arange(w, dtype=jnp.float32), indexing="ij")
    omega = jnp.arange(dim // 4, dtype=jnp.float32) / (dim // 4 - 1)
    omega = 1.0 / (temperature ** omega)
    y = y.reshape(-1)[:, None] * omega[None, :]
    x = x.reshape(-1)[:, None] * omega[None, :]
    pe = jnp.concatenate([jnp.sin(x), jnp.cos(x), jnp.sin(y), jnp.cos(y)], axis=1)
    return pe.astype(dtype)


def init_transformer(key, depth, dim, heads, dim_head, mlp_dim):
    inner = heads * dim_head
    layers = []
    for _ in range(depth):
        key, k1, k2, k3, k4, k5, k6 = jax.random.split(key, 7)
        layers.append(dict(
            attn_ln_g=jnp.ones((dim,), jnp.float32),
            attn_ln_b=jnp.zeros((dim,), jnp.float32),
            w_qkv=jax.random.normal(k1, (dim, 3 * inner), jnp.float32) * 0.05,
            w_out=jax.random.normal(k2, (inner, dim), jnp.float32) * 0.05,
            ff_ln_g=jnp.ones((dim,), jnp.float32),
            ff_ln_b=jnp.zeros((dim,), jnp.float32),
            ff_w1=jax.random.normal(k3, (dim, mlp_dim), jnp.float32) * 0.05,
            ff_b1=jax.random.normal(k5, (mlp_dim,), jnp.float32) * 0.01,
            ff_w2=jax.random.normal(k4, (mlp_dim, dim), jnp.float32) * 0.05,
            ff_b2=jax.random.normal(k6, (dim,), jnp.float32) * 0.01,
        ))
    return dict(layers=layers,
                norm_g=jnp.ones((dim,), jnp.float32),
                norm_b=jnp.zeros((dim,), jnp.float32)), key


def init_params(key, cfg):
    C, E = cfg["channels"], cfg["emb"]
    p1, p2 = cfg["patch_h"], cfg["patch_w"]
    pd = C * p1 * p2

    def nrm(k, shape, s=0.05):
        return jax.random.normal(k, shape, jnp.float32) * s

    key, *ks = jax.random.split(key, 9)
    enc, key = init_transformer(key, cfg["layers"], E, cfg["heads"], cfg["dim_head"], cfg["mlp_dim"])
    dec, key = init_transformer(key, cfg["layers"], E, cfg["heads"], cfg["dim_head"], cfg["mlp_dim"])
    params = dict(
        pe_ln1_g=jnp.ones((pd,), jnp.float32), pe_ln1_b=jnp.zeros((pd,), jnp.float32),
        pe_w=nrm(ks[0], (pd, E)), pe_b=nrm(ks[1], (E,), 0.01),
        pe_ln2_g=jnp.ones((E,), jnp.float32), pe_ln2_b=jnp.zeros((E,), jnp.float32),
        pos_emb=posemb_sincos_2d(cfg["img_h"] // p1, cfg["img_w"] // p2, E),
        encoder=enc, decoder=dec,
        fpe_ln1_g=jnp.ones((E,), jnp.float32), fpe_ln1_b=jnp.zeros((E,), jnp.float32),
        fpe_w=nrm(ks[2], (E, pd)), fpe_b=nrm(ks[3], (pd,), 0.01),
        fpe_ln2_g=jnp.ones((pd,), jnp.float32), fpe_ln2_b=jnp.zeros((pd,), jnp.float32),
        convT_w=nrm(ks[4], (C, C, 3, 3), 0.2),     # torch ConvTranspose2d (Cin, Cout, kH, kW)
        convT_b=nrm(ks[5], (C,), 0.05),
    )
    return params, key


# ---------------------------------------------------------------------------
# Model forward (mirrors ViTAE.forward = decode(encode(img)))
# ---------------------------------------------------------------------------
def transformer_forward(x, tp, heads, dim_head):
    B, N, E = x.shape
    for lp in tp["layers"]:
        x = attn_block(x, lp["attn_ln_g"], lp["attn_ln_b"], lp["w_qkv"], lp["w_out"],
                       heads, dim_head)
        x = ff_block(x.reshape(B * N, E), lp["ff_ln_g"], lp["ff_ln_b"],
                     lp["ff_w1"], lp["ff_b1"], lp["ff_w2"], lp["ff_b2"]).reshape(B, N, E)
    xn = layer_norm_rows(x.reshape(B * N, E), tp["norm_g"], tp["norm_b"])
    return xn.reshape(B, N, E)


def vitae_forward(img, params, cfg):
    B, C, H, W = img.shape
    p1, p2 = cfg["patch_h"], cfg["patch_w"]
    hc, wc = H // p1, W // p2
    N = hc * wc
    E = cfg["emb"]
    pd = C * p1 * p2

    # ---- encode ----
    # Rearrange 'b c (h p1) (w p2) -> b (h w) (p1 p2 c)'
    x = img.reshape(B, C, hc, p1, wc, p2).transpose(0, 2, 4, 3, 5, 1).reshape(B * N, pd)
    pos = jnp.tile(params["pos_emb"].astype(img.dtype), (B, 1))            # (B*N, E)
    h = ln_linear_ln(x, params["pe_ln1_g"], params["pe_ln1_b"],
                     params["pe_w"], params["pe_b"],
                     params["pe_ln2_g"], params["pe_ln2_b"], pos2d=pos)
    z = transformer_forward(h.reshape(B, N, E), params["encoder"],
                            cfg["heads"], cfg["dim_head"])

    # ---- decode ----
    y = transformer_forward(z, params["decoder"], cfg["heads"], cfg["dim_head"])
    h = ln_linear_ln(y.reshape(B * N, E), params["fpe_ln1_g"], params["fpe_ln1_b"],
                     params["fpe_w"], params["fpe_b"],
                     params["fpe_ln2_g"], params["fpe_ln2_b"])             # (B*N, pd)
    # Rearrange 'b (h w) (p1 p2 c) -> b c (h p1) (w p2)'
    patches = h.reshape(B, hc, wc, p1, p2, C).transpose(0, 5, 1, 3, 2, 4).reshape(B, C, H, W)
    out = conv_transpose3x3_sigmoid(patches, params["convT_w"], params["convT_b"])
    return out, z


# ---------------------------------------------------------------------------
if __name__ == "__main__":
    # small config, lane-friendly dims: pd=256, emb=128, inner=128, mlp=256
    cfg = dict(img_h=32, img_w=32, channels=4, emb=128, layers=2, heads=4,
               patch_count=4, mlp_dim=256, dim_head=32)
    cfg["patch_h"] = cfg["img_h"] // cfg["patch_count"]
    cfg["patch_w"] = cfg["img_w"] // cfg["patch_count"]

    key = jax.random.PRNGKey(0)
    params, key = init_params(key, cfg)
    key, ik = jax.random.split(key)
    img = jax.random.uniform(ik, (2, cfg["channels"], cfg["img_h"], cfg["img_w"]),
                             dtype=jnp.float32)

    fwd = jax.jit(functools.partial(vitae_forward, cfg=cfg))
    out, z = fwd(img, params)
    jax.block_until_ready((out, z))

    assert out.shape == img.shape, out.shape
    assert z.shape == (2, cfg["patch_count"] ** 2, cfg["emb"]), z.shape
    assert bool(jnp.all(jnp.isfinite(out))) and bool(jnp.all(jnp.isfinite(z)))
    # Sigmoid output must be strictly inside (0, 1)
    assert bool(jnp.all((out > 0.0) & (out < 1.0)))
    print("KERNEL_OK")
</pallas_src>

<mosaic_0001>
module attributes {stable_mosaic.version = 11 : i64} {
  func.func @_ln_linear_ln_kernel(%arg0: i32, %arg1: memref<32x256xf32, #tpu.memory_space<vmem>>, %arg2: memref<1x256xf32, #tpu.memory_space<vmem>>, %arg3: memref<1x256xf32, #tpu.memory_space<vmem>>, %arg4: memref<256x128xf32, #tpu.memory_space<vmem>>, %arg5: memref<1x128xf32, #tpu.memory_space<vmem>>, %arg6: memref<1x128xf32, #tpu.memory_space<vmem>>, %arg7: memref<1x128xf32, #tpu.memory_space<vmem>>, %arg8: memref<32x128xf32, #tpu.memory_space<vmem>>, %arg9: memref<32x128xf32, #tpu.memory_space<vmem>>) attributes {dimension_semantics = [#tpu.dimension_semantics<parallel>], iteration_bounds = array<i64: 1>, scalar_prefetch = 0 : i64, scratch_operands = 0 : i64, tpu.core_type = #tpu.core_type<tc>, window_params = [{transform_indices = @transform_0, window_bounds = array<i64: 32, 256>}, {pipeline_mode = #tpu.pipeline_mode<synchronous>, transform_indices = @transform_1, window_bounds = array<i64: 1, 256>}, {pipeline_mode = #tpu.pipeline_mode<synchronous>, transform_indices = @transform_2, window_bounds = array<i64: 1, 256>}, {pipeline_mode = #tpu.pipeline_mode<synchronous>, transform_indices = @transform_3, window_bounds = array<i64: 256, 128>}, {pipeline_mode = #tpu.pipeline_mode<synchronous>, transform_indices = @transform_4, window_bounds = array<i64: 1, 128>}, {pipeline_mode = #tpu.pipeline_mode<synchronous>, transform_indices = @transform_5, window_bounds = array<i64: 1, 128>}, {pipeline_mode = #tpu.pipeline_mode<synchronous>, transform_indices = @transform_6, window_bounds = array<i64: 1, 128>}, {transform_indices = @transform_7, window_bounds = array<i64: 32, 128>}, {transform_indices = @transform_8, window_bounds = array<i64: 32, 128>}]} {
    %c0 = arith.constant 0 : index
    %c0_0 = arith.constant 0 : index
    %0 = vector.load %arg1[%c0, %c0_0] : memref<32x256xf32, #tpu.memory_space<vmem>>, vector<32x256xf32>
    %c0_1 = arith.constant 0 : index
    %c0_2 = arith.constant 0 : index
    %1 = vector.load %arg2[%c0_1, %c0_2] : memref<1x256xf32, #tpu.memory_space<vmem>>, vector<1x256xf32>
    %c0_3 = arith.constant 0 : index
    %c0_4 = arith.constant 0 : index
    %2 = vector.load %arg3[%c0_3, %c0_4] : memref<1x256xf32, #tpu.memory_space<vmem>>, vector<1x256xf32>
    %cst = arith.constant dense<0.000000e+00> : vector<32xf32>
    %3 = vector.multi_reduction <add>, %0, %cst [1] : vector<32x256xf32> to vector<32xf32>
    %4 = vector.shape_cast %3 : vector<32xf32> to vector<32x1xf32>
    %cst_5 = arith.constant 2.560000e+02 : f32
    %5 = vector.broadcast %cst_5 : f32 to vector<32x1xf32>
    %6 = arith.divf %4, %5 : vector<32x1xf32>
    %7 = vector.broadcast %6 : vector<32x1xf32> to vector<32x256xf32>
    %8 = arith.subf %0, %7 : vector<32x256xf32>
    %9 = arith.mulf %8, %8 : vector<32x256xf32>
    %cst_6 = arith.constant dense<0.000000e+00> : vector<32xf32>
    %10 = vector.multi_reduction <add>, %9, %cst_6 [1] : vector<32x256xf32> to vector<32xf32>
    %11 = vector.shape_cast %10 : vector<32xf32> to vector<32x1xf32>
    %cst_7 = arith.constant 2.560000e+02 : f32
    %12 = vector.broadcast %cst_7 : f32 to vector<32x1xf32>
    %13 = arith.divf %11, %12 : vector<32x1xf32>
    %14 = vector.broadcast %6 : vector<32x1xf32> to vector<32x256xf32>
    %15 = arith.subf %0, %14 : vector<32x256xf32>
    %cst_8 = arith.constant 9.99999974E-6 : f32
    %16 = vector.broadcast %cst_8 : f32 to vector<32x1xf32>
    %17 = arith.addf %13, %16 : vector<32x1xf32>
    %18 = math.rsqrt %17 : vector<32x1xf32>
    %19 = vector.broadcast %18 : vector<32x1xf32> to vector<32x256xf32>
    %20 = arith.mulf %15, %19 : vector<32x256xf32>
    %21 = vector.broadcast %1 : vector<1x256xf32> to vector<32x256xf32>
    %22 = arith.mulf %20, %21 : vector<32x256xf32>
    %23 = vector.broadcast %2 : vector<1x256xf32> to vector<32x256xf32>
    %24 = arith.addf %22, %23 : vector<32x256xf32>
    %c0_9 = arith.constant 0 : index
    %c0_10 = arith.constant 0 : index
    %25 = vector.load %arg4[%c0_9, %c0_10] : memref<256x128xf32, #tpu.memory_space<vmem>>, vector<256x128xf32>
    %cst_11 = arith.constant dense<0.000000e+00> : vector<32x128xf32>
    %26 = tpu.matmul %24, %25, %cst_11 {dimension_numbers = #tpu.dot_dimension_numbers<[1], [0], [0], [1], [0, 0, 1, 1], [], []>} : vector<32x256xf32>, vector<256x128xf32>, vector<32x128xf32> -> vector<32x128xf32>
    %c0_12 = arith.constant 0 : index
    %c0_13 = arith.constant 0 : index
    %27 = vector.load %arg5[%c0_12, %c0_13] : memref<1x128xf32, #tpu.memory_space<vmem>>, vector<1x128xf32>
    %28 = vector.broadcast %27 : vector<1x128xf32> to vector<32x128xf32>
    %29 = arith.addf %26, %28 : vector<32x128xf32>
    %c0_14 = arith.constant 0 : index
    %c0_15 = arith.constant 0 : index
    %30 = vector.load %arg6[%c0_14, %c0_15] : memref<1x128xf32, #tpu.memory_space<vmem>>, vector<1x128xf32>
    %c0_16 = arith.constant 0 : index
    %c0_17 = arith.constant 0 : index
    %31 = vector.load %arg7[%c0_16, %c0_17] : memref<1x128xf32, #tpu.memory_space<vmem>>, vector<1x128xf32>
    %cst_18 = arith.constant dense<0.000000e+00> : vector<32xf32>
    %32 = vector.multi_reduction <add>, %29, %cst_18 [1] : vector<32x128xf32> to vector<32xf32>
    %33 = vector.shape_cast %32 : vector<32xf32> to vector<32x1xf32>
    %cst_19 = arith.constant 1.280000e+02 : f32
    %34 = vector.broadcast %cst_19 : f32 to vector<32x1xf32>
    %35 = arith.divf %33, %34 : vector<32x1xf32>
    %36 = vector.broadcast %35 : vector<32x1xf32> to vector<32x128xf32>
    %37 = arith.subf %29, %36 : vector<32x128xf32>
    %38 = arith.mulf %37, %37 : vector<32x128xf32>
    %cst_20 = arith.constant dense<0.000000e+00> : vector<32xf32>
    %39 = vector.multi_reduction <add>, %38, %cst_20 [1] : vector<32x128xf32> to vector<32xf32>
    %40 = vector.shape_cast %39 : vector<32xf32> to vector<32x1xf32>
    %cst_21 = arith.constant 1.280000e+02 : f32
    %41 = vector.broadcast %cst_21 : f32 to vector<32x1xf32>
    %42 = arith.divf %40, %41 : vector<32x1xf32>
    %43 = vector.broadcast %35 : vector<32x1xf32> to vector<32x128xf32>
    %44 = arith.subf %29, %43 : vector<32x128xf32>
    %cst_22 = arith.constant 9.99999974E-6 : f32
    %45 = vector.broadcast %cst_22 : f32 to vector<32x1xf32>
    %46 = arith.addf %42, %45 : vector<32x1xf32>
    %47 = math.rsqrt %46 : vector<32x1xf32>
    %48 = vector.broadcast %47 : vector<32x1xf32> to vector<32x128xf32>
    %49 = arith.mulf %44, %48 : vector<32x128xf32>
    %50 = vector.broadcast %30 : vector<1x128xf32> to vector<32x128xf32>
    %51 = arith.mulf %49, %50 : vector<32x128xf32>
    %52 = vector.broadcast %31 : vector<1x128xf32> to vector<32x128xf32>
    %53 = arith.addf %51, %52 : vector<32x128xf32>
    %c0_23 = arith.constant 0 : index
    %c0_24 = arith.constant 0 : index
    %54 = vector.load %arg8[%c0_23, %c0_24] : memref<32x128xf32, #tpu.memory_space<vmem>>, vector<32x128xf32>
    %55 = arith.addf %53, %54 : vector<32x128xf32>
    %c0_25 = arith.constant 0 : index
    %c0_26 = arith.constant 0 : index
    %56 = vector.load %arg9[%c0_25, %c0_26] : memref<32x128xf32, #tpu.memory_space<vmem>>, vector<32x128xf32>
    tpu.vector_store %arg9[%c0_25, %c0_26], %55 {strides = array<i32>} : memref<32x128xf32, #tpu.memory_space<vmem>>, vector<32x128xf32>,
    return
  }
  func.func @transform_0(%arg0: i32) -> (i32, i32) {
    %c0_i32 = arith.constant 0 : i32
    %c0_i32_0 = arith.constant 0 : i32
    return %arg0, %c0_i32 : i32, i32
  }
  func.func @transform_1(%arg0: i32) -> (i32, i32) {
    %c0_i32 = arith.constant 0 : i32
    %c0_i32_0 = arith.constant 0 : i32
    %c0_i32_1 = arith.constant 0 : i32
    return %c0_i32, %c0_i32_0 : i32, i32
  }
  func.func @transform_2(%arg0: i32) -> (i32, i32) {
    %c0_i32 = arith.constant 0 : i32
    %c0_i32_0 = arith.constant 0 : i32
    %c0_i32_1 = arith.constant 0 : i32
    return %c0_i32, %c0_i32_0 : i32, i32
  }
  func.func @transform_3(%arg0: i32) -> (i32, i32) {
    %c0_i32 = arith.constant 0 : i32
    %c0_i32_0 = arith.constant 0 : i32
    %c0_i32_1 = arith.constant 0 : i32
    return %c0_i32, %c0_i32_0 : i32, i32
  }
  func.func @transform_4(%arg0: i32) -> (i32, i32) {
    %c0_i32 = arith.constant 0 : i32
    %c0_i32_0 = arith.constant 0 : i32
    %c0_i32_1 = arith.constant 0 : i32
    return %c0_i32, %c0_i32_0 : i32, i32
  }
  func.func @transform_5(%arg0: i32) -> (i32, i32) {
    %c0_i32 = arith.constant 0 : i32
    %c0_i32_0 = arith.constant 0 : i32
    %c0_i32_1 = arith.constant 0 : i32
    return %c0_i32, %c0_i32_0 : i32, i32
  }
  func.func @transform_6(%arg0: i32) -> (i32, i32) {
    %c0_i32 = arith.constant 0 : i32
    %c0_i32_0 = arith.constant 0 : i32
    %c0_i32_1 = arith.constant 0 : i32
    return %c0_i32, %c0_i32_0 : i32, i32
  }
  func.func @transform_7(%arg0: i32) -> (i32, i32) {
    %c0_i32 = arith.constant 0 : i32
    %c0_i32_0 = arith.constant 0 : i32
    return %arg0, %c0_i32 : i32, i32
  }
  func.func @transform_8(%arg0: i32) -> (i32, i32) {
    %c0_i32 = arith.constant 0 : i32
    %c0_i32_0 = arith.constant 0 : i32
    return %arg0, %c0_i32 : i32, i32
  }
}

module attributes {stable_mosaic.version = 11 : i64} {
  func.func @_attn_block_kernel(%arg0: i32, %arg1: memref<1x16x128xf32, #tpu.memory_space<vmem>>, %arg2: memref<1x128xf32, #tpu.memory_space<vmem>>, %arg3: memref<1x128xf32, #tpu.memory_space<vmem>>, %arg4: memref<128x384xf32, #tpu.memory_space<vmem>>, %arg5: memref<128x128xf32, #tpu.memory_space<vmem>>, %arg6: memref<1x16x128xf32, #tpu.memory_space<vmem>>) attributes {dimension_semantics = [#tpu.dimension_semantics<parallel>], iteration_bounds = array<i64: 2>, scalar_prefetch = 0 : i64, scratch_operands = 0 : i64, tpu.core_type = #tpu.core_type<tc>, window_params = [{transform_indices = @transform_0, window_bounds = array<i64: 1, 16, 128>}, {pipeline_mode = #tpu.pipeline_mode<synchronous>, transform_indices = @transform_1, window_bounds = array<i64: 1, 128>}, {pipeline_mode = #tpu.pipeline_mode<synchronous>, transform_indices = @transform_2, window_bounds = array<i64: 1, 128>}, {pipeline_mode = #tpu.pipeline_mode<synchronous>, transform_indices = @transform_3, window_bounds = array<i64: 128, 384>}, {pipeline_mode = #tpu.pipeline_mode<synchronous>, transform_indices = @transform_4, window_bounds = array<i64: 128, 128>}, {transform_indices = @transform_5, window_bounds = array<i64: 1, 16, 128>}]} {
    %c0 = arith.constant 0 : index
    %c0_0 = arith.constant 0 : index
    %c0_1 = arith.constant 0 : index
    %0 = vector.load %arg1[%c0, %c0_0, %c0_1] : memref<1x16x128xf32, #tpu.memory_space<vmem>>, vector<1x16x128xf32>
    %1 = vector.shape_cast %0 : vector<1x16x128xf32> to vector<16x128xf32>
    %c0_2 = arith.constant 0 : index
    %c0_3 = arith.constant 0 : index
    %2 = vector.load %arg2[%c0_2, %c0_3] : memref<1x128xf32, #tpu.memory_space<vmem>>, vector<1x128xf32>
    %c0_4 = arith.constant 0 : index
    %c0_5 = arith.constant 0 : index
    %3 = vector.load %arg3[%c0_4, %c0_5] : memref<1x128xf32, #tpu.memory_space<vmem>>, vector<1x128xf32>
    %cst = arith.constant dense<0.000000e+00> : vector<16xf32>
    %4 = vector.multi_reduction <add>, %1, %cst [1] : vector<16x128xf32> to vector<16xf32>
    %5 = vector.shape_cast %4 : vector<16xf32> to vector<16x1xf32>
    %cst_6 = arith.constant 1.280000e+02 : f32
    %6 = vector.broadcast %cst_6 : f32 to vector<16x1xf32>
    %7 = arith.divf %5, %6 : vector<16x1xf32>
    %8 = vector.broadcast %7 : vector<16x1xf32> to vector<16x128xf32>
    %9 = arith.subf %1, %8 : vector<16x128xf32>
    %10 = arith.mulf %9, %9 : vector<16x128xf32>
    %cst_7 = arith.constant dense<0.000000e+00> : vector<16xf32>
    %11 = vector.multi_reduction <add>, %10, %cst_7 [1] : vector<16x128xf32> to vector<16xf32>
    %12 = vector.shape_cast %11 : vector<16xf32> to vector<16x1xf32>
    %cst_8 = arith.constant 1.280000e+02 : f32
    %13 = vector.broadcast %cst_8 : f32 to vector<16x1xf32>
    %14 = arith.divf %12, %13 : vector<16x1xf32>
    %15 = vector.broadcast %7 : vector<16x1xf32> to vector<16x128xf32>
    %16 = arith.subf %1, %15 : vector<16x128xf32>
    %cst_9 = arith.constant 9.99999974E-6 : f32
    %17 = vector.broadcast %cst_9 : f32 to vector<16x1xf32>
    %18 = arith.addf %14, %17 : vector<16x1xf32>
    %19 = math.rsqrt %18 : vector<16x1xf32>
    %20 = vector.broadcast %19 : vector<16x1xf32> to vector<16x128xf32>
    %21 = arith.mulf %16, %20 : vector<16x128xf32>
    %22 = vector.broadcast %2 : vector<1x128xf32> to vector<16x128xf32>
    %23 = arith.mulf %21, %22 : vector<16x128xf32>
    %24 = vector.broadcast %3 : vector<1x128xf32> to vector<16x128xf32>
    %25 = arith.addf %23, %24 : vector<16x128xf32>
    %c0_10 = arith.constant 0 : index
    %c0_11 = arith.constant 0 : index
    %26 = vector.load %arg4[%c0_10, %c0_11] : memref<128x384xf32, #tpu.memory_space<vmem>>, vector<128x384xf32>
    %cst_12 = arith.constant dense<0.000000e+00> : vector<16x384xf32>
    %27 = tpu.matmul %25, %26, %cst_12 {dimension_numbers = #tpu.dot_dimension_numbers<[1], [0], [0], [1], [0, 0, 1, 1], [], []>} : vector<16x128xf32>, vector<128x384xf32>, vector<16x384xf32> -> vector<16x384xf32>
    %cst_13 = arith.constant 0.000000e+00 : f32
    %28 = vector.broadcast %cst_13 : f32 to vector<16x128xf32>
    %29 = vector.extract_strided_slice %27 {offsets = [0, 0], sizes = [16, 32], strides = [1, 1]} : vector<16x384xf32> to vector<16x32xf32>
    %30 = vector.extract_strided_slice %27 {offsets = [0, 128], sizes = [16, 32], strides = [1, 1]} : vector<16x384xf32> to vector<16x32xf32>
    %31 = vector.extract_strided_slice %27 {offsets = [0, 256], sizes = [16, 32], strides = [1, 1]} : vector<16x384xf32> to vector<16x32xf32>
    %cst_14 = arith.constant dense<0.000000e+00> : vector<16x16xf32>
    %32 = tpu.matmul %29, %30, %cst_14 {dimension_numbers = #tpu.dot_dimension_numbers<[1], [1], [0], [0], [0, 0, 1, 0], [], []>} : vector<16x32xf32>, vector<16x32xf32>, vector<16x16xf32> -> vector<16x16xf32>
    %cst_15 = arith.constant 0.176776692 : f32
    %33 = vector.broadcast %cst_15 : f32 to vector<16x16xf32>
    %34 = arith.mulf %32, %33 : vector<16x16xf32>
    %cst_16 = arith.constant dense<0xFF800000> : vector<16xf32>
    %35 = vector.multi_reduction <maximumf>, %34, %cst_16 [1] : vector<16x16xf32> to vector<16xf32>
    %36 = vector.shape_cast %35 : vector<16xf32> to vector<16x1xf32>
    %37 = vector.broadcast %36 : vector<16x1xf32> to vector<16x16xf32>
    %38 = arith.subf %34, %37 : vector<16x16xf32>
    %39 = math.exp %38 : vector<16x16xf32>
    %cst_17 = arith.constant dense<0.000000e+00> : vector<16xf32>
    %40 = vector.multi_reduction <add>, %39, %cst_17 [1] : vector<16x16xf32> to vector<16xf32>
    %41 = vector.shape_cast %40 : vector<16xf32> to vector<16x1xf32>
    %42 = tpu.reciprocal %41 {approx = true} : vector<16x1xf32> -> vector<16x1xf32>
    %43 = vector.broadcast %42 : vector<16x1xf32> to vector<16x16xf32>
    %44 = arith.mulf %39, %43 : vector<16x16xf32>
    %cst_18 = arith.constant dense<0.000000e+00> : vector<16x32xf32>
    %45 = tpu.matmul %44, %31, %cst_18 {dimension_numbers = #tpu.dot_dimension_numbers<[1], [0], [0], [1], [0, 0, 1, 1], [], []>} : vector<16x16xf32>, vector<16x32xf32>, vector<16x32xf32> -> vector<16x32xf32>
    %c0_19 = arith.constant 0 : index
    %c0_20 = arith.constant 0 : index
    %46 = vector.load %arg5[%c0_19, %c0_20] : memref<128x128xf32, #tpu.memory_space<vmem>>, vector<32x128xf32>
    %cst_21 = arith.constant dense<0.000000e+00> : vector<16x128xf32>
    %47 = tpu.matmul %45, %46, %cst_21 {dimension_numbers = #tpu.dot_dimension_numbers<[1], [0], [0], [1], [0, 0, 1, 1], [], []>} : vector<16x32xf32>, vector<32x128xf32>, vector<16x128xf32> -> vector<16x128xf32>
    %48 = arith.addf %28, %47 : vector<16x128xf32>
    %49 = vector.extract_strided_slice %27 {offsets = [0, 32], sizes = [16, 32], strides = [1, 1]} : vector<16x384xf32> to vector<16x32xf32>
    %50 = vector.extract_strided_slice %27 {offsets = [0, 160], sizes = [16, 32], strides = [1, 1]} : vector<16x384xf32> to vector<16x32xf32>
    %51 = vector.extract_strided_slice %27 {offsets = [0, 288], sizes = [16, 32], strides = [1, 1]} : vector<16x384xf32> to vector<16x32xf32>
    %cst_22 = arith.constant dense<0.000000e+00> : vector<16x16xf32>
    %52 = tpu.matmul %49, %50, %cst_22 {dimension_numbers = #tpu.dot_dimension_numbers<[1], [1], [0], [0], [0, 0, 1, 0], [], []>} : vector<16x32xf32>, vector<16x32xf32>, vector<16x16xf32> -> vector<16x16xf32>
    %cst_23 = arith.constant 0.176776692 : f32
    %53 = vector.broadcast %cst_23 : f32 to vector<16x16xf32>
    %54 = arith.mulf %52, %53 : vector<16x16xf32>
    %cst_24 = arith.constant dense<0xFF800000> : vector<16xf32>
    %55 = vector.multi_reduction <maximumf>, %54, %cst_24 [1] : vector<16x16xf32> to vector<16xf32>
    %56 = vector.shape_cast %55 : vector<16xf32> to vector<16x1xf32>
    %57 = vector.broadcast %56 : vector<16x1xf32> to vector<16x16xf32>
    %58 = arith.subf %54, %57 : vector<16x16xf32>
    %59 = math.exp %58 : vector<16x16xf32>
    %cst_25 = arith.constant dense<0.000000e+00> : vector<16xf32>
    %60 = vector.multi_reduction <add>, %59, %cst_25 [1] : vector<16x16xf32> to vector<16xf32>
    %61 = vector.shape_cast %60 : vector<16xf32> to vector<16x1xf32>
    %62 = tpu.reciprocal %61 {approx = true} : vector<16x1xf32> -> vector<16x1xf32>
    %63 = vector.broadcast %62 : vector<16x1xf32> to vector<16x16xf32>
    %64 = arith.mulf %59, %63 : vector<16x16xf32>
    %cst_26 = arith.constant dense<0.000000e+00> : vector<16x32xf32>
    %65 = tpu.matmul %64, %51, %cst_26 {dimension_numbers = #tpu.dot_dimension_numbers<[1], [0], [0], [1], [0, 0, 1, 1], [], []>} : vector<16x16xf32>, vector<16x32xf32>, vector<16x32xf32> -> vector<16x32xf32>
    %c32 = arith.constant 32 : index
    %c0_27 = arith.constant 0 : index
    %66 = vector.load %arg5[%c32, %c0_27] : memref<128x128xf32, #tpu.memory_space<vmem>>, vector<32x128xf32>
    %cst_28 = arith.constant dense<0.000000e+00> : vector<16x128xf32>
    %67 = tpu.matmul %65, %66, %cst_28 {dimension_numbers = #tpu.dot_dimension_numbers<[1], [0], [0], [1], [0, 0, 1, 1], [], []>} : vector<16x32xf32>, vector<32x128xf32>, vector<16x128xf32> -> vector<16x128xf32>
    %68 = arith.addf %48, %67 : vector<16x128xf32>
    %69 = vector.extract_strided_slice %27 {offsets = [0, 64], sizes = [16, 32], strides = [1, 1]} : vector<16x384xf32> to vector<16x32xf32>
    %70 = vector.extract_strided_slice %27 {offsets = [0, 192], sizes = [16, 32], strides = [1, 1]} : vector<16x384xf32> to vector<16x32xf32>
    %71 = vector.extract_strided_slice %27 {offsets = [0, 320], sizes = [16, 32], strides = [1, 1]} : vector<16x384xf32> to vector<16x32xf32>
    %cst_29 = arith.constant dense<0.000000e+00> : vector<16x16xf32>
    %72 = tpu.matmul %69, %70, %cst_29 {dimension_numbers = #tpu.dot_dimension_numbers<[1], [1], [0], [0], [0, 0, 1, 0], [], []>} : vector<16x32xf32>, vector<16x32xf32>, vector<16x16xf32> -> vector<16x16xf32>
    %cst_30 = arith.constant 0.176776692 : f32
    %73 = vector.broadcast %cst_30 : f32 to vector<16x16xf32>
    %74 = arith.mulf %72, %73 : vector<16x16xf32>
    %cst_31 = arith.constant dense<0xFF800000> : vector<16xf32>
    %75 = vector.multi_reduction <maximumf>, %74, %cst_31 [1] : vector<16x16xf32> to vector<16xf32>
    %76 = vector.shape_cast %75 : vector<16xf32> to vector<16x1xf32>
    %77 = vector.broadcast %76 : vector<16x1xf32> to vector<16x16xf32>
    %78 = arith.subf %74, %77 : vector<16x16xf32>
    %79 = math.exp %78 : vector<16x16xf32>
    %cst_32 = arith.constant dense<0.000000e+00> : vector<16xf32>
    %80 = vector.multi_reduction <add>, %79, %cst_32 [1] : vector<16x16xf32> to vector<16xf32>
    %81 = vector.shape_cast %80 : vector<16xf32> to vector<16x1xf32>
    %82 = tpu.reciprocal %81 {approx = true} : vector<16x1xf32> -> vector<16x1xf32>
    %83 = vector.broadcast %82 : vector<16x1xf32> to vector<16x16xf32>
    %84 = arith.mulf %79, %83 : vector<16x16xf32>
    %cst_33 = arith.constant dense<0.000000e+00> : vector<16x32xf32>
    %85 = tpu.matmul %84, %71, %cst_33 {dimension_numbers = #tpu.dot_dimension_numbers<[1], [0], [0], [1], [0, 0, 1, 1], [], []>} : vector<16x16xf32>, vector<16x32xf32>, vector<16x32xf32> -> vector<16x32xf32>
    %c64 = arith.constant 64 : index
    %c0_34 = arith.constant 0 : index
    %86 = vector.load %arg5[%c64, %c0_34] : memref<128x128xf32, #tpu.memory_space<vmem>>, vector<32x128xf32>
    %cst_35 = arith.constant dense<0.000000e+00> : vector<16x128xf32>
    %87 = tpu.matmul %85, %86, %cst_35 {dimension_numbers = #tpu.dot_dimension_numbers<[1], [0], [0], [1], [0, 0, 1, 1], [], []>} : vector<16x32xf32>, vector<32x128xf32>, vector<16x128xf32> -> vector<16x128xf32>
    %88 = arith.addf %68, %87 : vector<16x128xf32>
    %89 = vector.extract_strided_slice %27 {offsets = [0, 96], sizes = [16, 32], strides = [1, 1]} : vector<16x384xf32> to vector<16x32xf32>
    %90 = vector.extract_strided_slice %27 {offsets = [0, 224], sizes = [16, 32], strides = [1, 1]} : vector<16x384xf32> to vector<16x32xf32>
    %91 = vector.extract_strided_slice %27 {offsets = [0, 352], sizes = [16, 32], strides = [1, 1]} : vector<16x384xf32> to vector<16x32xf32>
    %cst_36 = arith.constant dense<0.000000e+00> : vector<16x16xf32>
    %92 = tpu.matmul %89, %90, %cst_36 {dimension_numbers = #tpu.dot_dimension_numbers<[1], [1], [0], [0], [0, 0, 1, 0], [], []>} : vector<16x32xf32>, vector<16x32xf32>, vector<16x16xf32> -> vector<16x16xf32>
    %cst_37 = arith.constant 0.176776692 : f32
    %93 = vector.broadcast %cst_37 : f32 to vector<16x16xf32>
    %94 = arith.mulf %92, %93 : vector<16x16xf32>
    %cst_38 = arith.constant dense<0xFF800000> : vector<16xf32>
    %95 = vector.multi_reduction <maximumf>, %94, %cst_38 [1] : vector<16x16xf32> to vector<16xf32>
    %96 = vector.shape_cast %95 : vector<16xf32> to vector<16x1xf32>
    %97 = vector.broadcast %96 : vector<16x1xf32> to vector<16x16xf32>
    %98 = arith.subf %94, %97 : vector<16x16xf32>
    %99 = math.exp %98 : vector<16x16xf32>
    %cst_39 = arith.constant dense<0.000000e+00> : vector<16xf32>
    %100 = vector.multi_reduction <add>, %99, %cst_39 [1] : vector<16x16xf32> to vector<16xf32>
    %101 = vector.shape_cast %100 : vector<16xf32> to vector<16x1xf32>
    %102 = tpu.reciprocal %101 {approx = true} : vector<16x1xf32> -> vector<16x1xf32>
    %103 = vector.broadcast %102 : vector<16x1xf32> to vector<16x16xf32>
    %104 = arith.mulf %99, %103 : vector<16x16xf32>
    %cst_40 = arith.constant dense<0.000000e+00> : vector<16x32xf32>
    %105 = tpu.matmul %104, %91, %cst_40 {dimension_numbers = #tpu.dot_dimension_numbers<[1], [0], [0], [1], [0, 0, 1, 1], [], []>} : vector<16x16xf32>, vector<16x32xf32>, vector<16x32xf32> -> vector<16x32xf32>
    %c96 = arith.constant 96 : index
    %c0_41 = arith.constant 0 : index
    %106 = vector.load %arg5[%c96, %c0_41] : memref<128x128xf32, #tpu.memory_space<vmem>>, vector<32x128xf32>
    %cst_42 = arith.constant dense<0.000000e+00> : vector<16x128xf32>
    %107 = tpu.matmul %105, %106, %cst_42 {dimension_numbers = #tpu.dot_dimension_numbers<[1], [0], [0], [1], [0, 0, 1, 1], [], []>} : vector<16x32xf32>, vector<32x128xf32>, vector<16x128xf32> -> vector<16x128xf32>
    %108 = arith.addf %88, %107 : vector<16x128xf32>
    %109 = arith.addf %1, %108 : vector<16x128xf32>
    %c0_43 = arith.constant 0 : index
    %c0_44 = arith.constant 0 : index
    %c0_45 = arith.constant 0 : index
    %110 = vector.load %arg6[%c0_43, %c0_44, %c0_45] : memref<1x16x128xf32, #tpu.memory_space<vmem>>, vector<1x16x128xf32>
    %111 = vector.shape_cast %110 : vector<1x16x128xf32> to vector<16x128xf32>
    %112 = vector.shape_cast %109 : vector<16x128xf32> to vector<1x16x128xf32>
    tpu.vector_store %arg6[%c0_43, %c0_44, %c0_45], %112 {strides = array<i32>} : memref<1x16x128xf32, #tpu.memory_space<vmem>>, vector<1x16x128xf32>,
    return
  }
  func.func @transform_0(%arg0: i32) -> (i32, i32, i32) {
    %c0_i32 = arith.constant 0 : i32
    %c0_i32_0 = arith.constant 0 : i32
    %c0_i32_1 = arith.constant 0 : i32
    return %arg0, %c0_i32, %c0_i32_0 : i32, i32, i32
  }
  func.func @transform_1(%arg0: i32) -> (i32, i32) {
    %c0_i32 = arith.constant 0 : i32
    %c0_i32_0 = arith.constant 0 : i32
    %c0_i32_1 = arith.constant 0 : i32
    return %c0_i32, %c0_i32_0 : i32, i32
  }
  func.func @transform_2(%arg0: i32) -> (i32, i32) {
    %c0_i32 = arith.constant 0 : i32
    %c0_i32_0 = arith.constant 0 : i32
    %c0_i32_1 = arith.constant 0 : i32
    return %c0_i32, %c0_i32_0 : i32, i32
  }
  func.func @transform_3(%arg0: i32) -> (i32, i32) {
    %c0_i32 = arith.constant 0 : i32
    %c0_i32_0 = arith.constant 0 : i32
    %c0_i32_1 = arith.constant 0 : i32
    return %c0_i32, %c0_i32_0 : i32, i32
  }
  func.func @transform_4(%arg0: i32) -> (i32, i32) {
    %c0_i32 = arith.constant 0 : i32
    %c0_i32_0 = arith.constant 0 : i32
    %c0_i32_1 = arith.constant 0 : i32
    return %c0_i32, %c0_i32_0 : i32, i32
  }
  func.func @transform_5(%arg0: i32) -> (i32, i32, i32) {
    %c0_i32 = arith.constant 0 : i32
    %c0_i32_0 = arith.constant 0 : i32
    %c0_i32_1 = arith.constant 0 : i32
    return %arg0, %c0_i32, %c0_i32_0 : i32, i32, i32
  }
}

module attributes {stable_mosaic.version = 11 : i64} {
  func.func @_ff_block_kernel(%arg0: i32, %arg1: memref<32x128xf32, #tpu.memory_space<vmem>>, %arg2: memref<1x128xf32, #tpu.memory_space<vmem>>, %arg3: memref<1x128xf32, #tpu.memory_space<vmem>>, %arg4: memref<128x256xf32, #tpu.memory_space<vmem>>, %arg5: memref<1x256xf32, #tpu.memory_space<vmem>>, %arg6: memref<256x128xf32, #tpu.memory_space<vmem>>, %arg7: memref<1x128xf32, #tpu.memory_space<vmem>>, %arg8: memref<32x128xf32, #tpu.memory_space<vmem>>) attributes {dimension_semantics = [#tpu.dimension_semantics<parallel>], iteration_bounds = array<i64: 1>, scalar_prefetch = 0 : i64, scratch_operands = 0 : i64, tpu.core_type = #tpu.core_type<tc>, window_params = [{transform_indices = @transform_0, window_bounds = array<i64: 32, 128>}, {pipeline_mode = #tpu.pipeline_mode<synchronous>, transform_indices = @transform_1, window_bounds = array<i64: 1, 128>}, {pipeline_mode = #tpu.pipeline_mode<synchronous>, transform_indices = @transform_2, window_bounds = array<i64: 1, 128>}, {pipeline_mode = #tpu.pipeline_mode<synchronous>, transform_indices = @transform_3, window_bounds = array<i64: 128, 256>}, {pipeline_mode = #tpu.pipeline_mode<synchronous>, transform_indices = @transform_4, window_bounds = array<i64: 1, 256>}, {pipeline_mode = #tpu.pipeline_mode<synchronous>, transform_indices = @transform_5, window_bounds = array<i64: 256, 128>}, {pipeline_mode = #tpu.pipeline_mode<synchronous>, transform_indices = @transform_6, window_bounds = array<i64: 1, 128>}, {transform_indices = @transform_7, window_bounds = array<i64: 32, 128>}]} {
    %c0 = arith.constant 0 : index
    %c0_0 = arith.constant 0 : index
    %0 = vector.load %arg1[%c0, %c0_0] : memref<32x128xf32, #tpu.memory_space<vmem>>, vector<32x128xf32>
    %c0_1 = arith.constant 0 : index
    %c0_2 = arith.constant 0 : index
    %1 = vector.load %arg2[%c0_1, %c0_2] : memref<1x128xf32, #tpu.memory_space<vmem>>, vector<1x128xf32>
    %c0_3 = arith.constant 0 : index
    %c0_4 = arith.constant 0 : index
    %2 = vector.load %arg3[%c0_3, %c0_4] : memref<1x128xf32, #tpu.memory_space<vmem>>, vector<1x128xf32>
    %cst = arith.constant dense<0.000000e+00> : vector<32xf32>
    %3 = vector.multi_reduction <add>, %0, %cst [1] : vector<32x128xf32> to vector<32xf32>
    %4 = vector.shape_cast %3 : vector<32xf32> to vector<32x1xf32>
    %cst_5 = arith.constant 1.280000e+02 : f32
    %5 = vector.broadcast %cst_5 : f32 to vector<32x1xf32>
    %6 = arith.divf %4, %5 : vector<32x1xf32>
    %7 = vector.broadcast %6 : vector<32x1xf32> to vector<32x128xf32>
    %8 = arith.subf %0, %7 : vector<32x128xf32>
    %9 = arith.mulf %8, %8 : vector<32x128xf32>
    %cst_6 = arith.constant dense<0.000000e+00> : vector<32xf32>
    %10 = vector.multi_reduction <add>, %9, %cst_6 [1] : vector<32x128xf32> to vector<32xf32>
    %11 = vector.shape_cast %10 : vector<32xf32> to vector<32x1xf32>
    %cst_7 = arith.constant 1.280000e+02 : f32
    %12 = vector.broadcast %cst_7 : f32 to vector<32x1xf32>
    %13 = arith.divf %11, %12 : vector<32x1xf32>
    %14 = vector.broadcast %6 : vector<32x1xf32> to vector<32x128xf32>
    %15 = arith.subf %0, %14 : vector<32x128xf32>
    %cst_8 = arith.constant 9.99999974E-6 : f32
    %16 = vector.broadcast %cst_8 : f32 to vector<32x1xf32>
    %17 = arith.addf %13, %16 : vector<32x1xf32>
    %18 = math.rsqrt %17 : vector<32x1xf32>
    %19 = vector.broadcast %18 : vector<32x1xf32> to vector<32x128xf32>
    %20 = arith.mulf %15, %19 : vector<32x128xf32>
    %21 = vector.broadcast %1 : vector<1x128xf32> to vector<32x128xf32>
    %22 = arith.mulf %20, %21 : vector<32x128xf32>
    %23 = vector.broadcast %2 : vector<1x128xf32> to vector<32x128xf32>
    %24 = arith.addf %22, %23 : vector<32x128xf32>
    %c0_9 = arith.constant 0 : index
    %c0_10 = arith.constant 0 : index
    %25 = vector.load %arg4[%c0_9, %c0_10] : memref<128x256xf32, #tpu.memory_space<vmem>>, vector<128x256xf32>
    %cst_11 = arith.constant dense<0.000000e+00> : vector<32x256xf32>
    %26 = tpu.matmul %24, %25, %cst_11 {dimension_numbers = #tpu.dot_dimension_numbers<[1], [0], [0], [1], [0, 0, 1, 1], [], []>} : vector<32x128xf32>, vector<128x256xf32>, vector<32x256xf32> -> vector<32x256xf32>
    %c0_12 = arith.constant 0 : index
    %c0_13 = arith.constant 0 : index
    %27 = vector.load %arg5[%c0_12, %c0_13] : memref<1x256xf32, #tpu.memory_space<vmem>>, vector<1x256xf32>
    %28 = vector.broadcast %27 : vector<1x256xf32> to vector<32x256xf32>
    %29 = arith.addf %26, %28 : vector<32x256xf32>
    %cst_14 = arith.constant 5.000000e-01 : f32
    %30 = vector.broadcast %cst_14 : f32 to vector<32x256xf32>
    %31 = arith.mulf %30, %29 : vector<32x256xf32>
    %cst_15 = arith.constant 0.707106769 : f32
    %32 = vector.broadcast %cst_15 : f32 to vector<32x256xf32>
    %33 = arith.mulf %29, %32 : vector<32x256xf32>
    %34 = math.absf %33 : vector<32x256xf32>
    %cst_16 = arith.constant 0.327591091 : f32
    %35 = vector.broadcast %cst_16 : f32 to vector<32x256xf32>
    %36 = arith.mulf %35, %34 : vector<32x256xf32>
    %cst_17 = arith.constant 1.000000e+00 : f32
    %37 = vector.broadcast %cst_17 : f32 to vector<32x256xf32>
    %38 = arith.addf %37, %36 : vector<32x256xf32>
    %cst_18 = arith.constant 1.000000e+00 : f32
    %39 = vector.broadcast %cst_18 : f32 to vector<32x256xf32>
    %40 = arith.divf %39, %38 : vector<32x256xf32>
    %cst_19 = arith.constant 1.06140542 : f32
    %41 = vector.broadcast %cst_19 : f32 to vector<32x256xf32>
    %42 = arith.mulf %41, %40 : vector<32x256xf32>
    %cst_20 = arith.constant -1.45315206 : f32
    %43 = vector.broadcast %cst_20 : f32 to vector<32x256xf32>
    %44 = arith.addf %42, %43 : vector<32x256xf32>
    %45 = arith.mulf %44, %40 : vector<32x256xf32>
    %cst_21 = arith.constant 1.42141378 : f32
    %46 = vector.broadcast %cst_21 : f32 to vector<32x256xf32>
    %47 = arith.addf %45, %46 : vector<32x256xf32>
    %48 = arith.mulf %47, %40 : vector<32x256xf32>
    %cst_22 = arith.constant -0.284496725 : f32
    %49 = vector.broadcast %cst_22 : f32 to vector<32x256xf32>
    %50 = arith.addf %48, %49 : vector<32x256xf32>
    %51 = arith.mulf %50, %40 : vector<32x256xf32>
    %cst_23 = arith.constant 0.254829586 : f32
    %52 = vector.broadcast %cst_23 : f32 to vector<32x256xf32>
    %53 = arith.addf %51, %52 : vector<32x256xf32>
    %54 = arith.mulf %53, %40 : vector<32x256xf32>
    %cst_24 = arith.constant 0.000000e+00 : f32
    %55 = vector.broadcast %cst_24 : f32 to vector<32x256xf32>
    %56 = arith.subf %55, %34 : vector<32x256xf32>
    %57 = arith.mulf %56, %34 : vector<32x256xf32>
    %58 = math.exp %57 : vector<32x256xf32>
    %59 = arith.mulf %54, %58 : vector<32x256xf32>
    %cst_25 = arith.constant 1.000000e+00 : f32
    %60 = vector.broadcast %cst_25 : f32 to vector<32x256xf32>
    %61 = arith.subf %60, %59 : vector<32x256xf32>
    %cst_26 = arith.constant 0.000000e+00 : f32
    %62 = vector.broadcast %cst_26 : f32 to vector<32x256xf32>
    %63 = arith.cmpf oge, %33, %62 : vector<32x256xf32>
    %cst_27 = arith.constant 0.000000e+00 : f32
    %64 = vector.broadcast %cst_27 : f32 to vector<32x256xf32>
    %65 = arith.subf %64, %61 : vector<32x256xf32>
    %66 = arith.select %63, %61, %65 : vector<32x256xi1>, vector<32x256xf32>
    %cst_28 = arith.constant 1.000000e+00 : f32
    %67 = vector.broadcast %cst_28 : f32 to vector<32x256xf32>
    %68 = arith.addf %67, %66 : vector<32x256xf32>
    %69 = arith.mulf %31, %68 : vector<32x256xf32>
    %c0_29 = arith.constant 0 : index
    %c0_30 = arith.constant 0 : index
    %70 = vector.load %arg6[%c0_29, %c0_30] : memref<256x128xf32, #tpu.memory_space<vmem>>, vector<256x128xf32>
    %cst_31 = arith.constant dense<0.000000e+00> : vector<32x128xf32>
    %71 = tpu.matmul %69, %70, %cst_31 {dimension_numbers = #tpu.dot_dimension_numbers<[1], [0], [0], [1], [0, 0, 1, 1], [], []>} : vector<32x256xf32>, vector<256x128xf32>, vector<32x128xf32> -> vector<32x128xf32>
    %c0_32 = arith.constant 0 : index
    %c0_33 = arith.constant 0 : index
    %72 = vector.load %arg7[%c0_32, %c0_33] : memref<1x128xf32, #tpu.memory_space<vmem>>, vector<1x128xf32>
    %73 = vector.broadcast %72 : vector<1x128xf32> to vector<32x128xf32>
    %74 = arith.addf %71, %73 : vector<32x128xf32>
    %75 = arith.addf %0, %74 : vector<32x128xf32>
    %c0_34 = arith.constant 0 : index
    %c0_35 = arith.constant 0 : index
    %76 = vector.load %arg8[%c0_34, %c0_35] : memref<32x128xf32, #tpu.memory_space<vmem>>, vector<32x128xf32>
    tpu.vector_store %arg8[%c0_34, %c0_35], %75 {strides = array<i32>} : memref<32x128xf32, #tpu.memory_space<vmem>>, vector<32x128xf32>,
    return
  }
  func.func @transform_0(%arg0: i32) -> (i32, i32) {
    %c0_i32 = arith.constant 0 : i32
    %c0_i32_0 = arith.constant 0 : i32
    return %arg0, %c0_i32 : i32, i32
  }
  func.func @transform_1(%arg0: i32) -> (i32, i32) {
    %c0_i32 = arith.constant 0 : i32
    %c0_i32_0 = arith.constant 0 : i32
    %c0_i32_1 = arith.constant 0 : i32
    return %c0_i32, %c0_i32_0 : i32, i32
  }
  func.func @transform_2(%arg0: i32) -> (i32, i32) {
    %c0_i32 = arith.constant 0 : i32
    %c0_i32_0 = arith.constant 0 : i32
    %c0_i32_1 = arith.constant 0 : i32
    return %c0_i32, %c0_i32_0 : i32, i32
  }
  func.func @transform_3(%arg0: i32) -> (i32, i32) {
    %c0_i32 = arith.constant 0 : i32
    %c0_i32_0 = arith.constant 0 : i32
    %c0_i32_1 = arith.constant 0 : i32
    return %c0_i32, %c0_i32_0 : i32, i32
  }
  func.func @transform_4(%arg0: i32) -> (i32, i32) {
    %c0_i32 = arith.constant 0 : i32
    %c0_i32_0 = arith.constant 0 : i32
    %c0_i32_1 = arith.constant 0 : i32
    return %c0_i32, %c0_i32_0 : i32, i32
  }
  func.func @transform_5(%arg0: i32) -> (i32, i32) {
    %c0_i32 = arith.constant 0 : i32
    %c0_i32_0 = arith.constant 0 : i32
    %c0_i32_1 = arith.constant 0 : i32
    return %c0_i32, %c0_i32_0 : i32, i32
  }
  func.func @transform_6(%arg0: i32) -> (i32, i32) {
    %c0_i32 = arith.constant 0 : i32
    %c0_i32_0 = arith.constant 0 : i32
    %c0_i32_1 = arith.constant 0 : i32
    return %c0_i32, %c0_i32_0 : i32, i32
  }
  func.func @transform_7(%arg0: i32) -> (i32, i32) {
    %c0_i32 = arith.constant 0 : i32
    %c0_i32_0 = arith.constant 0 : i32
    return %arg0, %c0_i32 : i32, i32
  }
}

module attributes {stable_mosaic.version = 11 : i64} {
  func.func @_ln_kernel(%arg0: i32, %arg1: memref<32x128xf32, #tpu.memory_space<vmem>>, %arg2: memref<1x128xf32, #tpu.memory_space<vmem>>, %arg3: memref<1x128xf32, #tpu.memory_space<vmem>>, %arg4: memref<32x128xf32, #tpu.memory_space<vmem>>) attributes {dimension_semantics = [#tpu.dimension_semantics<parallel>], iteration_bounds = array<i64: 1>, scalar_prefetch = 0 : i64, scratch_operands = 0 : i64, tpu.core_type = #tpu.core_type<tc>, window_params = [{transform_indices = @transform_0, window_bounds = array<i64: 32, 128>}, {pipeline_mode = #tpu.pipeline_mode<synchronous>, transform_indices = @transform_1, window_bounds = array<i64: 1, 128>}, {pipeline_mode = #tpu.pipeline_mode<synchronous>, transform_indices = @transform_2, window_bounds = array<i64: 1, 128>}, {transform_indices = @transform_3, window_bounds = array<i64: 32, 128>}]} {
    %c0 = arith.constant 0 : index
    %c0_0 = arith.constant 0 : index
    %0 = vector.load %arg1[%c0, %c0_0] : memref<32x128xf32, #tpu.memory_space<vmem>>, vector<32x128xf32>
    %c0_1 = arith.constant 0 : index
    %c0_2 = arith.constant 0 : index
    %1 = vector.load %arg2[%c0_1, %c0_2] : memref<1x128xf32, #tpu.memory_space<vmem>>, vector<1x128xf32>
    %c0_3 = arith.constant 0 : index
    %c0_4 = arith.constant 0 : index
    %2 = vector.load %arg3[%c0_3, %c0_4] : memref<1x128xf32, #tpu.memory_space<vmem>>, vector<1x128xf32>
    %cst = arith.constant dense<0.000000e+00> : vector<32xf32>
    %3 = vector.multi_reduction <add>, %0, %cst [1] : vector<32x128xf32> to vector<32xf32>
    %4 = vector.shape_cast %3 : vector<32xf32> to vector<32x1xf32>
    %cst_5 = arith.constant 1.280000e+02 : f32
    %5 = vector.broadcast %cst_5 : f32 to vector<32x1xf32>
    %6 = arith.divf %4, %5 : vector<32x1xf32>
    %7 = vector.broadcast %6 : vector<32x1xf32> to vector<32x128xf32>
    %8 = arith.subf %0, %7 : vector<32x128xf32>
    %9 = arith.mulf %8, %8 : vector<32x128xf32>
    %cst_6 = arith.constant dense<0.000000e+00> : vector<32xf32>
    %10 = vector.multi_reduction <add>, %9, %cst_6 [1] : vector<32x128xf32> to vector<32xf32>
    %11 = vector.shape_cast %10 : vector<32xf32> to vector<32x1xf32>
    %cst_7 = arith.constant 1.280000e+02 : f32
    %12 = vector.broadcast %cst_7 : f32 to vector<32x1xf32>
    %13 = arith.divf %11, %12 : vector<32x1xf32>
    %14 = vector.broadcast %6 : vector<32x1xf32> to vector<32x128xf32>
    %15 = arith.subf %0, %14 : vector<32x128xf32>
    %cst_8 = arith.constant 9.99999974E-6 : f32
    %16 = vector.broadcast %cst_8 : f32 to vector<32x1xf32>
    %17 = arith.addf %13, %16 : vector<32x1xf32>
    %18 = math.rsqrt %17 : vector<32x1xf32>
    %19 = vector.broadcast %18 : vector<32x1xf32> to vector<32x128xf32>
    %20 = arith.mulf %15, %19 : vector<32x128xf32>
    %21 = vector.broadcast %1 : vector<1x128xf32> to vector<32x128xf32>
    %22 = arith.mulf %20, %21 : vector<32x128xf32>
    %23 = vector.broadcast %2 : vector<1x128xf32> to vector<32x128xf32>
    %24 = arith.addf %22, %23 : vector<32x128xf32>
    %c0_9 = arith.constant 0 : index
    %c0_10 = arith.constant 0 : index
    %25 = vector.load %arg4[%c0_9, %c0_10] : memref<32x128xf32, #tpu.memory_space<vmem>>, vector<32x128xf32>
    tpu.vector_store %arg4[%c0_9, %c0_10], %24 {strides = array<i32>} : memref<32x128xf32, #tpu.memory_space<vmem>>, vector<32x128xf32>,
    return
  }
  func.func @transform_0(%arg0: i32) -> (i32, i32) {
    %c0_i32 = arith.constant 0 : i32
    %c0_i32_0 = arith.constant 0 : i32
    return %arg0, %c0_i32 : i32, i32
  }
  func.func @transform_1(%arg0: i32) -> (i32, i32) {
    %c0_i32 = arith.constant 0 : i32
    %c0_i32_0 = arith.constant 0 : i32
    %c0_i32_1 = arith.constant 0 : i32
    return %c0_i32, %c0_i32_0 : i32, i32
  }
  func.func @transform_2(%arg0: i32) -> (i32, i32) {
    %c0_i32 = arith.constant 0 : i32
    %c0_i32_0 = arith.constant 0 : i32
    %c0_i32_1 = arith.constant 0 : i32
    return %c0_i32, %c0_i32_0 : i32, i32
  }
  func.func @transform_3(%arg0: i32) -> (i32, i32) {
    %c0_i32 = arith.constant 0 : i32
    %c0_i32_0 = arith.constant 0 : i32
    return %arg0, %c0_i32 : i32, i32
  }
}

module attributes {stable_mosaic.version = 11 : i64} {
  func.func @_ln_linear_ln_kernel(%arg0: i32, %arg1: memref<32x128xf32, #tpu.memory_space<vmem>>, %arg2: memref<1x128xf32, #tpu.memory_space<vmem>>, %arg3: memref<1x128xf32, #tpu.memory_space<vmem>>, %arg4: memref<128x256xf32, #tpu.memory_space<vmem>>, %arg5: memref<1x256xf32, #tpu.memory_space<vmem>>, %arg6: memref<1x256xf32, #tpu.memory_space<vmem>>, %arg7: memref<1x256xf32, #tpu.memory_space<vmem>>, %arg8: memref<32x256xf32, #tpu.memory_space<vmem>>) attributes {dimension_semantics = [#tpu.dimension_semantics<parallel>], iteration_bounds = array<i64: 1>, scalar_prefetch = 0 : i64, scratch_operands = 0 : i64, tpu.core_type = #tpu.core_type<tc>, window_params = [{transform_indices = @transform_0, window_bounds = array<i64: 32, 128>}, {pipeline_mode = #tpu.pipeline_mode<synchronous>, transform_indices = @transform_1, window_bounds = array<i64: 1, 128>}, {pipeline_mode = #tpu.pipeline_mode<synchronous>, transform_indices = @transform_2, window_bounds = array<i64: 1, 128>}, {pipeline_mode = #tpu.pipeline_mode<synchronous>, transform_indices = @transform_3, window_bounds = array<i64: 128, 256>}, {pipeline_mode = #tpu.pipeline_mode<synchronous>, transform_indices = @transform_4, window_bounds = array<i64: 1, 256>}, {pipeline_mode = #tpu.pipeline_mode<synchronous>, transform_indices = @transform_5, window_bounds = array<i64: 1, 256>}, {pipeline_mode = #tpu.pipeline_mode<synchronous>, transform_indices = @transform_6, window_bounds = array<i64: 1, 256>}, {transform_indices = @transform_7, window_bounds = array<i64: 32, 256>}]} {
    %c0 = arith.constant 0 : index
    %c0_0 = arith.constant 0 : index
    %0 = vector.load %arg1[%c0, %c0_0] : memref<32x128xf32, #tpu.memory_space<vmem>>, vector<32x128xf32>
    %c0_1 = arith.constant 0 : index
    %c0_2 = arith.constant 0 : index
    %1 = vector.load %arg2[%c0_1, %c0_2] : memref<1x128xf32, #tpu.memory_space<vmem>>, vector<1x128xf32>
    %c0_3 = arith.constant 0 : index
    %c0_4 = arith.constant 0 : index
    %2 = vector.load %arg3[%c0_3, %c0_4] : memref<1x128xf32, #tpu.memory_space<vmem>>, vector<1x128xf32>
    %cst = arith.constant dense<0.000000e+00> : vector<32xf32>
    %3 = vector.multi_reduction <add>, %0, %cst [1] : vector<32x128xf32> to vector<32xf32>
    %4 = vector.shape_cast %3 : vector<32xf32> to vector<32x1xf32>
    %cst_5 = arith.constant 1.280000e+02 : f32
    %5 = vector.broadcast %cst_5 : f32 to vector<32x1xf32>
    %6 = arith.divf %4, %5 : vector<32x1xf32>
    %7 = vector.broadcast %6 : vector<32x1xf32> to vector<32x128xf32>
    %8 = arith.subf %0, %7 : vector<32x128xf32>
    %9 = arith.mulf %8, %8 : vector<32x128xf32>
    %cst_6 = arith.constant dense<0.000000e+00> : vector<32xf32>
    %10 = vector.multi_reduction <add>, %9, %cst_6 [1] : vector<32x128xf32> to vector<32xf32>
    %11 = vector.shape_cast %10 : vector<32xf32> to vector<32x1xf32>
    %cst_7 = arith.constant 1.280000e+02 : f32
    %12 = vector.broadcast %cst_7 : f32 to vector<32x1xf32>
    %13 = arith.divf %11, %12 : vector<32x1xf32>
    %14 = vector.broadcast %6 : vector<32x1xf32> to vector<32x128xf32>
    %15 = arith.subf %0, %14 : vector<32x128xf32>
    %cst_8 = arith.constant 9.99999974E-6 : f32
    %16 = vector.broadcast %cst_8 : f32 to vector<32x1xf32>
    %17 = arith.addf %13, %16 : vector<32x1xf32>
    %18 = math.rsqrt %17 : vector<32x1xf32>
    %19 = vector.broadcast %18 : vector<32x1xf32> to vector<32x128xf32>
    %20 = arith.mulf %15, %19 : vector<32x128xf32>
    %21 = vector.broadcast %1 : vector<1x128xf32> to vector<32x128xf32>
    %22 = arith.mulf %20, %21 : vector<32x128xf32>
    %23 = vector.broadcast %2 : vector<1x128xf32> to vector<32x128xf32>
    %24 = arith.addf %22, %23 : vector<32x128xf32>
    %c0_9 = arith.constant 0 : index
    %c0_10 = arith.constant 0 : index
    %25 = vector.load %arg4[%c0_9, %c0_10] : memref<128x256xf32, #tpu.memory_space<vmem>>, vector<128x256xf32>
    %cst_11 = arith.constant dense<0.000000e+00> : vector<32x256xf32>
    %26 = tpu.matmul %24, %25, %cst_11 {dimension_numbers = #tpu.dot_dimension_numbers<[1], [0], [0], [1], [0, 0, 1, 1], [], []>} : vector<32x128xf32>, vector<128x256xf32>, vector<32x256xf32> -> vector<32x256xf32>
    %c0_12 = arith.constant 0 : index
    %c0_13 = arith.constant 0 : index
    %27 = vector.load %arg5[%c0_12, %c0_13] : memref<1x256xf32, #tpu.memory_space<vmem>>, vector<1x256xf32>
    %28 = vector.broadcast %27 : vector<1x256xf32> to vector<32x256xf32>
    %29 = arith.addf %26, %28 : vector<32x256xf32>
    %c0_14 = arith.constant 0 : index
    %c0_15 = arith.constant 0 : index
    %30 = vector.load %arg6[%c0_14, %c0_15] : memref<1x256xf32, #tpu.memory_space<vmem>>, vector<1x256xf32>
    %c0_16 = arith.constant 0 : index
    %c0_17 = arith.constant 0 : index
    %31 = vector.load %arg7[%c0_16, %c0_17] : memref<1x256xf32, #tpu.memory_space<vmem>>, vector<1x256xf32>
    %cst_18 = arith.constant dense<0.000000e+00> : vector<32xf32>
    %32 = vector.multi_reduction <add>, %29, %cst_18 [1] : vector<32x256xf32> to vector<32xf32>
    %33 = vector.shape_cast %32 : vector<32xf32> to vector<32x1xf32>
    %cst_19 = arith.constant 2.560000e+02 : f32
    %34 = vector.broadcast %cst_19 : f32 to vector<32x1xf32>
    %35 = arith.divf %33, %34 : vector<32x1xf32>
    %36 = vector.broadcast %35 : vector<32x1xf32> to vector<32x256xf32>
    %37 = arith.subf %29, %36 : vector<32x256xf32>
    %38 = arith.mulf %37, %37 : vector<32x256xf32>
    %cst_20 = arith.constant dense<0.000000e+00> : vector<32xf32>
    %39 = vector.multi_reduction <add>, %38, %cst_20 [1] : vector<32x256xf32> to vector<32xf32>
    %40 = vector.shape_cast %39 : vector<32xf32> to vector<32x1xf32>
    %cst_21 = arith.constant 2.560000e+02 : f32
    %41 = vector.broadcast %cst_21 : f32 to vector<32x1xf32>
    %42 = arith.divf %40, %41 : vector<32x1xf32>
    %43 = vector.broadcast %35 : vector<32x1xf32> to vector<32x256xf32>
    %44 = arith.subf %29, %43 : vector<32x256xf32>
    %cst_22 = arith.constant 9.99999974E-6 : f32
    %45 = vector.broadcast %cst_22 : f32 to vector<32x1xf32>
    %46 = arith.addf %42, %45 : vector<32x1xf32>
    %47 = math.rsqrt %46 : vector<32x1xf32>
    %48 = vector.broadcast %47 : vector<32x1xf32> to vector<32x256xf32>
    %49 = arith.mulf %44, %48 : vector<32x256xf32>
    %50 = vector.broadcast %30 : vector<1x256xf32> to vector<32x256xf32>
    %51 = arith.mulf %49, %50 : vector<32x256xf32>
    %52 = vector.broadcast %31 : vector<1x256xf32> to vector<32x256xf32>
    %53 = arith.addf %51, %52 : vector<32x256xf32>
    %c0_23 = arith.constant 0 : index
    %c0_24 = arith.constant 0 : index
    %54 = vector.load %arg8[%c0_23, %c0_24] : memref<32x256xf32, #tpu.memory_space<vmem>>, vector<32x256xf32>
    tpu.vector_store %arg8[%c0_23, %c0_24], %53 {strides = array<i32>} : memref<32x256xf32, #tpu.memory_space<vmem>>, vector<32x256xf32>,
    return
  }
  func.func @transform_0(%arg0: i32) -> (i32, i32) {
    %c0_i32 = arith.constant 0 : i32
    %c0_i32_0 = arith.constant 0 : i32
    return %arg0, %c0_i32 : i32, i32
  }
  func.func @transform_1(%arg0: i32) -> (i32, i32) {
    %c0_i32 = arith.constant 0 : i32
    %c0_i32_0 = arith.constant 0 : i32
    %c0_i32_1 = arith.constant 0 : i32
    return %c0_i32, %c0_i32_0 : i32, i32
  }
  func.func @transform_2(%arg0: i32) -> (i32, i32) {
    %c0_i32 = arith.constant 0 : i32
    %c0_i32_0 = arith.constant 0 : i32
    %c0_i32_1 = arith.constant 0 : i32
    return %c0_i32, %c0_i32_0 : i32, i32
  }
  func.func @transform_3(%arg0: i32) -> (i32, i32) {
    %c0_i32 = arith.constant 0 : i32
    %c0_i32_0 = arith.constant 0 : i32
    %c0_i32_1 = arith.constant 0 : i32
    return %c0_i32, %c0_i32_0 : i32, i32
  }
  func.func @transform_4(%arg0: i32) -> (i32, i32) {
    %c0_i32 = arith.constant 0 : i32
    %c0_i32_0 = arith.constant 0 : i32
    %c0_i32_1 = arith.constant 0 : i32
    return %c0_i32, %c0_i32_0 : i32, i32
  }
  func.func @transform_5(%arg0: i32) -> (i32, i32) {
    %c0_i32 = arith.constant 0 : i32
    %c0_i32_0 = arith.constant 0 : i32
    %c0_i32_1 = arith.constant 0 : i32
    return %c0_i32, %c0_i32_0 : i32, i32
  }
  func.func @transform_6(%arg0: i32) -> (i32, i32) {
    %c0_i32 = arith.constant 0 : i32
    %c0_i32_0 = arith.constant 0 : i32
    %c0_i32_1 = arith.constant 0 : i32
    return %c0_i32, %c0_i32_0 : i32, i32
  }
  func.func @transform_7(%arg0: i32) -> (i32, i32) {
    %c0_i32 = arith.constant 0 : i32
    %c0_i32_0 = arith.constant 0 : i32
    return %arg0, %c0_i32 : i32, i32
  }
}

module attributes {stable_mosaic.version = 11 : i64} {
  func.func @_convT_sigmoid_kernel(%arg0: i32, %arg1: memref<1x4x34x34xf32, #tpu.memory_space<vmem>>, %arg2: memref<4x36xf32, #tpu.memory_space<smem>>, %arg3: memref<4xf32, #tpu.memory_space<smem>>, %arg4: memref<1x4x32x32xf32, #tpu.memory_space<vmem>>) attributes {dimension_semantics = [#tpu.dimension_semantics<parallel>], iteration_bounds = array<i64: 2>, scalar_prefetch = 0 : i64, scratch_operands = 0 : i64, tpu.core_type = #tpu.core_type<tc>, window_params = [{transform_indices = @transform_0, window_bounds = array<i64: 1, 4, 34, 34>}, {transform_indices = @transform_1, window_bounds = array<i64: 4, 36>}, {transform_indices = @transform_2, window_bounds = array<i64: 4>}, {transform_indices = @transform_3, window_bounds = array<i64: 1, 4, 32, 32>}]} {
    %cst = arith.constant 0.000000e+00 : f32
    %0 = vector.broadcast %cst : f32 to vector<32x32xf32>
    %cst_0 = arith.constant 0.000000e+00 : f32
    %1 = vector.broadcast %cst_0 : f32 to vector<32x32xf32>
    %cst_1 = arith.constant 0.000000e+00 : f32
    %2 = vector.broadcast %cst_1 : f32 to vector<32x32xf32>
    %cst_2 = arith.constant 0.000000e+00 : f32
    %3 = vector.broadcast %cst_2 : f32 to vector<32x32xf32>
    %c0 = arith.constant 0 : index
    %c0_3 = arith.constant 0 : index
    %c0_4 = arith.constant 0 : index
    %c0_5 = arith.constant 0 : index
    %4 = vector.load %arg1[%c0, %c0_3, %c0_4, %c0_5] : memref<1x4x34x34xf32, #tpu.memory_space<vmem>>, vector<1x1x32x32xf32>
    %5 = vector.shape_cast %4 : vector<1x1x32x32xf32> to vector<32x32xf32>
    %c0_6 = arith.constant 0 : index
    %c0_7 = arith.constant 0 : index
    %6 = memref.load %arg2[%c0_6, %c0_7] : memref<4x36xf32, #tpu.memory_space<smem>>
    %7 = vector.broadcast %6 : f32 to vector<32x32xf32>
    %8 = arith.mulf %7, %5 : vector<32x32xf32>
    %9 = arith.addf %0, %8 : vector<32x32xf32>
    %c1 = arith.constant 1 : index
    %c0_8 = arith.constant 0 : index
    %10 = memref.load %arg2[%c1, %c0_8] : memref<4x36xf32, #tpu.memory_space<smem>>
    %11 = vector.broadcast %10 : f32 to vector<32x32xf32>
    %12 = arith.mulf %11, %5 : vector<32x32xf32>
    %13 = arith.addf %1, %12 : vector<32x32xf32>
    %c2 = arith.constant 2 : index
    %c0_9 = arith.constant 0 : index
    %14 = memref.load %arg2[%c2, %c0_9] : memref<4x36xf32, #tpu.memory_space<smem>>
    %15 = vector.broadcast %14 : f32 to vector<32x32xf32>
    %16 = arith.mulf %15, %5 : vector<32x32xf32>
    %17 = arith.addf %2, %16 : vector<32x32xf32>
    %c3 = arith.constant 3 : index
    %c0_10 = arith.constant 0 : index
    %18 = memref.load %arg2[%c3, %c0_10] : memref<4x36xf32, #tpu.memory_space<smem>>
    %19 = vector.broadcast %18 : f32 to vector<32x32xf32>
    %20 = arith.mulf %19, %5 : vector<32x32xf32>
    %21 = arith.addf %3, %20 : vector<32x32xf32>
    %c0_11 = arith.constant 0 : index
    %c0_12 = arith.constant 0 : index
    %c0_13 = arith.constant 0 : index
    %c1_14 = arith.constant 1 : index
    %22 = vector.load %arg1[%c0_11, %c0_12, %c0_13, %c1_14] : memref<1x4x34x34xf32, #tpu.memory_space<vmem>>, vector<1x1x32x32xf32>
    %23 = vector.shape_cast %22 : vector<1x1x32x32xf32> to vector<32x32xf32>
    %c0_15 = arith.constant 0 : index
    %c1_16 = arith.constant 1 : index
    %24 = memref.load %arg2[%c0_15, %c1_16] : memref<4x36xf32, #tpu.memory_space<smem>>
    %25 = vector.broadcast %24 : f32 to vector<32x32xf32>
    %26 = arith.mulf %25, %23 : vector<32x32xf32>
    %27 = arith.addf %9, %26 : vector<32x32xf32>
    %c1_17 = arith.constant 1 : index
    %c1_18 = arith.constant 1 : index
    %28 = memref.load %arg2[%c1_17, %c1_18] : memref<4x36xf32, #tpu.memory_space<smem>>
    %29 = vector.broadcast %28 : f32 to vector<32x32xf32>
    %30 = arith.mulf %29, %23 : vector<32x32xf32>
    %31 = arith.addf %13, %30 : vector<32x32xf32>
    %c2_19 = arith.constant 2 : index
    %c1_20 = arith.constant 1 : index
    %32 = memref.load %arg2[%c2_19, %c1_20] : memref<4x36xf32, #tpu.memory_space<smem>>
    %33 = vector.broadcast %32 : f32 to vector<32x32xf32>
    %34 = arith.mulf %33, %23 : vector<32x32xf32>
    %35 = arith.addf %17, %34 : vector<32x32xf32>
    %c3_21 = arith.constant 3 : index
    %c1_22 = arith.constant 1 : index
    %36 = memref.load %arg2[%c3_21, %c1_22] : memref<4x36xf32, #tpu.memory_space<smem>>
    %37 = vector.broadcast %36 : f32 to vector<32x32xf32>
    %38 = arith.mulf %37, %23 : vector<32x32xf32>
    %39 = arith.addf %21, %38 : vector<32x32xf32>
    %c0_23 = arith.constant 0 : index
    %c0_24 = arith.constant 0 : index
    %c0_25 = arith.constant 0 : index
    %c2_26 = arith.constant 2 : index
    %40 = vector.load %arg1[%c0_23, %c0_24, %c0_25, %c2_26] : memref<1x4x34x34xf32, #tpu.memory_space<vmem>>, vector<1x1x32x32xf32>
    %41 = vector.shape_cast %40 : vector<1x1x32x32xf32> to vector<32x32xf32>
    %c0_27 = arith.constant 0 : index
    %c2_28 = arith.constant 2 : index
    %42 = memref.load %arg2[%c0_27, %c2_28] : memref<4x36xf32, #tpu.memory_space<smem>>
    %43 = vector.broadcast %42 : f32 to vector<32x32xf32>
    %44 = arith.mulf %43, %41 : vector<32x32xf32>
    %45 = arith.addf %27, %44 : vector<32x32xf32>
    %c1_29 = arith.constant 1 : index
    %c2_30 = arith.constant 2 : index
    %46 = memref.load %arg2[%c1_29, %c2_30] : memref<4x36xf32, #tpu.memory_space<smem>>
    %47 = vector.broadcast %46 : f32 to vector<32x32xf32>
    %48 = arith.mulf %47, %41 : vector<32x32xf32>
    %49 = arith.addf %31, %48 : vector<32x32xf32>
    %c2_31 = arith.constant 2 : index
    %c2_32 = arith.constant 2 : index
    %50 = memref.load %arg2[%c2_31, %c2_32] : memref<4x36xf32, #tpu.memory_space<smem>>
    %51 = vector.broadcast %50 : f32 to vector<32x32xf32>
    %52 = arith.mulf %51, %41 : vector<32x32xf32>
    %53 = arith.addf %35, %52 : vector<32x32xf32>
    %c3_33 = arith.constant 3 : index
    %c2_34 = arith.constant 2 : index
    %54 = memref.load %arg2[%c3_33, %c2_34] : memref<4x36xf32, #tpu.memory_space<smem>>
    %55 = vector.broadcast %54 : f32 to vector<32x32xf32>
    %56 = arith.mulf %55, %41 : vector<32x32xf32>
    %57 = arith.addf %39, %56 : vector<32x32xf32>
    %c0_35 = arith.constant 0 : index
    %c0_36 = arith.constant 0 : index
    %c1_37 = arith.constant 1 : index
    %c0_38 = arith.constant 0 : index
    %58 = vector.load %arg1[%c0_35, %c0_36, %c1_37, %c0_38] : memref<1x4x34x34xf32, #tpu.memory_space<vmem>>, vector<1x1x32x32xf32>
    %59 = vector.shape_cast %58 : vector<1x1x32x32xf32> to vector<32x32xf32>
    %c0_39 = arith.constant 0 : index
    %c3_40 = arith.constant 3 : index
    %60 = memref.load %arg2[%c0_39, %c3_40] : memref<4x36xf32, #tpu.memory_space<smem>>
    %61 = vector.broadcast %60 : f32 to vector<32x32xf32>
    %62 = arith.mulf %61, %59 : vector<32x32xf32>
    %63 = arith.addf %45, %62 : vector<32x32xf32>
    %c1_41 = arith.constant 1 : index
    %c3_42 = arith.constant 3 : index
    %64 = memref.load %arg2[%c1_41, %c3_42] : memref<4x36xf32, #tpu.memory_space<smem>>
    %65 = vector.broadcast %64 : f32 to vector<32x32xf32>
    %66 = arith.mulf %65, %59 : vector<32x32xf32>
    %67 = arith.addf %49, %66 : vector<32x32xf32>
    %c2_43 = arith.constant 2 : index
    %c3_44 = arith.constant 3 : index
    %68 = memref.load %arg2[%c2_43, %c3_44] : memref<4x36xf32, #tpu.memory_space<smem>>
    %69 = vector.broadcast %68 : f32 to vector<32x32xf32>
    %70 = arith.mulf %69, %59 : vector<32x32xf32>
    %71 = arith.addf %53, %70 : vector<32x32xf32>
    %c3_45 = arith.constant 3 : index
    %c3_46 = arith.constant 3 : index
    %72 = memref.load %arg2[%c3_45, %c3_46] : memref<4x36xf32, #tpu.memory_space<smem>>
    %73 = vector.broadcast %72 : f32 to vector<32x32xf32>
    %74 = arith.mulf %73, %59 : vector<32x32xf32>
    %75 = arith.addf %57, %74 : vector<32x32xf32>
    %c0_47 = arith.constant 0 : index
    %c0_48 = arith.constant 0 : index
    %c1_49 = arith.constant 1 : index
    %c1_50 = arith.constant 1 : index
    %76 = vector.load %arg1[%c0_47, %c0_48, %c1_49, %c1_50] : memref<1x4x34x34xf32, #tpu.memory_space<vmem>>, vector<1x1x32x32xf32>
    %77 = vector.shape_cast %76 : vector<1x1x32x32xf32> to vector<32x32xf32>
    %c0_51 = arith.constant 0 : index
    %c4 = arith.constant 4 : index
    %78 = memref.load %arg2[%c0_51, %c4] : memref<4x36xf32, #tpu.memory_space<smem>>
    %79 = vector.broadcast %78 : f32 to vector<32x32xf32>
    %80 = arith.mulf %79, %77 : vector<32x32xf32>
    %81 = arith.addf %63, %80 : vector<32x32xf32>
    %c1_52 = arith.constant 1 : index
    %c4_53 = arith.constant 4 : index
    %82 = memref.load %arg2[%c1_52, %c4_53] : memref<4x36xf32, #tpu.memory_space<smem>>
    %83 = vector.broadcast %82 : f32 to vector<32x32xf32>
    %84 = arith.mulf %83, %77 : vector<32x32xf32>
    %85 = arith.addf %67, %84 : vector<32x32xf32>
    %c2_54 = arith.constant 2 : index
    %c4_55 = arith.constant 4 : index
    %86 = memref.load %arg2[%c2_54, %c4_55] : memref<4x36xf32, #tpu.memory_space<smem>>
    %87 = vector.broadcast %86 : f32 to vector<32x32xf32>
    %88 = arith.mulf %87, %77 : vector<32x32xf32>
    %89 = arith.addf %71, %88 : vector<32x32xf32>
    %c3_56 = arith.constant 3 : index
    %c4_57 = arith.constant 4 : index
    %90 = memref.load %arg2[%c3_56, %c4_57] : memref<4x36xf32, #tpu.memory_space<smem>>
    %91 = vector.broadcast %90 : f32 to vector<32x32xf32>
    %92 = arith.mulf %91, %77 : vector<32x32xf32>
    %93 = arith.addf %75, %92 : vector<32x32xf32>
    %c0_58 = arith.constant 0 : index
    %c0_59 = arith.constant 0 : index
    %c1_60 = arith.constant 1 : index
    %c2_61 = arith.constant 2 : index
    %94 = vector.load %arg1[%c0_58, %c0_59, %c1_60, %c2_61] : memref<1x4x34x34xf32, #tpu.memory_space<vmem>>, vector<1x1x32x32xf32>
    %95 = vector.shape_cast %94 : vector<1x1x32x32xf32> to vector<32x32xf32>
    %c0_62 = arith.constant 0 : index
    %c5 = arith.constant 5 : index
    %96 = memref.load %arg2[%c0_62, %c5] : memref<4x36xf32, #tpu.memory_space<smem>>
    %97 = vector.broadcast %96 : f32 to vector<32x32xf32>
    %98 = arith.mulf %97, %95 : vector<32x32xf32>
    %99 = arith.addf %81, %98 : vector<32x32xf32>
    %c1_63 = arith.constant 1 : index
    %c5_64 = arith.constant 5 : index
    %100 = memref.load %arg2[%c1_63, %c5_64] : memref<4x36xf32, #tpu.memory_space<smem>>
    %101 = vector.broadcast %100 : f32 to vector<32x32xf32>
    %102 = arith.mulf %101, %95 : vector<32x32xf32>
    %103 = arith.addf %85, %102 : vector<32x32xf32>
    %c2_65 = arith.constant 2 : index
    %c5_66 = arith.constant 5 : index
    %104 = memref.load %arg2[%c2_65, %c5_66] : memref<4x36xf32, #tpu.memory_space<smem>>
    %105 = vector.broadcast %104 : f32 to vector<32x32xf32>
    %106 = arith.mulf %105, %95 : vector<32x32xf32>
    %107 = arith.addf %89, %106 : vector<32x32xf32>
    %c3_67 = arith.constant 3 : index
    %c5_68 = arith.constant 5 : index
    %108 = memref.load %arg2[%c3_67, %c5_68] : memref<4x36xf32, #tpu.memory_space<smem>>
    %109 = vector.broadcast %108 : f32 to vector<32x32xf32>
    %110 = arith.mulf %109, %95 : vector<32x32xf32>
    %111 = arith.addf %93, %110 : vector<32x32xf32>
    %c0_69 = arith.constant 0 : index
    %c0_70 = arith.constant 0 : index
    %c2_71 = arith.constant 2 : index
    %c0_72 = arith.constant 0 : index
    %112 = vector.load %arg1[%c0_69, %c0_70, %c2_71, %c0_72] : memref<1x4x34x34xf32, #tpu.memory_space<vmem>>, vector<1x1x32x32xf32>
    %113 = vector.shape_cast %112 : vector<1x1x32x32xf32> to vector<32x32xf32>
    %c0_73 = arith.constant 0 : index
    %c6 = arith.constant 6 : index
    %114 = memref.load %arg2[%c0_73, %c6] : memref<4x36xf32, #tpu.memory_space<smem>>
    %115 = vector.broadcast %114 : f32 to vector<32x32xf32>
    %116 = arith.mulf %115, %113 : vector<32x32xf32>
    %117 = arith.addf %99, %116 : vector<32x32xf32>
    %c1_74 = arith.constant 1 : index
    %c6_75 = arith.constant 6 : index
    %118 = memref.load %arg2[%c1_74, %c6_75] : memref<4x36xf32, #tpu.memory_space<smem>>
    %119 = vector.broadcast %118 : f32 to vector<32x32xf32>
    %120 = arith.mulf %119, %113 : vector<32x32xf32>
    %121 = arith.addf %103, %120 : vector<32x32xf32>
    %c2_76 = arith.constant 2 : index
    %c6_77 = arith.constant 6 : index
    %122 = memref.load %arg2[%c2_76, %c6_77] : memref<4x36xf32, #tpu.memory_space<smem>>
    %123 = vector.broadcast %122 : f32 to vector<32x32xf32>
    %124 = arith.mulf %123, %113 : vector<32x32xf32>
    %125 = arith.addf %107, %124 : vector<32x32xf32>
    %c3_78 = arith.constant 3 : index
    %c6_79 = arith.constant 6 : index
    %126 = memref.load %arg2[%c3_78, %c6_79] : memref<4x36xf32, #tpu.memory_space<smem>>
    %127 = vector.broadcast %126 : f32 to vector<32x32xf32>
    %128 = arith.mulf %127, %113 : vector<32x32xf32>
    %129 = arith.addf %111, %128 : vector<32x32xf32>
    %c0_80 = arith.constant 0 : index
    %c0_81 = arith.constant 0 : index
    %c2_82 = arith.constant 2 : index
    %c1_83 = arith.constant 1 : index
    %130 = vector.load %arg1[%c0_80, %c0_81, %c2_82, %c1_83] : memref<1x4x34x34xf32, #tpu.memory_space<vmem>>, vector<1x1x32x32xf32>
    %131 = vector.shape_cast %130 : vector<1x1x32x32xf32> to vector<32x32xf32>
    %c0_84 = arith.constant 0 : index
    %c7 = arith.constant 7 : index
    %132 = memref.load %arg2[%c0_84, %c7] : memref<4x36xf32, #tpu.memory_space<smem>>
    %133 = vector.broadcast %132 : f32 to vector<32x32xf32>
    %134 = arith.mulf %133, %131 : vector<32x32xf32>
    %135 = arith.addf %117, %134 : vector<32x32xf32>
    %c1_85 = arith.constant 1 : index
    %c7_86 = arith.constant 7 : index
    %136 = memref.load %arg2[%c1_85, %c7_86] : memref<4x36xf32, #tpu.memory_space<smem>>
    %137 = vector.broadcast %136 : f32 to vector<32x32xf32>
    %138 = arith.mulf %137, %131 : vector<32x32xf32>
    %139 = arith.addf %121, %138 : vector<32x32xf32>
    %c2_87 = arith.constant 2 : index
    %c7_88 = arith.constant 7 : index
    %140 = memref.load %arg2[%c2_87, %c7_88] : memref<4x36xf32, #tpu.memory_space<smem>>
    %141 = vector.broadcast %140 : f32 to vector<32x32xf32>
    %142 = arith.mulf %141, %131 : vector<32x32xf32>
    %143 = arith.addf %125, %142 : vector<32x32xf32>
    %c3_89 = arith.constant 3 : index
    %c7_90 = arith.constant 7 : index
    %144 = memref.load %arg2[%c3_89, %c7_90] : memref<4x36xf32, #tpu.memory_space<smem>>
    %145 = vector.broadcast %144 : f32 to vector<32x32xf32>
    %146 = arith.mulf %145, %131 : vector<32x32xf32>
    %147 = arith.addf %129, %146 : vector<32x32xf32>
    %c0_91 = arith.constant 0 : index
    %c0_92 = arith.constant 0 : index
    %c2_93 = arith.constant 2 : index
    %c2_94 = arith.constant 2 : index
    %148 = vector.load %arg1[%c0_91, %c0_92, %c2_93, %c2_94] : memref<1x4x34x34xf32, #tpu.memory_space<vmem>>, vector<1x1x32x32xf32>
    %149 = vector.shape_cast %148 : vector<1x1x32x32xf32> to vector<32x32xf32>
    %c0_95 = arith.constant 0 : index
    %c8 = arith.constant 8 : index
    %150 = memref.load %arg2[%c0_95, %c8] : memref<4x36xf32, #tpu.memory_space<smem>>
    %151 = vector.broadcast %150 : f32 to vector<32x32xf32>
    %152 = arith.mulf %151, %149 : vector<32x32xf32>
    %153 = arith.addf %135, %152 : vector<32x32xf32>
    %c1_96 = arith.constant 1 : index
    %c8_97 = arith.constant 8 : index
    %154 = memref.load %arg2[%c1_96, %c8_97] : memref<4x36xf32, #tpu.memory_space<smem>>
    %155 = vector.broadcast %154 : f32 to vector<32x32xf32>
    %156 = arith.mulf %155, %149 : vector<32x32xf32>
    %157 = arith.addf %139, %156 : vector<32x32xf32>
    %c2_98 = arith.constant 2 : index
    %c8_99 = arith.constant 8 : index
    %158 = memref.load %arg2[%c2_98, %c8_99] : memref<4x36xf32, #tpu.memory_space<smem>>
    %159 = vector.broadcast %158 : f32 to vector<32x32xf32>
    %160 = arith.mulf %159, %149 : vector<32x32xf32>
    %161 = arith.addf %143, %160 : vector<32x32xf32>
    %c3_100 = arith.constant 3 : index
    %c8_101 = arith.constant 8 : index
    %162 = memref.load %arg2[%c3_100, %c8_101] : memref<4x36xf32, #tpu.memory_space<smem>>
    %163 = vector.broadcast %162 : f32 to vector<32x32xf32>
    %164 = arith.mulf %163, %149 : vector<32x32xf32>
    %165 = arith.addf %147, %164 : vector<32x32xf32>
    %c0_102 = arith.constant 0 : index
    %c1_103 = arith.constant 1 : index
    %c0_104 = arith.constant 0 : index
    %c0_105 = arith.constant 0 : index
    %166 = vector.load %arg1[%c0_102, %c1_103, %c0_104, %c0_105] : memref<1x4x34x34xf32, #tpu.memory_space<vmem>>, vector<1x1x32x32xf32>
    %167 = vector.shape_cast %166 : vector<1x1x32x32xf32> to vector<32x32xf32>
    %c0_106 = arith.constant 0 : index
    %c9 = arith.constant 9 : index
    %168 = memref.load %arg2[%c0_106, %c9] : memref<4x36xf32, #tpu.memory_space<smem>>
    %169 = vector.broadcast %168 : f32 to vector<32x32xf32>
    %170 = arith.mulf %169, %167 : vector<32x32xf32>
    %171 = arith.addf %153, %170 : vector<32x32xf32>
    %c1_107 = arith.constant 1 : index
    %c9_108 = arith.constant 9 : index
    %172 = memref.load %arg2[%c1_107, %c9_108] : memref<4x36xf32, #tpu.memory_space<smem>>
    %173 = vector.broadcast %172 : f32 to vector<32x32xf32>
    %174 = arith.mulf %173, %167 : vector<32x32xf32>
    %175 = arith.addf %157, %174 : vector<32x32xf32>
    %c2_109 = arith.constant 2 : index
    %c9_110 = arith.constant 9 : index
    %176 = memref.load %arg2[%c2_109, %c9_110] : memref<4x36xf32, #tpu.memory_space<smem>>
    %177 = vector.broadcast %176 : f32 to vector<32x32xf32>
    %178 = arith.mulf %177, %167 : vector<32x32xf32>
    %179 = arith.addf %161, %178 : vector<32x32xf32>
    %c3_111 = arith.constant 3 : index
    %c9_112 = arith.constant 9 : index
    %180 = memref.load %arg2[%c3_111, %c9_112] : memref<4x36xf32, #tpu.memory_space<smem>>
    %181 = vector.broadcast %180 : f32 to vector<32x32xf32>
    %182 = arith.mulf %181, %167 : vector<32x32xf32>
    %183 = arith.addf %165, %182 : vector<32x32xf32>
    %c0_113 = arith.constant 0 : index
    %c1_114 = arith.constant 1 : index
    %c0_115 = arith.constant 0 : index
    %c1_116 = arith.constant 1 : index
    %184 = vector.load %arg1[%c0_113, %c1_114, %c0_115, %c1_116] : memref<1x4x34x34xf32, #tpu.memory_space<vmem>>, vector<1x1x32x32xf32>
    %185 = vector.shape_cast %184 : vector<1x1x32x32xf32> to vector<32x32xf32>
    %c0_117 = arith.constant 0 : index
    %c10 = arith.constant 10 : index
    %186 = memref.load %arg2[%c0_117, %c10] : memref<4x36xf32, #tpu.memory_space<smem>>
    %187 = vector.broadcast %186 : f32 to vector<32x32xf32>
    %188 = arith.mulf %187, %185 : vector<32x32xf32>
    %189 = arith.addf %171, %188 : vector<32x32xf32>
    %c1_118 = arith.constant 1 : index
    %c10_119 = arith.constant 10 : index
    %190 = memref.load %arg2[%c1_118, %c10_119] : memref<4x36xf32, #tpu.memory_space<smem>>
    %191 = vector.broadcast %190 : f32 to vector<32x32xf32>
    %192 = arith.mulf %191, %185 : vector<32x32xf32>
    %193 = arith.addf %175, %192 : vector<32x32xf32>
    %c2_120 = arith.constant 2 : index
    %c10_121 = arith.constant 10 : index
    %194 = memref.load %arg2[%c2_120, %c10_121] : memref<4x36xf32, #tpu.memory_space<smem>>
    %195 = vector.broadcast %194 : f32 to vector<32x32xf32>
    %196 = arith.mulf %195, %185 : vector<32x32xf32>
    %197 = arith.addf %179, %196 : vector<32x32xf32>
    %c3_122 = arith.constant 3 : index
    %c10_123 = arith.constant 10 : index
    %198 = memref.load %arg2[%c3_122, %c10_123] : memref<4x36xf32, #tpu.memory_space<smem>>
    %199 = vector.broadcast %198 : f32 to vector<32x32xf32>
    %200 = arith.mulf %199, %185 : vector<32x32xf32>
    %201 = arith.addf %183, %200 : vector<32x32xf32>
    %c0_124 = arith.constant 0 : index
    %c1_125 = arith.constant 1 : index
    %c0_126 = arith.constant 0 : index
    %c2_127 = arith.constant 2 : index
    %202 = vector.load %arg1[%c0_124, %c1_125, %c0_126, %c2_127] : memref<1x4x34x34xf32, #tpu.memory_space<vmem>>, vector<1x1x32x32xf32>
    %203 = vector.shape_cast %202 : vector<1x1x32x32xf32> to vector<32x32xf32>
    %c0_128 = arith.constant 0 : index
    %c11 = arith.constant 11 : index
    %204 = memref.load %arg2[%c0_128, %c11] : memref<4x36xf32, #tpu.memory_space<smem>>
    %205 = vector.broadcast %204 : f32 to vector<32x32xf32>
    %206 = arith.mulf %205, %203 : vector<32x32xf32>
    %207 = arith.addf %189, %206 : vector<32x32xf32>
    %c1_129 = arith.constant 1 : index
    %c11_130 = arith.constant 11 : index
    %208 = memref.load %arg2[%c1_129, %c11_130] : memref<4x36xf32, #tpu.memory_space<smem>>
    %209 = vector.broadcast %208 : f32 to vector<32x32xf32>
    %210 = arith.mulf %209, %203 : vector<32x32xf32>
    %211 = arith.addf %193, %210 : vector<32x32xf32>
    %c2_131 = arith.constant 2 : index
    %c11_132 = arith.constant 11 : index
    %212 = memref.load %arg2[%c2_131, %c11_132] : memref<4x36xf32, #tpu.memory_space<smem>>
    %213 = vector.broadcast %212 : f32 to vector<32x32xf32>
    %214 = arith.mulf %213, %203 : vector<32x32xf32>
    %215 = arith.addf %197, %214 : vector<32x32xf32>
    %c3_133 = arith.constant 3 : index
    %c11_134 = arith.constant 11 : index
    %216 = memref.load %arg2[%c3_133, %c11_134] : memref<4x36xf32, #tpu.memory_space<smem>>
    %217 = vector.broadcast %216 : f32 to vector<32x32xf32>
    %218 = arith.mulf %217, %203 : vector<32x32xf32>
    %219 = arith.addf %201, %218 : vector<32x32xf32>
    %c0_135 = arith.constant 0 : index
    %c1_136 = arith.constant 1 : index
    %c1_137 = arith.constant 1 : index
    %c0_138 = arith.constant 0 : index
    %220 = vector.load %arg1[%c0_135, %c1_136, %c1_137, %c0_138] : memref<1x4x34x34xf32, #tpu.memory_space<vmem>>, vector<1x1x32x32xf32>
    %221 = vector.shape_cast %220 : vector<1x1x32x32xf32> to vector<32x32xf32>
    %c0_139 = arith.constant 0 : index
    %c12 = arith.constant 12 : index
    %222 = memref.load %arg2[%c0_139, %c12] : memref<4x36xf32, #tpu.memory_space<smem>>
    %223 = vector.broadcast %222 : f32 to vector<32x32xf32>
    %224 = arith.mulf %223, %221 : vector<32x32xf32>
    %225 = arith.addf %207, %224 : vector<32x32xf32>
    %c1_140 = arith.constant 1 : index
    %c12_141 = arith.constant 12 : index
    %226 = memref.load %arg2[%c1_140, %c12_141] : memref<4x36xf32, #tpu.memory_space<smem>>
    %227 = vector.broadcast %226 : f32 to vector<32x32xf32>
    %228 = arith.mulf %227, %221 : vector<32x32xf32>
    %229 = arith.addf %211, %228 : vector<32x32xf32>
    %c2_142 = arith.constant 2 : index
    %c12_143 = arith.constant 12 : index
    %230 = memref.load %arg2[%c2_142, %c12_143] : memref<4x36xf32, #tpu.memory_space<smem>>
    %231 = vector.broadcast %230 : f32 to vector<32x32xf32>
    %232 = arith.mulf %231, %221 : vector<32x32xf32>
    %233 = arith.addf %215, %232 : vector<32x32xf32>
    %c3_144 = arith.constant 3 : index
    %c12_145 = arith.constant 12 : index
    %234 = memref.load %arg2[%c3_144, %c12_145] : memref<4x36xf32, #tpu.memory_space<smem>>
    %235 = vector.broadcast %234 : f32 to vector<32x32xf32>
    %236 = arith.mulf %235, %221 : vector<32x32xf32>
    %237 = arith.addf %219, %236 : vector<32x32xf32>
    %c0_146 = arith.constant 0 : index
    %c1_147 = arith.constant 1 : index
    %c1_148 = arith.constant 1 : index
    %c1_149 = arith.constant 1 : index
    %238 = vector.load %arg1[%c0_146, %c1_147, %c1_148, %c1_149] : memref<1x4x34x34xf32, #tpu.memory_space<vmem>>, vector<1x1x32x32xf32>
    %239 = vector.shape_cast %238 : vector<1x1x32x32xf32> to vector<32x32xf32>
    %c0_150 = arith.constant 0 : index
    %c13 = arith.constant 13 : index
    %240 = memref.load %arg2[%c0_150, %c13] : memref<4x36xf32, #tpu.memory_space<smem>>
    %241 = vector.broadcast %240 : f32 to vector<32x32xf32>
    %242 = arith.mulf %241, %239 : vector<32x32xf32>
    %243 = arith.addf %225, %242 : vector<32x32xf32>
    %c1_151 = arith.constant 1 : index
    %c13_152 = arith.constant 13 : index
    %244 = memref.load %arg2[%c1_151, %c13_152] : memref<4x36xf32, #tpu.memory_space<smem>>
    %245 = vector.broadcast %244 : f32 to vector<32x32xf32>
    %246 = arith.mulf %245, %239 : vector<32x32xf32>
    %247 = arith.addf %229, %246 : vector<32x32xf32>
    %c2_153 = arith.constant 2 : index
    %c13_154 = arith.constant 13 : index
    %248 = memref.load %arg2[%c2_153, %c13_154] : memref<4x36xf32, #tpu.memory_space<smem>>
    %249 = vector.broadcast %248 : f32 to vector<32x32xf32>
    %250 = arith.mulf %249, %239 : vector<32x32xf32>
    %251 = arith.addf %233, %250 : vector<32x32xf32>
    %c3_155 = arith.constant 3 : index
    %c13_156 = arith.constant 13 : index
    %252 = memref.load %arg2[%c3_155, %c13_156] : memref<4x36xf32, #tpu.memory_space<smem>>
    %253 = vector.broadcast %252 : f32 to vector<32x32xf32>
    %254 = arith.mulf %253, %239 : vector<32x32xf32>
    %255 = arith.addf %237, %254 : vector<32x32xf32>
    %c0_157 = arith.constant 0 : index
    %c1_158 = arith.constant 1 : index
    %c1_159 = arith.constant 1 : index
    %c2_160 = arith.constant 2 : index
    %256 = vector.load %arg1[%c0_157, %c1_158, %c1_159, %c2_160] : memref<1x4x34x34xf32, #tpu.memory_space<vmem>>, vector<1x1x32x32xf32>
    %257 = vector.shape_cast %256 : vector<1x1x32x32xf32> to vector<32x32xf32>
    %c0_161 = arith.constant 0 : index
    %c14 = arith.constant 14 : index
    %258 = memref.load %arg2[%c0_161, %c14] : memref<4x36xf32, #tpu.memory_space<smem>>
    %259 = vector.broadcast %258 : f32 to vector<32x32xf32>
    %260 = arith.mulf %259, %257 : vector<32x32xf32>
    %261 = arith.addf %243, %260 : vector<32x32xf32>
    %c1_162 = arith.constant 1 : index
    %c14_163 = arith.constant 14 : index
    %262 = memref.load %arg2[%c1_162, %c14_163] : memref<4x36xf32, #tpu.memory_space<smem>>
    %263 = vector.broadcast %262 : f32 to vector<32x32xf32>
    %264 = arith.mulf %263, %257 : vector<32x32xf32>
    %265 = arith.addf %247, %264 : vector<32x32xf32>
    %c2_164 = arith.constant 2 : index
    %c14_165 = arith.constant 14 : index
    %266 = memref.load %arg2[%c2_164, %c14_165] : memref<4x36xf32, #tpu.memory_space<smem>>
    %267 = vector.broadcast %266 : f32 to vector<32x32xf32>
    %268 = arith.mulf %267, %257 : vector<32x32xf32>
    %269 = arith.addf %251, %268 : vector<32x32xf32>
    %c3_166 = arith.constant 3 : index
    %c14_167 = arith.constant 14 : index
    %270 = memref.load %arg2[%c3_166, %c14_167] : memref<4x36xf32, #tpu.memory_space<smem>>
    %271 = vector.broadcast %270 : f32 to vector<32x32xf32>
    %272 = arith.mulf %271, %257 : vector<32x32xf32>
    %273 = arith.addf %255, %272 : vector<32x32xf32>
    %c0_168 = arith.constant 0 : index
    %c1_169 = arith.constant 1 : index
    %c2_170 = arith.constant 2 : index
    %c0_171 = arith.constant 0 : index
    %274 = vector.load %arg1[%c0_168, %c1_169, %c2_170, %c0_171] : memref<1x4x34x34xf32, #tpu.memory_space<vmem>>, vector<1x1x32x32xf32>
    %275 = vector.shape_cast %274 : vector<1x1x32x32xf32> to vector<32x32xf32>
    %c0_172 = arith.constant 0 : index
    %c15 = arith.constant 15 : index
    %276 = memref.load %arg2[%c0_172, %c15] : memref<4x36xf32, #tpu.memory_space<smem>>
    %277 = vector.broadcast %276 : f32 to vector<32x32xf32>
    %278 = arith.mulf %277, %275 : vector<32x32xf32>
    %279 = arith.addf %261, %278 : vector<32x32xf32>
    %c1_173 = arith.constant 1 : index
    %c15_174 = arith.constant 15 : index
    %280 = memref.load %arg2[%c1_173, %c15_174] : memref<4x36xf32, #tpu.memory_space<smem>>
    %281 = vector.broadcast %280 : f32 to vector<32x32xf32>
    %282 = arith.mulf %281, %275 : vector<32x32xf32>
    %283 = arith.addf %265, %282 : vector<32x32xf32>
    %c2_175 = arith.constant 2 : index
    %c15_176 = arith.constant 15 : index
    %284 = memref.load %arg2[%c2_175, %c15_176] : memref<4x36xf32, #tpu.memory_space<smem>>
    %285 = vector.broadcast %284 : f32 to vector<32x32xf32>
    %286 = arith.mulf %285, %275 : vector<32x32xf32>
    %287 = arith.addf %269, %286 : vector<32x32xf32>
    %c3_177 = arith.constant 3 : index
    %c15_178 = arith.constant 15 : index
    %288 = memref.load %arg2[%c3_177, %c15_178] : memref<4x36xf32, #tpu.memory_space<smem>>
    %289 = vector.broadcast %288 : f32 to vector<32x32xf32>
    %290 = arith.mulf %289, %275 : vector<32x32xf32>
    %291 = arith.addf %273, %290 : vector<32x32xf32>
    %c0_179 = arith.constant 0 : index
    %c1_180 = arith.constant 1 : index
    %c2_181 = arith.constant 2 : index
    %c1_182 = arith.constant 1 : index
    %292 = vector.load %arg1[%c0_179, %c1_180, %c2_181, %c1_182] : memref<1x4x34x34xf32, #tpu.memory_space<vmem>>, vector<1x1x32x32xf32>
    %293 = vector.shape_cast %292 : vector<1x1x32x32xf32> to vector<32x32xf32>
    %c0_183 = arith.constant 0 : index
    %c16 = arith.constant 16 : index
    %294 = memref.load %arg2[%c0_183, %c16] : memref<4x36xf32, #tpu.memory_space<smem>>
    %295 = vector.broadcast %294 : f32 to vector<32x32xf32>
    %296 = arith.mulf %295, %293 : vector<32x32xf32>
    %297 = arith.addf %279, %296 : vector<32x32xf32>
    %c1_184 = arith.constant 1 : index
    %c16_185 = arith.constant 16 : index
    %298 = memref.load %arg2[%c1_184, %c16_185] : memref<4x36xf32, #tpu.memory_space<smem>>
    %299 = vector.broadcast %298 : f32 to vector<32x32xf32>
    %300 = arith.mulf %299, %293 : vector<32x32xf32>
    %301 = arith.addf %283, %300 : vector<32x32xf32>
    %c2_186 = arith.constant 2 : index
    %c16_187 = arith.constant 16 : index
    %302 = memref.load %arg2[%c2_186, %c16_187] : memref<4x36xf32, #tpu.memory_space<smem>>
    %303 = vector.broadcast %302 : f32 to vector<32x32xf32>
    %304 = arith.mulf %303, %293 : vector<32x32xf32>
    %305 = arith.addf %287, %304 : vector<32x32xf32>
    %c3_188 = arith.constant 3 : index
    %c16_189 = arith.constant 16 : index
    %306 = memref.load %arg2[%c3_188, %c16_189] : memref<4x36xf32, #tpu.memory_space<smem>>
    %307 = vector.broadcast %306 : f32 to vector<32x32xf32>
    %308 = arith.mulf %307, %293 : vector<32x32xf32>
    %309 = arith.addf %291, %308 : vector<32x32xf32>
    %c0_190 = arith.constant 0 : index
    %c1_191 = arith.constant 1 : index
    %c2_192 = arith.constant 2 : index
    %c2_193 = arith.constant 2 : index
    %310 = vector.load %arg1[%c0_190, %c1_191, %c2_192, %c2_193] : memref<1x4x34x34xf32, #tpu.memory_space<vmem>>, vector<1x1x32x32xf32>
    %311 = vector.shape_cast %310 : vector<1x1x32x32xf32> to vector<32x32xf32>
    %c0_194 = arith.constant 0 : index
    %c17 = arith.constant 17 : index
    %312 = memref.load %arg2[%c0_194, %c17] : memref<4x36xf32, #tpu.memory_space<smem>>
    %313 = vector.broadcast %312 : f32 to vector<32x32xf32>
    %314 = arith.mulf %313, %311 : vector<32x32xf32>
    %315 = arith.addf %297, %314 : vector<32x32xf32>
    %c1_195 = arith.constant 1 : index
    %c17_196 = arith.constant 17 : index
    %316 = memref.load %arg2[%c1_195, %c17_196] : memref<4x36xf32, #tpu.memory_space<smem>>
    %317 = vector.broadcast %316 : f32 to vector<32x32xf32>
    %318 = arith.mulf %317, %311 : vector<32x32xf32>
    %319 = arith.addf %301, %318 : vector<32x32xf32>
    %c2_197 = arith.constant 2 : index
    %c17_198 = arith.constant 17 : index
    %320 = memref.load %arg2[%c2_197, %c17_198] : memref<4x36xf32, #tpu.memory_space<smem>>
    %321 = vector.broadcast %320 : f32 to vector<32x32xf32>
    %322 = arith.mulf %321, %311 : vector<32x32xf32>
    %323 = arith.addf %305, %322 : vector<32x32xf32>
    %c3_199 = arith.constant 3 : index
    %c17_200 = arith.constant 17 : index
    %324 = memref.load %arg2[%c3_199, %c17_200] : memref<4x36xf32, #tpu.memory_space<smem>>
    %325 = vector.broadcast %324 : f32 to vector<32x32xf32>
    %326 = arith.mulf %325, %311 : vector<32x32xf32>
    %327 = arith.addf %309, %326 : vector<32x32xf32>
    %c0_201 = arith.constant 0 : index
    %c2_202 = arith.constant 2 : index
    %c0_203 = arith.constant 0 : index
    %c0_204 = arith.constant 0 : index
    %328 = vector.load %arg1[%c0_201, %c2_202, %c0_203, %c0_204] : memref<1x4x34x34xf32, #tpu.memory_space<vmem>>, vector<1x1x32x32xf32>
    %329 = vector.shape_cast %328 : vector<1x1x32x32xf32> to vector<32x32xf32>
    %c0_205 = arith.constant 0 : index
    %c18 = arith.constant 18 : index
    %330 = memref.load %arg2[%c0_205, %c18] : memref<4x36xf32, #tpu.memory_space<smem>>
    %331 = vector.broadcast %330 : f32 to vector<32x32xf32>
    %332 = arith.mulf %331, %329 : vector<32x32xf32>
    %333 = arith.addf %315, %332 : vector<32x32xf32>
    %c1_206 = arith.constant 1 : index
    %c18_207 = arith.constant 18 : index
    %334 = memref.load %arg2[%c1_206, %c18_207] : memref<4x36xf32, #tpu.memory_space<smem>>
    %335 = vector.broadcast %334 : f32 to vector<32x32xf32>
    %336 = arith.mulf %335, %329 : vector<32x32xf32>
    %337 = arith.addf %319, %336 : vector<32x32xf32>
    %c2_208 = arith.constant 2 : index
    %c18_209 = arith.constant 18 : index
    %338 = memref.load %arg2[%c2_208, %c18_209] : memref<4x36xf32, #tpu.memory_space<smem>>
    %339 = vector.broadcast %338 : f32 to vector<32x32xf32>
    %340 = arith.mulf %339, %329 : vector<32x32xf32>
    %341 = arith.addf %323, %340 : vector<32x32xf32>
    %c3_210 = arith.constant 3 : index
    %c18_211 = arith.constant 18 : index
    %342 = memref.load %arg2[%c3_210, %c18_211] : memref<4x36xf32, #tpu.memory_space<smem>>
    %343 = vector.broadcast %342 : f32 to vector<32x32xf32>
    %344 = arith.mulf %343, %329 : vector<32x32xf32>
    %345 = arith.addf %327, %344 : vector<32x32xf32>
    %c0_212 = arith.constant 0 : index
    %c2_213 = arith.constant 2 : index
    %c0_214 = arith.constant 0 : index
    %c1_215 = arith.constant 1 : index
    %346 = vector.load %arg1[%c0_212, %c2_213, %c0_214, %c1_215] : memref<1x4x34x34xf32, #tpu.memory_space<vmem>>, vector<1x1x32x32xf32>
    %347 = vector.shape_cast %346 : vector<1x1x32x32xf32> to vector<32x32xf32>
    %c0_216 = arith.constant 0 : index
    %c19 = arith.constant 19 : index
    %348 = memref.load %arg2[%c0_216, %c19] : memref<4x36xf32, #tpu.memory_space<smem>>
    %349 = vector.broadcast %348 : f32 to vector<32x32xf32>
    %350 = arith.mulf %349, %347 : vector<32x32xf32>
    %351 = arith.addf %333, %350 : vector<32x32xf32>
    %c1_217 = arith.constant 1 : index
    %c19_218 = arith.constant 19 : index
    %352 = memref.load %arg2[%c1_217, %c19_218] : memref<4x36xf32, #tpu.memory_space<smem>>
    %353 = vector.broadcast %352 : f32 to vector<32x32xf32>
    %354 = arith.mulf %353, %347 : vector<32x32xf32>
    %355 = arith.addf %337, %354 : vector<32x32xf32>
    %c2_219 = arith.constant 2 : index
    %c19_220 = arith.constant 19 : index
    %356 = memref.load %arg2[%c2_219, %c19_220] : memref<4x36xf32, #tpu.memory_space<smem>>
    %357 = vector.broadcast %356 : f32 to vector<32x32xf32>
    %358 = arith.mulf %357, %347 : vector<32x32xf32>
    %359 = arith.addf %341, %358 : vector<32x32xf32>
    %c3_221 = arith.constant 3 : index
    %c19_222 = arith.constant 19 : index
    %360 = memref.load %arg2[%c3_221, %c19_222] : memref<4x36xf32, #tpu.memory_space<smem>>
    %361 = vector.broadcast %360 : f32 to vector<32x32xf32>
    %362 = arith.mulf %361, %347 : vector<32x32xf32>
    %363 = arith.addf %345, %362 : vector<32x32xf32>
    %c0_223 = arith.constant 0 : index
    %c2_224 = arith.constant 2 : index
    %c0_225 = arith.constant 0 : index
    %c2_226 = arith.constant 2 : index
    %364 = vector.load %arg1[%c0_223, %c2_224, %c0_225, %c2_226] : memref<1x4x34x34xf32, #tpu.memory_space<vmem>>, vector<1x1x32x32xf32>
    %365 = vector.shape_cast %364 : vector<1x1x32x32xf32> to vector<32x32xf32>
    %c0_227 = arith.constant 0 : index
    %c20 = arith.constant 20 : index
    %366 = memref.load %arg2[%c0_227, %c20] : memref<4x36xf32, #tpu.memory_space<smem>>
    %367 = vector.broadcast %366 : f32 to vector<32x32xf32>
    %368 = arith.mulf %367, %365 : vector<32x32xf32>
    %369 = arith.addf %351, %368 : vector<32x32xf32>
    %c1_228 = arith.constant 1 : index
    %c20_229 = arith.constant 20 : index
    %370 = memref.load %arg2[%c1_228, %c20_229] : memref<4x36xf32, #tpu.memory_space<smem>>
    %371 = vector.broadcast %370 : f32 to vector<32x32xf32>
    %372 = arith.mulf %371, %365 : vector<32x32xf32>
    %373 = arith.addf %355, %372 : vector<32x32xf32>
    %c2_230 = arith.constant 2 : index
    %c20_231 = arith.constant 20 : index
    %374 = memref.load %arg2[%c2_230, %c20_231] : memref<4x36xf32, #tpu.memory_space<smem>>
    %375 = vector.broadcast %374 : f32 to vector<32x32xf32>
    %376 = arith.mulf %375, %365 : vector<32x32xf32>
    %377 = arith.addf %359, %376 : vector<32x32xf32>
    %c3_232 = arith.constant 3 : index
    %c20_233 = arith.constant 20 : index
    %378 = memref.load %arg2[%c3_232, %c20_233] : memref<4x36xf32, #tpu.memory_space<smem>>
    %379 = vector.broadcast %378 : f32 to vector<32x32xf32>
    %380 = arith.mulf %379, %365 : vector<32x32xf32>
    %381 = arith.addf %363, %380 : vector<32x32xf32>
    %c0_234 = arith.constant 0 : index
    %c2_235 = arith.constant 2 : index
    %c1_236 = arith.constant 1 : index
    %c0_237 = arith.constant 0 : index
    %382 = vector.load %arg1[%c0_234, %c2_235, %c1_236, %c0_237] : memref<1x4x34x34xf32, #tpu.memory_space<vmem>>, vector<1x1x32x32xf32>
    %383 = vector.shape_cast %382 : vector<1x1x32x32xf32> to vector<32x32xf32>
    %c0_238 = arith.constant 0 : index
    %c21 = arith.constant 21 : index
    %384 = memref.load %arg2[%c0_238, %c21] : memref<4x36xf32, #tpu.memory_space<smem>>
    %385 = vector.broadcast %384 : f32 to vector<32x32xf32>
    %386 = arith.mulf %385, %383 : vector<32x32xf32>
    %387 = arith.addf %369, %386 : vector<32x32xf32>
    %c1_239 = arith.constant 1 : index
    %c21_240 = arith.constant 21 : index
    %388 = memref.load %arg2[%c1_239, %c21_240] : memref<4x36xf32, #tpu.memory_space<smem>>
    %389 = vector.broadcast %388 : f32 to vector<32x32xf32>
    %390 = arith.mulf %389, %383 : vector<32x32xf32>
    %391 = arith.addf %373, %390 : vector<32x32xf32>
    %c2_241 = arith.constant 2 : index
    %c21_242 = arith.constant 21 : index
    %392 = memref.load %arg2[%c2_241, %c21_242] : memref<4x36xf32, #tpu.memory_space<smem>>
    %393 = vector.broadcast %392 : f32 to vector<32x32xf32>
    %394 = arith.mulf %393, %383 : vector<32x32xf32>
    %395 = arith.addf %377, %394 : vector<32x32xf32>
    %c3_243 = arith.constant 3 : index
    %c21_244 = arith.constant 21 : index
    %396 = memref.load %arg2[%c3_243, %c21_244] : memref<4x36xf32, #tpu.memory_space<smem>>
    %397 = vector.broadcast %396 : f32 to vector<32x32xf32>
    %398 = arith.mulf %397, %383 : vector<32x32xf32>
    %399 = arith.addf %381, %398 : vector<32x32xf32>
    %c0_245 = arith.constant 0 : index
    %c2_246 = arith.constant 2 : index
    %c1_247 = arith.constant 1 : index
    %c1_248 = arith.constant 1 : index
    %400 = vector.load %arg1[%c0_245, %c2_246, %c1_247, %c1_248] : memref<1x4x34x34xf32, #tpu.memory_space<vmem>>, vector<1x1x32x32xf32>
    %401 = vector.shape_cast %400 : vector<1x1x32x32xf32> to vector<32x32xf32>
    %c0_249 = arith.constant 0 : index
    %c22 = arith.constant 22 : index
    %402 = memref.load %arg2[%c0_249, %c22] : memref<4x36xf32, #tpu.memory_space<smem>>
    %403 = vector.broadcast %402 : f32 to vector<32x32xf32>
    %404 = arith.mulf %403, %401 : vector<32x32xf32>
    %405 = arith.addf %387, %404 : vector<32x32xf32>
    %c1_250 = arith.constant 1 : index
    %c22_251 = arith.constant 22 : index
    %406 = memref.load %arg2[%c1_250, %c22_251] : memref<4x36xf32, #tpu.memory_space<smem>>
    %407 = vector.broadcast %406 : f32 to vector<32x32xf32>
    %408 = arith.mulf %407, %401 : vector<32x32xf32>
    %409 = arith.addf %391, %408 : vector<32x32xf32>
    %c2_252 = arith.constant 2 : index
    %c22_253 = arith.constant 22 : index
    %410 = memref.load %arg2[%c2_252, %c22_253] : memref<4x36xf32, #tpu.memory_space<smem>>
    %411 = vector.broadcast %410 : f32 to vector<32x32xf32>
    %412 = arith.mulf %411, %401 : vector<32x32xf32>
    %413 = arith.addf %395, %412 : vector<32x32xf32>
    %c3_254 = arith.constant 3 : index
    %c22_255 = arith.constant 22 : index
    %414 = memref.load %arg2[%c3_254, %c22_255] : memref<4x36xf32, #tpu.memory_space<smem>>
    %415 = vector.broadcast %414 : f32 to vector<32x32xf32>
    %416 = arith.mulf %415, %401 : vector<32x32xf32>
    %417 = arith.addf %399, %416 : vector<32x32xf32>
    %c0_256 = arith.constant 0 : index
    %c2_257 = arith.constant 2 : index
    %c1_258 = arith.constant 1 : index
    %c2_259 = arith.constant 2 : index
    %418 = vector.load %arg1[%c0_256, %c2_257, %c1_258, %c2_259] : memref<1x4x34x34xf32, #tpu.memory_space<vmem>>, vector<1x1x32x32xf32>
    %419 = vector.shape_cast %418 : vector<1x1x32x32xf32> to vector<32x32xf32>
    %c0_260 = arith.constant 0 : index
    %c23 = arith.constant 23 : index
    %420 = memref.load %arg2[%c0_260, %c23] : memref<4x36xf32, #tpu.memory_space<smem>>
    %421 = vector.broadcast %420 : f32 to vector<32x32xf32>
    %422 = arith.mulf %421, %419 : vector<32x32xf32>
    %423 = arith.addf %405, %422 : vector<32x32xf32>
    %c1_261 = arith.constant 1 : index
    %c23_262 = arith.constant 23 : index
    %424 = memref.load %arg2[%c1_261, %c23_262] : memref<4x36xf32, #tpu.memory_space<smem>>
    %425 = vector.broadcast %424 : f32 to vector<32x32xf32>
    %426 = arith.mulf %425, %419 : vector<32x32xf32>
    %427 = arith.addf %409, %426 : vector<32x32xf32>
    %c2_263 = arith.constant 2 : index
    %c23_264 = arith.constant 23 : index
    %428 = memref.load %arg2[%c2_263, %c23_264] : memref<4x36xf32, #tpu.memory_space<smem>>
    %429 = vector.broadcast %428 : f32 to vector<32x32xf32>
    %430 = arith.mulf %429, %419 : vector<32x32xf32>
    %431 = arith.addf %413, %430 : vector<32x32xf32>
    %c3_265 = arith.constant 3 : index
    %c23_266 = arith.constant 23 : index
    %432 = memref.load %arg2[%c3_265, %c23_266] : memref<4x36xf32, #tpu.memory_space<smem>>
    %433 = vector.broadcast %432 : f32 to vector<32x32xf32>
    %434 = arith.mulf %433, %419 : vector<32x32xf32>
    %435 = arith.addf %417, %434 : vector<32x32xf32>
    %c0_267 = arith.constant 0 : index
    %c2_268 = arith.constant 2 : index
    %c2_269 = arith.constant 2 : index
    %c0_270 = arith.constant 0 : index
    %436 = vector.load %arg1[%c0_267, %c2_268, %c2_269, %c0_270] : memref<1x4x34x34xf32, #tpu.memory_space<vmem>>, vector<1x1x32x32xf32>
    %437 = vector.shape_cast %436 : vector<1x1x32x32xf32> to vector<32x32xf32>
    %c0_271 = arith.constant 0 : index
    %c24 = arith.constant 24 : index
    %438 = memref.load %arg2[%c0_271, %c24] : memref<4x36xf32, #tpu.memory_space<smem>>
    %439 = vector.broadcast %438 : f32 to vector<32x32xf32>
    %440 = arith.mulf %439, %437 : vector<32x32xf32>
    %441 = arith.addf %423, %440 : vector<32x32xf32>
    %c1_272 = arith.constant 1 : index
    %c24_273 = arith.constant 24 : index
    %442 = memref.load %arg2[%c1_272, %c24_273] : memref<4x36xf32, #tpu.memory_space<smem>>
    %443 = vector.broadcast %442 : f32 to vector<32x32xf32>
    %444 = arith.mulf %443, %437 : vector<32x32xf32>
    %445 = arith.addf %427, %444 : vector<32x32xf32>
    %c2_274 = arith.constant 2 : index
    %c24_275 = arith.constant 24 : index
    %446 = memref.load %arg2[%c2_274, %c24_275] : memref<4x36xf32, #tpu.memory_space<smem>>
    %447 = vector.broadcast %446 : f32 to vector<32x32xf32>
    %448 = arith.mulf %447, %437 : vector<32x32xf32>
    %449 = arith.addf %431, %448 : vector<32x32xf32>
    %c3_276 = arith.constant 3 : index
    %c24_277 = arith.constant 24 : index
    %450 = memref.load %arg2[%c3_276, %c24_277] : memref<4x36xf32, #tpu.memory_space<smem>>
    %451 = vector.broadcast %450 : f32 to vector<32x32xf32>
    %452 = arith.mulf %451, %437 : vector<32x32xf32>
    %453 = arith.addf %435, %452 : vector<32x32xf32>
    %c0_278 = arith.constant 0 : index
    %c2_279 = arith.constant 2 : index
    %c2_280 = arith.constant 2 : index
    %c1_281 = arith.constant 1 : index
    %454 = vector.load %arg1[%c0_278, %c2_279, %c2_280, %c1_281] : memref<1x4x34x34xf32, #tpu.memory_space<vmem>>, vector<1x1x32x32xf32>
    %455 = vector.shape_cast %454 : vector<1x1x32x32xf32> to vector<32x32xf32>
    %c0_282 = arith.constant 0 : index
    %c25 = arith.constant 25 : index
    %456 = memref.load %arg2[%c0_282, %c25] : memref<4x36xf32, #tpu.memory_space<smem>>
    %457 = vector.broadcast %456 : f32 to vector<32x32xf32>
    %458 = arith.mulf %457, %455 : vector<32x32xf32>
    %459 = arith.addf %441, %458 : vector<32x32xf32>
    %c1_283 = arith.constant 1 : index
    %c25_284 = arith.constant 25 : index
    %460 = memref.load %arg2[%c1_283, %c25_284] : memref<4x36xf32, #tpu.memory_space<smem>>
    %461 = vector.broadcast %460 : f32 to vector<32x32xf32>
    %462 = arith.mulf %461, %455 : vector<32x32xf32>
    %463 = arith.addf %445, %462 : vector<32x32xf32>
    %c2_285 = arith.constant 2 : index
    %c25_286 = arith.constant 25 : index
    %464 = memref.load %arg2[%c2_285, %c25_286] : memref<4x36xf32, #tpu.memory_space<smem>>
    %465 = vector.broadcast %464 : f32 to vector<32x32xf32>
    %466 = arith.mulf %465, %455 : vector<32x32xf32>
    %467 = arith.addf %449, %466 : vector<32x32xf32>
    %c3_287 = arith.constant 3 : index
    %c25_288 = arith.constant 25 : index
    %468 = memref.load %arg2[%c3_287, %c25_288] : memref<4x36xf32, #tpu.memory_space<smem>>
    %469 = vector.broadcast %468 : f32 to vector<32x32xf32>
    %470 = arith.mulf %469, %455 : vector<32x32xf32>
    %471 = arith.addf %453, %470 : vector<32x32xf32>
    %c0_289 = arith.constant 0 : index
    %c2_290 = arith.constant 2 : index
    %c2_291 = arith.constant 2 : index
    %c2_292 = arith.constant 2 : index
    %472 = vector.load %arg1[%c0_289, %c2_290, %c2_291, %c2_292] : memref<1x4x34x34xf32, #tpu.memory_space<vmem>>, vector<1x1x32x32xf32>
    %473 = vector.shape_cast %472 : vector<1x1x32x32xf32> to vector<32x32xf32>
    %c0_293 = arith.constant 0 : index
    %c26 = arith.constant 26 : index
    %474 = memref.load %arg2[%c0_293, %c26] : memref<4x36xf32, #tpu.memory_space<smem>>
    %475 = vector.broadcast %474 : f32 to vector<32x32xf32>
    %476 = arith.mulf %475, %473 : vector<32x32xf32>
    %477 = arith.addf %459, %476 : vector<32x32xf32>
    %c1_294 = arith.constant 1 : index
    %c26_295 = arith.constant 26 : index
    %478 = memref.load %arg2[%c1_294, %c26_295] : memref<4x36xf32, #tpu.memory_space<smem>>
    %479 = vector.broadcast %478 : f32 to vector<32x32xf32>
    %480 = arith.mulf %479, %473 : vector<32x32xf32>
    %481 = arith.addf %463, %480 : vector<32x32xf32>
    %c2_296 = arith.constant 2 : index
    %c26_297 = arith.constant 26 : index
    %482 = memref.load %arg2[%c2_296, %c26_297] : memref<4x36xf32, #tpu.memory_space<smem>>
    %483 = vector.broadcast %482 : f32 to vector<32x32xf32>
    %484 = arith.mulf %483, %473 : vector<32x32xf32>
    %485 = arith.addf %467, %484 : vector<32x32xf32>
    %c3_298 = arith.constant 3 : index
    %c26_299 = arith.constant 26 : index
    %486 = memref.load %arg2[%c3_298, %c26_299] : memref<4x36xf32, #tpu.memory_space<smem>>
    %487 = vector.broadcast %486 : f32 to vector<32x32xf32>
    %488 = arith.mulf %487, %473 : vector<32x32xf32>
    %489 = arith.addf %471, %488 : vector<32x32xf32>
    %c0_300 = arith.constant 0 : index
    %c3_301 = arith.constant 3 : index
    %c0_302 = arith.constant 0 : index
    %c0_303 = arith.constant 0 : index
    %490 = vector.load %arg1[%c0_300, %c3_301, %c0_302, %c0_303] : memref<1x4x34x34xf32, #tpu.memory_space<vmem>>, vector<1x1x32x32xf32>
    %491 = vector.shape_cast %490 : vector<1x1x32x32xf32> to vector<32x32xf32>
    %c0_304 = arith.constant 0 : index
    %c27 = arith.constant 27 : index
    %492 = memref.load %arg2[%c0_304, %c27] : memref<4x36xf32, #tpu.memory_space<smem>>
    %493 = vector.broadcast %492 : f32 to vector<32x32xf32>
    %494 = arith.mulf %493, %491 : vector<32x32xf32>
    %495 = arith.addf %477, %494 : vector<32x32xf32>
    %c1_305 = arith.constant 1 : index
    %c27_306 = arith.constant 27 : index
    %496 = memref.load %arg2[%c1_305, %c27_306] : memref<4x36xf32, #tpu.memory_space<smem>>
    %497 = vector.broadcast %496 : f32 to vector<32x32xf32>
    %498 = arith.mulf %497, %491 : vector<32x32xf32>
    %499 = arith.addf %481, %498 : vector<32x32xf32>
    %c2_307 = arith.constant 2 : index
    %c27_308 = arith.constant 27 : index
    %500 = memref.load %arg2[%c2_307, %c27_308] : memref<4x36xf32, #tpu.memory_space<smem>>
    %501 = vector.broadcast %500 : f32 to vector<32x32xf32>
    %502 = arith.mulf %501, %491 : vector<32x32xf32>
    %503 = arith.addf %485, %502 : vector<32x32xf32>
    %c3_309 = arith.constant 3 : index
    %c27_310 = arith.constant 27 : index
    %504 = memref.load %arg2[%c3_309, %c27_310] : memref<4x36xf32, #tpu.memory_space<smem>>
    %505 = vector.broadcast %504 : f32 to vector<32x32xf32>
    %506 = arith.mulf %505, %491 : vector<32x32xf32>
    %507 = arith.addf %489, %506 : vector<32x32xf32>
    %c0_311 = arith.constant 0 : index
    %c3_312 = arith.constant 3 : index
    %c0_313 = arith.constant 0 : index
    %c1_314 = arith.constant 1 : index
    %508 = vector.load %arg1[%c0_311, %c3_312, %c0_313, %c1_314] : memref<1x4x34x34xf32, #tpu.memory_space<vmem>>, vector<1x1x32x32xf32>
    %509 = vector.shape_cast %508 : vector<1x1x32x32xf32> to vector<32x32xf32>
    %c0_315 = arith.constant 0 : index
    %c28 = arith.constant 28 : index
    %510 = memref.load %arg2[%c0_315, %c28] : memref<4x36xf32, #tpu.memory_space<smem>>
    %511 = vector.broadcast %510 : f32 to vector<32x32xf32>
    %512 = arith.mulf %511, %509 : vector<32x32xf32>
    %513 = arith.addf %495, %512 : vector<32x32xf32>
    %c1_316 = arith.constant 1 : index
    %c28_317 = arith.constant 28 : index
    %514 = memref.load %arg2[%c1_316, %c28_317] : memref<4x36xf32, #tpu.memory_space<smem>>
    %515 = vector.broadcast %514 : f32 to vector<32x32xf32>
    %516 = arith.mulf %515, %509 : vector<32x32xf32>
    %517 = arith.addf %499, %516 : vector<32x32xf32>
    %c2_318 = arith.constant 2 : index
    %c28_319 = arith.constant 28 : index
    %518 = memref.load %arg2[%c2_318, %c28_319] : memref<4x36xf32, #tpu.memory_space<smem>>
    %519 = vector.broadcast %518 : f32 to vector<32x32xf32>
    %520 = arith.mulf %519, %509 : vector<32x32xf32>
    %521 = arith.addf %503, %520 : vector<32x32xf32>
    %c3_320 = arith.constant 3 : index
    %c28_321 = arith.constant 28 : index
    %522 = memref.load %arg2[%c3_320, %c28_321] : memref<4x36xf32, #tpu.memory_space<smem>>
    %523 = vector.broadcast %522 : f32 to vector<32x32xf32>
    %524 = arith.mulf %523, %509 : vector<32x32xf32>
    %525 = arith.addf %507, %524 : vector<32x32xf32>
    %c0_322 = arith.constant 0 : index
    %c3_323 = arith.constant 3 : index
    %c0_324 = arith.constant 0 : index
    %c2_325 = arith.constant 2 : index
    %526 = vector.load %arg1[%c0_322, %c3_323, %c0_324, %c2_325] : memref<1x4x34x34xf32, #tpu.memory_space<vmem>>, vector<1x1x32x32xf32>
    %527 = vector.shape_cast %526 : vector<1x1x32x32xf32> to vector<32x32xf32>
    %c0_326 = arith.constant 0 : index
    %c29 = arith.constant 29 : index
    %528 = memref.load %arg2[%c0_326, %c29] : memref<4x36xf32, #tpu.memory_space<smem>>
    %529 = vector.broadcast %528 : f32 to vector<32x32xf32>
    %530 = arith.mulf %529, %527 : vector<32x32xf32>
    %531 = arith.addf %513, %530 : vector<32x32xf32>
    %c1_327 = arith.constant 1 : index
    %c29_328 = arith.constant 29 : index
    %532 = memref.load %arg2[%c1_327, %c29_328] : memref<4x36xf32, #tpu.memory_space<smem>>
    %533 = vector.broadcast %532 : f32 to vector<32x32xf32>
    %534 = arith.mulf %533, %527 : vector<32x32xf32>
    %535 = arith.addf %517, %534 : vector<32x32xf32>
    %c2_329 = arith.constant 2 : index
    %c29_330 = arith.constant 29 : index
    %536 = memref.load %arg2[%c2_329, %c29_330] : memref<4x36xf32, #tpu.memory_space<smem>>
    %537 = vector.broadcast %536 : f32 to vector<32x32xf32>
    %538 = arith.mulf %537, %527 : vector<32x32xf32>
    %539 = arith.addf %521, %538 : vector<32x32xf32>
    %c3_331 = arith.constant 3 : index
    %c29_332 = arith.constant 29 : index
    %540 = memref.load %arg2[%c3_331, %c29_332] : memref<4x36xf32, #tpu.memory_space<smem>>
    %541 = vector.broadcast %540 : f32 to vector<32x32xf32>
    %542 = arith.mulf %541, %527 : vector<32x32xf32>
    %543 = arith.addf %525, %542 : vector<32x32xf32>
    %c0_333 = arith.constant 0 : index
    %c3_334 = arith.constant 3 : index
    %c1_335 = arith.constant 1 : index
    %c0_336 = arith.constant 0 : index
    %544 = vector.load %arg1[%c0_333, %c3_334, %c1_335, %c0_336] : memref<1x4x34x34xf32, #tpu.memory_space<vmem>>, vector<1x1x32x32xf32>
    %545 = vector.shape_cast %544 : vector<1x1x32x32xf32> to vector<32x32xf32>
    %c0_337 = arith.constant 0 : index
    %c30 = arith.constant 30 : index
    %546 = memref.load %arg2[%c0_337, %c30] : memref<4x36xf32, #tpu.memory_space<smem>>
    %547 = vector.broadcast %546 : f32 to vector<32x32xf32>
    %548 = arith.mulf %547, %545 : vector<32x32xf32>
    %549 = arith.addf %531, %548 : vector<32x32xf32>
    %c1_338 = arith.constant 1 : index
    %c30_339 = arith.constant 30 : index
    %550 = memref.load %arg2[%c1_338, %c30_339] : memref<4x36xf32, #tpu.memory_space<smem>>
    %551 = vector.broadcast %550 : f32 to vector<32x32xf32>
    %552 = arith.mulf %551, %545 : vector<32x32xf32>
    %553 = arith.addf %535, %552 : vector<32x32xf32>
    %c2_340 = arith.constant 2 : index
    %c30_341 = arith.constant 30 : index
    %554 = memref.load %arg2[%c2_340, %c30_341] : memref<4x36xf32, #tpu.memory_space<smem>>
    %555 = vector.broadcast %554 : f32 to vector<32x32xf32>
    %556 = arith.mulf %555, %545 : vector<32x32xf32>
    %557 = arith.addf %539, %556 : vector<32x32xf32>
    %c3_342 = arith.constant 3 : index
    %c30_343 = arith.constant 30 : index
    %558 = memref.load %arg2[%c3_342, %c30_343] : memref<4x36xf32, #tpu.memory_space<smem>>
    %559 = vector.broadcast %558 : f32 to vector<32x32xf32>
    %560 = arith.mulf %559, %545 : vector<32x32xf32>
    %561 = arith.addf %543, %560 : vector<32x32xf32>
    %c0_344 = arith.constant 0 : index
    %c3_345 = arith.constant 3 : index
    %c1_346 = arith.constant 1 : index
    %c1_347 = arith.constant 1 : index
    %562 = vector.load %arg1[%c0_344, %c3_345, %c1_346, %c1_347] : memref<1x4x34x34xf32, #tpu.memory_space<vmem>>, vector<1x1x32x32xf32>
    %563 = vector.shape_cast %562 : vector<1x1x32x32xf32> to vector<32x32xf32>
    %c0_348 = arith.constant 0 : index
    %c31 = arith.constant 31 : index
    %564 = memref.load %arg2[%c0_348, %c31] : memref<4x36xf32, #tpu.memory_space<smem>>
    %565 = vector.broadcast %564 : f32 to vector<32x32xf32>
    %566 = arith.mulf %565, %563 : vector<32x32xf32>
    %567 = arith.addf %549, %566 : vector<32x32xf32>
    %c1_349 = arith.constant 1 : index
    %c31_350 = arith.constant 31 : index
    %568 = memref.load %arg2[%c1_349, %c31_350] : memref<4x36xf32, #tpu.memory_space<smem>>
    %569 = vector.broadcast %568 : f32 to vector<32x32xf32>
    %570 = arith.mulf %569, %563 : vector<32x32xf32>
    %571 = arith.addf %553, %570 : vector<32x32xf32>
    %c2_351 = arith.constant 2 : index
    %c31_352 = arith.constant 31 : index
    %572 = memref.load %arg2[%c2_351, %c31_352] : memref<4x36xf32, #tpu.memory_space<smem>>
    %573 = vector.broadcast %572 : f32 to vector<32x32xf32>
    %574 = arith.mulf %573, %563 : vector<32x32xf32>
    %575 = arith.addf %557, %574 : vector<32x32xf32>
    %c3_353 = arith.constant 3 : index
    %c31_354 = arith.constant 31 : index
    %576 = memref.load %arg2[%c3_353, %c31_354] : memref<4x36xf32, #tpu.memory_space<smem>>
    %577 = vector.broadcast %576 : f32 to vector<32x32xf32>
    %578 = arith.mulf %577, %563 : vector<32x32xf32>
    %579 = arith.addf %561, %578 : vector<32x32xf32>
    %c0_355 = arith.constant 0 : index
    %c3_356 = arith.constant 3 : index
    %c1_357 = arith.constant 1 : index
    %c2_358 = arith.constant 2 : index
    %580 = vector.load %arg1[%c0_355, %c3_356, %c1_357, %c2_358] : memref<1x4x34x34xf32, #tpu.memory_space<vmem>>, vector<1x1x32x32xf32>
    %581 = vector.shape_cast %580 : vector<1x1x32x32xf32> to vector<32x32xf32>
    %c0_359 = arith.constant 0 : index
    %c32 = arith.constant 32 : index
    %582 = memref.load %arg2[%c0_359, %c32] : memref<4x36xf32, #tpu.memory_space<smem>>
    %583 = vector.broadcast %582 : f32 to vector<32x32xf32>
    %584 = arith.mulf %583, %581 : vector<32x32xf32>
    %585 = arith.addf %567, %584 : vector<32x32xf32>
    %c1_360 = arith.constant 1 : index
    %c32_361 = arith.constant 32 : index
    %586 = memref.load %arg2[%c1_360, %c32_361] : memref<4x36xf32, #tpu.memory_space<smem>>
    %587 = vector.broadcast %586 : f32 to vector<32x32xf32>
    %588 = arith.mulf %587, %581 : vector<32x32xf32>
    %589 = arith.addf %571, %588 : vector<32x32xf32>
    %c2_362 = arith.constant 2 : index
    %c32_363 = arith.constant 32 : index
    %590 = memref.load %arg2[%c2_362, %c32_363] : memref<4x36xf32, #tpu.memory_space<smem>>
    %591 = vector.broadcast %590 : f32 to vector<32x32xf32>
    %592 = arith.mulf %591, %581 : vector<32x32xf32>
    %593 = arith.addf %575, %592 : vector<32x32xf32>
    %c3_364 = arith.constant 3 : index
    %c32_365 = arith.constant 32 : index
    %594 = memref.load %arg2[%c3_364, %c32_365] : memref<4x36xf32, #tpu.memory_space<smem>>
    %595 = vector.broadcast %594 : f32 to vector<32x32xf32>
    %596 = arith.mulf %595, %581 : vector<32x32xf32>
    %597 = arith.addf %579, %596 : vector<32x32xf32>
    %c0_366 = arith.constant 0 : index
    %c3_367 = arith.constant 3 : index
    %c2_368 = arith.constant 2 : index
    %c0_369 = arith.constant 0 : index
    %598 = vector.load %arg1[%c0_366, %c3_367, %c2_368, %c0_369] : memref<1x4x34x34xf32, #tpu.memory_space<vmem>>, vector<1x1x32x32xf32>
    %599 = vector.shape_cast %598 : vector<1x1x32x32xf32> to vector<32x32xf32>
    %c0_370 = arith.constant 0 : index
    %c33 = arith.constant 33 : index
    %600 = memref.load %arg2[%c0_370, %c33] : memref<4x36xf32, #tpu.memory_space<smem>>
    %601 = vector.broadcast %600 : f32 to vector<32x32xf32>
    %602 = arith.mulf %601, %599 : vector<32x32xf32>
    %603 = arith.addf %585, %602 : vector<32x32xf32>
    %c1_371 = arith.constant 1 : index
    %c33_372 = arith.constant 33 : index
    %604 = memref.load %arg2[%c1_371, %c33_372] : memref<4x36xf32, #tpu.memory_space<smem>>
    %605 = vector.broadcast %604 : f32 to vector<32x32xf32>
    %606 = arith.mulf %605, %599 : vector<32x32xf32>
    %607 = arith.addf %589, %606 : vector<32x32xf32>
    %c2_373 = arith.constant 2 : index
    %c33_374 = arith.constant 33 : index
    %608 = memref.load %arg2[%c2_373, %c33_374] : memref<4x36xf32, #tpu.memory_space<smem>>
    %609 = vector.broadcast %608 : f32 to vector<32x32xf32>
    %610 = arith.mulf %609, %599 : vector<32x32xf32>
    %611 = arith.addf %593, %610 : vector<32x32xf32>
    %c3_375 = arith.constant 3 : index
    %c33_376 = arith.constant 33 : index
    %612 = memref.load %arg2[%c3_375, %c33_376] : memref<4x36xf32, #tpu.memory_space<smem>>
    %613 = vector.broadcast %612 : f32 to vector<32x32xf32>
    %614 = arith.mulf %613, %599 : vector<32x32xf32>
    %615 = arith.addf %597, %614 : vector<32x32xf32>
    %c0_377 = arith.constant 0 : index
    %c3_378 = arith.constant 3 : index
    %c2_379 = arith.constant 2 : index
    %c1_380 = arith.constant 1 : index
    %616 = vector.load %arg1[%c0_377, %c3_378, %c2_379, %c1_380] : memref<1x4x34x34xf32, #tpu.memory_space<vmem>>, vector<1x1x32x32xf32>
    %617 = vector.shape_cast %616 : vector<1x1x32x32xf32> to vector<32x32xf32>
    %c0_381 = arith.constant 0 : index
    %c34 = arith.constant 34 : index
    %618 = memref.load %arg2[%c0_381, %c34] : memref<4x36xf32, #tpu.memory_space<smem>>
    %619 = vector.broadcast %618 : f32 to vector<32x32xf32>
    %620 = arith.mulf %619, %617 : vector<32x32xf32>
    %621 = arith.addf %603, %620 : vector<32x32xf32>
    %c1_382 = arith.constant 1 : index
    %c34_383 = arith.constant 34 : index
    %622 = memref.load %arg2[%c1_382, %c34_383] : memref<4x36xf32, #tpu.memory_space<smem>>
    %623 = vector.broadcast %622 : f32 to vector<32x32xf32>
    %624 = arith.mulf %623, %617 : vector<32x32xf32>
    %625 = arith.addf %607, %624 : vector<32x32xf32>
    %c2_384 = arith.constant 2 : index
    %c34_385 = arith.constant 34 : index
    %626 = memref.load %arg2[%c2_384, %c34_385] : memref<4x36xf32, #tpu.memory_space<smem>>
    %627 = vector.broadcast %626 : f32 to vector<32x32xf32>
    %628 = arith.mulf %627, %617 : vector<32x32xf32>
    %629 = arith.addf %611, %628 : vector<32x32xf32>
    %c3_386 = arith.constant 3 : index
    %c34_387 = arith.constant 34 : index
    %630 = memref.load %arg2[%c3_386, %c34_387] : memref<4x36xf32, #tpu.memory_space<smem>>
    %631 = vector.broadcast %630 : f32 to vector<32x32xf32>
    %632 = arith.mulf %631, %617 : vector<32x32xf32>
    %633 = arith.addf %615, %632 : vector<32x32xf32>
    %c0_388 = arith.constant 0 : index
    %c3_389 = arith.constant 3 : index
    %c2_390 = arith.constant 2 : index
    %c2_391 = arith.constant 2 : index
    %634 = vector.load %arg1[%c0_388, %c3_389, %c2_390, %c2_391] : memref<1x4x34x34xf32, #tpu.memory_space<vmem>>, vector<1x1x32x32xf32>
    %635 = vector.shape_cast %634 : vector<1x1x32x32xf32> to vector<32x32xf32>
    %c0_392 = arith.constant 0 : index
    %c35 = arith.constant 35 : index
    %636 = memref.load %arg2[%c0_392, %c35] : memref<4x36xf32, #tpu.memory_space<smem>>
    %637 = vector.broadcast %636 : f32 to vector<32x32xf32>
    %638 = arith.mulf %637, %635 : vector<32x32xf32>
    %639 = arith.addf %621, %638 : vector<32x32xf32>
    %c1_393 = arith.constant 1 : index
    %c35_394 = arith.constant 35 : index
    %640 = memref.load %arg2[%c1_393, %c35_394] : memref<4x36xf32, #tpu.memory_space<smem>>
    %641 = vector.broadcast %640 : f32 to vector<32x32xf32>
    %642 = arith.mulf %641, %635 : vector<32x32xf32>
    %643 = arith.addf %625, %642 : vector<32x32xf32>
    %c2_395 = arith.constant 2 : index
    %c35_396 = arith.constant 35 : index
    %644 = memref.load %arg2[%c2_395, %c35_396] : memref<4x36xf32, #tpu.memory_space<smem>>
    %645 = vector.broadcast %644 : f32 to vector<32x32xf32>
    %646 = arith.mulf %645, %635 : vector<32x32xf32>
    %647 = arith.addf %629, %646 : vector<32x32xf32>
    %c3_397 = arith.constant 3 : index
    %c35_398 = arith.constant 35 : index
    %648 = memref.load %arg2[%c3_397, %c35_398] : memref<4x36xf32, #tpu.memory_space<smem>>
    %649 = vector.broadcast %648 : f32 to vector<32x32xf32>
    %650 = arith.mulf %649, %635 : vector<32x32xf32>
    %651 = arith.addf %633, %650 : vector<32x32xf32>
    %c0_399 = arith.constant 0 : index
    %652 = memref.load %arg3[%c0_399] : memref<4xf32, #tpu.memory_space<smem>>
    %653 = vector.broadcast %652 : f32 to vector<32x32xf32>
    %654 = arith.addf %639, %653 : vector<32x32xf32>
    %655 = math.absf %654 : vector<32x32xf32>
    %cst_400 = arith.constant 0.000000e+00 : f32
    %656 = vector.broadcast %cst_400 : f32 to vector<32x32xf32>
    %657 = arith.subf %656, %655 : vector<32x32xf32>
    %658 = math.exp %657 : vector<32x32xf32>
    %cst_401 = arith.constant 0.000000e+00 : f32
    %659 = vector.broadcast %cst_401 : f32 to vector<32x32xf32>
    %660 = arith.cmpf oge, %654, %659 : vector<32x32xf32>
    %cst_402 = arith.constant 1.000000e+00 : f32
    %661 = vector.broadcast %cst_402 : f32 to vector<32x32xf32>
    %662 = arith.addf %661, %658 : vector<32x32xf32>
    %cst_403 = arith.constant 1.000000e+00 : f32
    %663 = vector.broadcast %cst_403 : f32 to vector<32x32xf32>
    %664 = arith.divf %663, %662 : vector<32x32xf32>
    %cst_404 = arith.constant 1.000000e+00 : f32
    %665 = vector.broadcast %cst_404 : f32 to vector<32x32xf32>
    %666 = arith.addf %665, %658 : vector<32x32xf32>
    %667 = arith.divf %658, %666 : vector<32x32xf32>
    %668 = arith.select %660, %664, %667 : vector<32x32xi1>, vector<32x32xf32>
    %c0_405 = arith.constant 0 : index
    %c0_406 = arith.constant 0 : index
    %c0_407 = arith.constant 0 : index
    %c0_408 = arith.constant 0 : index
    %669 = vector.load %arg4[%c0_405, %c0_406, %c0_407, %c0_408] : memref<1x4x32x32xf32, #tpu.memory_space<vmem>>, vector<1x1x32x32xf32>
    %670 = vector.shape_cast %669 : vector<1x1x32x32xf32> to vector<32x32xf32>
    %671 = vector.shape_cast %668 : vector<32x32xf32> to vector<1x1x32x32xf32>
    tpu.vector_store %arg4[%c0_405, %c0_406, %c0_407, %c0_408], %671 {strides = array<i32>} : memref<1x4x32x32xf32, #tpu.memory_space<vmem>>, vector<1x1x32x32xf32>,
    %c1_409 = arith.constant 1 : index
    %672 = memref.load %arg3[%c1_409] : memref<4xf32, #tpu.memory_space<smem>>
    %673 = vector.broadcast %672 : f32 to vector<32x32xf32>
    %674 = arith.addf %643, %673 : vector<32x32xf32>
    %675 = math.absf %674 : vector<32x32xf32>
    %cst_410 = arith.constant 0.000000e+00 : f32
    %676 = vector.broadcast %cst_410 : f32 to vector<32x32xf32>
    %677 = arith.subf %676, %675 : vector<32x32xf32>
    %678 = math.exp %677 : vector<32x32xf32>
    %cst_411 = arith.constant 0.000000e+00 : f32
    %679 = vector.broadcast %cst_411 : f32 to vector<32x32xf32>
    %680 = arith.cmpf oge, %674, %679 : vector<32x32xf32>
    %cst_412 = arith.constant 1.000000e+00 : f32
    %681 = vector.broadcast %cst_412 : f32 to vector<32x32xf32>
    %682 = arith.addf %681, %678 : vector<32x32xf32>
    %cst_413 = arith.constant 1.000000e+00 : f32
    %683 = vector.broadcast %cst_413 : f32 to vector<32x32xf32>
    %684 = arith.divf %683, %682 : vector<32x32xf32>
    %cst_414 = arith.constant 1.000000e+00 : f32
    %685 = vector.broadcast %cst_414 : f32 to vector<32x32xf32>
    %686 = arith.addf %685, %678 : vector<32x32xf32>
    %687 = arith.divf %678, %686 : vector<32x32xf32>
    %688 = arith.select %680, %684, %687 : vector<32x32xi1>, vector<32x32xf32>
    %c0_415 = arith.constant 0 : index
    %c1_416 = arith.constant 1 : index
    %c0_417 = arith.constant 0 : index
    %c0_418 = arith.constant 0 : index
    %689 = vector.load %arg4[%c0_415, %c1_416, %c0_417, %c0_418] : memref<1x4x32x32xf32, #tpu.memory_space<vmem>>, vector<1x1x32x32xf32>
    %690 = vector.shape_cast %689 : vector<1x1x32x32xf32> to vector<32x32xf32>
    %691 = vector.shape_cast %688 : vector<32x32xf32> to vector<1x1x32x32xf32>
    tpu.vector_store %arg4[%c0_415, %c1_416, %c0_417, %c0_418], %691 {strides = array<i32>} : memref<1x4x32x32xf32, #tpu.memory_space<vmem>>, vector<1x1x32x32xf32>,
    %c2_419 = arith.constant 2 : index
    %692 = memref.load %arg3[%c2_419] : memref<4xf32, #tpu.memory_space<smem>>
    %693 = vector.broadcast %692 : f32 to vector<32x32xf32>
    %694 = arith.addf %647, %693 : vector<32x32xf32>
    %695 = math.absf %694 : vector<32x32xf32>
    %cst_420 = arith.constant 0.000000e+00 : f32
    %696 = vector.broadcast %cst_420 : f32 to vector<32x32xf32>
    %697 = arith.subf %696, %695 : vector<32x32xf32>
    %698 = math.exp %697 : vector<32x32xf32>
    %cst_421 = arith.constant 0.000000e+00 : f32
    %699 = vector.broadcast %cst_421 : f32 to vector<32x32xf32>
    %700 = arith.cmpf oge, %694, %699 : vector<32x32xf32>
    %cst_422 = arith.constant 1.000000e+00 : f32
    %701 = vector.broadcast %cst_422 : f32 to vector<32x32xf32>
    %702 = arith.addf %701, %698 : vector<32x32xf32>
    %cst_423 = arith.constant 1.000000e+00 : f32
    %703 = vector.broadcast %cst_423 : f32 to vector<32x32xf32>
    %704 = arith.divf %703, %702 : vector<32x32xf32>
    %cst_424 = arith.constant 1.000000e+00 : f32
    %705 = vector.broadcast %cst_424 : f32 to vector<32x32xf32>
    %706 = arith.addf %705, %698 : vector<32x32xf32>
    %707 = arith.divf %698, %706 : vector<32x32xf32>
    %708 = arith.select %700, %704, %707 : vector<32x32xi1>, vector<32x32xf32>
    %c0_425 = arith.constant 0 : index
    %c2_426 = arith.constant 2 : index
    %c0_427 = arith.constant 0 : index
    %c0_428 = arith.constant 0 : index
    %709 = vector.load %arg4[%c0_425, %c2_426, %c0_427, %c0_428] : memref<1x4x32x32xf32, #tpu.memory_space<vmem>>, vector<1x1x32x32xf32>
    %710 = vector.shape_cast %709 : vector<1x1x32x32xf32> to vector<32x32xf32>
    %711 = vector.shape_cast %708 : vector<32x32xf32> to vector<1x1x32x32xf32>
    tpu.vector_store %arg4[%c0_425, %c2_426, %c0_427, %c0_428], %711 {strides = array<i32>} : memref<1x4x32x32xf32, #tpu.memory_space<vmem>>, vector<1x1x32x32xf32>,
    %c3_429 = arith.constant 3 : index
    %712 = memref.load %arg3[%c3_429] : memref<4xf32, #tpu.memory_space<smem>>
    %713 = vector.broadcast %712 : f32 to vector<32x32xf32>
    %714 = arith.addf %651, %713 : vector<32x32xf32>
    %715 = math.absf %714 : vector<32x32xf32>
    %cst_430 = arith.constant 0.000000e+00 : f32
    %716 = vector.broadcast %cst_430 : f32 to vector<32x32xf32>
    %717 = arith.subf %716, %715 : vector<32x32xf32>
    %718 = math.exp %717 : vector<32x32xf32>
    %cst_431 = arith.constant 0.000000e+00 : f32
    %719 = vector.broadcast %cst_431 : f32 to vector<32x32xf32>
    %720 = arith.cmpf oge, %714, %719 : vector<32x32xf32>
    %cst_432 = arith.constant 1.000000e+00 : f32
    %721 = vector.broadcast %cst_432 : f32 to vector<32x32xf32>
    %722 = arith.addf %721, %718 : vector<32x32xf32>
    %cst_433 = arith.constant 1.000000e+00 : f32
    %723 = vector.broadcast %cst_433 : f32 to vector<32x32xf32>
    %724 = arith.divf %723, %722 : vector<32x32xf32>
    %cst_434 = arith.constant 1.000000e+00 : f32
    %725 = vector.broadcast %cst_434 : f32 to vector<32x32xf32>
    %726 = arith.addf %725, %718 : vector<32x32xf32>
    %727 = arith.divf %718, %726 : vector<32x32xf32>
    %728 = arith.select %720, %724, %727 : vector<32x32xi1>, vector<32x32xf32>
    %c0_435 = arith.constant 0 : index
    %c3_436 = arith.constant 3 : index
    %c0_437 = arith.constant 0 : index
    %c0_438 = arith.constant 0 : index
    %729 = vector.load %arg4[%c0_435, %c3_436, %c0_437, %c0_438] : memref<1x4x32x32xf32, #tpu.memory_space<vmem>>, vector<1x1x32x32xf32>
    %730 = vector.shape_cast %729 : vector<1x1x32x32xf32> to vector<32x32xf32>
    %731 = vector.shape_cast %728 : vector<32x32xf32> to vector<1x1x32x32xf32>
    tpu.vector_store %arg4[%c0_435, %c3_436, %c0_437, %c0_438], %731 {strides = array<i32>} : memref<1x4x32x32xf32, #tpu.memory_space<vmem>>, vector<1x1x32x32xf32>,
    return
  }
  func.func @transform_0(%arg0: i32) -> (i32, i32, i32, i32) {
    %c0_i32 = arith.constant 0 : i32
    %c0_i32_0 = arith.constant 0 : i32
    %c0_i32_1 = arith.constant 0 : i32
    %c0_i32_2 = arith.constant 0 : i32
    return %arg0, %c0_i32, %c0_i32_0, %c0_i32_1 : i32, i32, i32, i32
  }
  func.func @transform_1(%arg0: i32) -> (i32, i32) {
    %c0_i32 = arith.constant 0 : i32
    %c0_i32_0 = arith.constant 0 : i32
    %c0_i32_1 = arith.constant 0 : i32
    return %c0_i32, %c0_i32_0 : i32, i32
  }
  func.func @transform_2(%arg0: i32) -> i32 {
    %c0_i32 = arith.constant 0 : i32
    %c0_i32_0 = arith.constant 0 : i32
    return %c0_i32 : i32
  }
  func.func @transform_3(%arg0: i32) -> (i32, i32, i32, i32) {
    %c0_i32 = arith.constant 0 : i32
    %c0_i32_0 = arith.constant 0 : i32
    %c0_i32_1 = arith.constant 0 : i32
    %c0_i32_2 = arith.constant 0 : i32
    return %arg0, %c0_i32, %c0_i32_0, %c0_i32_1 : i32, i32, i32, i32
  }
}

</mosaic_0001>

<bundles_post_ra>
// kernel: vitae_forward.13
= control target key start
LH: loop header
LB: loop body
LE: loop exit
PB: predicated region body
PF: predicated region fallthrough
CT: control target
= control target key end

     0   :  { %s688_s0 = inlined_call_operand.vmem [shape: f32[32,256], index: 0, kind: input, shape index: {}]   ;;  %s689_s3 = inlined_call_operand.vmem [shape: f32[256,128], index: 3, kind: input, shape index: {}]   ;;  %s690_s1 = inlined_call_operand.vmem [shape: f32[1,256], index: 1, kind: input, shape index: {}]   ;;  %s691_s2 = inlined_call_operand.vmem [shape: f32[1,256], index: 2, kind: input, shape index: {}]   ;;  %s692_s4 = inlined_call_operand.vmem [shape: f32[1,128], index: 4, kind: input, shape index: {}]   ;;  %s693_s5 = inlined_call_operand.vmem [shape: f32[1,128], index: 5, kind: input, shape index: {}]   ;;  %s694_s6 = inlined_call_operand.vmem [shape: f32[1,128], index: 6, kind: input, shape index: {}]   ;;  %s695_s7 = inlined_call_operand.vmem [shape: f32[32,128], index: 7, kind: input, shape index: {}]   ;;  %s696_s8 = inlined_call_operand.vmem [shape: f32[32,128], index: 8, kind: output, shape index: {}]  }
   0x1   :  { %v29_v0 = vld [vmem:[%s688_s0] sm:$0xff]  ;;  %v30_v1 = vld [vmem:[%s688_s0 + $0x8] sm:$0xff]  ;;  %v31_v2 = vld [vmem:[%s688_s0 + $0x10] sm:$0xff] }
   0x2   :  { %v39_v3 = vadd.f32 %v30_v1, %v29_v0  ;;  %v32_v4 = vld [vmem:[%s688_s0 + $0x18] sm:$0xff]  ;;  %v33_v5 = vld [vmem:[%s688_s0 + $0x20] sm:$0xff]  ;;  %v34_v6 = vld [vmem:[%s688_s0 + $0x28] sm:$0xff] }
   0x3   :  { %v42_v7 = vadd.f32 %v32_v4, %v31_v2  ;;  %v35_v8 = vld [vmem:[%s688_s0 + $0x30] sm:$0xff]  ;;  %v36_v9 = vld [vmem:[%s688_s0 + $0x38] sm:$0xff]  ;;  %v45_v10 = vadd.f32 %v34_v6, %v33_v5  ;;  %v171_v16 = vld [vmem:[%s689_s3 + $0xe8] sm:$0xff] }
   0x4   :  { %40 = vadd.xlane.f32.xlu0 %v39_v3  ;;  %v48_v11 = vadd.f32 %v36_v9, %v35_v8  ;;  %v173_v12 = vld [vmem:[%s689_s3 + $0xf8] sm:$0xff]  ;;  %v172_v14 = vld [vmem:[%s689_s3 + $0xf0] sm:$0xff]  ;;  %v155_v17 = vld [vmem:[%s689_s3 + $0x68] sm:$0xff] }
   0x5   :  { %43 = vadd.xlane.f32.xlu1 %v42_v7  ;;  %v157_v13 = vld [vmem:[%s689_s3 + $0x78] sm:$0xff]  ;;  %352 = vmatprep.subr.mxu0 %v173_v12  ;;  %v156_v15 = vld [vmem:[%s689_s3 + $0x70] sm:$0xff]  ;;  %v170_v18 = vld [vmem:[%s689_s3 + $0xe0] sm:$0xff] }
   0x6   :  { %396 = vmatprep.subr.mxu1 %v173_v12  ;;  %353 = vmatpush3.msra.mxu0 %v157_v13  ;;  %v154_v47 = vld [vmem:[%s689_s3 + $0x60] sm:$0xff]  ;;  %v169_v48 = vld [vmem:[%s689_s3 + $0xd8] sm:$0xff]  ;;  %v168_v50 = vld [vmem:[%s689_s3 + $0xd0] sm:$0xff] }
   0x7   :  { %412 = vmatpush3.msra.mxu1 %v157_v13  ;;  %354 = vmatprep.subr.mxu0 %v172_v14  ;;  %v153_v49 = vld [vmem:[%s689_s3 + $0x58] sm:$0xff]  ;;  %v152_v51 = vld [vmem:[%s689_s3 + $0x50] sm:$0xff]  ;;  %v167_v52 = vld [vmem:[%s689_s3 + $0xc8] sm:$0xff] }
   0x8   :  { %46 = vadd.xlane.f32.xlu0 %v45_v10  ;;  %397 = vmatprep.subr.mxu1 %v172_v14  ;;  %v151_v53 = vld [vmem:[%s689_s3 + $0x48] sm:$0xff]  ;;  %v166_v54 = vld [vmem:[%s689_s3 + $0xc0] sm:$0xff]  ;;  %v165_v56 = vld [vmem:[%s689_s3 + $0xb8] sm:$0xff] }
   0x9   :  { %49 = vadd.xlane.f32.xlu1 %v48_v11  ;;  %355 = vmatpush3.msra.mxu0 %v156_v15  ;;  %v150_v55 = vld [vmem:[%s689_s3 + $0x40] sm:$0xff]  ;;  %v149_v57 = vld [vmem:[%s689_s3 + $0x38] sm:$0xff]  ;;  %v164_v58 = vld [vmem:[%s689_s3 + $0xb0] sm:$0xff] }
   0xa   :  { %413 = vmatpush3.msra.mxu1 %v156_v15  ;;  %356 = vmatprep.subr.mxu0 %v171_v16  ;;  %v148_v59 = vld [vmem:[%s689_s3 + $0x30] sm:$0xff]  ;;  %v163_v60 = vld [vmem:[%s689_s3 + $0xa8] sm:$0xff]  ;;  %v162_v62 = vld [vmem:[%s689_s3 + $0xa0] sm:$0xff]  ;;  %v105_v15 = vlaneseq }
   0xb   :  { %398 = vmatprep.subr.mxu1 %v171_v16  ;;  %357 = vmatpush3.msra.mxu0 %v155_v17  ;;  %v147_v61 = vld [vmem:[%s689_s3 + $0x28] sm:$0xff]  ;;  %v146_v63 = vld [vmem:[%s689_s3 + $0x20] sm:$0xff]  ;;  %v144_v3 = vld [vmem:[%s689_s3 + $0x10] sm:$0xff] }
   0xc   :  { %414 = vmatpush3.msra.mxu1 %v155_v17  ;;  %358 = vmatprep.subr.mxu0 %v170_v18  ;;  %v142_v7 = vld [vmem:[%s689_s3] sm:$0xff] }
   0xd   :  { %399 = vmatprep.subr.mxu1 %v170_v18  ;;  %359 = vmatpush3.msra.mxu0 %v154_v47 }
   0xe   :  { %415 = vmatpush3.msra.mxu1 %v154_v47  ;;  %360 = vmatprep.subr.mxu0 %v169_v48 }
   0xf   :  { %400 = vmatprep.subr.mxu1 %v169_v48  ;;  %361 = vmatpush3.msra.mxu0 %v153_v49 }
  0x10   :  { %416 = vmatpush3.msra.mxu1 %v153_v49  ;;  %362 = vmatprep.subr.mxu0 %v168_v50 }
  0x11   :  { %401 = vmatprep.subr.mxu1 %v168_v50  ;;  %363 = vmatpush3.msra.mxu0 %v152_v51 }
  0x12   :  { %417 = vmatpush3.msra.mxu1 %v152_v51  ;;  %364 = vmatprep.subr.mxu0 %v167_v52 }
  0x13   :  { %402 = vmatprep.subr.mxu1 %v167_v52  ;;  %365 = vmatpush3.msra.mxu0 %v151_v53 }
  0x14   :  { %418 = vmatpush3.msra.mxu1 %v151_v53  ;;  %366 = vmatprep.subr.mxu0 %v166_v54 }
  0x15   :  { %403 = vmatprep.subr.mxu1 %v166_v54  ;;  %367 = vmatpush3.msra.mxu0 %v150_v55 }
  0x16   :  { %419 = vmatpush3.msra.mxu1 %v150_v55  ;;  %368 = vmatprep.subr.mxu0 %v165_v56 }
  0x17   :  { %404 = vmatprep.subr.mxu1 %v165_v56  ;;  %369 = vmatpush3.msra.mxu0 %v149_v57 }
  0x18   :  { %420 = vmatpush3.msra.mxu1 %v149_v57  ;;  %370 = vmatprep.subr.mxu0 %v164_v58 }
  0x19   :  { %405 = vmatprep.subr.mxu1 %v164_v58  ;;  %371 = vmatpush3.msra.mxu0 %v148_v59 }
  0x1a   :  { %421 = vmatpush3.msra.mxu1 %v148_v59  ;;  %372 = vmatprep.subr.mxu0 %v163_v60 }
  0x1b   :  { %406 = vmatprep.subr.mxu1 %v163_v60  ;;  %373 = vmatpush3.msra.mxu0 %v147_v61 }
  0x1c   :  { %422 = vmatpush3.msra.mxu1 %v147_v61  ;;  %374 = vmatprep.subr.mxu0 %v162_v62 }
  0x1d   :  { %407 = vmatprep.subr.mxu1 %v162_v62  ;;  %375 = vmatpush3.msra.mxu0 %v146_v63 }
  0x1e   :  { %423 = vmatpush3.msra.mxu1 %v146_v63 }
  0x8d   :  { %v41_v19 = vpop.xlane.xlu0 %40 }
  0x8e   :  { %v52_v20 = vmul.f32 0.00390625, %v41_v19  ;;  %v44_v21 = vpop.xlane.xlu1 %43 }
  0x8f   :  { %v53_v22 = vmul.f32 0.00390625, %v44_v21 }
  0x90   :  { %v534_v23 = vsub.f32 %v29_v0, %v52_v20  ;;  %v536_v24 = vsub.f32 %v30_v1, %v52_v20  ;;  %v161_v0 = vld [vmem:[%s689_s3 + $0x98] sm:$0xff]  ;;  %v106_v20 = vshrl.u32 %v105_v15, 7 }
  0x91   :  { %v538_v25 = vsub.f32 %v31_v2, %v53_v22  ;;  %v540_v26 = vsub.f32 %v32_v4, %v53_v22  ;;  %v47_v27 = vpop.xlane.xlu0 %46  ;;  %v145_v1 = vld [vmem:[%s689_s3 + $0x18] sm:$0xff]  ;;  %v160_v2 = vld [vmem:[%s689_s3 + $0x90] sm:$0xff]  ;;  %376 = vmatprep.subr.mxu0 %v161_v0  ;;  %408 = vmatprep.subr.mxu1 %v161_v0  ;;  %v159_v4 = vld [vmem:[%s689_s3 + $0x88] sm:$0xff] }
  0x92   :  { %v54_v28 = vmul.f32 0.00390625, %v47_v27  ;;  %v50_v29 = vpop.xlane.xlu1 %49  ;;  %v64_v30 = vmul.f32 %v534_v23, %v534_v23  ;;  %v65_v31 = vmul.f32 %v536_v24, %v536_v24  ;;  %377 = vmatpush3.msra.mxu0 %v145_v1  ;;  %424 = vmatpush3.msra.mxu1 %v145_v1  ;;  %v107_v22 = vsub.s32 0, %v106_v20 }
  0x93   :  { %v55_v32 = vmul.f32 0.00390625, %v50_v29  ;;  %v66_v33 = vmul.f32 %v538_v25, %v538_v25  ;;  %v67_v34 = vmul.f32 %v540_v26, %v540_v26  ;;  %378 = vmatprep.subr.mxu0 %v160_v2  ;;  %409 = vmatprep.subr.mxu1 %v160_v2  ;;  %v111_v27 = vsub.s32 1, %v106_v20  ;;  %v38_v29 = vld [vmem:[%s691_s2] sm:$0x3] }
  0x94   :  { %v550_v35 = vsub.f32 %v33_v5, %v54_v28  ;;  %v552_v36 = vsub.f32 %v34_v6, %v54_v28  ;;  %v72_v37 = vadd.f32 %v65_v31, %v64_v30  ;;  %v143_v5 = vld [vmem:[%s689_s3 + $0x8] sm:$0xff]  ;;  %379 = vmatpush3.msra.mxu0 %v144_v3  ;;  %v158_v6 = vld [vmem:[%s689_s3 + $0x80] sm:$0xff]  ;;  %425 = vmatpush3.msra.mxu1 %v144_v3 }
  0x95   :  { %v554_v38 = vsub.f32 %v35_v8, %v55_v32  ;;  %v556_v39 = vsub.f32 %v36_v9, %v55_v32  ;;  %v75_v40 = vadd.f32 %v67_v34, %v66_v33  ;;  %380 = vmatprep.subr.mxu0 %v159_v4  ;;  %410 = vmatprep.subr.mxu1 %v159_v4  ;;  %v37_v28 = vld [vmem:[%s690_s1] sm:$0x3] }
  0x96   :  { %73 = vadd.xlane.f32.xlu0 %v72_v37  ;;  %v68_v41 = vmul.f32 %v550_v35, %v550_v35  ;;  %v69_v42 = vmul.f32 %v552_v36, %v552_v36  ;;  %381 = vmatpush3.msra.mxu0 %v143_v5  ;;  %v108_v30 = vrot.slane %v37_v28, %v107_v22 }
  0x97   :  { %v70_v43 = vmul.f32 %v554_v38, %v554_v38  ;;  %v71_v44 = vmul.f32 %v556_v39, %v556_v39  ;;  %426 = vmatpush3.msra.mxu1 %v143_v5  ;;  %382 = vmatprep.subr.mxu0 %v158_v6  ;;  %v112_v31 = vrot.slane %v37_v28, %v111_v27 }
  0x98   :  { %v78_v45 = vadd.f32 %v69_v42, %v68_v41  ;;  %411 = vmatprep.subr.mxu1 %v158_v6  ;;  %383 = vmatpush3.msra.mxu0 %v142_v7  ;;  %v127_v34 = vrot.slane %v38_v29, %v107_v22  ;;  %v131_v37 = vrot.slane %v38_v29, %v111_v27 }
  0x99   :  { %v81_v46 = vadd.f32 %v71_v44, %v70_v43  ;;  %427 = vmatpush3.msra.mxu1 %v142_v7 }
  0x9a   :  { %76 = vadd.xlane.f32.xlu0 %v75_v40  ;;  %79 = vadd.xlane.f32.xlu1 %v78_v45 }
  0x9e   :  { %82 = vadd.xlane.f32.xlu1 %v81_v46 }
 0x11f   :  { %v74_v8 = vpop.xlane.xlu0 %73 }
 0x120   :  { %v84_v9 = vmul.f32 0.00390625, %v74_v8 }
 0x122   :  { %v88_v10 = vadd.f32 1e-05, %v84_v9 }
 0x123   :  { %v80_v11 = vpop.xlane.xlu1 %79  ;;  %v77_v12 = vpop.xlane.xlu0 %76 }
 0x124   :  { %428 = vrsqrt.f32 %v88_v10  ;;  %v86_v13 = vmul.f32 0.00390625, %v80_v11  ;;  %v85_v14 = vmul.f32 0.00390625, %v77_v12 }
 0x126   :  { %v90_v16 = vadd.f32 1e-05, %v86_v13  ;;  %v89_v17 = vadd.f32 1e-05, %v85_v14 }
 0x127   :  { %v83_v18 = vpop.xlane.xlu1 %82 }
 0x128   :  { %430 = vrsqrt.f32 %v90_v16  ;;  %v87_v19 = vmul.f32 0.00390625, %v83_v18 }
 0x129   :  { %432 = vrsqrt.f32 %v89_v17 }
 0x12a   :  { %v91_v21 = vadd.f32 1e-05, %v87_v19 }
 0x12c   :  { %434 = vrsqrt.f32 %v91_v21 }
 0x131   :  { %v429_v32 = vpop.eup %428 }
 0x132   :  { %v97_v33 = vmul.f32 %v429_v32, %v536_v24  ;;  %v96_v40 = vmul.f32 %v429_v32, %v534_v23 }
 0x134   :  { %v116_v41 = vmul.f32 %v112_v31, %v97_v33  ;;  %v115_v42 = vmul.f32 %v108_v30, %v96_v40 }
 0x135   :  { %v431_v43 = vpop.eup %430 }
 0x136   :  { %v433_v44 = vpop.eup %432  ;;  %v135_v45 = vadd.f32 %v131_v37, %v116_v41  ;;  %v134_v46 = vadd.f32 %v127_v34, %v115_v42  ;;  %v101_v47 = vmul.f32 %v431_v43, %v552_v36  ;;  %v100_v48 = vmul.f32 %v431_v43, %v550_v35 }
 0x137   :  { %v99_v49 = vmul.f32 %v433_v44, %v540_v26  ;;  %v98_v50 = vmul.f32 %v433_v44, %v538_v25 }
 0x138   :  { %245 = vmatprep.mubr.f32.mxu0 %v135_v45  ;;  %v120_v24 = vmul.f32 %v112_v31, %v101_v47  ;;  %v119_v51 = vmul.f32 %v108_v30, %v100_v48  ;;  %v350_v48 = vld [vmem:[%s693_s5] ss:$0 sm:$0xff] }
 0x139   :  { %v435_v52 = vpop.eup %434  ;;  %246 = vmatmul.mubr.f32.vlgmr.msra.gmra.mxu0 %v134_v46  ;;  %v118_v23 = vmul.f32 %v112_v31, %v99_v49  ;;  %v117_v53 = vmul.f32 %v108_v30, %v98_v50  ;;  %v351_v50 = vld [vmem:[%s694_s6] ss:$0 sm:$0xff] }
 0x13a   :  { %v139_v54 = vadd.f32 %v131_v37, %v120_v24  ;;  %v138_v55 = vadd.f32 %v127_v34, %v119_v51  ;;  %v103_v56 = vmul.f32 %v435_v52, %v556_v39  ;;  %v102_v57 = vmul.f32 %v435_v52, %v554_v38  ;;  %v349_v39 = vld [vmem:[%s692_s4] ss:$0 sm:$0xff] }
 0x13b   :  { %v137_v36 = vadd.f32 %v131_v37, %v118_v23  ;;  %v136_v58 = vadd.f32 %v127_v34, %v117_v53  ;;  %v333_v52 = vld [vmem:[%s695_s7] sm:$0xff] }
 0x13c   :  { %255 = vmatprep.mubr.f32.mxu1 %v139_v54  ;;  %v122_v35 = vmul.f32 %v112_v31, %v103_v56  ;;  %v121_v26 = vmul.f32 %v108_v30, %v102_v57 }
 0x13d   :  { %250 = vmatprep.mubr.f32.mxu0 %v137_v36  ;;  %256 = vmatmul.mubr.f32.vlgmr.msra.gmra.mxu1 %v138_v55 }
 0x13e   :  { %251 = vmatmul.mubr.f32.gmra.mxu0 %v136_v58  ;;  %v141_v25 = vadd.f32 %v131_v37, %v122_v35  ;;  %v140_v59 = vadd.f32 %v127_v34, %v121_v26  ;;  %v335_v58 = vld [vmem:[%s695_s7 + $0x10] sm:$0xff]  ;;  %v334_v26 = vld [vmem:[%s695_s7 + $0x8] sm:$0xff] }
 0x140   :  { %260 = vmatprep.mubr.f32.mxu1 %v141_v25 }
 0x141   :  { %261 = vmatmul.mubr.f32.gmra.mxu1 %v140_v59 }
 0x1f9   :  { %v384_v60 = vpop.f32.mrf.mxu0 }
 0x1fb   :  { %v385_v61 = vpop.f32.mrf.mxu0 }
 0x1fc   :  { %v386_v62 = vadd.f32 %v385_v61, %v384_v60 }
 0x1fd   :  { %v390_v38 = vpop.f32.mrf.mxu1 }
 0x1fe   :  { %v387_v63 = vpop.f32.mrf.mxu0  ;;  %v248_v0 = vadd.f32 %v386_v62, %v349_v39 }
 0x1ff   :  { %v391_v1 = vpop.f32.mrf.mxu1 }
 0x200   :  { %v388_v2 = vpop.f32.mrf.mxu0  ;;  %v392_v3 = vadd.f32 %v391_v1, %v390_v38  ;;  %268 = vadd.xlane.f32.xlu0 %v248_v0  ;;  %v336_v38 = vld [vmem:[%s695_s7 + $0x18] sm:$0xff] }
 0x201   :  { %v389_v4 = vadd.f32 %v388_v2, %v387_v63  ;;  %v393_v5 = vpop.f32.mrf.mxu1 }
 0x202   :  { %v258_v6 = vadd.f32 %v392_v3, %v349_v39 }
 0x203   :  { %v394_v7 = vpop.f32.mrf.mxu1  ;;  %v253_v8 = vadd.f32 %v389_v4, %v349_v39 }
 0x204   :  { %v395_v9 = vadd.f32 %v394_v7, %v393_v5  ;;  %272 = vadd.xlane.f32.xlu0 %v258_v6 }
 0x205   :  { %270 = vadd.xlane.f32.xlu1 %v253_v8 }
 0x206   :  { %v263_v10 = vadd.f32 %v395_v9, %v349_v39 }
 0x209   :  { %274 = vadd.xlane.f32.xlu1 %v263_v10 }
 0x289   :  { %v269_v11 = vpop.xlane.xlu0 %268 }
 0x28a   :  { %v277_v12 = vmul.f32 0.0078125, %v269_v11 }
 0x28c   :  { %v281_v13 = vsub.f32 %v248_v0, %v277_v12 }
 0x28d   :  { %v273_v14 = vpop.xlane.xlu0 %272 }
 0x28e   :  { %v271_v15 = vpop.xlane.xlu1 %270  ;;  %v279_v16 = vmul.f32 0.0078125, %v273_v14  ;;  %v285_v17 = vmul.f32 %v281_v13, %v281_v13 }
 0x28f   :  { %v278_v18 = vmul.f32 0.0078125, %v271_v15 }
 0x290   :  { %v283_v19 = vsub.f32 %v258_v6, %v279_v16  ;;  %289 = vadd.xlane.f32.xlu0 %v285_v17 }
 0x291   :  { %v282_v20 = vsub.f32 %v253_v8, %v278_v18 }
 0x292   :  { %v275_v21 = vpop.xlane.xlu1 %274  ;;  %v287_v22 = vmul.f32 %v283_v19, %v283_v19 }
 0x293   :  { %v280_v27 = vmul.f32 0.0078125, %v275_v21  ;;  %v286_v28 = vmul.f32 %v282_v20, %v282_v20 }
 0x294   :  { %293 = vadd.xlane.f32.xlu0 %v287_v22 }
 0x295   :  { %v284_v29 = vsub.f32 %v263_v10, %v280_v27  ;;  %291 = vadd.xlane.f32.xlu1 %v286_v28 }
 0x297   :  { %v288_v30 = vmul.f32 %v284_v29, %v284_v29 }
 0x299   :  { %295 = vadd.xlane.f32.xlu1 %v288_v30 }
 0x319   :  { %v290_v31 = vpop.xlane.xlu0 %289 }
 0x31a   :  { %v297_v32 = vmul.f32 0.0078125, %v290_v31 }
 0x31c   :  { %v301_v33 = vadd.f32 1e-05, %v297_v32 }
 0x31d   :  { %v294_v34 = vpop.xlane.xlu0 %293 }
 0x31e   :  { %436 = vrsqrt.f32 %v301_v33  ;;  %v292_v37 = vpop.xlane.xlu1 %291  ;;  %v299_v40 = vmul.f32 0.0078125, %v294_v34 }
 0x31f   :  { %v298_v41 = vmul.f32 0.0078125, %v292_v37 }
 0x320   :  { %v303_v42 = vadd.f32 1e-05, %v299_v40 }
 0x321   :  { %v302_v43 = vadd.f32 1e-05, %v298_v41 }
 0x322   :  { %438 = vrsqrt.f32 %v303_v42  ;;  %v296_v44 = vpop.xlane.xlu1 %295 }
 0x323   :  { %440 = vrsqrt.f32 %v302_v43  ;;  %v300_v45 = vmul.f32 0.0078125, %v296_v44 }
 0x325   :  { %v304_v46 = vadd.f32 1e-05, %v300_v45 }
 0x327   :  { %442 = vrsqrt.f32 %v304_v46 }
 0x32b   :  { %v437_v47 = vpop.eup %436 }
 0x32c   :  { %v309_v49 = vmul.f32 %v437_v47, %v281_v13 }
 0x32e   :  { %v319_v24 = vmul.f32 %v350_v48, %v309_v49 }
 0x32f   :  { %v439_v51 = vpop.eup %438 }
 0x330   :  { %v441_v23 = vpop.eup %440  ;;  %v329_v53 = vadd.f32 %v351_v50, %v319_v24  ;;  %v311_v54 = vmul.f32 %v439_v51, %v283_v19 }
 0x331   :  { %v310_v55 = vmul.f32 %v441_v23, %v282_v20 }
 0x332   :  { %v337_v56 = vadd.f32 %v333_v52, %v329_v53  ;;  %v321_v57 = vmul.f32 %v350_v48, %v311_v54 }
 0x333   :  { %v320_v36 = vmul.f32 %v350_v48, %v310_v55 }
 0x334   :  { %v443_v35 = vpop.eup %442  ;;  %341 = vst [vmem:[%s696_s8] sm:$0xff] %v337_v56  ;;  %v331_v25 = vadd.f32 %v351_v50, %v321_v57 }
 0x335   :  { %v330_v59 = vadd.f32 %v351_v50, %v320_v36  ;;  %v312_v60 = vmul.f32 %v443_v35, %v284_v29 }
 0x336   :  { %v339_v61 = vadd.f32 %v335_v58, %v331_v25 }
 0x337   :  { %v338_v39 = vadd.f32 %v334_v26, %v330_v59  ;;  %v322_v62 = vmul.f32 %v350_v48, %v312_v60 }
 0x338   :  { %343 = vst [vmem:[%s696_s8 + $0x10] sm:$0xff] %v339_v61 }
 0x339   :  { %342 = vst [vmem:[%s696_s8 + $0x8] sm:$0xff] %v338_v39  ;;  %v332_v63 = vadd.f32 %v351_v50, %v322_v62 }
 0x33b   :  { %v340_v0 = vadd.f32 %v336_v38, %v332_v63 }
 0x33d   :  { %344 = vst [vmem:[%s696_s8 + $0x18] sm:$0xff] %v340_v0 }

// kernel: vitae_forward.14
= control target key start
LH: loop header
LB: loop body
LE: loop exit
PB: predicated region body
PF: predicated region fallthrough
CT: control target
= control target key end

     0   :  { %s2019_s18 = smov 0   ;;  %s2387_s0 = inlined_call_operand.vmem [shape: f32[2,16,128], index: 0, kind: input, shape index: {}]   ;;  %s2388_s1 = inlined_call_operand.vmem [shape: f32[1,128], index: 1, kind: input, shape index: {}]   ;;  %s2389_s2 = inlined_call_operand.vmem [shape: f32[1,128], index: 2, kind: input, shape index: {}]   ;;  %s2390_s3 = inlined_call_operand.vmem [shape: f32[128,384], index: 3, kind: input, shape index: {}]   ;;  %s2391_s4 = inlined_call_operand.vmem [shape: f32[128,128], index: 4, kind: input, shape index: {}]   ;;  %s2392_s5 = inlined_call_operand.vmem [shape: f32[2,16,128], index: 5, kind: output, shape index: {}]  }
   0x1 LB: > { %s1673_s19 = sadd.s32 4294967295, %s1983_s18   ;;  %p1677_p0 = scmp.ge.s32.totalorder %s1983_s18, 1  ;;  %s1983_s18 = sphi %s2019_s18, %s15_s18  }
   0x2   : > { %p187_p1 = scmp.lt.s32.totalorder %s1983_s18, 3 }
   0x4   : > { %p188_p2 = pnand %p1677_p0, %p187_p1 }
   0x5   : > { %p215_p3 = scmp.lt.s32.totalorder (!%p188_p2), %s1673_s19, 1  ;;  %s1986_s11 = smov (!%p188_p2), 96  }
   0x6   : > { %191 = sbr.rel (%p188_p2) target bundleno = 2879 (0xb3f), region = 40  ;;  %s1988_s24 = smov (!%p188_p2), 32  }
   0xb   : > { %s2394_s19 = smov (!%p215_p3, %s1673_s19), 1  ;;  %v314_v2 = vld [vmem:[%s2390_s3 + $0x170] sm:$0xff]  ;;  %v313_v3 = vld [vmem:[%s2390_s3 + $0x168] sm:$0xff]  ;;  %v311_v4 = vld [vmem:[%s2390_s3 + $0x158] sm:$0xff]  ;;  %v1985_v56 = vmov 0.0   ;;  %vm468_vm0 = vcmask 261120  }
   0xc   : > { %s1718_s20 = sshll.u32 %s2394_s19, 4  ;;  %316 = vmatprep.subr.mxu0 %v314_v2  ;;  %v310_v5 = vld [vmem:[%s2390_s3 + $0x150] sm:$0xff]  ;;  %v315_v6 = vld [vmem:[%s2390_s3 + $0x178] sm:$0xff]  ;;  %v308_v7 = vld [vmem:[%s2390_s3 + $0x140] sm:$0xff]  ;;  %380 = vmatprep.mubr.f32.mxu0 %v1985_v56  ;;  %vm558_vm1 = vcmask 130048  }
   0xd   : > { %s219_s23 = scalar_lea.vmem %s2387_s0, %s1718_s20  ;;  %317 = vmatpush1.msra.mxu0 %v313_v3  ;;  %1794 = vmatprep.subr.mxu1 %v315_v6  ;;  %v312_v8 = vld [vmem:[%s2390_s3 + $0x160] sm:$0xff]  ;;  %v307_v9 = vld [vmem:[%s2390_s3 + $0x138] sm:$0xff]  ;;  %v305_v10 = vld [vmem:[%s2390_s3 + $0x128] sm:$0xff]  ;;  %s224_s29 = scalar_lea.vmem %s2392_s5, %s1718_s20 }
   0xe   : > { %v2035_v0 = vld [vmem:[%s219_s23] sm:$0xff]  ;;  %v2038_v1 = vld [vmem:[%s219_s23 + $0x8] sm:$0xff]  ;;  %318 = vmatprep.subr.mxu0 %v311_v4  ;;  %1795 = vmatpush3.msra.mxu1 %v315_v6  ;;  %v302_v20 = vld [vmem:[%s2390_s3 + $0x110] sm:$0xff]  ;;  %s1987_s23 = smov 64  }
   0xf   : > { %229 = vadd.xlane.f32.xlu0 %v2035_v0  ;;  %319 = vmatpush1.msra.mxu0 %v310_v5  ;;  %v304_v11 = vld [vmem:[%s2390_s3 + $0x120] sm:$0xff]  ;;  %v309_v21 = vld [vmem:[%s2390_s3 + $0x148] sm:$0xff]  ;;  %v299_v23 = vld [vmem:[%s2390_s3 + $0xf8] sm:$0xff] }
  0x10   : > { %1796 = vmatprep.subr.mxu1 %v312_v8  ;;  %320 = vmatprep.subr.mxu0 %v308_v7  ;;  %v301_v22 = vld [vmem:[%s2390_s3 + $0x108] sm:$0xff]  ;;  %v306_v24 = vld [vmem:[%s2390_s3 + $0x130] sm:$0xff]  ;;  %v296_v26 = vld [vmem:[%s2390_s3 + $0xe0] sm:$0xff] }
  0x11   : > { %1797 = vmatpush3.msra.mxu1 %v312_v8  ;;  %321 = vmatpush1.msra.mxu0 %v307_v9  ;;  %v298_v25 = vld [vmem:[%s2390_s3 + $0xf0] sm:$0xff]  ;;  %v303_v27 = vld [vmem:[%s2390_s3 + $0x118] sm:$0xff]  ;;  %v293_v29 = vld [vmem:[%s2390_s3 + $0xc8] sm:$0xff] }
  0x12   : > { %322 = vmatprep.subr.mxu0 %v305_v10  ;;  %1798 = vmatprep.subr.mxu1 %v309_v21  ;;  %v295_v28 = vld [vmem:[%s2390_s3 + $0xd8] sm:$0xff]  ;;  %v300_v30 = vld [vmem:[%s2390_s3 + $0x100] sm:$0xff]  ;;  %v290_v32 = vld [vmem:[%s2390_s3 + $0xb0] sm:$0xff] }
  0x13   : > { %231 = vadd.xlane.f32.xlu0 %v2038_v1  ;;  %323 = vmatpush1.msra.mxu0 %v304_v11  ;;  %v292_v31 = vld [vmem:[%s2390_s3 + $0xc0] sm:$0xff]  ;;  %v297_v33 = vld [vmem:[%s2390_s3 + $0xe8] sm:$0xff]  ;;  %v287_v35 = vld [vmem:[%s2390_s3 + $0x98] sm:$0xff] }
  0x14   : > { %324 = vmatprep.subr.mxu0 %v302_v20  ;;  %1799 = vmatpush3.msra.mxu1 %v309_v21  ;;  %v289_v34 = vld [vmem:[%s2390_s3 + $0xa8] sm:$0xff]  ;;  %v294_v36 = vld [vmem:[%s2390_s3 + $0xd0] sm:$0xff]  ;;  %v284_v38 = vld [vmem:[%s2390_s3 + $0x80] sm:$0xff] }
  0x15   : > { %325 = vmatpush1.msra.mxu0 %v301_v22  ;;  %1800 = vmatprep.subr.mxu1 %v306_v24  ;;  %v286_v37 = vld [vmem:[%s2390_s3 + $0x90] sm:$0xff]  ;;  %v291_v39 = vld [vmem:[%s2390_s3 + $0xb8] sm:$0xff]  ;;  %v281_v41 = vld [vmem:[%s2390_s3 + $0x68] sm:$0xff] }
  0x16   : > { %326 = vmatprep.subr.mxu0 %v299_v23  ;;  %1801 = vmatpush3.msra.mxu1 %v306_v24  ;;  %v283_v40 = vld [vmem:[%s2390_s3 + $0x78] sm:$0xff]  ;;  %v288_v42 = vld [vmem:[%s2390_s3 + $0xa0] sm:$0xff]  ;;  %v278_v44 = vld [vmem:[%s2390_s3 + $0x50] sm:$0xff] }
  0x17   : > { %327 = vmatpush1.msra.mxu0 %v298_v25  ;;  %1802 = vmatprep.subr.mxu1 %v303_v27  ;;  %v280_v43 = vld [vmem:[%s2390_s3 + $0x60] sm:$0xff]  ;;  %v285_v45 = vld [vmem:[%s2390_s3 + $0x88] sm:$0xff]  ;;  %v275_v47 = vld [vmem:[%s2390_s3 + $0x38] sm:$0xff] }
  0x18   : > { %328 = vmatprep.subr.mxu0 %v296_v26  ;;  %1803 = vmatpush3.msra.mxu1 %v303_v27  ;;  %v277_v46 = vld [vmem:[%s2390_s3 + $0x48] sm:$0xff]  ;;  %v282_v48 = vld [vmem:[%s2390_s3 + $0x70] sm:$0xff]  ;;  %v272_v50 = vld [vmem:[%s2390_s3 + $0x20] sm:$0xff] }
  0x19   : > { %329 = vmatpush1.msra.mxu0 %v295_v28  ;;  %1804 = vmatprep.subr.mxu1 %v300_v30  ;;  %v274_v49 = vld [vmem:[%s2390_s3 + $0x30] sm:$0xff]  ;;  %v279_v51 = vld [vmem:[%s2390_s3 + $0x58] sm:$0xff]  ;;  %v269_v53 = vld [vmem:[%s2390_s3 + $0x8] sm:$0xff] }
  0x1a   : > { %330 = vmatprep.subr.mxu0 %v293_v29  ;;  %1805 = vmatpush3.msra.mxu1 %v300_v30  ;;  %v271_v52 = vld [vmem:[%s2390_s3 + $0x18] sm:$0xff]  ;;  %v276_v54 = vld [vmem:[%s2390_s3 + $0x40] sm:$0xff]  ;;  %v273_v57 = vld [vmem:[%s2390_s3 + $0x28] sm:$0xff] }
  0x1b   : > { %331 = vmatpush1.msra.mxu0 %v292_v31  ;;  %1806 = vmatprep.subr.mxu1 %v297_v33  ;;  %v268_v55 = vld [vmem:[%s2390_s3] sm:$0xff]  ;;  %v270_v58 = vld [vmem:[%s2390_s3 + $0x10] sm:$0xff] }
  0x1c   : > { %332 = vmatprep.subr.mxu0 %v290_v32  ;;  %1807 = vmatpush3.msra.mxu1 %v297_v33  ;;  %v1682_v4 = vld [vmem:[%s2388_s1] ss:$0 sm:$0xff] }
  0x1d   : > { %333 = vmatpush1.msra.mxu0 %v289_v34  ;;  %1808 = vmatprep.subr.mxu1 %v294_v36  ;;  %v1683_v6 = vld [vmem:[%s2389_s2] ss:$0 sm:$0xff] }
  0x1e   : > { %334 = vmatprep.subr.mxu0 %v287_v35  ;;  %1809 = vmatpush3.msra.mxu1 %v294_v36 }
  0x1f   : > { %335 = vmatpush1.msra.mxu0 %v286_v37  ;;  %1810 = vmatprep.subr.mxu1 %v291_v39 }
  0x20   : > { %336 = vmatprep.subr.mxu0 %v284_v38  ;;  %1811 = vmatpush3.msra.mxu1 %v291_v39 }
  0x21   : > { %337 = vmatpush1.msra.mxu0 %v283_v40  ;;  %1812 = vmatprep.subr.mxu1 %v288_v42 }
  0x22   : > { %338 = vmatprep.subr.mxu0 %v281_v41  ;;  %1813 = vmatpush3.msra.mxu1 %v288_v42 }
  0x23   : > { %339 = vmatpush1.msra.mxu0 %v280_v43  ;;  %1814 = vmatprep.subr.mxu1 %v285_v45 }
  0x24   : > { %340 = vmatprep.subr.mxu0 %v278_v44  ;;  %1815 = vmatpush3.msra.mxu1 %v285_v45 }
  0x25   : > { %341 = vmatpush1.msra.mxu0 %v277_v46  ;;  %1816 = vmatprep.subr.mxu1 %v282_v48 }
  0x26   : > { %342 = vmatprep.subr.mxu0 %v275_v47  ;;  %1817 = vmatpush3.msra.mxu1 %v282_v48 }
  0x27   : > { %343 = vmatpush1.msra.mxu0 %v274_v49  ;;  %1818 = vmatprep.subr.mxu1 %v279_v51 }
  0x28   : > { %344 = vmatprep.subr.mxu0 %v272_v50  ;;  %1819 = vmatpush3.msra.mxu1 %v279_v51 }
  0x29   : > { %345 = vmatpush1.msra.mxu0 %v271_v52  ;;  %1820 = vmatprep.subr.mxu1 %v276_v54 }
  0x2a   : > { %346 = vmatprep.subr.mxu0 %v269_v53  ;;  %1821 = vmatpush3.msra.mxu1 %v276_v54  ;;  %v873_v53 = vld [vmem:[%s2391_s4 + $0x38] sm:$0xff]  ;;  %v872_v54 = vld [vmem:[%s2391_s4 + $0x30] sm:$0xff] }
  0x2b   : > { %347 = vmatpush1.msra.mxu0 %v268_v55  ;;  %1822 = vmatprep.subr.mxu1 %v273_v57  ;;  %v871_v55 = vld [vmem:[%s2391_s4 + $0x28] sm:$0xff] }
  0x2c   : > { %1823 = vmatpush3.msra.mxu1 %v273_v57 }
  0x2d   : > { %1824 = vmatprep.subr.mxu1 %v270_v58 }
  0x2e   : > { %1825 = vmatpush3.msra.mxu1 %v270_v58 }
  0x98   : > { %v230_v12 = vpop.xlane.xlu0 %229 }
  0x99   : > { %v234_v13 = vmul.f32 0.0078125, %v230_v12 }
  0x9b   : > { %v2072_v14 = vsub.f32 %v2035_v0, %v234_v13 }
  0x9c   : > { %v232_v15 = vpop.xlane.xlu0 %231 }
  0x9d   : > { %v235_v16 = vmul.f32 0.0078125, %v232_v15  ;;  %v238_v17 = vmul.f32 %v2072_v14, %v2072_v14 }
  0x9f   : > { %v2077_v18 = vsub.f32 %v2038_v1, %v235_v16  ;;  %240 = vadd.xlane.f32.xlu1 %v238_v17 }
  0xa1   : > { %v239_v19 = vmul.f32 %v2077_v18, %v2077_v18 }
  0xa3   : > { %242 = vadd.xlane.f32.xlu1 %v239_v19 }
 0x128   : > { %v241_v59 = vpop.xlane.xlu1 %240 }
 0x129   : > { %v244_v60 = vmul.f32 0.0078125, %v241_v59 }
 0x12b   : > { %v246_v61 = vadd.f32 1e-05, %v244_v60 }
 0x12c   : > { %v243_v62 = vpop.xlane.xlu1 %242 }
 0x12d   : > { %1941 = vrsqrt.f32 %v246_v61  ;;  %v245_v63 = vmul.f32 0.0078125, %v243_v62 }
 0x12f   : > { %v247_v2 = vadd.f32 1e-05, %v245_v63 }
 0x131   : > { %1943 = vrsqrt.f32 %v247_v2 }
 0x13a   : > { %v1942_v3 = vpop.eup %1941 }
 0x13b   : > { %v250_v5 = vmul.f32 %v1942_v3, %v2072_v14 }
 0x13d   : > { %v258_v7 = vmul.f32 %v1682_v4, %v250_v5 }
 0x13e   : > { %v1944_v8 = vpop.eup %1943 }
 0x13f   : > { %v266_v9 = vadd.f32 %v1683_v6, %v258_v7  ;;  %v251_v10 = vmul.f32 %v1944_v8, %v2077_v18 }
 0x141   : > { %381 = vmatmul.mubr.f32.vlgmr.msra.gmra.mxu0 %v266_v9  ;;  %1826 = vmatprep.mubr.f32.mxu1 %v266_v9  ;;  %v259_v11 = vmul.f32 %v1682_v4, %v251_v10  ;;  %v665_v10 = vld [vmem:[%s2391_s4 + $0x18] sm:$0xff] }
 0x142   : > { %386 = vmatprep.mubr.f32.mxu0 %v1985_v56  ;;  %v870_v56 = vld [vmem:[%s2391_s4 + $0x20] sm:$0xff] }
 0x143   : > { %v267_v12 = vadd.f32 %v1683_v6, %v259_v11 }
 0x145   : > { %387 = vmatmul.mubr.f32.gmra.mxu0 %v267_v12  ;;  %1827 = vmatmul.mubr.f32.vlgmr.msra.gmra.mxu1 %v267_v12 }
 0x201   : > { %v2203_v13 = vpop.f32.mrf.mxu0 }
 0x202   : > { %1833 = vmatprep.mubr.msk.f32.mxu0 %vm468_vm0, %v2203_v13 }
 0x203   : > { %v2207_v14 = vpop.f32.mrf.mxu0 }
 0x205   : > { %v2209_v15 = vpop.f32.mrf.mxu0  ;;  %v2211_v16 = vpop.f32.mrf.mxu1 }
 0x206   : > { %1836 = vmatprep.subr.mxu1 %v2211_v16 }
 0x207   : > { %v2214_v17 = vpop.f32.mrf.mxu0  ;;  %v2216_v18 = vpop.f32.mrf.mxu1  ;;  %1837 = vmatpush3.msra.mxu1 %v2211_v16 }
 0x208   : > { %1829 = vmatprep.subr.msk.mxu0 %vm468_vm0, %v2214_v17  ;;  %1838 = vmatprep.subr.mxu1 %v2216_v18 }
 0x209   : > { %1830 = vmatpush3.xpose.msk.msra.mxu0 %vm468_vm0, %v2214_v17  ;;  %1839 = vmatpush3.msra.mxu1 %v2216_v18 }
 0x20a   : > { %1831 = vmatprep.subr.msk.mxu0 %vm468_vm0, %v2207_v14 }
 0x20d   : > { %1832 = vmatpush3.xpose.msk.msra.mxu0 %vm468_vm0, %v2207_v14 }
 0x20e   : > { %1857 = vmatprep.subr.mxu0 %v873_v53 }
 0x210   : > { %1834 = vmatmul.mubr.msk.f32.vlgmr.msra.gmra.mxu0 %vm468_vm0, %v2209_v15 }
 0x211   : > { %1858 = vmatpush3.msra.mxu0 %v873_v53 }
 0x212   : > { %1859 = vmatprep.subr.mxu0 %v872_v54 }
 0x213   : > { %1860 = vmatpush3.msra.mxu0 %v872_v54 }
 0x214   : > { %1861 = vmatprep.subr.mxu0 %v871_v55 }
 0x215   : > { %1862 = vmatpush3.msra.mxu0 %v871_v55 }
 0x216   : > { %1863 = vmatprep.subr.mxu0 %v870_v56 }
 0x217   : > { %1864 = vmatpush3.msra.mxu0 %v870_v56 }
 0x2d0   : > { %v1835_v19 = vpop.f32.mrf.mxu0 }
 0x2d1   : > { %v557_v20 = vmul.f32 0.17677669, %v1835_v19  ;;  %v662_v19 = vld [vmem:[%s2391_s4] sm:$0xff] }
 0x2d2   : > { %v547_v21 = vpop.f32.mrf.mxu0 }
 0x2d3   : > { %v556_v22 = vmul.f32 0.17677669, %v547_v21  ;;  %v562_v23 = vsel %vm558_vm1, %v557_v20, -inf }
 0x2d4   : > { %563 = vmax.xlane.f32.xlu1 %v562_v23 }
 0x2d5   : > { %v559_v24 = vsel %vm558_vm1, %v556_v22, -inf }
 0x2d6   : > { %560 = vmax.xlane.f32.xlu0 %v559_v24 }
 0x35d   : > { %v564_v25 = vpop.xlane.xlu1 %563 }
 0x35e   : > { %v566_v26 = vsub.f32 %v557_v20, %v564_v25 }
 0x35f   : > { %v561_v27 = vpop.xlane.xlu0 %560 }
 0x360   : > { %v569_v28 = vmul.f32 1.442695, %v566_v26  ;;  %v565_v29 = vsub.f32 %v556_v22, %v561_v27 }
 0x362   : > { %1945 = vpow2.f32 %v569_v28  ;;  %v567_v30 = vmul.f32 1.442695, %v565_v29 }
 0x364   : > { %1947 = vpow2.f32 %v567_v30 }
 0x36f   : > { %v1946_v31 = vpop.eup %1945 }
 0x370   : > { %v574_v32 = vsel %vm558_vm1, %v1946_v31, 0.0 }
 0x371   : > { %v1948_v33 = vpop.eup %1947  ;;  %575 = vadd.xlane.f32.xlu1 %v574_v32 }
 0x372   : > { %v571_v34 = vsel %vm558_vm1, %v1948_v33, 0.0 }
 0x373   : > { %572 = vadd.xlane.f32.xlu0 %v571_v34 }
 0x382   : > { %670 = vrot.lane.b32.xlu1 %v2207_v14, %s1986_s11 }
 0x386   : > { %666 = vrot.lane.b32.xlu1 %v2203_v13, %s1986_s11 }
 0x389   : > { %672 = vrot.lane.b32.xlu0 %v2214_v17, %s1986_s11 }
 0x38a   : > { %668 = vrot.lane.b32.xlu1 %v2209_v15, %s1986_s11 }
 0x3fa   : > { %v576_v35 = vpop.xlane.xlu1 %575 }
 0x3fb   : > { %1949 = vrcp.f32 %v576_v35 }
 0x3fc   : > { %v573_v36 = vpop.xlane.xlu0 %572 }
 0x3fd   : > { %1951 = vrcp.f32 %v573_v36 }
 0x3fe   : > { %v671_v38 = vpop.permute.xlu1 %670 }
 0x400   : > { %v673_v37 = vpop.permute.xlu0 %672 }
 0x401   : > { %1843 = vmatprep.subr.msk.mxu1 %vm468_vm0, %v673_v37 }
 0x402   : > { %v667_v43 = vpop.permute.xlu1 %666 }
 0x406   : > { %v669_v44 = vpop.permute.xlu1 %668 }
 0x408   : > { %v1950_v39 = vpop.eup %1949 }
 0x409   : > { %v580_v42 = vmul.f32 %v1950_v39, %v1946_v31 }
 0x40a   : > { %v1952_v40 = vpop.eup %1951 }
 0x40b   : > { %v579_v41 = vmul.f32 %v1952_v40, %v1948_v33 }
 0x40d   : > { %1840 = vmatprep.mubr.msk.f32.mxu1 %vm558_vm1, %v579_v41 }
 0x40e   : > { %1841 = vmatmul.mubr.msk.f32.vlgmr.msra.gmra.mxu1 %vm558_vm1, %v580_v42 }
 0x40f   : > { %1844 = vmatpush3.xpose.msk.msra.mxu1 %vm468_vm0, %v673_v37  ;;  %1847 = vmatprep.mubr.msk.f32.mxu1 %vm468_vm0, %v667_v43 }
 0x410   : > { %1845 = vmatprep.subr.msk.mxu1 %vm468_vm0, %v671_v38 }
 0x413   : > { %1846 = vmatpush3.xpose.msk.msra.mxu1 %vm468_vm0, %v671_v38 }
 0x416   : > { %1848 = vmatmul.mubr.msk.f32.vlgmr.msra.gmra.mxu1 %vm468_vm0, %v669_v44 }
 0x4ce   : > { %v2251_v45 = vpop.f32.mrf.mxu1 }
 0x4d0   : > { %v2253_v46 = vpop.f32.mrf.mxu1 }
 0x4d6   : > { %v1849_v47 = vpop.f32.mrf.mxu1 }
 0x4d7   : > { %v758_v48 = vmul.f32 0.17677669, %v1849_v47 }
 0x4d8   : > { %v748_v49 = vpop.f32.mrf.mxu1 }
 0x4d9   : > { %v757_v50 = vmul.f32 0.17677669, %v748_v49  ;;  %v762_v51 = vsel %vm558_vm1, %v758_v48, -inf }
 0x4da   : > { %763 = vmax.xlane.f32.xlu1 %v762_v51 }
 0x4db   : > { %v759_v52 = vsel %vm558_vm1, %v757_v50, -inf }
 0x4dc   : > { %760 = vmax.xlane.f32.xlu0 %v759_v52 }
 0x4eb   : > { %783 = vrot.lane.b32.xlu1 %v2216_v18, %s1986_s11 }
 0x4ef   : > { %1042 = vrot.lane.b32.xlu1 %v2214_v17, %s1987_s23 }
 0x4f3   : > { %1040 = vrot.lane.b32.xlu1 %v2207_v14, %s1987_s23 }
 0x4f7   : > { %1038 = vrot.lane.b32.xlu1 %v2209_v15, %s1987_s23 }
 0x4fb   : > { %1329 = vrot.lane.b32.xlu1 %v2207_v14, %s1988_s24 }
 0x4ff   : > { %1327 = vrot.lane.b32.xlu1 %v2209_v15, %s1988_s24 }
 0x563   : > { %v764_v57 = vpop.xlane.xlu1 %763 }
 0x564   : > { %v766_v58 = vsub.f32 %v758_v48, %v764_v57 }
 0x565   : > { %v761_v59 = vpop.xlane.xlu0 %760 }
 0x566   : > { %v769_v60 = vmul.f32 1.442695, %v766_v58  ;;  %v765_v61 = vsub.f32 %v757_v50, %v761_v59 }
 0x567   : > { %v784_v62 = vpop.permute.xlu1 %783 }
 0x568   : > { %1953 = vpow2.f32 %v769_v60  ;;  %v767_v63 = vmul.f32 1.442695, %v765_v61 }
 0x56a   : > { %1955 = vpow2.f32 %v767_v63 }
 0x56b   : > { %v1043_v2 = vpop.permute.xlu1 %1042 }
 0x56c   : > { %1879 = vmatprep.subr.msk.mxu0 %vm468_vm0, %v1043_v2 }
 0x56f   : > { %v1041_v22 = vpop.permute.xlu1 %1040 }
 0x573   : > { %v1039_v25 = vpop.permute.xlu1 %1038 }
 0x575   : > { %v1954_v3 = vpop.eup %1953 }
 0x576   : > { %v774_v4 = vsel %vm558_vm1, %v1954_v3, 0.0 }
 0x577   : > { %v1956_v5 = vpop.eup %1955  ;;  %775 = vadd.xlane.f32.xlu0 %v774_v4  ;;  %v1330_v27 = vpop.permute.xlu1 %1329 }
 0x578   : > { %v771_v6 = vsel %vm558_vm1, %v1956_v5, 0.0 }
 0x57b   : > { %772 = vadd.xlane.f32.xlu0 %v771_v6  ;;  %v1328_v28 = vpop.permute.xlu1 %1327  ;;  %v1238_v6 = vld [vmem:[%s2391_s4 + $0x40] sm:$0xff] }
 0x591   : > { %785 = vrot.lane.b32.xlu0 %v2211_v16, %s1986_s11 }
 0x595   : > { %1036 = vrot.lane.b32.xlu0 %v2203_v13, %s1987_s23 }
 0x599   : > { %1331 = vrot.lane.b32.xlu0 %v2214_v17, %s1988_s24  ;;  %v663_v17 = vld [vmem:[%s2391_s4 + $0x8] sm:$0xff] }
 0x59d   : > { %1325 = vrot.lane.b32.xlu0 %v2203_v13, %s1988_s24  ;;  %v664_v13 = vld [vmem:[%s2391_s4 + $0x10] sm:$0xff] }
 0x600   : > { %v776_v7 = vpop.xlane.xlu0 %775 }
 0x601   : > { %1957 = vrcp.f32 %v776_v7 }
 0x604   : > { %v773_v8 = vpop.xlane.xlu0 %772 }
 0x605   : > { %1959 = vrcp.f32 %v773_v8 }
 0x608   : > { %v786_v9 = vpop.permute.xlu0 %785 }
 0x609   : > { %1850 = vmatprep.subr.mxu1 %v786_v9 }
 0x60a   : > { %1851 = vmatpush3.msra.mxu1 %v786_v9 }
 0x60b   : > { %1852 = vmatprep.subr.mxu1 %v784_v62 }
 0x60c   : > { %1853 = vmatpush3.msra.mxu1 %v784_v62  ;;  %v1037_v20 = vpop.permute.xlu0 %1036  ;;  %v1241_v62 = vld [vmem:[%s2391_s4 + $0x58] sm:$0xff] }
 0x60d   : > { %1868 = vmatprep.subr.mxu1 %v665_v10 }
 0x60e   : > { %v1958_v11 = vpop.eup %1957 }
 0x60f   : > { %v780_v15 = vmul.f32 %v1958_v11, %v1954_v3 }
 0x610   : > { %v1332_v24 = vpop.permute.xlu0 %1331 }
 0x612   : > { %v1960_v12 = vpop.eup %1959 }
 0x613   : > { %v779_v14 = vmul.f32 %v1960_v12, %v1956_v5  ;;  %v1239_v5 = vld [vmem:[%s2391_s4 + $0x48] sm:$0xff] }
 0x614   : > { %v1326_v26 = vpop.permute.xlu0 %1325 }
 0x615   : > { %1854 = vmatprep.mubr.msk.f32.mxu1 %vm558_vm1, %v779_v14 }
 0x616   : > { %1855 = vmatmul.mubr.msk.f32.vlgmr.msra.gmra.mxu1 %vm558_vm1, %v780_v15 }
 0x617   : > { %1869 = vmatpush3.msra.mxu1 %v665_v10  ;;  %1876 = vmatprep.mubr.msk.f32.mxu1 %vm468_vm0, %v2253_v46 }
 0x618   : > { %1870 = vmatprep.subr.mxu1 %v664_v13 }
 0x619   : > { %1871 = vmatpush3.msra.mxu1 %v664_v13 }
 0x61a   : > { %1872 = vmatprep.subr.mxu1 %v663_v17 }
 0x61b   : > { %1873 = vmatpush3.msra.mxu1 %v663_v17 }
 0x61c   : > { %1874 = vmatprep.subr.mxu1 %v662_v19 }
 0x61d   : > { %1875 = vmatpush3.msra.mxu1 %v662_v19 }
 0x61e   : > { %1877 = vmatmul.mubr.msk.f32.vlgmr.msra.gmra.mxu1 %vm468_vm0, %v2251_v45 }
 0x6d6   : > { %v1856_v21 = vpop.f32.mrf.mxu1 }
 0x6d8   : > { %v861_v23 = vpop.f32.mrf.mxu1 }
 0x6d9   : > { %1865 = vmatprep.mubr.msk.f32.mxu0 %vm468_vm0, %v861_v23 }
 0x6da   : > { %1866 = vmatmul.mubr.msk.f32.vlgmr.msra.gmra.mxu0 %vm468_vm0, %v1856_v21 }
 0x6db   : > { %1880 = vmatpush3.xpose.msk.msra.mxu0 %vm468_vm0, %v1043_v2  ;;  %1883 = vmatprep.mubr.msk.f32.mxu0 %vm468_vm0, %v1037_v20 }
 0x6dc   : > { %1881 = vmatprep.subr.msk.mxu0 %vm468_vm0, %v1041_v22 }
 0x6de   : > { %v1878_v15 = vpop.f32.mrf.mxu1 }
 0x6df   : > { %1882 = vmatpush3.xpose.msk.msra.mxu0 %vm468_vm0, %v1041_v22 }
 0x6e0   : > { %1904 = vmatprep.subr.msk.mxu0 %vm468_vm0, %v1332_v24  ;;  %v1027_v13 = vpop.f32.mrf.mxu1 }
 0x6e2   : > { %1884 = vmatmul.mubr.msk.f32.vlgmr.msra.gmra.mxu0 %vm468_vm0, %v1039_v25  ;;  %v1530_v25 = vld [vmem:[%s2391_s4 + $0x78] sm:$0xff] }
 0x6e3   : > { %1905 = vmatpush3.xpose.msk.msra.mxu0 %vm468_vm0, %v1332_v24  ;;  %1908 = vmatprep.mubr.msk.f32.mxu0 %vm468_vm0, %v1326_v26  ;;  %v1529_v26 = vld [vmem:[%s2391_s4 + $0x70] sm:$0xff] }
 0x6e4   : > { %1906 = vmatprep.subr.msk.mxu0 %vm468_vm0, %v1330_v27 }
 0x6e7   : > { %1907 = vmatpush3.xpose.msk.msra.mxu0 %vm468_vm0, %v1330_v27  ;;  %v1528_v27 = vld [vmem:[%s2391_s4 + $0x68] sm:$0xff] }
 0x6e8   : > { %1918 = vmatprep.subr.mxu0 %v1530_v25 }
 0x6ea   : > { %1909 = vmatmul.mubr.msk.f32.vlgmr.msra.gmra.mxu0 %vm468_vm0, %v1328_v28  ;;  %v1527_v28 = vld [vmem:[%s2391_s4 + $0x60] sm:$0xff] }
 0x6eb   : > { %1919 = vmatpush3.msra.mxu0 %v1530_v25 }
 0x6ec   : > { %1920 = vmatprep.subr.mxu0 %v1529_v26 }
 0x6ed   : > { %1921 = vmatpush3.msra.mxu0 %v1529_v26 }
 0x6ee   : > { %1922 = vmatprep.subr.mxu0 %v1528_v27 }
 0x6ef   : > { %1923 = vmatpush3.msra.mxu0 %v1528_v27 }
 0x6f0   : > { %1924 = vmatprep.subr.mxu0 %v1527_v28 }
 0x6f1   : > { %1925 = vmatpush3.msra.mxu0 %v1527_v28 }
 0x79a   : > { %v2323_v29 = vpop.f32.mrf.mxu0 }
 0x79c   : > { %v2325_v30 = vpop.f32.mrf.mxu0 }
 0x7a2   : > { %v1885_v31 = vpop.f32.mrf.mxu0 }
 0x7a3   : > { %v1128_v32 = vmul.f32 0.17677669, %v1885_v31  ;;  %v1033_v31 = vadd.f32 %v1878_v15, %v2323_v29 }
 0x7a4   : > { %v1118_v33 = vpop.f32.mrf.mxu0 }
 0x7a5   : > { %v1127_v34 = vmul.f32 0.17677669, %v1118_v33  ;;  %v1132_v35 = vsel %vm558_vm1, %v1128_v32, -inf  ;;  %v1028_v33 = vadd.f32 %v1027_v13, %v2325_v30 }
 0x7a6   : > { %1133 = vmax.xlane.f32.xlu1 %v1132_v35 }
 0x7a7   : > { %v1129_v36 = vsel %vm558_vm1, %v1127_v34, -inf }
 0x7a8   : > { %1130 = vmax.xlane.f32.xlu0 %v1129_v36 }
 0x7aa   : > { %v1910_v37 = vpop.f32.mrf.mxu0 }
 0x7ab   : > { %v1417_v55 = vmul.f32 0.17677669, %v1910_v37 }
 0x7ac   : > { %v1407_v38 = vpop.f32.mrf.mxu0 }
 0x7ad   : > { %v1416_v39 = vmul.f32 0.17677669, %v1407_v38  ;;  %v1421_v56 = vsel %vm558_vm1, %v1417_v55, -inf }
 0x7af   : > { %v1418_v40 = vsel %vm558_vm1, %v1416_v39, -inf }
 0x7b7   : > { %1151 = vrot.lane.b32.xlu1 %v2216_v18, %s1987_s23 }
 0x7db   : > { %1419 = vmax.xlane.f32.xlu1 %v1418_v40 }
 0x82f   : > { %v1134_v41 = vpop.xlane.xlu1 %1133 }
 0x830   : > { %v1136_v42 = vsub.f32 %v1128_v32, %v1134_v41 }
 0x831   : > { %v1131_v43 = vpop.xlane.xlu0 %1130 }
 0x832   : > { %v1139_v44 = vmul.f32 1.442695, %v1136_v42  ;;  %v1135_v45 = vsub.f32 %v1127_v34, %v1131_v43 }
 0x833   : > { %v1152_v51 = vpop.permute.xlu1 %1151 }
 0x834   : > { %1961 = vpow2.f32 %v1139_v44  ;;  %v1137_v46 = vmul.f32 1.442695, %v1135_v45 }
 0x836   : > { %1963 = vpow2.f32 %v1137_v46 }
 0x841   : > { %v1962_v47 = vpop.eup %1961 }
 0x842   : > { %v1144_v48 = vsel %vm558_vm1, %v1962_v47, 0.0 }
 0x843   : > { %v1964_v49 = vpop.eup %1963  ;;  %1145 = vadd.xlane.f32.xlu0 %v1144_v48 }
 0x844   : > { %v1141_v50 = vsel %vm558_vm1, %v1964_v49, 0.0 }
 0x847   : > { %1142 = vadd.xlane.f32.xlu0 %v1141_v50 }
 0x85d   : > { %1153 = vrot.lane.b32.xlu0 %v2211_v16, %s1987_s23 }
 0x864   : > { %v1420_v52 = vpop.xlane.xlu1 %1419 }
 0x865   : > { %v1424_v53 = vsub.f32 %v1416_v39, %v1420_v52 }
 0x867   : > { %v1426_v54 = vmul.f32 1.442695, %v1424_v53 }
 0x869   : > { %1965 = vpow2.f32 %v1426_v54 }
 0x876   : > { %v1966_v57 = vpop.eup %1965 }
 0x877   : > { %v1430_v58 = vsel %vm558_vm1, %v1966_v57, 0.0 }
 0x87c   : > { %1422 = vmax.xlane.f32.xlu0 %v1421_v56 }
 0x880   : > { %1431 = vadd.xlane.f32.xlu0 %v1430_v58 }
 0x896   : > { %1442 = vrot.lane.b32.xlu0 %v2211_v16, %s1988_s24  ;;  %v1240_v16 = vld [vmem:[%s2391_s4 + $0x50] sm:$0xff] }
 0x8cc   : > { %v1146_v59 = vpop.xlane.xlu0 %1145 }
 0x8cd   : > { %1967 = vrcp.f32 %v1146_v59 }
 0x8d0   : > { %v1143_v60 = vpop.xlane.xlu0 %1142 }
 0x8d1   : > { %1969 = vrcp.f32 %v1143_v60 }
 0x8d4   : > { %v1154_v61 = vpop.permute.xlu0 %1153 }
 0x8d5   : > { %1886 = vmatprep.subr.mxu1 %v1154_v61 }
 0x8d6   : > { %1887 = vmatpush3.msra.mxu1 %v1154_v61 }
 0x8d7   : > { %1888 = vmatprep.subr.mxu1 %v1152_v51 }
 0x8d8   : > { %1889 = vmatpush3.msra.mxu1 %v1152_v51 }
 0x8d9   : > { %1893 = vmatprep.subr.mxu1 %v1241_v62 }
 0x8da   : > { %v1968_v63 = vpop.eup %1967 }
 0x8db   : > { %v1150_v4 = vmul.f32 %v1968_v63, %v1962_v47 }
 0x8de   : > { %v1970_v2 = vpop.eup %1969 }
 0x8df   : > { %v1149_v3 = vmul.f32 %v1970_v2, %v1964_v49 }
 0x8e1   : > { %1890 = vmatprep.mubr.msk.f32.mxu1 %vm558_vm1, %v1149_v3 }
 0x8e2   : > { %1891 = vmatmul.mubr.msk.f32.vlgmr.msra.gmra.mxu1 %vm558_vm1, %v1150_v4 }
 0x8e3   : > { %1894 = vmatpush3.msra.mxu1 %v1241_v62 }
 0x8e4   : > { %1895 = vmatprep.subr.mxu1 %v1240_v16 }
 0x8e5   : > { %1896 = vmatpush3.msra.mxu1 %v1240_v16 }
 0x8e6   : > { %1897 = vmatprep.subr.mxu1 %v1239_v5 }
 0x8e7   : > { %1898 = vmatpush3.msra.mxu1 %v1239_v5 }
 0x8e8   : > { %1899 = vmatprep.subr.mxu1 %v1238_v6 }
 0x8e9   : > { %1900 = vmatpush3.msra.mxu1 %v1238_v6 }
 0x905   : > { %v1423_v7 = vpop.xlane.xlu0 %1422 }
 0x906   : > { %v1425_v8 = vsub.f32 %v1417_v55, %v1423_v7 }
 0x908   : > { %v1428_v9 = vmul.f32 1.442695, %v1425_v8 }
 0x909   : > { %v1432_v10 = vpop.xlane.xlu0 %1431 }
 0x90a   : > { %1971 = vpow2.f32 %v1428_v9 }
 0x90b   : > { %1973 = vrcp.f32 %v1432_v10 }
 0x90d   : > { %v1443_v11 = vpop.permute.xlu0 %1442 }
 0x90e   : > { %1911 = vmatprep.subr.mxu1 %v1443_v11 }
 0x917   : > { %v1972_v12 = vpop.eup %1971 }
 0x918   : > { %v1433_v14 = vsel %vm558_vm1, %v1972_v12, 0.0  ;;  %v1974_v17 = vpop.eup %1973 }
 0x919   : > { %1434 = vadd.xlane.f32.xlu1 %v1433_v14  ;;  %v1438_v22 = vmul.f32 %v1974_v17, %v1966_v57 }
 0x92a   : > { %1440 = vrot.lane.b32.xlu1 %v2216_v18, %s1988_s24 }
 0x9a2   : > { %v1892_v19 = vpop.f32.mrf.mxu1  ;;  %v1435_v20 = vpop.xlane.xlu1 %1434 }
 0x9a3   : > { %1975 = vrcp.f32 %v1435_v20 }
 0x9a4   : > { %v1229_v21 = vpop.f32.mrf.mxu1 }
 0x9a5   : > { %1901 = vmatprep.mubr.msk.f32.mxu1 %vm468_vm0, %v1229_v21 }
 0x9a6   : > { %1902 = vmatmul.mubr.msk.f32.vlgmr.msra.gmra.mxu1 %vm468_vm0, %v1892_v19  ;;  %v1441_v23 = vpop.permute.xlu1 %1440 }
 0x9a7   : > { %1912 = vmatpush3.msra.mxu1 %v1443_v11  ;;  %1915 = vmatprep.mubr.msk.f32.mxu1 %vm558_vm1, %v1438_v22 }
 0x9a8   : > { %1913 = vmatprep.subr.mxu1 %v1441_v23 }
 0x9a9   : > { %1914 = vmatpush3.msra.mxu1 %v1441_v23 }
 0x9b0   : > { %v1976_v18 = vpop.eup %1975 }
 0x9b1   : > { %v1439_v24 = vmul.f32 %v1976_v18, %v1972_v12 }
 0x9b3   : > { %1916 = vmatmul.mubr.msk.f32.vlgmr.msra.gmra.mxu1 %vm558_vm1, %v1439_v24 }
 0xa66   : > { %v1903_v32 = vpop.f32.mrf.mxu1 }
 0xa67   : > { %v1324_v34 = vadd.f32 %v1903_v32, %v1033_v31 }
 0xa68   : > { %v1314_v35 = vpop.f32.mrf.mxu1 }
 0xa69   : > { %v1323_v36 = vadd.f32 %v1314_v35, %v1028_v33 }
 0xa73   : > { %v1917_v37 = vpop.f32.mrf.mxu1 }
 0xa75   : > { %v1518_v38 = vpop.f32.mrf.mxu1 }
 0xa76   : > { %1926 = vmatprep.mubr.msk.f32.mxu0 %vm468_vm0, %v1518_v38 }
 0xa77   : > { %1927 = vmatmul.mubr.msk.f32.vlgmr.msra.gmra.mxu0 %vm468_vm0, %v1917_v37 }
 0xb37   : > { %v1928_v39 = vpop.f32.mrf.mxu0 }
 0xb38   : > { %v1613_v40 = vadd.f32 %v1928_v39, %v1324_v34 }
 0xb39   : > { %v1603_v29 = vpop.f32.mrf.mxu0 }
 0xb3a   : > { %v1615_v41 = vadd.f32 %v1613_v40, %v2038_v1  ;;  %v1612_v30 = vadd.f32 %v1603_v29, %v1323_v36 }
 0xb3c   : > { %1617 = vst [vmem:[%s224_s29 + $0x8] sm:$0xff] %v1615_v41  ;;  %v1614_v42 = vadd.f32 %v1612_v30, %v2035_v0 }
 0xb3e   : > { %1616 = vst [vmem:[%s224_s29] sm:$0xff] %v1614_v42 }
 0xb3f PF: > { %s15_s18 = sadd.s32 1, %s1983_s18  }
 0xb40   : > { %p12_p4 = scmp.ge.s32.totalorder %s15_s18, 4  }
 0xb42   :  { %14 = sbr.rel (!%p12_p4) target bundleno = 1 (0x1), region = 70 }

// kernel: vitae_forward.15
= control target key start
LH: loop header
LB: loop body
LE: loop exit
PB: predicated region body
PF: predicated region fallthrough
CT: control target
= control target key end

     0   :  { %v670_v44 = vmov 0.0   ;;  %s1108_s0 = inlined_call_operand.vmem [shape: f32[32,128], index: 0, kind: input, shape index: {}]   ;;  %s1109_s3 = inlined_call_operand.vmem [shape: f32[128,256], index: 3, kind: input, shape index: {}]   ;;  %s1110_s1 = inlined_call_operand.vmem [shape: f32[1,128], index: 1, kind: input, shape index: {}]   ;;  %s1111_s2 = inlined_call_operand.vmem [shape: f32[1,128], index: 2, kind: input, shape index: {}]   ;;  %s1112_s5 = inlined_call_operand.vmem [shape: f32[256,128], index: 5, kind: input, shape index: {}]   ;;  %s1113_s4 = inlined_call_operand.vmem [shape: f32[1,256], index: 4, kind: input, shape index: {}]   ;;  %s1114_s6 = inlined_call_operand.vmem [shape: f32[1,128], index: 6, kind: input, shape index: {}]   ;;  %s1115_s7 = inlined_call_operand.vmem [shape: f32[32,128], index: 7, kind: output, shape index: {}]  }
   0x1   :  { %v714_v0 = vld [vmem:[%s1108_s0] sm:$0xff]  ;;  %v719_v1 = vld [vmem:[%s1108_s0 + $0x10] sm:$0xff]  ;;  %v726_v2 = vld [vmem:[%s1108_s0 + $0x8] sm:$0xff]  ;;  %205 = vmatprep.mubr.f32.mxu0 %v670_v44 }
   0x2   :  { %32 = vadd.xlane.f32.xlu0 %v714_v0  ;;  %36 = vadd.xlane.f32.xlu1 %v719_v1  ;;  %v731_v3 = vld [vmem:[%s1108_s0 + $0x18] sm:$0xff]  ;;  %v127_v5 = vld [vmem:[%s1109_s3 + $0xf0] sm:$0xff]  ;;  %v126_v6 = vld [vmem:[%s1109_s3 + $0xe8] sm:$0xff] }
   0x3   :  { %v128_v4 = vld [vmem:[%s1109_s3 + $0xf8] sm:$0xff]  ;;  %v125_v7 = vld [vmem:[%s1109_s3 + $0xe0] sm:$0xff]  ;;  %v123_v9 = vld [vmem:[%s1109_s3 + $0xd0] sm:$0xff] }
   0x4   :  { %141 = vmatprep.subr.mxu0 %v128_v4  ;;  %v124_v8 = vld [vmem:[%s1109_s3 + $0xd8] sm:$0xff]  ;;  %v122_v10 = vld [vmem:[%s1109_s3 + $0xc8] sm:$0xff]  ;;  %v121_v11 = vld [vmem:[%s1109_s3 + $0xc0] sm:$0xff] }
   0x5   :  { %142 = vmatpush1.msra.mxu0 %v127_v5  ;;  %v120_v28 = vld [vmem:[%s1109_s3 + $0xb8] sm:$0xff]  ;;  %v119_v29 = vld [vmem:[%s1109_s3 + $0xb0] sm:$0xff]  ;;  %v118_v30 = vld [vmem:[%s1109_s3 + $0xa8] sm:$0xff] }
   0x6   :  { %34 = vadd.xlane.f32.xlu0 %v726_v2  ;;  %38 = vadd.xlane.f32.xlu1 %v731_v3  ;;  %v117_v31 = vld [vmem:[%s1109_s3 + $0xa0] sm:$0xff]  ;;  %v116_v32 = vld [vmem:[%s1109_s3 + $0x98] sm:$0xff]  ;;  %v115_v33 = vld [vmem:[%s1109_s3 + $0x90] sm:$0xff] }
   0x7   :  { %143 = vmatprep.subr.mxu0 %v126_v6  ;;  %v114_v34 = vld [vmem:[%s1109_s3 + $0x88] sm:$0xff]  ;;  %v113_v35 = vld [vmem:[%s1109_s3 + $0x80] sm:$0xff]  ;;  %v112_v36 = vld [vmem:[%s1109_s3 + $0x78] sm:$0xff] }
   0x8   :  { %144 = vmatpush1.msra.mxu0 %v125_v7  ;;  %v111_v37 = vld [vmem:[%s1109_s3 + $0x70] sm:$0xff]  ;;  %v110_v38 = vld [vmem:[%s1109_s3 + $0x68] sm:$0xff]  ;;  %v109_v39 = vld [vmem:[%s1109_s3 + $0x60] sm:$0xff] }
   0x9   :  { %145 = vmatprep.subr.mxu0 %v124_v8  ;;  %v108_v40 = vld [vmem:[%s1109_s3 + $0x58] sm:$0xff]  ;;  %v107_v41 = vld [vmem:[%s1109_s3 + $0x50] sm:$0xff]  ;;  %v106_v42 = vld [vmem:[%s1109_s3 + $0x48] sm:$0xff] }
   0xa   :  { %146 = vmatpush1.msra.mxu0 %v123_v9  ;;  %v105_v43 = vld [vmem:[%s1109_s3 + $0x40] sm:$0xff]  ;;  %v104_v45 = vld [vmem:[%s1109_s3 + $0x38] sm:$0xff]  ;;  %v103_v46 = vld [vmem:[%s1109_s3 + $0x30] sm:$0xff] }
   0xb   :  { %147 = vmatprep.subr.mxu0 %v122_v10  ;;  %v102_v47 = vld [vmem:[%s1109_s3 + $0x28] sm:$0xff]  ;;  %v101_v48 = vld [vmem:[%s1109_s3 + $0x20] sm:$0xff]  ;;  %v100_v49 = vld [vmem:[%s1109_s3 + $0x18] sm:$0xff] }
   0xc   :  { %148 = vmatpush1.msra.mxu0 %v121_v11  ;;  %v99_v50 = vld [vmem:[%s1109_s3 + $0x10] sm:$0xff]  ;;  %v98_v51 = vld [vmem:[%s1109_s3 + $0x8] sm:$0xff]  ;;  %v97_v52 = vld [vmem:[%s1109_s3] sm:$0xff] }
   0xd   :  { %149 = vmatprep.subr.mxu0 %v120_v28  ;;  %v582_v6 = vld [vmem:[%s1110_s1] ss:$0 sm:$0xff]  ;;  %v459_v28 = vld [vmem:[%s1112_s5 + $0x68] sm:$0xff] }
   0xe   :  { %150 = vmatpush1.msra.mxu0 %v119_v29  ;;  %v583_v8 = vld [vmem:[%s1111_s2] ss:$0 sm:$0xff] }
   0xf   :  { %151 = vmatprep.subr.mxu0 %v118_v30  ;;  %v474_v29 = vld [vmem:[%s1112_s5 + $0xe0] sm:$0xff] }
  0x10   :  { %152 = vmatpush1.msra.mxu0 %v117_v31  ;;  %v458_v30 = vld [vmem:[%s1112_s5 + $0x60] sm:$0xff]  ;;  %v473_v31 = vld [vmem:[%s1112_s5 + $0xd8] sm:$0xff] }
  0x11   :  { %153 = vmatprep.subr.mxu0 %v116_v32  ;;  %v457_v32 = vld [vmem:[%s1112_s5 + $0x58] sm:$0xff] }
  0x12   :  { %154 = vmatpush1.msra.mxu0 %v115_v33  ;;  %v472_v33 = vld [vmem:[%s1112_s5 + $0xd0] sm:$0xff] }
  0x13   :  { %155 = vmatprep.subr.mxu0 %v114_v34  ;;  %v456_v34 = vld [vmem:[%s1112_s5 + $0x50] sm:$0xff] }
  0x14   :  { %156 = vmatpush1.msra.mxu0 %v113_v35  ;;  %v471_v35 = vld [vmem:[%s1112_s5 + $0xc8] sm:$0xff] }
  0x15   :  { %157 = vmatprep.subr.mxu0 %v112_v36  ;;  %v455_v36 = vld [vmem:[%s1112_s5 + $0x48] sm:$0xff] }
  0x16   :  { %158 = vmatpush1.msra.mxu0 %v111_v37  ;;  %v470_v37 = vld [vmem:[%s1112_s5 + $0xc0] sm:$0xff] }
  0x17   :  { %159 = vmatprep.subr.mxu0 %v110_v38  ;;  %v454_v38 = vld [vmem:[%s1112_s5 + $0x40] sm:$0xff] }
  0x18   :  { %160 = vmatpush1.msra.mxu0 %v109_v39  ;;  %v469_v39 = vld [vmem:[%s1112_s5 + $0xb8] sm:$0xff] }
  0x19   :  { %161 = vmatprep.subr.mxu0 %v108_v40  ;;  %v453_v40 = vld [vmem:[%s1112_s5 + $0x38] sm:$0xff] }
  0x1a   :  { %162 = vmatpush1.msra.mxu0 %v107_v41  ;;  %v468_v41 = vld [vmem:[%s1112_s5 + $0xb0] sm:$0xff] }
  0x1b   :  { %163 = vmatprep.subr.mxu0 %v106_v42  ;;  %v452_v42 = vld [vmem:[%s1112_s5 + $0x30] sm:$0xff] }
  0x1c   :  { %164 = vmatpush1.msra.mxu0 %v105_v43  ;;  %v467_v43 = vld [vmem:[%s1112_s5 + $0xa8] sm:$0xff] }
  0x1d   :  { %165 = vmatprep.subr.mxu0 %v104_v45  ;;  %v466_v45 = vld [vmem:[%s1112_s5 + $0xa0] sm:$0xff] }
  0x1e   :  { %166 = vmatpush1.msra.mxu0 %v103_v46  ;;  %v450_v46 = vld [vmem:[%s1112_s5 + $0x20] sm:$0xff] }
  0x1f   :  { %167 = vmatprep.subr.mxu0 %v102_v47  ;;  %v465_v47 = vld [vmem:[%s1112_s5 + $0x98] sm:$0xff] }
  0x20   :  { %168 = vmatpush1.msra.mxu0 %v101_v48  ;;  %v449_v48 = vld [vmem:[%s1112_s5 + $0x18] sm:$0xff] }
  0x21   :  { %169 = vmatprep.subr.mxu0 %v100_v49  ;;  %v464_v49 = vld [vmem:[%s1112_s5 + $0x90] sm:$0xff] }
  0x22   :  { %170 = vmatpush1.msra.mxu0 %v99_v50  ;;  %v448_v50 = vld [vmem:[%s1112_s5 + $0x10] sm:$0xff] }
  0x23   :  { %171 = vmatprep.subr.mxu0 %v98_v51  ;;  %v463_v51 = vld [vmem:[%s1112_s5 + $0x88] sm:$0xff] }
  0x24   :  { %172 = vmatpush1.msra.mxu0 %v97_v52  ;;  %v447_v52 = vld [vmem:[%s1112_s5 + $0x8] sm:$0xff] }
  0x8b   :  { %v33_v12 = vpop.xlane.xlu0 %32  ;;  %v37_v13 = vpop.xlane.xlu1 %36 }
  0x8c   :  { %v41_v14 = vmul.f32 0.0078125, %v33_v12  ;;  %v43_v15 = vmul.f32 0.0078125, %v37_v13 }
  0x8e   :  { %v760_v16 = vsub.f32 %v714_v0, %v41_v14  ;;  %v763_v17 = vsub.f32 %v719_v1, %v43_v15 }
  0x8f   :  { %v35_v18 = vpop.xlane.xlu0 %34  ;;  %v39_v19 = vpop.xlane.xlu1 %38 }
  0x90   :  { %v42_v20 = vmul.f32 0.0078125, %v35_v18  ;;  %v49_v21 = vmul.f32 %v760_v16, %v760_v16  ;;  %v44_v22 = vmul.f32 0.0078125, %v39_v19  ;;  %v51_v25 = vmul.f32 %v763_v17, %v763_v17 }
  0x92   :  { %v768_v23 = vsub.f32 %v726_v2, %v42_v20  ;;  %53 = vadd.xlane.f32.xlu0 %v49_v21  ;;  %v771_v24 = vsub.f32 %v731_v3, %v44_v22 }
  0x94   :  { %v50_v26 = vmul.f32 %v768_v23, %v768_v23  ;;  %v52_v27 = vmul.f32 %v771_v24, %v771_v24 }
  0x96   :  { %57 = vadd.xlane.f32.xlu0 %v51_v25  ;;  %55 = vadd.xlane.f32.xlu1 %v50_v26  ;;  %v460_v26 = vld [vmem:[%s1112_s5 + $0x70] sm:$0xff] }
  0x9a   :  { %59 = vadd.xlane.f32.xlu1 %v52_v27  ;;  %v475_v27 = vld [vmem:[%s1112_s5 + $0xe8] sm:$0xff] }
 0x11b   :  { %v54_v53 = vpop.xlane.xlu0 %53 }
 0x11c   :  { %v61_v54 = vmul.f32 0.0078125, %v54_v53  ;;  %v462_v53 = vld [vmem:[%s1112_s5 + $0x80] sm:$0xff] }
 0x11e   :  { %v65_v55 = vadd.f32 1e-05, %v61_v54  ;;  %v446_v54 = vld [vmem:[%s1112_s5] sm:$0xff] }
 0x11f   :  { %v56_v56 = vpop.xlane.xlu1 %55  ;;  %v58_v57 = vpop.xlane.xlu0 %57 }
 0x120   :  { %630 = vrsqrt.f32 %v65_v55  ;;  %v62_v58 = vmul.f32 0.0078125, %v56_v56  ;;  %v63_v59 = vmul.f32 0.0078125, %v58_v57  ;;  %v131_v55 = vlaneseq }
 0x122   :  { %v66_v60 = vadd.f32 1e-05, %v62_v58  ;;  %v67_v61 = vadd.f32 1e-05, %v63_v59  ;;  %v132_v56 = vshrl.u32 %v131_v55, 7 }
 0x123   :  { %v60_v62 = vpop.xlane.xlu1 %59  ;;  %v129_v58 = vld [vmem:[%s1113_s4] sm:$0x3] }
 0x124   :  { %632 = vrsqrt.f32 %v66_v60  ;;  %v64_v63 = vmul.f32 0.0078125, %v60_v62  ;;  %v133_v57 = vsub.s32 0, %v132_v56  ;;  %v137_v59 = vsub.s32 1, %v132_v56 }
 0x125   :  { %634 = vrsqrt.f32 %v67_v61 }
 0x126   :  { %v68_v4 = vadd.f32 1e-05, %v64_v63  ;;  %v134_v60 = vrot.slane %v129_v58, %v133_v57  ;;  %v138_v61 = vrot.slane %v129_v58, %v137_v59 }
 0x128   :  { %636 = vrsqrt.f32 %v68_v4 }
 0x12d   :  { %v631_v5 = vpop.eup %630 }
 0x12e   :  { %v73_v7 = vmul.f32 %v631_v5, %v760_v16 }
 0x130   :  { %v83_v9 = vmul.f32 %v582_v6, %v73_v7 }
 0x131   :  { %v633_v10 = vpop.eup %632 }
 0x132   :  { %v635_v11 = vpop.eup %634  ;;  %v93_v12 = vadd.f32 %v583_v8, %v83_v9  ;;  %v74_v13 = vmul.f32 %v633_v10, %v768_v23  ;;  %v461_v23 = vld [vmem:[%s1112_s5 + $0x78] sm:$0xff] }
 0x133   :  { %v75_v14 = vmul.f32 %v635_v11, %v763_v17  ;;  %v477_v17 = vld [vmem:[%s1112_s5 + $0xf8] sm:$0xff] }
 0x134   :  { %206 = vmatmul.mubr.f32.vlgmr.msra.gmra.mxu0 %v93_v12  ;;  %v84_v15 = vmul.f32 %v582_v6, %v74_v13  ;;  %585 = vmatprep.subr.mxu1 %v477_v17 }
 0x135   :  { %v637_v18 = vpop.eup %636  ;;  %211 = vmatprep.mubr.f32.mxu0 %v670_v44  ;;  %v85_v20 = vmul.f32 %v582_v6, %v75_v14  ;;  %586 = vmatpush3.msra.mxu1 %v461_v23 }
 0x136   :  { %v94_v19 = vadd.f32 %v583_v8, %v84_v15  ;;  %v76_v16 = vmul.f32 %v637_v18, %v771_v24  ;;  %v476_v24 = vld [vmem:[%s1112_s5 + $0xf0] sm:$0xff] }
 0x137   :  { %v95_v21 = vadd.f32 %v583_v8, %v85_v20  ;;  %587 = vmatprep.subr.mxu1 %v476_v24 }
 0x138   :  { %212 = vmatmul.mubr.f32.gmra.mxu0 %v94_v19  ;;  %v86_v22 = vmul.f32 %v582_v6, %v76_v16  ;;  %588 = vmatpush3.msra.mxu1 %v460_v26 }
 0x139   :  { %217 = vmatprep.mubr.f32.mxu0 %v670_v44  ;;  %589 = vmatprep.subr.mxu1 %v475_v27 }
 0x13a   :  { %v96_v25 = vadd.f32 %v583_v8, %v86_v22  ;;  %590 = vmatpush3.msra.mxu1 %v459_v28 }
 0x13b   :  { %591 = vmatprep.subr.mxu1 %v474_v29 }
 0x13c   :  { %218 = vmatmul.mubr.f32.gmra.mxu0 %v95_v21  ;;  %592 = vmatpush3.msra.mxu1 %v458_v30 }
 0x13d   :  { %223 = vmatprep.mubr.f32.mxu0 %v670_v44  ;;  %593 = vmatprep.subr.mxu1 %v473_v31  ;;  %v451_v44 = vld [vmem:[%s1112_s5 + $0x28] sm:$0xff] }
 0x13e   :  { %594 = vmatpush3.msra.mxu1 %v457_v32 }
 0x13f   :  { %595 = vmatprep.subr.mxu1 %v472_v33 }
 0x140   :  { %224 = vmatmul.mubr.f32.gmra.mxu0 %v96_v25  ;;  %596 = vmatpush3.msra.mxu1 %v456_v34 }
 0x141   :  { %597 = vmatprep.subr.mxu1 %v471_v35 }
 0x142   :  { %598 = vmatpush3.msra.mxu1 %v455_v36 }
 0x143   :  { %599 = vmatprep.subr.mxu1 %v470_v37 }
 0x144   :  { %600 = vmatpush3.msra.mxu1 %v454_v38 }
 0x145   :  { %601 = vmatprep.subr.mxu1 %v469_v39 }
 0x146   :  { %602 = vmatpush3.msra.mxu1 %v453_v40 }
 0x147   :  { %603 = vmatprep.subr.mxu1 %v468_v41 }
 0x148   :  { %604 = vmatpush3.msra.mxu1 %v452_v42 }
 0x149   :  { %605 = vmatprep.subr.mxu1 %v467_v43 }
 0x14a   :  { %606 = vmatpush3.msra.mxu1 %v451_v44 }
 0x14b   :  { %607 = vmatprep.subr.mxu1 %v466_v45 }
 0x14c   :  { %608 = vmatpush3.msra.mxu1 %v450_v46 }
 0x14d   :  { %609 = vmatprep.subr.mxu1 %v465_v47 }
 0x14e   :  { %610 = vmatpush3.msra.mxu1 %v449_v48 }
 0x14f   :  { %611 = vmatprep.subr.mxu1 %v464_v49 }
 0x150   :  { %612 = vmatpush3.msra.mxu1 %v448_v50 }
 0x151   :  { %613 = vmatprep.subr.mxu1 %v463_v51 }
 0x152   :  { %614 = vmatpush3.msra.mxu1 %v447_v52 }
 0x153   :  { %615 = vmatprep.subr.mxu1 %v462_v53 }
 0x154   :  { %616 = vmatpush3.msra.mxu1 %v446_v54 }
 0x1f4   :  { %v207_v62 = vpop.f32.mrf.mxu0 }
 0x1f5   :  { %v960_v63 = vadd.f32 %v207_v62, %v134_v60 }
 0x1f6   :  { %v209_v4 = vpop.f32.mrf.mxu0 }
 0x1f7   :  { %v963_v5 = vmul.f32 0.70710677, %v960_v63  ;;  %v965_v6 = vadd.f32 %v209_v4, %v138_v61 }
 0x1f8   :  { %v213_v7 = vpop.f32.mrf.mxu0 }
 0x1f9   :  { %v246_v8 = vand.u32 2147483647, %v963_v5  ;;  %v969_v9 = vmul.f32 0.70710677, %v965_v6  ;;  %v971_v10 = vadd.f32 %v213_v7, %v134_v60  ;;  %vm406_vm0 = vcmp.ge.f32.partialorder %v963_v5, 0.0 }
 0x1fa   :  { %v215_v11 = vpop.f32.mrf.mxu0 }
 0x1fb   :  { %v254_v12 = vmul.f32 0.3275911, %v246_v8  ;;  %v247_v13 = vand.u32 2147483647, %v969_v9  ;;  %v975_v14 = vmul.f32 0.70710677, %v971_v10  ;;  %v977_v15 = vadd.f32 %v215_v11, %v138_v61 }
 0x1fc   :  { %v219_v18 = vpop.f32.mrf.mxu0  ;;  %v358_v30 = vsub.f32 0.0, %v246_v8  ;;  %vm407_vm1 = vcmp.ge.f32.partialorder %v969_v9, 0.0 }
 0x1fd   :  { %v262_v19 = vadd.f32 1.0, %v254_v12  ;;  %v255_v20 = vmul.f32 0.3275911, %v247_v13  ;;  %v248_v16 = vand.u32 2147483647, %v975_v14  ;;  %v984_v26 = vadd.f32 %v219_v18, %v134_v60 }
 0x1fe   :  { %v981_v21 = vmul.f32 0.70710677, %v977_v15  ;;  %v221_v22 = vpop.f32.mrf.mxu0  ;;  %v366_v37 = vmul.f32 %v358_v30, %v246_v8  ;;  %v359_v40 = vsub.f32 0.0, %v247_v13  ;;  %vm408_vm2 = vcmp.ge.f32.partialorder %v975_v14, 0.0 }
 0x1ff   :  { %638 = vrcp.f32 %v262_v19  ;;  %v263_v25 = vadd.f32 1.0, %v255_v20  ;;  %v256_v17 = vmul.f32 0.3275911, %v248_v16  ;;  %v986_v27 = vadd.f32 %v221_v22, %v138_v61 }
 0x200   :  { %v249_v23 = vand.u32 2147483647, %v981_v21  ;;  %v225_v24 = vpop.f32.mrf.mxu0  ;;  %v989_v31 = vmul.f32 0.70710677, %v984_v26  ;;  %v360_v44 = vsub.f32 0.0, %v248_v16  ;;  %v367_v50 = vmul.f32 %v359_v40, %v247_v13 }
 0x201   :  { %640 = vrcp.f32 %v263_v25  ;;  %v264_v28 = vadd.f32 1.0, %v256_v17  ;;  %v993_v35 = vmul.f32 0.70710677, %v986_v27  ;;  %v995_v36 = vadd.f32 %v225_v24, %v134_v60 }
 0x202   :  { %v257_v29 = vmul.f32 0.3275911, %v249_v23  ;;  %v227_v33 = vpop.f32.mrf.mxu0  ;;  %v250_v34 = vand.u32 2147483647, %v989_v31  ;;  %v374_v47 = vmul.f32 1.442695, %v366_v37  ;;  %v368_v56 = vmul.f32 %v360_v44, %v248_v16 }
 0x203   :  { %642 = vrcp.f32 %v264_v28  ;;  %v997_v39 = vadd.f32 %v227_v33, %v138_v61  ;;  %v251_v41 = vand.u32 2147483647, %v993_v35  ;;  %v1001_v42 = vmul.f32 0.70710677, %v995_v36 }
 0x204   :  { %v265_v32 = vadd.f32 1.0, %v257_v29  ;;  %v258_v38 = vmul.f32 0.3275911, %v250_v34  ;;  %v361_v51 = vsub.f32 0.0, %v249_v23  ;;  %v362_v59 = vsub.f32 0.0, %v250_v34 }
 0x205   :  { %v259_v45 = vmul.f32 0.3275911, %v251_v41  ;;  %v252_v46 = vand.u32 2147483647, %v1001_v42  ;;  %v1005_v48 = vmul.f32 0.70710677, %v997_v39 }
 0x206   :  { %644 = vrcp.f32 %v265_v32  ;;  %v266_v43 = vadd.f32 1.0, %v258_v38  ;;  %v376_v62 = vmul.f32 1.442695, %v367_v50  ;;  %v369_v4 = vmul.f32 %v361_v51, %v249_v23 }
 0x207   :  { %v267_v52 = vadd.f32 1.0, %v259_v45  ;;  %v260_v53 = vmul.f32 0.3275911, %v252_v46  ;;  %v253_v54 = vand.u32 2147483647, %v1005_v48  ;;  %v363_v11 = vsub.f32 0.0, %v251_v41 }
 0x208   :  { %646 = vrcp.f32 %v266_v43  ;;  %v378_v18 = vmul.f32 1.442695, %v368_v56  ;;  %v370_v16 = vmul.f32 %v362_v59, %v250_v34  ;;  %v380_v17 = vmul.f32 1.442695, %v369_v4 }
 0x209   :  { %648 = vrcp.f32 %v267_v52  ;;  %v268_v57 = vadd.f32 1.0, %v260_v53  ;;  %v261_v60 = vmul.f32 0.3275911, %v253_v54  ;;  %v371_v28 = vmul.f32 %v363_v11, %v251_v41 }
 0x20a   :  { %650 = vpow2.f32 %v374_v47  ;;  %v364_v32 = vsub.f32 0.0, %v252_v46  ;;  %v382_v34 = vmul.f32 1.442695, %v370_v16  ;;  %v365_v44 = vsub.f32 0.0, %v253_v54 }
 0x20b   :  { %652 = vrcp.f32 %v268_v57  ;;  %v269_v12 = vadd.f32 1.0, %v261_v60  ;;  %v384_v41 = vmul.f32 1.442695, %v371_v28  ;;  %vm409_vm3 = vcmp.ge.f32.partialorder %v981_v21, 0.0 }
 0x20c   :  { %v1007_v49 = vpop.eup %638  ;;  %v372_v53 = vmul.f32 %v364_v32, %v252_v46  ;;  %v373_v4 = vmul.f32 %v365_v44, %v253_v54  ;;  %vm410_vm4 = vcmp.ge.f32.partialorder %v989_v31, 0.0  ;;  %vm411_vm5 = vcmp.ge.f32.partialorder %v993_v35, 0.0 }
 0x20d   :  { %v286_v55 = vmul.f32 1.0614054, %v1007_v49  ;;  %654 = vrcp.f32 %v269_v12  ;;  %vm412_vm6 = vcmp.ge.f32.partialorder %v1001_v42, 0.0  ;;  %vm413_vm7 = vcmp.ge.f32.partialorder %v1005_v48, 0.0  ;;  %v584_v42 = vld [vmem:[%s1114_s6] ss:$0 sm:$0xff] }
 0x20e   :  { %v1011_v58 = vpop.eup %640  ;;  %656 = vpow2.f32 %v376_v62 }
 0x20f   :  { %v294_v61 = vadd.f32 -1.4531521, %v286_v55  ;;  %v287_v7 = vmul.f32 1.0614054, %v1011_v58  ;;  %658 = vpow2.f32 %v378_v18  ;;  %v1031_v55 = vmul.f32 0.5, %v965_v6 }
 0x210   :  { %v1014_v8 = vpop.eup %642  ;;  %660 = vpow2.f32 %v380_v17 }
 0x211   :  { %v302_v13 = vmul.f32 %v1007_v49, %v294_v61  ;;  %v295_v19 = vadd.f32 -1.4531521, %v287_v7  ;;  %v288_v20 = vmul.f32 1.0614054, %v1014_v8  ;;  %662 = vpow2.f32 %v382_v34 }
 0x212   :  { %664 = vpow2.f32 %v384_v41 }
 0x213   :  { %v310_v22 = vadd.f32 1.4214138, %v302_v13  ;;  %v1018_v25 = vpop.eup %644  ;;  %v303_v23 = vmul.f32 %v1011_v58, %v295_v19  ;;  %v296_v24 = vadd.f32 -1.4531521, %v288_v20  ;;  %v386_v20 = vmul.f32 1.442695, %v372_v53 }
 0x214   :  { %v289_v30 = vmul.f32 1.0614054, %v1018_v25 }
 0x215   :  { %v318_v29 = vmul.f32 %v1007_v49, %v310_v22  ;;  %v311_v33 = vadd.f32 1.4214138, %v303_v23  ;;  %v304_v37 = vmul.f32 %v1014_v8, %v296_v24  ;;  %v1024_v43 = vpop.eup %646  ;;  %666 = vpow2.f32 %v386_v20 }
 0x216   :  { %v297_v40 = vadd.f32 -1.4531521, %v289_v30  ;;  %v290_v52 = vmul.f32 1.0614054, %v1024_v43  ;;  %v1034_v59 = vpop.eup %648 }
 0x217   :  { %v326_v38 = vadd.f32 -0.28449672, %v318_v29  ;;  %v319_v45 = vmul.f32 %v1011_v58, %v311_v33  ;;  %v312_v47 = vadd.f32 1.4214138, %v304_v37  ;;  %v291_v46 = vmul.f32 1.0614054, %v1034_v59  ;;  %v651_v12 = vpop.eup %650 }
 0x218   :  { %v305_v51 = vmul.f32 %v1018_v25, %v297_v40  ;;  %v298_v62 = vadd.f32 -1.4531521, %v290_v52  ;;  %v1042_v19 = vpop.eup %652 }
 0x219   :  { %v334_v50 = vmul.f32 %v1007_v49, %v326_v38  ;;  %v327_v56 = vadd.f32 -0.28449672, %v319_v45  ;;  %v320_v57 = vmul.f32 %v1014_v8, %v312_v47  ;;  %v299_v54 = vadd.f32 -1.4531521, %v291_v46 }
 0x21a   :  { %v313_v61 = vadd.f32 1.4214138, %v305_v51  ;;  %v306_v18 = vmul.f32 %v1024_v43, %v298_v62  ;;  %v292_v28 = vmul.f32 1.0614054, %v1042_v19  ;;  %v1047_v29 = vpop.eup %654 }
 0x21b   :  { %v342_v60 = vadd.f32 0.2548296, %v334_v50  ;;  %v335_v7 = vmul.f32 %v1011_v58, %v327_v56  ;;  %v328_v11 = vadd.f32 -0.28449672, %v320_v57  ;;  %v307_v33 = vmul.f32 %v1034_v59, %v299_v54  ;;  %v657_v37 = vpop.eup %656 }
 0x21c   :  { %v321_v13 = vmul.f32 %v1018_v25, %v313_v61  ;;  %v314_v24 = vadd.f32 1.4214138, %v306_v18  ;;  %v293_v44 = vmul.f32 1.0614054, %v1047_v29  ;;  %v300_v50 = vadd.f32 -1.4531521, %v292_v28  ;;  %v659_v51 = vpop.eup %658 }
 0x21d   :  { %v350_v6 = vmul.f32 %v1007_v49, %v342_v60  ;;  %v343_v16 = vadd.f32 0.2548296, %v335_v7  ;;  %v336_v22 = vmul.f32 %v1014_v8, %v328_v11  ;;  %v388_v49 = vmul.f32 1.442695, %v373_v4  ;;  %v661_v62 = vpop.eup %660 }
 0x21e   :  { %v329_v23 = vadd.f32 -0.28449672, %v321_v13  ;;  %v322_v40 = vmul.f32 %v1024_v43, %v314_v24  ;;  %v315_v41 = vadd.f32 1.4214138, %v307_v33  ;;  %v301_v61 = vadd.f32 -1.4531521, %v293_v44 }
 0x21f   :  { %v390_v17 = vmul.f32 %v651_v12, %v350_v6  ;;  %v351_v30 = vmul.f32 %v1011_v58, %v343_v16  ;;  %v344_v32 = vadd.f32 0.2548296, %v336_v22  ;;  %v308_v11 = vmul.f32 %v1042_v19, %v300_v50  ;;  %v663_v22 = vpop.eup %662 }
 0x220   :  { %v337_v38 = vmul.f32 %v1018_v25, %v329_v23  ;;  %v330_v53 = vadd.f32 -0.28449672, %v322_v40  ;;  %v323_v60 = vmul.f32 %v1034_v59, %v315_v41  ;;  %668 = vpow2.f32 %v388_v49 }
 0x221   :  { %v398_v34 = vsub.f32 1.0, %v390_v17  ;;  %v391_v45 = vmul.f32 %v657_v37, %v351_v30  ;;  %v352_v47 = vmul.f32 %v1014_v8, %v344_v32  ;;  %v309_v20 = vmul.f32 %v1047_v29, %v301_v61  ;;  %v665_v30 = vpop.eup %664 }
 0x222   :  { %v345_v52 = vadd.f32 0.2548296, %v337_v38  ;;  %v338_v8 = vmul.f32 %v1024_v43, %v330_v53  ;;  %v331_v6 = vadd.f32 -0.28449672, %v323_v60  ;;  %v316_v16 = vadd.f32 1.4214138, %v308_v11  ;;  %v667_v53 = vpop.eup %666 }
 0x223   :  { %v414_v58 = vsub.f32 0.0, %v398_v34  ;;  %v399_v56 = vsub.f32 1.0, %v391_v45  ;;  %v392_v57 = vmul.f32 %v659_v51, %v352_v47  ;;  %v317_v49 = vadd.f32 1.4214138, %v309_v20 }
 0x224   :  { %v353_v7 = vmul.f32 %v1018_v25, %v345_v52  ;;  %v346_v18 = vadd.f32 0.2548296, %v338_v8  ;;  %v339_v25 = vmul.f32 %v1034_v59, %v331_v6  ;;  %v230_v32 = vmul.f32 0.5, %v960_v63 }
 0x225   :  { %v422_v4 = vsel %vm406_vm0, %v398_v34, %v414_v58  ;;  %v415_v46 = vsub.f32 0.0, %v399_v56  ;;  %v400_v12 = vsub.f32 1.0, %v392_v57  ;;  %v324_v34 = vmul.f32 %v1042_v19, %v316_v16 }
 0x226   :  { %v393_v13 = vmul.f32 %v661_v62, %v353_v7  ;;  %v430_v54 = vadd.f32 1.0, %v422_v4  ;;  %v354_v28 = vmul.f32 %v1024_v43, %v346_v18  ;;  %v347_v37 = vadd.f32 0.2548296, %v339_v25 }
 0x227   :  { %v423_v5 = vsel %vm407_vm1, %v399_v56, %v415_v46  ;;  %v416_v17 = vsub.f32 0.0, %v400_v12  ;;  %v325_v43 = vmul.f32 %v1047_v29, %v317_v49  ;;  %v332_v47 = vadd.f32 -0.28449672, %v324_v34 }
 0x228   :  { %v431_v23 = vadd.f32 1.0, %v423_v5  ;;  %v401_v24 = vsub.f32 1.0, %v393_v13  ;;  %v394_v40 = vmul.f32 %v663_v22, %v354_v28  ;;  %v438_v44 = vmul.f32 %v430_v54, %v230_v32 }
 0x229   :  { %v424_v33 = vsel %vm408_vm2, %v400_v12, %v416_v17  ;;  %v355_v45 = vmul.f32 %v1034_v59, %v347_v37  ;;  %v233_v63 = vmul.f32 0.5, %v977_v15  ;;  %v333_v21 = vadd.f32 -0.28449672, %v325_v43 }
 0x22a   :  { %v439_v9 = vmul.f32 %v431_v23, %v1031_v55  ;;  %v417_v38 = vsub.f32 0.0, %v401_v24  ;;  %v432_v41 = vadd.f32 1.0, %v424_v33  ;;  %v402_v50 = vsub.f32 1.0, %v394_v40 }
 0x22b   :  { %v395_v58 = vmul.f32 %v665_v30, %v355_v45  ;;  %v340_v55 = vmul.f32 %v1042_v19, %v332_v47  ;;  %v232_v52 = vmul.f32 0.5, %v971_v10  ;;  %v341_v15 = vmul.f32 %v1047_v29, %v333_v21 }
 0x22c   :  { %549 = vmatprep.mubr.f32.mxu1 %v439_v9  ;;  %v425_v14 = vsel %vm409_vm3, %v401_v24, %v417_v38  ;;  %v418_v59 = vsub.f32 0.0, %v402_v50  ;;  %v235_v6 = vmul.f32 0.5, %v986_v27  ;;  %v234_v18 = vmul.f32 0.5, %v984_v26 }
 0x22d   :  { %550 = vmatmul.mubr.f32.vlgmr.msra.gmra.mxu1 %v438_v44  ;;  %v433_v51 = vadd.f32 1.0, %v425_v14  ;;  %v403_v57 = vsub.f32 1.0, %v395_v58  ;;  %v348_v60 = vadd.f32 0.2548296, %v340_v55  ;;  %v440_v61 = vmul.f32 %v432_v41, %v232_v52  ;;  %v669_v11 = vpop.eup %668 }
 0x22e   :  { %v426_v62 = vsel %vm410_vm4, %v402_v50, %v418_v59  ;;  %v349_v7 = vadd.f32 0.2548296, %v341_v15  ;;  %v237_v27 = vmul.f32 0.5, %v997_v39  ;;  %v236_v26 = vmul.f32 0.5, %v995_v36 }
 0x22f   :  { %v441_v56 = vmul.f32 %v433_v51, %v233_v63  ;;  %v419_v4 = vsub.f32 0.0, %v403_v57  ;;  %v356_v8 = vmul.f32 %v1042_v19, %v348_v60  ;;  %v434_v31 = vadd.f32 1.0, %v426_v62 }
 0x230   :  { %v357_v46 = vmul.f32 %v1047_v29, %v349_v7 }
 0x231   :  { %554 = vmatprep.mubr.f32.mxu1 %v441_v56  ;;  %v427_v10 = vsel %vm411_vm5, %v403_v57, %v419_v4  ;;  %v396_v12 = vmul.f32 %v667_v53, %v356_v8  ;;  %v442_v5 = vmul.f32 %v434_v31, %v234_v18 }
 0x232   :  { %555 = vmatmul.mubr.f32.gmra.mxu1 %v440_v61  ;;  %v435_v13 = vadd.f32 1.0, %v427_v10  ;;  %v397_v20 = vmul.f32 %v669_v11, %v357_v46 }
 0x233   :  { %v404_v16 = vsub.f32 1.0, %v396_v12 }
 0x234   :  { %v443_v22 = vmul.f32 %v435_v13, %v235_v6  ;;  %v405_v54 = vsub.f32 1.0, %v397_v20 }
 0x235   :  { %v420_v19 = vsub.f32 0.0, %v404_v16 }
 0x236   :  { %559 = vmatprep.mubr.f32.mxu1 %v443_v22  ;;  %v421_v35 = vsub.f32 0.0, %v405_v54 }
 0x237   :  { %560 = vmatmul.mubr.f32.gmra.mxu1 %v442_v5  ;;  %v428_v17 = vsel %vm412_vm6, %v404_v16, %v420_v19 }
 0x238   :  { %v429_v29 = vsel %vm413_vm7, %v405_v54, %v421_v35  ;;  %v436_v25 = vadd.f32 1.0, %v428_v17 }
 0x239   :  { %v437_v23 = vadd.f32 1.0, %v429_v29 }
 0x23a   :  { %v444_v28 = vmul.f32 %v436_v25, %v236_v26 }
 0x23b   :  { %v445_v24 = vmul.f32 %v437_v23, %v237_v27 }
 0x23d   :  { %564 = vmatprep.mubr.f32.mxu1 %v445_v24 }
 0x23e   :  { %565 = vmatmul.mubr.f32.gmra.mxu1 %v444_v28 }
 0x2ed   :  { %v617_v49 = vpop.f32.mrf.mxu1 }
 0x2ef   :  { %v618_v30 = vpop.f32.mrf.mxu1 }
 0x2f0   :  { %v619_v32 = vadd.f32 %v618_v30, %v617_v49 }
 0x2f2   :  { %v552_v33 = vadd.f32 %v619_v32, %v584_v42  ;;  %v620_v48 = vpop.f32.mrf.mxu1 }
 0x2f4   :  { %v570_v37 = vadd.f32 %v552_v33, %v714_v0  ;;  %v621_v34 = vpop.f32.mrf.mxu1 }
 0x2f5   :  { %v622_v39 = vadd.f32 %v621_v34, %v620_v48 }
 0x2f6   :  { %574 = vst [vmem:[%s1115_s7] sm:$0xff] %v570_v37 }
 0x2f7   :  { %v557_v36 = vadd.f32 %v622_v39, %v584_v42  ;;  %v623_v38 = vpop.f32.mrf.mxu1 }
 0x2f9   :  { %v571_v9 = vadd.f32 %v557_v36, %v726_v2  ;;  %v624_v40 = vpop.f32.mrf.mxu1 }
 0x2fa   :  { %v625_v44 = vadd.f32 %v624_v40, %v623_v38 }
 0x2fb   :  { %575 = vst [vmem:[%s1115_s7 + $0x8] sm:$0xff] %v571_v9 }
 0x2fc   :  { %v562_v45 = vadd.f32 %v625_v44, %v584_v42 }
 0x2fe   :  { %v572_v43 = vadd.f32 %v562_v45, %v719_v1  ;;  %v626_v0 = vpop.f32.mrf.mxu1 }
 0x300   :  { %576 = vst [vmem:[%s1115_s7 + $0x10] sm:$0xff] %v572_v43  ;;  %v627_v47 = vpop.f32.mrf.mxu1 }
 0x301   :  { %v628_v63 = vadd.f32 %v627_v47, %v626_v0 }
 0x303   :  { %v567_v14 = vadd.f32 %v628_v63, %v584_v42 }
 0x305   :  { %v573_v2 = vadd.f32 %v567_v14, %v731_v3 }
 0x307   :  { %577 = vst [vmem:[%s1115_s7 + $0x18] sm:$0xff] %v573_v2 }

// kernel: vitae_forward.18
= control target key start
LH: loop header
LB: loop body
LE: loop exit
PB: predicated region body
PF: predicated region fallthrough
CT: control target
= control target key end

     0   :  { %s153_s0 = inlined_call_operand.vmem [shape: f32[32,128], index: 0, kind: input, shape index: {}]   ;;  %s154_s1 = inlined_call_operand.vmem [shape: f32[1,128], index: 1, kind: input, shape index: {}]   ;;  %s155_s2 = inlined_call_operand.vmem [shape: f32[1,128], index: 2, kind: input, shape index: {}]   ;;  %s156_s3 = inlined_call_operand.vmem [shape: f32[32,128], index: 3, kind: output, shape index: {}]  }
   0x1   :  { %v14_v0 = vld [vmem:[%s153_s0] sm:$0xff]  ;;  %v16_v1 = vld [vmem:[%s153_s0 + $0x10] sm:$0xff]  ;;  %v15_v2 = vld [vmem:[%s153_s0 + $0x8] sm:$0xff] }
   0x2   :  { %20 = vadd.xlane.f32.xlu0 %v14_v0  ;;  %24 = vadd.xlane.f32.xlu1 %v16_v1  ;;  %v17_v3 = vld [vmem:[%s153_s0 + $0x18] sm:$0xff]  ;;  %v93_v33 = vld [vmem:[%s154_s1] ss:$0 sm:$0xff] }
   0x3   :  { %v94_v35 = vld [vmem:[%s155_s2] ss:$0 sm:$0xff] }
   0x6   :  { %22 = vadd.xlane.f32.xlu0 %v15_v2  ;;  %26 = vadd.xlane.f32.xlu1 %v17_v3 }
  0x8b   :  { %v21_v4 = vpop.xlane.xlu0 %20  ;;  %v25_v5 = vpop.xlane.xlu1 %24 }
  0x8c   :  { %v29_v6 = vmul.f32 0.0078125, %v21_v4  ;;  %v31_v7 = vmul.f32 0.0078125, %v25_v5 }
  0x8e   :  { %v33_v8 = vsub.f32 %v14_v0, %v29_v6  ;;  %v35_v9 = vsub.f32 %v16_v1, %v31_v7 }
  0x8f   :  { %v23_v10 = vpop.xlane.xlu0 %22  ;;  %v27_v11 = vpop.xlane.xlu1 %26 }
  0x90   :  { %v30_v12 = vmul.f32 0.0078125, %v23_v10  ;;  %v37_v13 = vmul.f32 %v33_v8, %v33_v8  ;;  %v32_v14 = vmul.f32 0.0078125, %v27_v11  ;;  %v39_v17 = vmul.f32 %v35_v9, %v35_v9 }
  0x92   :  { %v34_v15 = vsub.f32 %v15_v2, %v30_v12  ;;  %41 = vadd.xlane.f32.xlu0 %v37_v13  ;;  %v36_v16 = vsub.f32 %v17_v3, %v32_v14 }
  0x94   :  { %v38_v18 = vmul.f32 %v34_v15, %v34_v15  ;;  %v40_v19 = vmul.f32 %v36_v16, %v36_v16 }
  0x96   :  { %45 = vadd.xlane.f32.xlu0 %v39_v17  ;;  %43 = vadd.xlane.f32.xlu1 %v38_v18 }
  0x9a   :  { %47 = vadd.xlane.f32.xlu1 %v40_v19 }
 0x11b   :  { %v42_v20 = vpop.xlane.xlu0 %41 }
 0x11c   :  { %v49_v21 = vmul.f32 0.0078125, %v42_v20 }
 0x11e   :  { %v53_v22 = vadd.f32 1e-05, %v49_v21 }
 0x11f   :  { %v44_v23 = vpop.xlane.xlu1 %43  ;;  %v46_v24 = vpop.xlane.xlu0 %45 }
 0x120   :  { %95 = vrsqrt.f32 %v53_v22  ;;  %v50_v25 = vmul.f32 0.0078125, %v44_v23  ;;  %v51_v26 = vmul.f32 0.0078125, %v46_v24 }
 0x122   :  { %v54_v27 = vadd.f32 1e-05, %v50_v25  ;;  %v55_v28 = vadd.f32 1e-05, %v51_v26 }
 0x123   :  { %v48_v29 = vpop.xlane.xlu1 %47 }
 0x124   :  { %97 = vrsqrt.f32 %v54_v27  ;;  %v52_v30 = vmul.f32 0.0078125, %v48_v29 }
 0x125   :  { %99 = vrsqrt.f32 %v55_v28 }
 0x126   :  { %v56_v31 = vadd.f32 1e-05, %v52_v30 }
 0x128   :  { %101 = vrsqrt.f32 %v56_v31 }
 0x12d   :  { %v96_v32 = vpop.eup %95 }
 0x12e   :  { %v61_v34 = vmul.f32 %v96_v32, %v33_v8 }
 0x130   :  { %v71_v36 = vmul.f32 %v93_v33, %v61_v34 }
 0x131   :  { %v98_v37 = vpop.eup %97 }
 0x132   :  { %v100_v38 = vpop.eup %99  ;;  %v81_v39 = vadd.f32 %v94_v35, %v71_v36  ;;  %v62_v40 = vmul.f32 %v98_v37, %v34_v15 }
 0x133   :  { %v63_v41 = vmul.f32 %v100_v38, %v35_v9 }
 0x134   :  { %85 = vst [vmem:[%s156_s3] sm:$0xff] %v81_v39  ;;  %v72_v42 = vmul.f32 %v93_v33, %v62_v40 }
 0x135   :  { %v102_v43 = vpop.eup %101  ;;  %v73_v44 = vmul.f32 %v93_v33, %v63_v41 }
 0x136   :  { %v82_v45 = vadd.f32 %v94_v35, %v72_v42  ;;  %v64_v46 = vmul.f32 %v102_v43, %v36_v16 }
 0x137   :  { %v83_v47 = vadd.f32 %v94_v35, %v73_v44 }
 0x138   :  { %86 = vst [vmem:[%s156_s3 + $0x8] sm:$0xff] %v82_v45  ;;  %v74_v48 = vmul.f32 %v93_v33, %v64_v46 }
 0x139   :  { %87 = vst [vmem:[%s156_s3 + $0x10] sm:$0xff] %v83_v47 }
 0x13a   :  { %v84_v49 = vadd.f32 %v94_v35, %v74_v48 }
 0x13c   :  { %88 = vst [vmem:[%s156_s3 + $0x18] sm:$0xff] %v84_v49 }

// kernel: vitae_forward.24
= control target key start
LH: loop header
LB: loop body
LE: loop exit
PB: predicated region body
PF: predicated region fallthrough
CT: control target
= control target key end

     0   :  { %v398_v52 = vmov 0.0   ;;  %s616_s0 = inlined_call_operand.vmem [shape: f32[32,128], index: 0, kind: input, shape index: {}]   ;;  %s617_s3 = inlined_call_operand.vmem [shape: f32[128,256], index: 3, kind: input, shape index: {}]   ;;  %s618_s1 = inlined_call_operand.vmem [shape: f32[1,128], index: 1, kind: input, shape index: {}]   ;;  %s619_s2 = inlined_call_operand.vmem [shape: f32[1,128], index: 2, kind: input, shape index: {}]   ;;  %s620_s4 = inlined_call_operand.vmem [shape: f32[1,256], index: 4, kind: input, shape index: {}]   ;;  %s621_s5 = inlined_call_operand.vmem [shape: f32[1,256], index: 5, kind: input, shape index: {}]   ;;  %s622_s6 = inlined_call_operand.vmem [shape: f32[1,256], index: 6, kind: input, shape index: {}]   ;;  %s623_s7 = inlined_call_operand.vmem [shape: f32[32,256], index: 7, kind: output, shape index: {}]  }
   0x1   :  { %v26_v0 = vld [vmem:[%s616_s0] sm:$0xff]  ;;  %v27_v1 = vld [vmem:[%s616_s0 + $0x8] sm:$0xff]  ;;  %v28_v2 = vld [vmem:[%s616_s0 + $0x10] sm:$0xff]  ;;  %205 = vmatprep.mubr.f32.mxu0 %v398_v52  ;;  %217 = vmatprep.mubr.f32.mxu1 %v398_v52 }
   0x2   :  { %32 = vadd.xlane.f32.xlu0 %v26_v0  ;;  %34 = vadd.xlane.f32.xlu1 %v27_v1  ;;  %v29_v3 = vld [vmem:[%s616_s0 + $0x18] sm:$0xff]  ;;  %v127_v5 = vld [vmem:[%s617_s3 + $0xf0] sm:$0xff]  ;;  %v126_v6 = vld [vmem:[%s617_s3 + $0xe8] sm:$0xff] }
   0x3   :  { %v128_v4 = vld [vmem:[%s617_s3 + $0xf8] sm:$0xff]  ;;  %v125_v7 = vld [vmem:[%s617_s3 + $0xe0] sm:$0xff]  ;;  %v123_v9 = vld [vmem:[%s617_s3 + $0xd0] sm:$0xff] }
   0x4   :  { %141 = vmatprep.subr.mxu0 %v128_v4  ;;  %349 = vmatprep.subr.mxu1 %v128_v4  ;;  %v124_v8 = vld [vmem:[%s617_s3 + $0xd8] sm:$0xff]  ;;  %v122_v10 = vld [vmem:[%s617_s3 + $0xc8] sm:$0xff]  ;;  %v121_v11 = vld [vmem:[%s617_s3 + $0xc0] sm:$0xff] }
   0x5   :  { %142 = vmatpush1.msra.mxu0 %v127_v5  ;;  %365 = vmatpush1.msra.mxu1 %v127_v5  ;;  %v120_v28 = vld [vmem:[%s617_s3 + $0xb8] sm:$0xff]  ;;  %v119_v29 = vld [vmem:[%s617_s3 + $0xb0] sm:$0xff]  ;;  %v118_v30 = vld [vmem:[%s617_s3 + $0xa8] sm:$0xff] }
   0x6   :  { %36 = vadd.xlane.f32.xlu0 %v28_v2  ;;  %38 = vadd.xlane.f32.xlu1 %v29_v3  ;;  %v117_v31 = vld [vmem:[%s617_s3 + $0xa0] sm:$0xff]  ;;  %v116_v32 = vld [vmem:[%s617_s3 + $0x98] sm:$0xff]  ;;  %v115_v33 = vld [vmem:[%s617_s3 + $0x90] sm:$0xff] }
   0x7   :  { %143 = vmatprep.subr.mxu0 %v126_v6  ;;  %350 = vmatprep.subr.mxu1 %v126_v6  ;;  %v114_v34 = vld [vmem:[%s617_s3 + $0x88] sm:$0xff]  ;;  %v113_v35 = vld [vmem:[%s617_s3 + $0x80] sm:$0xff]  ;;  %v112_v36 = vld [vmem:[%s617_s3 + $0x78] sm:$0xff] }
   0x8   :  { %144 = vmatpush1.msra.mxu0 %v125_v7  ;;  %366 = vmatpush1.msra.mxu1 %v125_v7  ;;  %v111_v37 = vld [vmem:[%s617_s3 + $0x70] sm:$0xff]  ;;  %v110_v38 = vld [vmem:[%s617_s3 + $0x68] sm:$0xff]  ;;  %v109_v39 = vld [vmem:[%s617_s3 + $0x60] sm:$0xff] }
   0x9   :  { %145 = vmatprep.subr.mxu0 %v124_v8  ;;  %351 = vmatprep.subr.mxu1 %v124_v8  ;;  %v108_v40 = vld [vmem:[%s617_s3 + $0x58] sm:$0xff]  ;;  %v107_v41 = vld [vmem:[%s617_s3 + $0x50] sm:$0xff]  ;;  %v106_v42 = vld [vmem:[%s617_s3 + $0x48] sm:$0xff] }
   0xa   :  { %146 = vmatpush1.msra.mxu0 %v123_v9  ;;  %367 = vmatpush1.msra.mxu1 %v123_v9  ;;  %v105_v43 = vld [vmem:[%s617_s3 + $0x40] sm:$0xff]  ;;  %v104_v44 = vld [vmem:[%s617_s3 + $0x38] sm:$0xff]  ;;  %v103_v45 = vld [vmem:[%s617_s3 + $0x30] sm:$0xff] }
   0xb   :  { %147 = vmatprep.subr.mxu0 %v122_v10  ;;  %352 = vmatprep.subr.mxu1 %v122_v10  ;;  %v102_v46 = vld [vmem:[%s617_s3 + $0x28] sm:$0xff]  ;;  %v101_v47 = vld [vmem:[%s617_s3 + $0x20] sm:$0xff]  ;;  %v100_v48 = vld [vmem:[%s617_s3 + $0x18] sm:$0xff] }
   0xc   :  { %148 = vmatpush1.msra.mxu0 %v121_v11  ;;  %368 = vmatpush1.msra.mxu1 %v121_v11  ;;  %v99_v49 = vld [vmem:[%s617_s3 + $0x10] sm:$0xff]  ;;  %v98_v50 = vld [vmem:[%s617_s3 + $0x8] sm:$0xff]  ;;  %v97_v51 = vld [vmem:[%s617_s3] sm:$0xff] }
   0xd   :  { %149 = vmatprep.subr.mxu0 %v120_v28  ;;  %353 = vmatprep.subr.mxu1 %v120_v28  ;;  %v348_v4 = vld [vmem:[%s619_s2] ss:$0 sm:$0xff] }
   0xe   :  { %150 = vmatpush1.msra.mxu0 %v119_v29  ;;  %369 = vmatpush1.msra.mxu1 %v119_v29 }
   0xf   :  { %151 = vmatprep.subr.mxu0 %v118_v30  ;;  %354 = vmatprep.subr.mxu1 %v118_v30 }
  0x10   :  { %152 = vmatpush1.msra.mxu0 %v117_v31  ;;  %370 = vmatpush1.msra.mxu1 %v117_v31 }
  0x11   :  { %153 = vmatprep.subr.mxu0 %v116_v32  ;;  %355 = vmatprep.subr.mxu1 %v116_v32 }
  0x12   :  { %154 = vmatpush1.msra.mxu0 %v115_v33  ;;  %371 = vmatpush1.msra.mxu1 %v115_v33 }
  0x13   :  { %155 = vmatprep.subr.mxu0 %v114_v34  ;;  %356 = vmatprep.subr.mxu1 %v114_v34 }
  0x14   :  { %156 = vmatpush1.msra.mxu0 %v113_v35  ;;  %372 = vmatpush1.msra.mxu1 %v113_v35 }
  0x15   :  { %157 = vmatprep.subr.mxu0 %v112_v36  ;;  %357 = vmatprep.subr.mxu1 %v112_v36 }
  0x16   :  { %158 = vmatpush1.msra.mxu0 %v111_v37  ;;  %373 = vmatpush1.msra.mxu1 %v111_v37 }
  0x17   :  { %159 = vmatprep.subr.mxu0 %v110_v38  ;;  %358 = vmatprep.subr.mxu1 %v110_v38 }
  0x18   :  { %160 = vmatpush1.msra.mxu0 %v109_v39  ;;  %374 = vmatpush1.msra.mxu1 %v109_v39 }
  0x19   :  { %161 = vmatprep.subr.mxu0 %v108_v40  ;;  %359 = vmatprep.subr.mxu1 %v108_v40 }
  0x1a   :  { %162 = vmatpush1.msra.mxu0 %v107_v41  ;;  %375 = vmatpush1.msra.mxu1 %v107_v41 }
  0x1b   :  { %163 = vmatprep.subr.mxu0 %v106_v42  ;;  %360 = vmatprep.subr.mxu1 %v106_v42 }
  0x1c   :  { %164 = vmatpush1.msra.mxu0 %v105_v43  ;;  %376 = vmatpush1.msra.mxu1 %v105_v43 }
  0x1d   :  { %165 = vmatprep.subr.mxu0 %v104_v44  ;;  %361 = vmatprep.subr.mxu1 %v104_v44 }
  0x1e   :  { %166 = vmatpush1.msra.mxu0 %v103_v45  ;;  %377 = vmatpush1.msra.mxu1 %v103_v45 }
  0x1f   :  { %167 = vmatprep.subr.mxu0 %v102_v46  ;;  %362 = vmatprep.subr.mxu1 %v102_v46 }
  0x20   :  { %168 = vmatpush1.msra.mxu0 %v101_v47  ;;  %378 = vmatpush1.msra.mxu1 %v101_v47 }
  0x21   :  { %169 = vmatprep.subr.mxu0 %v100_v48  ;;  %363 = vmatprep.subr.mxu1 %v100_v48 }
  0x22   :  { %170 = vmatpush1.msra.mxu0 %v99_v49  ;;  %379 = vmatpush1.msra.mxu1 %v99_v49 }
  0x23   :  { %171 = vmatprep.subr.mxu0 %v98_v50  ;;  %364 = vmatprep.subr.mxu1 %v98_v50 }
  0x24   :  { %172 = vmatpush1.msra.mxu0 %v97_v51  ;;  %380 = vmatpush1.msra.mxu1 %v97_v51 }
  0x8b   :  { %v33_v12 = vpop.xlane.xlu0 %32  ;;  %v35_v13 = vpop.xlane.xlu1 %34 }
  0x8c   :  { %v41_v14 = vmul.f32 0.0078125, %v33_v12  ;;  %v42_v15 = vmul.f32 0.0078125, %v35_v13 }
  0x8e   :  { %v475_v16 = vsub.f32 %v26_v0, %v41_v14  ;;  %v477_v17 = vsub.f32 %v27_v1, %v42_v15 }
  0x8f   :  { %v37_v18 = vpop.xlane.xlu0 %36  ;;  %v39_v19 = vpop.xlane.xlu1 %38 }
  0x90   :  { %v43_v20 = vmul.f32 0.0078125, %v37_v18  ;;  %v49_v21 = vmul.f32 %v475_v16, %v475_v16  ;;  %v44_v22 = vmul.f32 0.0078125, %v39_v19  ;;  %v50_v25 = vmul.f32 %v477_v17, %v477_v17 }
  0x92   :  { %v481_v23 = vsub.f32 %v28_v2, %v43_v20  ;;  %53 = vadd.xlane.f32.xlu0 %v49_v21  ;;  %v483_v24 = vsub.f32 %v29_v3, %v44_v22  ;;  %v347_v2 = vld [vmem:[%s618_s1] ss:$0 sm:$0xff]  ;;  %v131_v20 = vlaneseq }
  0x94   :  { %v51_v26 = vmul.f32 %v481_v23, %v481_v23  ;;  %v52_v27 = vmul.f32 %v483_v24, %v483_v24  ;;  %v132_v21 = vshrl.u32 %v131_v20, 7 }
  0x96   :  { %55 = vadd.xlane.f32.xlu0 %v50_v25  ;;  %57 = vadd.xlane.f32.xlu1 %v51_v26  ;;  %v573_v22 = vsub.s32 0, %v132_v21 }
  0x9a   :  { %59 = vadd.xlane.f32.xlu1 %v52_v27 }
 0x11b   :  { %v54_v53 = vpop.xlane.xlu0 %53 }
 0x11c   :  { %v61_v54 = vmul.f32 0.0078125, %v54_v53 }
 0x11e   :  { %v65_v55 = vadd.f32 1e-05, %v61_v54 }
 0x11f   :  { %v58_v56 = vpop.xlane.xlu1 %57  ;;  %v56_v57 = vpop.xlane.xlu0 %55 }
 0x120   :  { %382 = vrsqrt.f32 %v65_v55  ;;  %v63_v58 = vmul.f32 0.0078125, %v58_v56  ;;  %v62_v59 = vmul.f32 0.0078125, %v56_v57 }
 0x122   :  { %v67_v60 = vadd.f32 1e-05, %v63_v58  ;;  %v66_v61 = vadd.f32 1e-05, %v62_v59 }
 0x123   :  { %v60_v62 = vpop.xlane.xlu1 %59 }
 0x124   :  { %384 = vrsqrt.f32 %v67_v60  ;;  %v64_v63 = vmul.f32 0.0078125, %v60_v62 }
 0x125   :  { %386 = vrsqrt.f32 %v66_v61 }
 0x126   :  { %v68_v0 = vadd.f32 1e-05, %v64_v63 }
 0x128   :  { %388 = vrsqrt.f32 %v68_v0 }
 0x12d   :  { %v383_v1 = vpop.eup %382 }
 0x12e   :  { %v73_v3 = vmul.f32 %v383_v1, %v475_v16 }
 0x130   :  { %v83_v5 = vmul.f32 %v347_v2, %v73_v3 }
 0x131   :  { %v385_v6 = vpop.eup %384 }
 0x132   :  { %v387_v7 = vpop.eup %386  ;;  %v93_v8 = vadd.f32 %v348_v4, %v83_v5  ;;  %v75_v9 = vmul.f32 %v385_v6, %v481_v23  ;;  %v129_v23 = vld [vmem:[%s620_s4] sm:$0x3] }
 0x133   :  { %v74_v10 = vmul.f32 %v387_v7, %v477_v17  ;;  %v575_v17 = vsub.s32 1, %v132_v21  ;;  %v134_v25 = vrot.slane %v129_v23, %v573_v22 }
 0x134   :  { %206 = vmatmul.mubr.f32.vlgmr.msra.gmra.mxu0 %v93_v8  ;;  %v85_v11 = vmul.f32 %v347_v2, %v75_v9 }
 0x135   :  { %v389_v12 = vpop.eup %388  ;;  %211 = vmatprep.mubr.f32.mxu0 %v398_v52  ;;  %v84_v13 = vmul.f32 %v347_v2, %v74_v10 }
 0x136   :  { %v95_v14 = vadd.f32 %v348_v4, %v85_v11  ;;  %v76_v15 = vmul.f32 %v389_v12, %v483_v24  ;;  %v138_v24 = vrot.slane %v129_v23, %v575_v17 }
 0x137   :  { %v94_v16 = vadd.f32 %v348_v4, %v84_v13 }
 0x138   :  { %218 = vmatmul.mubr.f32.vlgmr.msra.gmra.mxu1 %v95_v14  ;;  %v86_v18 = vmul.f32 %v347_v2, %v76_v15 }
 0x139   :  { %212 = vmatmul.mubr.f32.gmra.mxu0 %v94_v16  ;;  %223 = vmatprep.mubr.f32.mxu1 %v398_v52 }
 0x13a   :  { %v96_v19 = vadd.f32 %v348_v4, %v86_v18 }
 0x13c   :  { %224 = vmatmul.mubr.f32.gmra.mxu1 %v96_v19 }
 0x1f4   :  { %v207_v26 = vpop.f32.mrf.mxu0 }
 0x1f5   :  { %v208_v28 = vadd.f32 %v207_v26, %v134_v25 }
 0x1f6   :  { %v209_v27 = vpop.f32.mrf.mxu0 }
 0x1f7   :  { %v210_v29 = vadd.f32 %v209_v27, %v138_v24 }
 0x1f8   :  { %v219_v30 = vpop.f32.mrf.mxu1 }
 0x1f9   :  { %v213_v31 = vpop.f32.mrf.mxu0  ;;  %v232_v32 = vadd.f32 %v210_v29, %v208_v28  ;;  %v220_v34 = vadd.f32 %v219_v30, %v134_v25 }
 0x1fa   :  { %v221_v33 = vpop.f32.mrf.mxu1  ;;  %v214_v37 = vadd.f32 %v213_v31, %v134_v25 }
 0x1fb   :  { %v215_v35 = vpop.f32.mrf.mxu0  ;;  %v222_v36 = vadd.f32 %v221_v33, %v138_v24  ;;  %233 = vadd.xlane.f32.xlu0 %v232_v32 }
 0x1fc   :  { %v216_v38 = vadd.f32 %v215_v35, %v138_v24  ;;  %v225_v39 = vpop.f32.mrf.mxu1 }
 0x1fd   :  { %v238_v40 = vadd.f32 %v222_v36, %v220_v34  ;;  %v226_v43 = vadd.f32 %v225_v39, %v134_v25  ;;  %v230_v25 = vld [vmem:[%s621_s5] sm:$0x3] }
 0x1fe   :  { %v227_v41 = vpop.f32.mrf.mxu1  ;;  %v235_v42 = vadd.f32 %v216_v38, %v214_v37  ;;  %v301_v26 = vrot.slane %v230_v25, %v573_v22  ;;  %v305_v27 = vrot.slane %v230_v25, %v575_v17 }
 0x1ff   :  { %v228_v44 = vadd.f32 %v227_v41, %v138_v24  ;;  %239 = vadd.xlane.f32.xlu0 %v238_v40  ;;  %v231_v24 = vld [vmem:[%s622_s6] sm:$0x3] }
 0x200   :  { %236 = vadd.xlane.f32.xlu1 %v235_v42  ;;  %v324_v30 = vrot.slane %v231_v24, %v575_v17 }
 0x201   :  { %v241_v45 = vadd.f32 %v228_v44, %v226_v43 }
 0x204   :  { %242 = vadd.xlane.f32.xlu1 %v241_v45 }
 0x284   :  { %v234_v46 = vpop.xlane.xlu0 %233 }
 0x285   :  { %v245_v47 = vmul.f32 0.00390625, %v234_v46 }
 0x287   :  { %v249_v48 = vsub.f32 %v208_v28, %v245_v47  ;;  %v250_v49 = vsub.f32 %v210_v29, %v245_v47  ;;  %v320_v29 = vrot.slane %v231_v24, %v573_v22 }
 0x288   :  { %v240_v50 = vpop.xlane.xlu0 %239 }
 0x289   :  { %v237_v51 = vpop.xlane.xlu1 %236  ;;  %v247_v52 = vmul.f32 0.00390625, %v240_v50  ;;  %v257_v53 = vmul.f32 %v249_v48, %v249_v48  ;;  %v258_v54 = vmul.f32 %v250_v49, %v250_v49 }
 0x28a   :  { %v246_v55 = vmul.f32 0.00390625, %v237_v51 }
 0x28b   :  { %v253_v56 = vsub.f32 %v220_v34, %v247_v52  ;;  %v254_v57 = vsub.f32 %v222_v36, %v247_v52  ;;  %v265_v58 = vadd.f32 %v258_v54, %v257_v53 }
 0x28c   :  { %v251_v59 = vsub.f32 %v214_v37, %v246_v55  ;;  %v252_v60 = vsub.f32 %v216_v38, %v246_v55 }
 0x28d   :  { %v243_v61 = vpop.xlane.xlu1 %242  ;;  %266 = vadd.xlane.f32.xlu0 %v265_v58  ;;  %v261_v62 = vmul.f32 %v253_v56, %v253_v56  ;;  %v262_v63 = vmul.f32 %v254_v57, %v254_v57 }
 0x28e   :  { %v248_v0 = vmul.f32 0.00390625, %v243_v61  ;;  %v259_v1 = vmul.f32 %v251_v59, %v251_v59  ;;  %v260_v2 = vmul.f32 %v252_v60, %v252_v60 }
 0x28f   :  { %v271_v3 = vadd.f32 %v262_v63, %v261_v62 }
 0x290   :  { %v255_v4 = vsub.f32 %v226_v43, %v248_v0  ;;  %v256_v5 = vsub.f32 %v228_v44, %v248_v0  ;;  %v268_v6 = vadd.f32 %v260_v2, %v259_v1 }
 0x291   :  { %272 = vadd.xlane.f32.xlu0 %v271_v3 }
 0x292   :  { %269 = vadd.xlane.f32.xlu1 %v268_v6  ;;  %v263_v7 = vmul.f32 %v255_v4, %v255_v4  ;;  %v264_v8 = vmul.f32 %v256_v5, %v256_v5 }
 0x294   :  { %v274_v9 = vadd.f32 %v264_v8, %v263_v7 }
 0x296   :  { %275 = vadd.xlane.f32.xlu1 %v274_v9 }
 0x316   :  { %v267_v10 = vpop.xlane.xlu0 %266 }
 0x317   :  { %v277_v11 = vmul.f32 0.00390625, %v267_v10 }
 0x319   :  { %v281_v12 = vadd.f32 1e-05, %v277_v11 }
 0x31a   :  { %v273_v13 = vpop.xlane.xlu0 %272 }
 0x31b   :  { %390 = vrsqrt.f32 %v281_v12  ;;  %v270_v14 = vpop.xlane.xlu1 %269  ;;  %v279_v15 = vmul.f32 0.00390625, %v273_v13 }
 0x31c   :  { %v278_v16 = vmul.f32 0.00390625, %v270_v14 }
 0x31d   :  { %v283_v18 = vadd.f32 1e-05, %v279_v15 }
 0x31e   :  { %v282_v19 = vadd.f32 1e-05, %v278_v16 }
 0x31f   :  { %392 = vrsqrt.f32 %v283_v18  ;;  %v276_v20 = vpop.xlane.xlu1 %275 }
 0x320   :  { %394 = vrsqrt.f32 %v282_v19  ;;  %v280_v21 = vmul.f32 0.00390625, %v276_v20 }
 0x322   :  { %v284_v23 = vadd.f32 1e-05, %v280_v21 }
 0x324   :  { %396 = vrsqrt.f32 %v284_v23 }
 0x328   :  { %v391_v28 = vpop.eup %390 }
 0x329   :  { %v289_v31 = vmul.f32 %v391_v28, %v249_v48  ;;  %v290_v32 = vmul.f32 %v391_v28, %v250_v49 }
 0x32b   :  { %v308_v33 = vmul.f32 %v301_v26, %v289_v31  ;;  %v309_v34 = vmul.f32 %v305_v27, %v290_v32 }
 0x32c   :  { %v393_v35 = vpop.eup %392 }
 0x32d   :  { %v395_v36 = vpop.eup %394  ;;  %v327_v37 = vadd.f32 %v320_v29, %v308_v33  ;;  %v328_v38 = vadd.f32 %v324_v30, %v309_v34  ;;  %v293_v39 = vmul.f32 %v393_v35, %v253_v56  ;;  %v294_v40 = vmul.f32 %v393_v35, %v254_v57 }
 0x32e   :  { %v291_v41 = vmul.f32 %v395_v36, %v251_v59  ;;  %v292_v42 = vmul.f32 %v395_v36, %v252_v60 }
 0x32f   :  { %335 = vst [vmem:[%s623_s7] sm:$0xff] %v327_v37  ;;  %336 = vst [vmem:[%s623_s7 + $0x8] sm:$0xff] %v328_v38  ;;  %v312_v22 = vmul.f32 %v301_v26, %v293_v39  ;;  %v313_v17 = vmul.f32 %v305_v27, %v294_v40 }
 0x330   :  { %v310_v43 = vmul.f32 %v301_v26, %v291_v41  ;;  %v311_v44 = vmul.f32 %v305_v27, %v292_v42 }
 0x331   :  { %v397_v45 = vpop.eup %396  ;;  %v331_v46 = vadd.f32 %v320_v29, %v312_v22  ;;  %v332_v47 = vadd.f32 %v324_v30, %v313_v17 }
 0x332   :  { %v329_v48 = vadd.f32 %v320_v29, %v310_v43  ;;  %v330_v49 = vadd.f32 %v324_v30, %v311_v44  ;;  %v295_v50 = vmul.f32 %v397_v45, %v255_v4  ;;  %v296_v51 = vmul.f32 %v397_v45, %v256_v5 }
 0x333   :  { %339 = vst [vmem:[%s623_s7 + $0x20] sm:$0xff] %v331_v46  ;;  %340 = vst [vmem:[%s623_s7 + $0x28] sm:$0xff] %v332_v47 }
 0x334   :  { %337 = vst [vmem:[%s623_s7 + $0x10] sm:$0xff] %v329_v48  ;;  %338 = vst [vmem:[%s623_s7 + $0x18] sm:$0xff] %v330_v49  ;;  %v314_v52 = vmul.f32 %v301_v26, %v295_v50  ;;  %v315_v53 = vmul.f32 %v305_v27, %v296_v51 }
 0x336   :  { %v333_v54 = vadd.f32 %v320_v29, %v314_v52  ;;  %v334_v55 = vadd.f32 %v324_v30, %v315_v53 }
 0x338   :  { %341 = vst [vmem:[%s623_s7 + $0x30] sm:$0xff] %v333_v54  ;;  %342 = vst [vmem:[%s623_s7 + $0x38] sm:$0xff] %v334_v55 }

// kernel: vitae_forward.25
= control target key start
LH: loop header
LB: loop body
LE: loop exit
PB: predicated region body
PF: predicated region fallthrough
CT: control target
= control target key end

     0   :  { %8 = vsyncpa [#allocation4], 0  ;;  %s7181_s0 = inlined_call_operand.vmem [shape: f32[2,4,34,34], index: 0, kind: input, shape index: {}]   ;;  %s7182_s1 = inlined_call_operand.vmem [shape: f32[4,36], index: 1, kind: input, shape index: {}]   ;;  %s7183_s2 = inlined_call_operand.vmem [shape: f32[4], index: 2, kind: input, shape index: {}]   ;;  %s7184_s3 = inlined_call_operand.hbm [shape: f32[2,4,32,32], index: 3, kind: output, shape index: {}]  }
   0x1   :  { %9 = vsyncpa [#allocation6], 0 }
   0x2   :  { %10 = vsyncpa [#allocation3], 0 }
   0x3   :  { %12 = vsyncpa [#allocation3 + $0x1], 0  ;;  %s4027_s12 = smov 0   ;;  %s4029_s13 = smov 0  }
   0x4   :  { %s4031_s14 = smov 0   ;;  %s4033_s15 = smov 0  }
   0x5 LB: > { %s4048_s16 = sadd.s32 4294967295, %s3998_s15   ;;  %s3525_s17 = sadd.s32 4294967294, %s3998_s15   ;;  %s3998_s15 = sphi %s4033_s15, %s7783_s15   ;;  %s3994_s14 = sphi %s4031_s14, %s7782_s14   ;;  %s3990_s13 = sphi %s4029_s13, %s7781_s13   ;;  %s3986_s12 = sphi %s4027_s12, %s7780_s12  }
   0x6   : > { %s4052_s18 = sadd.s32 1, %s3998_s15   ;;  %s93_s19 = sadd.s32 1, %s3994_s14 }
   0x7   : > { %s90_s20 = ssub.s32 %s3998_s15, %s4052_s18  ;;  %p103_p0 = scmp.ne.s32.totalorder %s3994_s14, %s3990_s13 }
   0x8   : > { %p91_p1 = scmp.eq.s32.totalorder %s90_s20, 0  ;;  %p104_p2 = scmp.eq.s32.totalorder %s4048_s16, 1 }
   0x9   : > { %p109_p3 = scmp.ne.s32.totalorder %s3990_s13, %s3986_s12  ;;  %p110_p4 = scmp.eq.s32.totalorder %s3525_s17, 1 }
   0xa   : > { %s4063_s21 = scalar_select %p91_p1, %s3994_s14, %s93_s19  }
   0xb   : > { %p4065_p5 = por %p104_p2, %p103_p0  ;;  %p4069_p6 = por %p110_p4, %p109_p3 }
   0xc   : > { %p3526_p7 = scmp.ge.s32.totalorder %s3998_s15, 1  ;;  %p117_p8 = scmp.lt.s32.totalorder %s3998_s15, 3 }
   0xd   : > { %s7193_s22 = scalar_select %p4065_p5, 1, 0 }
   0xe   : > { %s7194_s23 = scalar_select %p4069_p6, 1, 0 }
   0xf   : > { %p7185_p9 = scmp.eq.s32.totalorder %s4048_s16, 0  ;;  %p4076_p10 = pnand %p3526_p7, %p117_p8 }
  0x10   : > { %s130_s27 = sshll.u32 %s7182_s1, 4  ;;  %s141_s30 = sshll.u32 %s7183_s2, 4  ;;  %s131_s27 = int_to_ptr.vmem [resolvable:$true] %s130_s27  ;;  %s142_s30 = int_to_ptr.vmem [resolvable:$true] %s141_s30 }
  0x11   : > { %s7195_s24 = scalar_select %p4076_p10, 1, 0 }
  0x12   : > { %p3746_p11 = pneg %p4076_p10  ;;  %s3900_s5 = scalar_lea.vmem %s131_s27, 64 }
  0x13   : > { %p3901_p13 = scmp.ne.s32.totalorder %s131_s27, %s3900_s5  ;;  %p3908_p3 = scmp.lt.s32.totalorder %s131_s27, %s131_s27 }
  0x14   : > { %p4090_p12 = pnand %p7185_p9, %p3746_p11  ;;  %p3909_p4 = scmp.lt.s32.totalorder %s3900_s5, %s3900_s5 }
  0x16   : > { %p3902_p0 = pneg %p4090_p12  ;;  %p3910_p7 = por %p3909_p4, %p3908_p3 }
  0x18   : > { %p3903_p1 = pnand %p3902_p0, %p3901_p13 }
  0x1a   : > { %p3904_p2 = pneg %p3903_p1 }
  0x1c   : > { %p3911_p8 = pnand %p3910_p7, %p3904_p2 }
  0x1e   : > { %3914 = shalt.err (!%p3911_p8)
}
  0x1f   : > { %s4000_s6 = smov [#allocation2]   ;;  %s3915_s7 = scalar_lea.vmem %s142_s30, 16 }
  0x20   : > { %3749 = dma.vmem_to_smem (!%p4090_p12), %s131_s27, 64, %s4000_s6, [#allocation4]  }
  0x21   : > { %p3916_p11 = scmp.ne.s32.totalorder %s142_s30, %s3915_s7  ;;  %p3923_p5 = scmp.lt.s32.totalorder %s142_s30, %s142_s30 }
  0x22   : > { %p3924_p10 = scmp.lt.s32.totalorder %s3915_s7, %s3915_s7 }
  0x23   : > { %p3918_p9 = pnand %p3916_p11, %p3902_p0 }
  0x24   : > { %p3925_p13 = por %p3924_p10, %p3923_p5 }
  0x25   : > { %p3919_p6 = pneg %p3918_p9 }
  0x27   : > { %p3926_p1 = pnand %p3925_p13, %p3919_p6 }
  0x29   : > { %3929 = shalt.err (!%p3926_p1)
}
  0x2a   : > { %s4001_s8 = smov [#allocation5]   ;;  %p7197_p2 = scmp.ne.s32.totalorder %s7195_s24, 0 }
  0x2b   : > { %3752 = dma.vmem_to_smem (!%p4090_p12), %s142_s30, 16, %s4001_s8, [#allocation6]  }
  0x2c   : > { %162 = sbr.rel (%p7197_p2) target bundleno = 1010 (0x3f2), region = 32 }
  0x31   : > { %p7198_p3 = scmp.eq.s32.totalorder %s4048_s16, 0 }
  0x33   : > { %3973 = dma.done.wait (%p7198_p3), [#allocation4], 64   ;;  %p7199_p4 = pmov %p7198_p3 }
  0x34   : > { %p7200_p9 = pmov %p7198_p3 }
  0x35   : > { %3975 = vsyncadd (%p7199_p4), [#allocation4], 4294967232 }
  0x36   : > { %3977 = dma.done.wait (%p7200_p9), [#allocation6], 16   ;;  %p7201_p5 = pmov %p7198_p3 }
  0x38   : > { %3979 = vsyncadd (%p7201_p5), [#allocation6], 4294967280 }
  0x39   : > { %172 = sfence }
  0x3a   : > { %p191_p6 = scmp.lt.s32.totalorder %s4048_s16, 1  ;;  %s3538_s9 = sld [smem:[#allocation2 + $0x1]]  ;;  %vm3269_vm0 = vcmask 261120  }
  0x3b   : > { %s3539_s11 = sld [smem:[#allocation2 + $0x81]]  ;;  %s4002_s25 = smov 127  }
  0x3c   : > { %s192_s10 = scalar_select %p191_p6, %s4048_s16, 1 }
  0x3d   : > { %s3540_s26 = sld [smem:[#allocation2 + $0x101]]  ;;  %s4003_s30 = smov 126  }
  0x3e   : > { %s3735_s17 = smul.u32 160, %s192_s10  ;;  %s3541_s27 = sld [smem:[#allocation2 + $0x181]] }
  0x3f   : > { %s3542_s28 = sld [smem:[#allocation2 + $0x2]]  ;;  %p7778_p12 = scmp.ne.s32.totalorder %s7193_s22, 0 }
  0x40   : > { %s4115_s24 = scalar_lea.vmem %s7181_s0, %s3735_s17  ;;  %v241_v0 = vstv %s3538_s9  ;;  %s3543_s29 = sld [smem:[#allocation2 + $0x82]] }
  0x41   : > { %v4118_v1 = vld [vmem:[%s4115_s24 + $0x10] sm:$0xff]  ;;  %v4121_v2 = vld [vmem:[%s4115_s24] sm:$0xff]  ;;  %v4124_v3 = vld [vmem:[%s4115_s24 + $0x18] sm:$0xff]  ;;  %v267_v9 = vstv %s3539_s11  ;;  %s3544_s4 = sld [smem:[#allocation2 + $0x102]] }
  0x42   : > { %v244_v4 = vmul.f32 %v241_v0, %v4118_v1  ;;  %v242_v5 = vmul.f32 %v241_v0, %v4121_v2  ;;  %v4129_v6 = vld [vmem:[%s4115_s24 + $0x8] sm:$0xff]  ;;  %v245_v7 = vmul.f32 %v241_v0, %v4124_v3  ;;  %v268_v11 = vmul.f32 %v267_v9, %v4121_v2  ;;  %s3545_s5 = sld [smem:[#allocation2 + $0x182]]  ;;  %v4202_v49 = vld [vmem:[%s4115_s24 + $0x19] sm:$0xff]  ;;  %v4205_v50 = vld [vmem:[%s4115_s24 + $0x11] sm:$0xff] }
  0x43   : > { %v243_v8 = vmul.f32 %v241_v0, %v4129_v6  ;;  %v269_v10 = vmul.f32 %v267_v9, %v4129_v6  ;;  %v271_v12 = vmul.f32 %v267_v9, %v4124_v3  ;;  %v270_v13 = vmul.f32 %v267_v9, %v4118_v1  ;;  %s3550_s6 = sld [smem:[#allocation2 + $0x4]]  ;;  %v4192_v44 = vld [vmem:[%s4115_s24 + $0x9] sm:$0xff]  ;;  %v4195_v46 = vld [vmem:[%s4115_s24 + $0x1] sm:$0xff] }
  0x44   : > { %254 = vrot.lane.b32.xlu1 %v244_v4, %s4002_s25  ;;  %250 = vrot.lane.b32.xlu0 %v242_v5, %s4002_s25  ;;  %v293_v14 = vstv %s3540_s26  ;;  %v319_v19 = vstv %s3541_s27  ;;  %s3551_s7 = sld [smem:[#allocation2 + $0x84]] }
  0x45   : > { %v295_v15 = vmul.f32 %v293_v14, %v4129_v6  ;;  %v294_v16 = vmul.f32 %v293_v14, %v4121_v2  ;;  %v297_v17 = vmul.f32 %v293_v14, %v4124_v3  ;;  %v296_v18 = vmul.f32 %v293_v14, %v4118_v1  ;;  %s3552_s8 = sld [smem:[#allocation2 + $0x104]] }
  0x46   : > { %v321_v20 = vmul.f32 %v319_v19, %v4129_v6  ;;  %v320_v21 = vmul.f32 %v319_v19, %v4121_v2  ;;  %v323_v22 = vmul.f32 %v319_v19, %v4124_v3  ;;  %v322_v23 = vmul.f32 %v319_v19, %v4118_v1  ;;  %s3553_s9 = sld [smem:[#allocation2 + $0x184]] }
  0x47   : > { %v345_v24 = vstv %s3542_s28  ;;  %v371_v29 = vstv %s3543_s29  ;;  %v397_v34 = vstv %s3544_s4  ;;  %s3554_s10 = sld [smem:[#allocation2 + $0x5]] }
  0x48   : > { %256 = vrot.lane.b32.xlu1 %v245_v7, %s4002_s25  ;;  %252 = vrot.lane.b32.xlu0 %v243_v8, %s4002_s25  ;;  %v347_v25 = vmul.f32 %v345_v24, %v4129_v6  ;;  %v346_v26 = vmul.f32 %v345_v24, %v4121_v2  ;;  %v349_v27 = vmul.f32 %v345_v24, %v4124_v3  ;;  %v423_v39 = vstv %s3545_s5  ;;  %s3555_s11 = sld [smem:[#allocation2 + $0x85]] }
  0x49   : > { %v348_v28 = vmul.f32 %v345_v24, %v4118_v1  ;;  %v373_v30 = vmul.f32 %v371_v29, %v4129_v6  ;;  %v372_v31 = vmul.f32 %v371_v29, %v4121_v2  ;;  %v375_v32 = vmul.f32 %v371_v29, %v4124_v3  ;;  %s3556_s17 = sld [smem:[#allocation2 + $0x105]] }
  0x4a   : > { %v374_v33 = vmul.f32 %v371_v29, %v4118_v1  ;;  %v399_v35 = vmul.f32 %v397_v34, %v4129_v6  ;;  %v398_v36 = vmul.f32 %v397_v34, %v4121_v2  ;;  %v401_v37 = vmul.f32 %v397_v34, %v4124_v3  ;;  %s3557_s19 = sld [smem:[#allocation2 + $0x185]] }
  0x4b   : > { %v400_v38 = vmul.f32 %v397_v34, %v4118_v1  ;;  %v425_v40 = vmul.f32 %v423_v39, %v4129_v6  ;;  %v424_v41 = vmul.f32 %v423_v39, %v4121_v2  ;;  %v427_v42 = vmul.f32 %v423_v39, %v4124_v3  ;;  %s3562_s20 = sld [smem:[#allocation2 + $0x7]]  ;;  %v4279_v34 = vld [vmem:[%s4115_s24 + $0x2] sm:$0xff] }
  0x4c   : > { %278 = vrot.lane.b32.xlu1 %v269_v10, %s4002_s25  ;;  %276 = vrot.lane.b32.xlu0 %v268_v11, %s4002_s25  ;;  %v426_v43 = vmul.f32 %v423_v39, %v4118_v1  ;;  %v493_v45 = vstv %s3550_s6  ;;  %v519_v53 = vstv %s3551_s7  ;;  %s3563_s26 = sld [smem:[#allocation2 + $0x87]] }
  0x4d   : > { %v495_v47 = vmul.f32 %v493_v45, %v4192_v44  ;;  %v494_v48 = vmul.f32 %v493_v45, %v4195_v46  ;;  %v497_v51 = vmul.f32 %v493_v45, %v4202_v49  ;;  %v496_v52 = vmul.f32 %v493_v45, %v4205_v50  ;;  %v4290_v39 = vld [vmem:[%s4115_s24 + $0x1a] sm:$0xff]  ;;  %s3564_s27 = sld [smem:[#allocation2 + $0x107]] }
  0x4e   : > { %v521_v54 = vmul.f32 %v519_v53, %v4192_v44  ;;  %v520_v55 = vmul.f32 %v519_v53, %v4195_v46  ;;  %v523_v56 = vmul.f32 %v519_v53, %v4202_v49  ;;  %v522_v57 = vmul.f32 %v519_v53, %v4205_v50  ;;  %s200_s28 = sld [smem:[#allocation2]] }
  0x4f   : > { %v545_v58 = vstv %s3552_s8  ;;  %v571_v63 = vstv %s3553_s9  ;;  %v597_v8 = vstv %s3554_s10  ;;  %s3546_s29 = sld [smem:[#allocation2 + $0x3]] }
  0x50   : > { %282 = vrot.lane.b32.xlu1 %v271_v12, %s4002_s25  ;;  %280 = vrot.lane.b32.xlu0 %v270_v13, %s4002_s25  ;;  %v547_v59 = vmul.f32 %v545_v58, %v4192_v44  ;;  %v546_v60 = vmul.f32 %v545_v58, %v4195_v46  ;;  %v549_v61 = vmul.f32 %v545_v58, %v4202_v49  ;;  %v623_v13 = vstv %s3555_s11  ;;  %s3535_s4 = sld [smem:[#allocation2 + $0x80]] }
  0x51   : > { %v548_v62 = vmul.f32 %v545_v58, %v4205_v50  ;;  %v573_v0 = vmul.f32 %v571_v63, %v4192_v44  ;;  %v572_v4 = vmul.f32 %v571_v63, %v4195_v46  ;;  %v575_v5 = vmul.f32 %v571_v63, %v4202_v49  ;;  %s3565_s5 = sld [smem:[#allocation2 + $0x187]] }
  0x52   : > { %v574_v7 = vmul.f32 %v571_v63, %v4205_v50  ;;  %v599_v9 = vmul.f32 %v597_v8, %v4192_v44  ;;  %v598_v10 = vmul.f32 %v597_v8, %v4195_v46  ;;  %v601_v11 = vmul.f32 %v597_v8, %v4202_v49  ;;  %s4327_s6 = sld [smem:[#allocation2 + $0x83]] }
  0x53   : > { %v600_v12 = vmul.f32 %v597_v8, %v4205_v50  ;;  %v625_v14 = vmul.f32 %v623_v13, %v4192_v44  ;;  %v797_v58 = vstv %s3564_s27  ;;  %s4336_s7 = sld [smem:[#allocation2 + $0x100]] }
  0x54   : > { %304 = vrot.lane.b32.xlu1 %v295_v15, %s4002_s25  ;;  %302 = vrot.lane.b32.xlu0 %v294_v16, %s4002_s25  ;;  %v624_v15 = vmul.f32 %v623_v13, %v4195_v46  ;;  %v627_v16 = vmul.f32 %v623_v13, %v4202_v49  ;;  %v798_v63 = vmul.f32 %v797_v58, %v4279_v34  ;;  %s4343_s8 = sld [smem:[#allocation2 + $0x8]] }
  0x55   : > { %v453_v8 = vstv %s3546_s29  ;;  %s4358_s9 = sld [smem:[#allocation2 + $0x103]] }
  0x56   : > { %s4369_s10 = sld [smem:[#allocation2 + $0x180]] }
  0x57   : > { %s4376_s11 = sld [smem:[#allocation2 + $0x88]] }
  0x58   : > { %308 = vrot.lane.b32.xlu1 %v297_v17, %s4002_s25  ;;  %306 = vrot.lane.b32.xlu0 %v296_v18, %s4002_s25  ;;  %v626_v17 = vmul.f32 %v623_v13, %v4205_v50  ;;  %v649_v18 = vstv %s3556_s17  ;;  %s4395_s17 = sld [smem:[#allocation2 + $0x183]] }
  0x59   : > { %v651_v19 = vmul.f32 %v649_v18, %v4192_v44  ;;  %s3579_s27 = sld [smem:[#allocation2 + $0x8a]] }
  0x5a   : > { %s3581_s29 = sld [smem:[#allocation2 + $0x18a]] }
  0x5c   : > { %330 = vrot.lane.b32.xlu1 %v321_v20, %s4002_s25  ;;  %328 = vrot.lane.b32.xlu0 %v320_v21, %s4002_s25  ;;  %v650_v20 = vmul.f32 %v649_v18, %v4195_v46  ;;  %v653_v21 = vmul.f32 %v649_v18, %v4202_v49 }
  0x60   : > { %334 = vrot.lane.b32.xlu1 %v323_v22, %s4002_s25  ;;  %332 = vrot.lane.b32.xlu0 %v322_v23, %s4002_s25  ;;  %v652_v22 = vmul.f32 %v649_v18, %v4205_v50  ;;  %v675_v23 = vstv %s3557_s19  ;;  %v454_v18 = vmul.f32 %v453_v8, %v4195_v46  ;;  %s4411_s19 = sld [smem:[#allocation2 + $0x108]] }
  0x64   : > { %356 = vrot.lane.b32.xlu1 %v347_v25, %s4003_s30  ;;  %354 = vrot.lane.b32.xlu0 %v346_v26, %s4003_s30  ;;  %v677_v26 = vmul.f32 %v675_v23, %v4192_v44 }
  0x68   : > { %360 = vrot.lane.b32.xlu1 %v349_v27, %s4003_s30  ;;  %358 = vrot.lane.b32.xlu0 %v348_v28, %s4003_s30  ;;  %v676_v27 = vmul.f32 %v675_v23, %v4195_v46 }
  0x6c   : > { %382 = vrot.lane.b32.xlu1 %v373_v30, %s4003_s30  ;;  %380 = vrot.lane.b32.xlu0 %v372_v31, %s4003_s30  ;;  %v679_v30 = vmul.f32 %v675_v23, %v4202_v49  ;;  %v678_v31 = vmul.f32 %v675_v23, %v4205_v50 }
  0x70   : > { %386 = vrot.lane.b32.xlu1 %v375_v32, %s4003_s30  ;;  %384 = vrot.lane.b32.xlu0 %v374_v33, %s4003_s30  ;;  %v4276_v32 = vld [vmem:[%s4115_s24 + $0xa] sm:$0xff]  ;;  %v745_v33 = vstv %s3562_s20  ;;  %s3569_s20 = sld [smem:[#allocation2 + $0x188]] }
  0x74   : > { %408 = vrot.lane.b32.xlu1 %v399_v35, %s4003_s30  ;;  %406 = vrot.lane.b32.xlu0 %v398_v36, %s4003_s30 }
  0x78   : > { %412 = vrot.lane.b32.xlu1 %v401_v37, %s4003_s30  ;;  %410 = vrot.lane.b32.xlu0 %v400_v38, %s4003_s30  ;;  %v747_v37 = vmul.f32 %v745_v33, %v4276_v32  ;;  %v746_v38 = vmul.f32 %v745_v33, %v4279_v34 }
  0x7c   : > { %434 = vrot.lane.b32.xlu1 %v425_v40, %s4003_s30  ;;  %432 = vrot.lane.b32.xlu0 %v424_v41, %s4003_s30  ;;  %v4293_v40 = vld [vmem:[%s4115_s24 + $0x12] sm:$0xff] }
  0x7d   : > { %v748_v45 = vmul.f32 %v745_v33, %v4293_v40  ;;  %v800_v13 = vmul.f32 %v797_v58, %v4293_v40 }
  0x80   : > { %438 = vrot.lane.b32.xlu1 %v427_v42, %s4003_s30  ;;  %436 = vrot.lane.b32.xlu0 %v426_v43, %s4003_s30  ;;  %v749_v43 = vmul.f32 %v745_v33, %v4290_v39 }
  0x84   : > { %504 = vrot.lane.b32.xlu1 %v495_v47, %s4002_s25  ;;  %502 = vrot.lane.b32.xlu0 %v494_v48, %s4002_s25  ;;  %v771_v47 = vstv %s3563_s26  ;;  %s3578_s26 = sld [smem:[#allocation2 + $0xa]] }
  0x85   : > { %v772_v53 = vmul.f32 %v771_v47, %v4279_v34 }
  0x88   : > { %508 = vrot.lane.b32.xlu1 %v497_v51, %s4002_s25  ;;  %506 = vrot.lane.b32.xlu0 %v496_v52, %s4002_s25  ;;  %v773_v52 = vmul.f32 %v771_v47, %v4276_v32 }
  0x8c   : > { %530 = vrot.lane.b32.xlu1 %v521_v54, %s4002_s25  ;;  %528 = vrot.lane.b32.xlu0 %v520_v55, %s4002_s25 }
  0x90   : > { %534 = vrot.lane.b32.xlu1 %v523_v56, %s4002_s25  ;;  %532 = vrot.lane.b32.xlu0 %v522_v57, %s4002_s25  ;;  %v775_v56 = vmul.f32 %v771_v47, %v4290_v39  ;;  %v774_v57 = vmul.f32 %v771_v47, %v4293_v40 }
  0x94   : > { %556 = vrot.lane.b32.xlu1 %v547_v59, %s4002_s25  ;;  %554 = vrot.lane.b32.xlu0 %v546_v60, %s4002_s25  ;;  %v201_v59 = vstv %s200_s28  ;;  %s3580_s28 = sld [smem:[#allocation2 + $0x10a]] }
  0x98   : > { %560 = vrot.lane.b32.xlu1 %v549_v61, %s4002_s25  ;;  %558 = vrot.lane.b32.xlu0 %v548_v62, %s4002_s25  ;;  %v799_v62 = vmul.f32 %v797_v58, %v4276_v32 }
  0x9c   : > { %582 = vrot.lane.b32.xlu1 %v573_v0, %s4002_s25  ;;  %580 = vrot.lane.b32.xlu0 %v572_v4, %s4002_s25  ;;  %v202_v0 = vmul.f32 %v201_v59, %v4121_v2  ;;  %v203_v4 = vmul.f32 %v201_v59, %v4129_v6 }
  0xa0   : > { %586 = vrot.lane.b32.xlu1 %v575_v5, %s4002_s25  ;;  %584 = vrot.lane.b32.xlu0 %v574_v7, %s4002_s25 }
  0xa4   : > { %608 = vrot.lane.b32.xlu1 %v599_v9, %s4003_s30  ;;  %606 = vrot.lane.b32.xlu0 %v598_v10, %s4003_s30  ;;  %v204_v9 = vmul.f32 %v201_v59, %v4118_v1  ;;  %v211_v10 = vstv %s3535_s4  ;;  %s3582_s4 = sld [smem:[#allocation2 + $0xb]] }
  0xa5   : > { %v214_v47 = vmul.f32 %v211_v10, %v4118_v1 }
  0xa8   : > { %612 = vrot.lane.b32.xlu1 %v601_v11, %s4003_s30  ;;  %610 = vrot.lane.b32.xlu0 %v600_v12, %s4003_s30  ;;  %v205_v11 = vmul.f32 %v201_v59, %v4124_v3  ;;  %v801_v12 = vmul.f32 %v797_v58, %v4290_v39  ;;  %v849_v59 = vstv %s4343_s8  ;;  %s3594_s8 = sld [smem:[#allocation2 + $0xd]] }
  0xac   : > { %634 = vrot.lane.b32.xlu1 %v625_v14, %s4003_s30  ;;  %632 = vrot.lane.b32.xlu0 %v624_v15, %s4003_s30  ;;  %v823_v14 = vstv %s3565_s5  ;;  %s3583_s5 = sld [smem:[#allocation2 + $0x8b]] }
  0xb0   : > { %638 = vrot.lane.b32.xlu1 %v627_v16, %s4003_s30  ;;  %636 = vrot.lane.b32.xlu0 %v626_v17, %s4003_s30  ;;  %v455_v17 = vmul.f32 %v453_v8, %v4192_v44 }
  0xb4   : > { %660 = vrot.lane.b32.xlu1 %v651_v19, %s4003_s30  ;;  %658 = vrot.lane.b32.xlu0 %v650_v20, %s4003_s30  ;;  %v213_v19 = vmul.f32 %v211_v10, %v4129_v6 }
  0xb6   : > { %v4259_v24 = vpop.permute.xlu1 %254  ;;  %v4261_v25 = vpop.permute.xlu0 %250 }
  0xb7   : > { %v262_v15 = vadd.f32 %v4261_v25, %v202_v0  ;;  %v824_v25 = vmul.f32 %v823_v14, %v4279_v34  ;;  %v264_v33 = vadd.f32 %v4259_v24, %v204_v9  ;;  %v827_v24 = vmul.f32 %v823_v14, %v4290_v39 }
  0xb8   : > { %664 = vrot.lane.b32.xlu1 %v653_v21, %s4003_s30  ;;  %662 = vrot.lane.b32.xlu0 %v652_v22, %s4003_s30  ;;  %v212_v22 = vmul.f32 %v211_v10, %v4121_v2 }
  0xba   : > { %v4267_v28 = vpop.permute.xlu1 %256  ;;  %v4269_v29 = vpop.permute.xlu0 %252 }
  0xbb   : > { %v263_v16 = vadd.f32 %v4269_v29, %v203_v4  ;;  %v457_v29 = vmul.f32 %v453_v8, %v4202_v49 }
  0xbc   : > { %686 = vrot.lane.b32.xlu1 %v677_v26, %s4003_s30  ;;  %684 = vrot.lane.b32.xlu0 %v676_v27, %s4003_s30  ;;  %v825_v27 = vmul.f32 %v823_v14, %v4276_v32 }
  0xbe   : > { %v4281_v35 = vpop.permute.xlu1 %278  ;;  %v4283_v36 = vpop.permute.xlu0 %276 }
  0xbf   : > { %v289_v0 = vadd.f32 %v4281_v35, %v213_v19  ;;  %v288_v4 = vadd.f32 %v4283_v36, %v212_v22  ;;  %v850_v35 = vmul.f32 %v849_v59, %v4279_v34 }
  0xc0   : > { %690 = vrot.lane.b32.xlu1 %v679_v30, %s4003_s30  ;;  %688 = vrot.lane.b32.xlu0 %v678_v31, %s4003_s30  ;;  %v456_v30 = vmul.f32 %v453_v8, %v4205_v50  ;;  %v463_v31 = vstv %s4327_s6  ;;  %s3584_s6 = sld [smem:[#allocation2 + $0x10b]] }
  0xc1   : > { %v467_v36 = vmul.f32 %v463_v31, %v4202_v49 }
  0xc2   : > { %v4295_v41 = vpop.permute.xlu1 %282  ;;  %v4297_v42 = vpop.permute.xlu0 %280 }
  0xc4   : > { %756 = vrot.lane.b32.xlu1 %v747_v37, %s4002_s25  ;;  %754 = vrot.lane.b32.xlu0 %v746_v38, %s4002_s25  ;;  %v265_v37 = vadd.f32 %v4267_v28, %v205_v11  ;;  %v826_v28 = vmul.f32 %v823_v14, %v4293_v40 }
  0xc6   : > { %v4303_v48 = vpop.permute.xlu1 %304  ;;  %v4305_v51 = vpop.permute.xlu0 %302 }
  0xc8   : > { %760 = vrot.lane.b32.xlu1 %v749_v43, %s4002_s25  ;;  %758 = vrot.lane.b32.xlu0 %v748_v45, %s4002_s25  ;;  %v215_v45 = vmul.f32 %v211_v10, %v4124_v3 }
  0xca   : > { %v4311_v54 = vpop.permute.xlu1 %308  ;;  %v4313_v55 = vpop.permute.xlu0 %306  ;;  %v291_v19 = vadd.f32 %v4295_v41, %v215_v45  ;;  %v852_v41 = vmul.f32 %v849_v59, %v4293_v40 }
  0xcc   : > { %782 = vrot.lane.b32.xlu1 %v773_v52, %s4002_s25  ;;  %780 = vrot.lane.b32.xlu0 %v772_v53, %s4002_s25 }
  0xce   : > { %v4319_v60 = vpop.permute.xlu1 %330  ;;  %v4321_v61 = vpop.permute.xlu0 %328 }
  0xd0   : > { %786 = vrot.lane.b32.xlu1 %v775_v56, %s4002_s25  ;;  %784 = vrot.lane.b32.xlu0 %v774_v57, %s4002_s25  ;;  %v221_v56 = vstv %s4336_s7  ;;  %s3585_s7 = sld [smem:[#allocation2 + $0x18b]] }
  0xd1   : > { %v223_v10 = vmul.f32 %v221_v56, %v4129_v6 }
  0xd2   : > { %v4331_v5 = vpop.permute.xlu1 %334  ;;  %v4333_v7 = vpop.permute.xlu0 %332 }
  0xd4   : > { %808 = vrot.lane.b32.xlu1 %v799_v62, %s4002_s25  ;;  %806 = vrot.lane.b32.xlu0 %v798_v63, %s4002_s25  ;;  %v465_v62 = vmul.f32 %v463_v31, %v4192_v44  ;;  %v464_v63 = vmul.f32 %v463_v31, %v4195_v46 }
  0xd6   : > { %v357_v20 = vpop.permute.xlu1 %356  ;;  %v355_v21 = vpop.permute.xlu0 %354 }
  0xd7   : > { %v367_v23 = vadd.f32 %v357_v20, %v263_v16  ;;  %v366_v26 = vadd.f32 %v355_v21, %v262_v15  ;;  %v851_v16 = vmul.f32 %v849_v59, %v4276_v32  ;;  %v290_v20 = vadd.f32 %v4297_v42, %v214_v47 }
  0xd8   : > { %812 = vrot.lane.b32.xlu1 %v801_v12, %s4002_s25  ;;  %810 = vrot.lane.b32.xlu0 %v800_v13, %s4002_s25  ;;  %v222_v13 = vmul.f32 %v221_v56, %v4121_v2  ;;  %v875_v42 = vstv %s4376_s11  ;;  %v315_v47 = vadd.f32 %v4303_v48, %v223_v10  ;;  %s3597_s11 = sld [smem:[#allocation2 + $0x18d]] }
  0xd9   : > { %v4362_v38 = vadd.f32 %v455_v17, %v367_v23  ;;  %v4364_v43 = vadd.f32 %v454_v18, %v366_v26  ;;  %v466_v17 = vmul.f32 %v463_v31, %v4205_v50  ;;  %v473_v18 = vstv %s4358_s9  ;;  %s3595_s9 = sld [smem:[#allocation2 + $0x8d]] }
  0xda   : > { %v361_v52 = vpop.permute.xlu1 %360  ;;  %v359_v53 = vpop.permute.xlu0 %358  ;;  %v225_v23 = vmul.f32 %v221_v56, %v4124_v3  ;;  %v224_v26 = vmul.f32 %v221_v56, %v4118_v1  ;;  %v474_v45 = vmul.f32 %v473_v18, %v4195_v46  ;;  %v876_v48 = vmul.f32 %v875_v42, %v4279_v34 }
  0xdb   : > { %v369_v57 = vadd.f32 %v361_v52, %v265_v37  ;;  %v368_v58 = vadd.f32 %v359_v53, %v264_v33  ;;  %v853_v33 = vmul.f32 %v849_v59, %v4290_v39  ;;  %v475_v37 = vmul.f32 %v473_v18, %v4192_v44 }
  0xdc   : > { %834 = vrot.lane.b32.xlu1 %v825_v27, %s4002_s25  ;;  %832 = vrot.lane.b32.xlu0 %v824_v25, %s4002_s25  ;;  %v314_v52 = vadd.f32 %v4305_v51, %v222_v13  ;;  %v477_v51 = vmul.f32 %v473_v18, %v4202_v49 }
  0xdd   : > { %v4382_v8 = vadd.f32 %v457_v29, %v369_v57  ;;  %v4384_v9 = vadd.f32 %v456_v30, %v368_v58  ;;  %v231_v29 = vstv %s4369_s10  ;;  %s3596_s10 = sld [smem:[#allocation2 + $0x10d]] }
  0xde   : > { %v383_v11 = vpop.permute.xlu1 %382  ;;  %v381_v12 = vpop.permute.xlu0 %380  ;;  %v233_v57 = vmul.f32 %v231_v29, %v4129_v6  ;;  %v483_v6 = vstv %s4395_s17  ;;  %s3598_s17 = sld [smem:[#allocation2 + $0xe]] }
  0xdf   : > { %v393_v14 = vadd.f32 %v383_v11, %v289_v0  ;;  %v392_v15 = vadd.f32 %v381_v12, %v288_v4  ;;  %v476_v0 = vmul.f32 %v473_v18, %v4205_v50  ;;  %v317_v4 = vadd.f32 %v4311_v54, %v225_v23 }
  0xe0   : > { %838 = vrot.lane.b32.xlu1 %v827_v24, %s4002_s25  ;;  %836 = vrot.lane.b32.xlu0 %v826_v28, %s4002_s25  ;;  %v232_v28 = vmul.f32 %v231_v29, %v4121_v2  ;;  %v316_v2 = vadd.f32 %v4313_v55, %v224_v26  ;;  %v235_v12 = vmul.f32 %v231_v29, %v4124_v3  ;;  %v901_v55 = vstv %s4411_s19  ;;  %s3599_s19 = sld [smem:[#allocation2 + $0x8e]] }
  0xe1   : > { %v4399_v21 = vadd.f32 %v465_v62, %v393_v14  ;;  %v4401_v22 = vadd.f32 %v464_v63, %v392_v15  ;;  %v877_v63 = vmul.f32 %v875_v42, %v4276_v32  ;;  %v234_v15 = vmul.f32 %v231_v29, %v4118_v1 }
  0xe2   : > { %v387_v27 = vpop.permute.xlu1 %386  ;;  %v385_v25 = vpop.permute.xlu0 %384  ;;  %v878_v54 = vmul.f32 %v875_v42, %v4293_v40  ;;  %v484_v18 = vmul.f32 %v483_v6, %v4195_v46  ;;  %v341_v3 = vadd.f32 %v4319_v60, %v233_v57  ;;  %v903_v29 = vmul.f32 %v901_v55, %v4276_v32 }
  0xe3   : > { %v395_v30 = vadd.f32 %v387_v27, %v291_v19  ;;  %v394_v31 = vadd.f32 %v385_v25, %v290_v20  ;;  %v340_v19 = vadd.f32 %v4321_v61, %v232_v28  ;;  %v487_v46 = vmul.f32 %v483_v6, %v4202_v49 }
  0xe4   : > { %860 = vrot.lane.b32.xlu1 %v851_v16, %s4003_s30  ;;  %858 = vrot.lane.b32.xlu0 %v850_v35, %s4003_s30  ;;  %v486_v60 = vmul.f32 %v483_v6, %v4205_v50  ;;  %v343_v61 = vadd.f32 %v4331_v5, %v235_v12  ;;  %v905_v49 = vmul.f32 %v901_v55, %v4290_v39 }
  0xe5   : > { %v4417_v53 = vadd.f32 %v467_v36, %v395_v30  ;;  %v4419_v56 = vadd.f32 %v466_v17, %v394_v31  ;;  %v879_v36 = vmul.f32 %v875_v42, %v4290_v39  ;;  %v485_v17 = vmul.f32 %v483_v6, %v4192_v44 }
  0xe6   : > { %v409_v58 = vpop.permute.xlu1 %408  ;;  %v407_v24 = vpop.permute.xlu0 %406  ;;  %v902_v44 = vmul.f32 %v901_v55, %v4279_v34  ;;  %v342_v30 = vadd.f32 %v4333_v7, %v234_v15  ;;  %v904_v50 = vmul.f32 %v901_v55, %v4293_v40  ;;  %v1024_v15 = vstv %s3579_s27  ;;  %s3610_s27 = sld [smem:[#allocation2 + $0x10]] }
  0xe7   : > { %v419_v59 = vadd.f32 %v409_v58, %v315_v47  ;;  %v418_v62 = vadd.f32 %v407_v24, %v314_v52  ;;  %v927_v47 = vstv %s3569_s20  ;;  %s3600_s20 = sld [smem:[#allocation2 + $0x10e]] }
  0xe8   : > { %864 = vrot.lane.b32.xlu1 %v853_v33, %s4003_s30  ;;  %862 = vrot.lane.b32.xlu0 %v852_v41, %s4003_s30  ;;  %v929_v58 = vmul.f32 %v927_v47, %v4276_v32  ;;  %v928_v24 = vmul.f32 %v927_v47, %v4279_v34  ;;  %v4491_v32 = vld [vmem:[%s4115_s24 + $0x28] sm:$0xff] }
  0xe9   : > { %v4432_v10 = vadd.f32 %v475_v37, %v419_v59  ;;  %v4434_v11 = vadd.f32 %v474_v45, %v418_v62  ;;  %v931_v62 = vmul.f32 %v927_v47, %v4290_v39 }
  0xea   : > { %v413_v13 = vpop.permute.xlu1 %412  ;;  %v411_v14 = vpop.permute.xlu0 %410 }
  0xeb   : > { %v421_v16 = vadd.f32 %v413_v13, %v317_v4  ;;  %v420_v35 = vadd.f32 %v411_v14, %v316_v2  ;;  %v4502_v4 = vld [vmem:[%s4115_s24 + $0x40] sm:$0xff] }
  0xec   : > { %886 = vrot.lane.b32.xlu1 %v877_v63, %s4003_s30  ;;  %884 = vrot.lane.b32.xlu0 %v876_v48, %s4003_s30  ;;  %v930_v63 = vmul.f32 %v927_v47, %v4293_v40  ;;  %v4488_v48 = vld [vmem:[%s4115_s24 + $0x30] sm:$0xff]  ;;  %v4505_v40 = vld [vmem:[%s4115_s24 + $0x38] sm:$0xff] }
  0xed   : > { %v4447_v1 = vadd.f32 %v477_v51, %v421_v16  ;;  %v4449_v20 = vadd.f32 %v476_v0, %v420_v35  ;;  %v998_v51 = vstv %s3578_s26  ;;  %s3601_s26 = sld [smem:[#allocation2 + $0x18e]] }
  0xee   : > { %v435_v23 = vpop.permute.xlu1 %434  ;;  %v433_v26 = vpop.permute.xlu0 %432  ;;  %v1000_v6 = vmul.f32 %v4488_v48, %v998_v51  ;;  %v999_v39 = vmul.f32 %v4491_v32, %v998_v51  ;;  %v1002_v13 = vmul.f32 %v4502_v4, %v998_v51  ;;  %v1001_v14 = vmul.f32 %v4505_v40, %v998_v51 }
  0xef   : > { %v445_v27 = vadd.f32 %v435_v23, %v341_v3  ;;  %v444_v25 = vadd.f32 %v433_v26, %v340_v19  ;;  %v1027_v3 = vmul.f32 %v4505_v40, %v1024_v15  ;;  %v1050_v19 = vstv %s3580_s28  ;;  %s3611_s28 = sld [smem:[#allocation2 + $0x90]] }
  0xf0   : > { %890 = vrot.lane.b32.xlu1 %v879_v36, %s4003_s30  ;;  %888 = vrot.lane.b32.xlu0 %v878_v54, %s4003_s30  ;;  %v1026_v36 = vmul.f32 %v4488_v48, %v1024_v15  ;;  %v1025_v54 = vmul.f32 %v4491_v32, %v1024_v15 }
  0xf1   : > { %v4459_v31 = vadd.f32 %v485_v17, %v445_v27  ;;  %v4461_v33 = vadd.f32 %v484_v18, %v444_v25  ;;  %v1028_v18 = vmul.f32 %v4502_v4, %v1024_v15  ;;  %v1052_v27 = vmul.f32 %v4488_v48, %v1050_v19 }
  0xf2   : > { %v439_v41 = vpop.permute.xlu1 %438  ;;  %v437_v42 = vpop.permute.xlu0 %436  ;;  %v1051_v25 = vmul.f32 %v4491_v32, %v1050_v19  ;;  %v1128_v15 = vstv %s3583_s5  ;;  %s3614_s5 = sld [smem:[#allocation2 + $0x11]] }
  0xf3   : > { %v447_v37 = vadd.f32 %v439_v41, %v343_v61  ;;  %v446_v45 = vadd.f32 %v437_v42, %v342_v30  ;;  %v1076_v61 = vstv %s3581_s29  ;;  %s3612_s29 = sld [smem:[#allocation2 + $0x110]] }
  0xf4   : > { %912 = vrot.lane.b32.xlu1 %v903_v29, %s4003_s30  ;;  %910 = vrot.lane.b32.xlu0 %v902_v44, %s4003_s30  ;;  %v1078_v42 = vmul.f32 %v4488_v48, %v1076_v61  ;;  %v1079_v47 = vmul.f32 %v4505_v40, %v1076_v61 }
  0xf5   : > { %v4467_v5 = vadd.f32 %v487_v46, %v447_v37  ;;  %v4469_v7 = vadd.f32 %v486_v60, %v446_v45  ;;  %v1054_v46 = vmul.f32 %v4502_v4, %v1050_v19  ;;  %v1053_v60 = vmul.f32 %v4505_v40, %v1050_v19 }
  0xf6   : > { %v4471_v52 = vpop.permute.xlu1 %504  ;;  %v4473_v57 = vpop.permute.xlu0 %502  ;;  %v1077_v37 = vmul.f32 %v4491_v32, %v1076_v61 }
  0xf8   : > { %916 = vrot.lane.b32.xlu1 %v905_v49, %s4003_s30  ;;  %914 = vrot.lane.b32.xlu0 %v904_v50, %s4003_s30  ;;  %v1080_v50 = vmul.f32 %v4502_v4, %v1076_v61 }
  0xfa   : > { %v4479_v28 = vpop.permute.xlu1 %508  ;;  %v4481_v59 = vpop.permute.xlu0 %506 }
  0xfc   : > { %938 = vrot.lane.b32.xlu1 %v929_v58, %s4003_s30  ;;  %936 = vrot.lane.b32.xlu0 %v928_v24, %s4003_s30  ;;  %v1102_v58 = vstv %s3582_s4  ;;  %s3613_s4 = sld [smem:[#allocation2 + $0x190]] }
  0xfd   : > { %v1103_v51 = vmul.f32 %v4491_v32, %v1102_v58 }
  0xfe   : > { %v4493_v34 = vpop.permute.xlu1 %530  ;;  %v4495_v0 = vpop.permute.xlu0 %528 }
 0x100   : > { %942 = vrot.lane.b32.xlu1 %v931_v62, %s4003_s30  ;;  %940 = vrot.lane.b32.xlu0 %v930_v63, %s4003_s30  ;;  %v1104_v63 = vmul.f32 %v4488_v48, %v1102_v58 }
 0x102   : > { %v4507_v2 = vpop.permute.xlu1 %534  ;;  %v4509_v12 = vpop.permute.xlu0 %532 }
 0x104   : > { %1009 = vrot.lane.b32.xlu1 %v1000_v6, %s4002_s25  ;;  %1007 = vrot.lane.b32.xlu0 %v999_v39, %s4002_s25 }
 0x106   : > { %v4515_v16 = vpop.permute.xlu1 %556  ;;  %v4517_v35 = vpop.permute.xlu0 %554 }
 0x108   : > { %1013 = vrot.lane.b32.xlu1 %v1002_v13, %s4002_s25  ;;  %1011 = vrot.lane.b32.xlu0 %v1001_v14, %s4002_s25  ;;  %v1106_v13 = vmul.f32 %v4502_v4, %v1102_v58  ;;  %v1105_v14 = vmul.f32 %v4505_v40, %v1102_v58 }
 0x10a   : > { %v4523_v55 = vpop.permute.xlu1 %560  ;;  %v4525_v17 = vpop.permute.xlu0 %558 }
 0x10c   : > { %1035 = vrot.lane.b32.xlu1 %v1026_v36, %s4002_s25  ;;  %1033 = vrot.lane.b32.xlu0 %v1025_v54, %s4002_s25 }
 0x10e   : > { %v4531_v23 = vpop.permute.xlu1 %582  ;;  %v4533_v26 = vpop.permute.xlu0 %580 }
 0x110   : > { %1039 = vrot.lane.b32.xlu1 %v1028_v18, %s4002_s25  ;;  %1037 = vrot.lane.b32.xlu0 %v1027_v3, %s4002_s25  ;;  %v1130_v18 = vmul.f32 %v4488_v48, %v1128_v15  ;;  %v1129_v3 = vmul.f32 %v4491_v32, %v1128_v15 }
 0x112   : > { %v4539_v29 = vpop.permute.xlu1 %586  ;;  %v4541_v44 = vpop.permute.xlu0 %584 }
 0x114   : > { %1061 = vrot.lane.b32.xlu1 %v1052_v27, %s4002_s25  ;;  %1059 = vrot.lane.b32.xlu0 %v1051_v25, %s4002_s25  ;;  %v1132_v25 = vmul.f32 %v4502_v4, %v1128_v15 }
 0x116   : > { %v4547_v30 = vpop.permute.xlu1 %608  ;;  %v4549_v41 = vpop.permute.xlu0 %606 }
 0x118   : > { %1065 = vrot.lane.b32.xlu1 %v1054_v46, %s4002_s25  ;;  %1063 = vrot.lane.b32.xlu0 %v1053_v60, %s4002_s25  ;;  %v1131_v46 = vmul.f32 %v4505_v40, %v1128_v15  ;;  %v1154_v60 = vstv %s3584_s6  ;;  %s3615_s6 = sld [smem:[#allocation2 + $0x91]] }
 0x11a   : > { %v4555_v45 = vpop.permute.xlu1 %612  ;;  %v4557_v49 = vpop.permute.xlu0 %610 }
 0x11c   : > { %1087 = vrot.lane.b32.xlu1 %v1078_v42, %s4002_s25  ;;  %1085 = vrot.lane.b32.xlu0 %v1077_v37, %s4002_s25  ;;  %v1156_v37 = vmul.f32 %v4488_v48, %v1154_v60 }
 0x11e   : > { %v4563_v24 = vpop.permute.xlu1 %634  ;;  %v4565_v62 = vpop.permute.xlu0 %632 }
 0x120   : > { %1091 = vrot.lane.b32.xlu1 %v1080_v50, %s4002_s25  ;;  %1089 = vrot.lane.b32.xlu0 %v1079_v47, %s4002_s25  ;;  %v1155_v50 = vmul.f32 %v4491_v32, %v1154_v60 }
 0x122   : > { %v4571_v6 = vpop.permute.xlu1 %638  ;;  %v4573_v39 = vpop.permute.xlu0 %636 }
 0x123   : > { %7202 = vst [vmem:[#allocation11_spill] sm:$0xff] %v4571_v6  ;;  %7203 = vst [vmem:[#allocation12_spill] sm:$0xff] %v4573_v39 }
 0x124   : > { %1113 = vrot.lane.b32.xlu1 %v1104_v63, %s4003_s30  ;;  %1111 = vrot.lane.b32.xlu0 %v1103_v51, %s4003_s30  ;;  %v1158_v63 = vmul.f32 %v4502_v4, %v1154_v60  ;;  %v1157_v51 = vmul.f32 %v4505_v40, %v1154_v60 }
 0x126   : > { %v4579_v36 = vpop.permute.xlu1 %660  ;;  %v4581_v54 = vpop.permute.xlu0 %658 }
 0x127   : > { %7204 = vst [vmem:[#allocation13_spill] sm:$0xff] %v4579_v36  ;;  %7205 = vst [vmem:[#allocation14_spill] sm:$0xff] %v4581_v54 }
 0x128   : > { %1117 = vrot.lane.b32.xlu1 %v1106_v13, %s4003_s30  ;;  %1115 = vrot.lane.b32.xlu0 %v1105_v14, %s4003_s30  ;;  %v1180_v13 = vstv %s3585_s7  ;;  %s3616_s7 = sld [smem:[#allocation2 + $0x111]] }
 0x129   : > { %v1184_v60 = vmul.f32 %v4502_v4, %v1180_v13 }
 0x12a   : > { %v4587_v19 = vpop.permute.xlu1 %664  ;;  %v4589_v27 = vpop.permute.xlu0 %662 }
 0x12b   : > { %7206 = vst [vmem:[#allocation15_spill] sm:$0xff] %v4587_v19  ;;  %7207 = vst [vmem:[#allocation16_spill] sm:$0xff] %v4589_v27 }
 0x12c   : > { %1139 = vrot.lane.b32.xlu1 %v1130_v18, %s4003_s30  ;;  %1137 = vrot.lane.b32.xlu0 %v1129_v3, %s4003_s30  ;;  %v1182_v18 = vmul.f32 %v4488_v48, %v1180_v13  ;;  %v1181_v3 = vmul.f32 %v4491_v32, %v1180_v13  ;;  %v4631_v48 = vld [vmem:[%s4115_s24 + $0x29] sm:$0xff] }
 0x12e   : > { %v4595_v61 = vpop.permute.xlu1 %686  ;;  %v4597_v42 = vpop.permute.xlu0 %684 }
 0x12f   : > { %7208 = vst [vmem:[#allocation17_spill] sm:$0xff] %v4595_v61  ;;  %7209 = vst [vmem:[#allocation18_spill] sm:$0xff] %v4597_v42  ;;  %v3867_v61 = vld [vmem:[%s4115_s24 + $0x12] sm:$0xff] }
 0x130   : > { %1143 = vrot.lane.b32.xlu1 %v1132_v25, %s4003_s30  ;;  %1141 = vrot.lane.b32.xlu0 %v1131_v46, %s4003_s30 }
 0x132   : > { %v4603_v47 = vpop.permute.xlu1 %690  ;;  %v4605_v58 = vpop.permute.xlu0 %688 }
 0x133   : > { %7210 = vst [vmem:[#allocation19_spill] sm:$0xff] %v4603_v47  ;;  %7211 = vst [vmem:[#allocation20_spill] sm:$0xff] %v4605_v58 }
 0x134   : > { %1165 = vrot.lane.b32.xlu1 %v1156_v37, %s4003_s30  ;;  %1163 = vrot.lane.b32.xlu0 %v1155_v50, %s4003_s30  ;;  %v1183_v37 = vmul.f32 %v4505_v40, %v1180_v13  ;;  %v4628_v50 = vld [vmem:[%s4115_s24 + $0x31] sm:$0xff]  ;;  %v4645_v40 = vld [vmem:[%s4115_s24 + $0x39] sm:$0xff] }
 0x136   : > { %v4611_v14 = vpop.permute.xlu1 %756  ;;  %v4613_v15 = vpop.permute.xlu0 %754 }
 0x137   : > { %7212 = vst [vmem:[#allocation21_spill] sm:$0xff] %v4611_v14  ;;  %7213 = vst [vmem:[#allocation22_spill] sm:$0xff] %v4613_v15  ;;  %v3865_v15 = vld [vmem:[%s4115_s24 + $0x2] sm:$0xff] }
 0x138   : > { %1169 = vrot.lane.b32.xlu1 %v1158_v63, %s4003_s30  ;;  %1167 = vrot.lane.b32.xlu0 %v1157_v51, %s4003_s30  ;;  %v1250_v63 = vstv %s3594_s8  ;;  %s3617_s8 = sld [smem:[#allocation2 + $0x191]] }
 0x139   : > { %v1251_v4 = vmul.f32 %v4631_v48, %v1250_v63 }
 0x13a   : > { %v4619_v25 = vpop.permute.xlu1 %760  ;;  %v4621_v46 = vpop.permute.xlu0 %758 }
 0x13b   : > { %7214 = vst [vmem:[#allocation23_spill] sm:$0xff] %v4619_v25  ;;  %7215 = vst [vmem:[#allocation24_spill] sm:$0xff] %v4621_v46 }
 0x13c   : > { %1191 = vrot.lane.b32.xlu1 %v1182_v18, %s4003_s30  ;;  %1189 = vrot.lane.b32.xlu0 %v1181_v3, %s4003_s30  ;;  %v1252_v18 = vmul.f32 %v4628_v50, %v1250_v63  ;;  %v4642_v3 = vld [vmem:[%s4115_s24 + $0x41] sm:$0xff] }
 0x13e   : > { %v4633_v32 = vpop.permute.xlu1 %782  ;;  %v4635_v51 = vpop.permute.xlu0 %780 }
 0x13f   : > { %7216 = vst [vmem:[#allocation25_spill] sm:$0xff] %v4633_v32  ;;  %7217 = vst [vmem:[#allocation26_spill] sm:$0xff] %v4635_v51  ;;  %v1276_v51 = vstv %s3595_s9  ;;  %s3626_s9 = sld [smem:[#allocation2 + $0x13]] }
 0x140   : > { %1195 = vrot.lane.b32.xlu1 %v1184_v60, %s4003_s30  ;;  %1193 = vrot.lane.b32.xlu0 %v1183_v37, %s4003_s30  ;;  %v1254_v60 = vmul.f32 %v4642_v3, %v1250_v63  ;;  %v1253_v37 = vmul.f32 %v4645_v40, %v1250_v63  ;;  %v1280_v63 = vmul.f32 %v4642_v3, %v1276_v51 }
 0x142   : > { %v4647_v13 = vpop.permute.xlu1 %786  ;;  %v4649_v46 = vpop.permute.xlu0 %784 }
 0x143   : > { %7218 = vst [vmem:[#allocation27_spill] sm:$0xff] %v4647_v13  ;;  %7219 = vst [vmem:[#allocation28_spill] sm:$0xff] %v4649_v46  ;;  %v1278_v46 = vmul.f32 %v4628_v50, %v1276_v51 }
 0x144   : > { %1261 = vrot.lane.b32.xlu1 %v1252_v18, %s4002_s25  ;;  %1259 = vrot.lane.b32.xlu0 %v1251_v4, %s4002_s25  ;;  %v1277_v18 = vmul.f32 %v4631_v48, %v1276_v51 }
 0x146   : > { %v4655_v32 = vpop.permute.xlu1 %808  ;;  %v4657_v25 = vpop.permute.xlu0 %806 }
 0x147   : > { %7220 = vst [vmem:[#allocation29_spill] sm:$0xff] %v4655_v32  ;;  %7221 = vst [vmem:[#allocation30_spill] sm:$0xff] %v4657_v25  ;;  %v1279_v25 = vmul.f32 %v4645_v40, %v1276_v51  ;;  %v1302_v32 = vstv %s3596_s10  ;;  %s3627_s10 = sld [smem:[#allocation2 + $0x93]] }
 0x148   : > { %1265 = vrot.lane.b32.xlu1 %v1254_v60, %s4002_s25  ;;  %1263 = vrot.lane.b32.xlu0 %v1253_v37, %s4002_s25  ;;  %v1306_v51 = vmul.f32 %v4642_v3, %v1302_v32 }
 0x14a   : > { %v4663_v13 = vpop.permute.xlu1 %812  ;;  %v4665_v4 = vpop.permute.xlu0 %810 }
 0x14b   : > { %7222 = vst [vmem:[#allocation31_spill] sm:$0xff] %v4663_v13  ;;  %7223 = vst [vmem:[#allocation32_spill] sm:$0xff] %v4665_v4  ;;  %v1304_v4 = vmul.f32 %v4628_v50, %v1302_v32 }
 0x14c   : > { %1287 = vrot.lane.b32.xlu1 %v1278_v46, %s4002_s25  ;;  %1285 = vrot.lane.b32.xlu0 %v1277_v18, %s4002_s25  ;;  %v1303_v46 = vmul.f32 %v4631_v48, %v1302_v32 }
 0x14e   : > { %v4671_v60 = vpop.permute.xlu1 %834  ;;  %v4673_v37 = vpop.permute.xlu0 %832 }
 0x14f   : > { %7224 = vst [vmem:[#allocation33_spill] sm:$0xff] %v4671_v60  ;;  %7225 = vst [vmem:[#allocation34_spill] sm:$0xff] %v4673_v37  ;;  %v1305_v37 = vmul.f32 %v4645_v40, %v1302_v32  ;;  %v1328_v60 = vstv %s3597_s11  ;;  %s3628_s11 = sld [smem:[#allocation2 + $0x113]] }
 0x150   : > { %1291 = vrot.lane.b32.xlu1 %v1280_v63, %s4002_s25  ;;  %1289 = vrot.lane.b32.xlu0 %v1279_v25, %s4002_s25  ;;  %v1332_v32 = vmul.f32 %v4642_v3, %v1328_v60 }
 0x152   : > { %v4679_v13 = vpop.permute.xlu1 %838  ;;  %v4681_v18 = vpop.permute.xlu0 %836 }
 0x153   : > { %7226 = vst [vmem:[#allocation35_spill] sm:$0xff] %v4679_v13  ;;  %7227 = vst [vmem:[#allocation36_spill] sm:$0xff] %v4681_v18  ;;  %v1330_v18 = vmul.f32 %v4628_v50, %v1328_v60 }
 0x154   : > { %1313 = vrot.lane.b32.xlu1 %v1304_v4, %s4002_s25  ;;  %1311 = vrot.lane.b32.xlu0 %v1303_v46, %s4002_s25  ;;  %v1329_v4 = vmul.f32 %v4631_v48, %v1328_v60 }
 0x156   : > { %v4687_v63 = vpop.permute.xlu1 %860  ;;  %v4689_v25 = vpop.permute.xlu0 %858 }
 0x157   : > { %7228 = vst [vmem:[#allocation37_spill] sm:$0xff] %v4687_v63  ;;  %7229 = vst [vmem:[#allocation38_spill] sm:$0xff] %v4689_v25  ;;  %v1331_v25 = vmul.f32 %v4645_v40, %v1328_v60  ;;  %v1354_v63 = vstv %s3598_s17  ;;  %s3629_s17 = sld [smem:[#allocation2 + $0x193]] }
 0x158   : > { %1317 = vrot.lane.b32.xlu1 %v1306_v51, %s4002_s25  ;;  %1315 = vrot.lane.b32.xlu0 %v1305_v37, %s4002_s25  ;;  %v1358_v60 = vmul.f32 %v4642_v3, %v1354_v63 }
 0x15a   : > { %v4695_v13 = vpop.permute.xlu1 %864  ;;  %v4697_v46 = vpop.permute.xlu0 %862 }
 0x15b   : > { %7230 = vst [vmem:[#allocation39_spill] sm:$0xff] %v4695_v13  ;;  %7231 = vst [vmem:[#allocation40_spill] sm:$0xff] %v4697_v46  ;;  %v1356_v46 = vmul.f32 %v4628_v50, %v1354_v63 }
 0x15c   : > { %1339 = vrot.lane.b32.xlu1 %v1330_v18, %s4002_s25  ;;  %1337 = vrot.lane.b32.xlu0 %v1329_v4, %s4002_s25  ;;  %v1355_v18 = vmul.f32 %v4631_v48, %v1354_v63 }
 0x15e   : > { %v4703_v51 = vpop.permute.xlu1 %886  ;;  %v4705_v37 = vpop.permute.xlu0 %884 }
 0x15f   : > { %7232 = vst [vmem:[#allocation41_spill] sm:$0xff] %v4703_v51  ;;  %7233 = vst [vmem:[#allocation42_spill] sm:$0xff] %v4705_v37  ;;  %v1357_v37 = vmul.f32 %v4645_v40, %v1354_v63  ;;  %v1380_v51 = vstv %s3599_s19  ;;  %s3630_s19 = sld [smem:[#allocation2 + $0x14]] }
 0x160   : > { %1343 = vrot.lane.b32.xlu1 %v1332_v32, %s4002_s25  ;;  %1341 = vrot.lane.b32.xlu0 %v1331_v25, %s4002_s25  ;;  %v1384_v63 = vmul.f32 %v4642_v3, %v1380_v51 }
 0x162   : > { %v4711_v13 = vpop.permute.xlu1 %890  ;;  %v4713_v4 = vpop.permute.xlu0 %888 }
 0x163   : > { %7234 = vst [vmem:[#allocation43_spill] sm:$0xff] %v4711_v13  ;;  %7235 = vst [vmem:[#allocation44_spill] sm:$0xff] %v4713_v4  ;;  %v1382_v4 = vmul.f32 %v4628_v50, %v1380_v51 }
 0x164   : > { %1365 = vrot.lane.b32.xlu1 %v1356_v46, %s4003_s30  ;;  %1363 = vrot.lane.b32.xlu0 %v1355_v18, %s4003_s30  ;;  %v1381_v46 = vmul.f32 %v4631_v48, %v1380_v51 }
 0x166   : > { %v4719_v32 = vpop.permute.xlu1 %912  ;;  %v4721_v25 = vpop.permute.xlu0 %910 }
 0x167   : > { %7236 = vst [vmem:[#allocation45_spill] sm:$0xff] %v4719_v32  ;;  %7237 = vst [vmem:[#allocation46_spill] sm:$0xff] %v4721_v25  ;;  %v1383_v25 = vmul.f32 %v4645_v40, %v1380_v51  ;;  %v1406_v32 = vstv %s3600_s20  ;;  %s3631_s20 = sld [smem:[#allocation2 + $0x94]] }
 0x168   : > { %1369 = vrot.lane.b32.xlu1 %v1358_v60, %s4003_s30  ;;  %1367 = vrot.lane.b32.xlu0 %v1357_v37, %s4003_s30  ;;  %v1410_v51 = vmul.f32 %v4642_v3, %v1406_v32 }
 0x16a   : > { %v4727_v13 = vpop.permute.xlu1 %916  ;;  %v4729_v18 = vpop.permute.xlu0 %914 }
 0x16b   : > { %7238 = vst [vmem:[#allocation47_spill] sm:$0xff] %v4727_v13  ;;  %7239 = vst [vmem:[#allocation48_spill] sm:$0xff] %v4729_v18  ;;  %v1408_v18 = vmul.f32 %v4628_v50, %v1406_v32 }
 0x16c   : > { %1391 = vrot.lane.b32.xlu1 %v1382_v4, %s4003_s30  ;;  %1389 = vrot.lane.b32.xlu0 %v1381_v46, %s4003_s30  ;;  %v1407_v4 = vmul.f32 %v4631_v48, %v1406_v32 }
 0x16e   : > { %v4735_v60 = vpop.permute.xlu1 %938  ;;  %v4737_v37 = vpop.permute.xlu0 %936 }
 0x16f   : > { %7240 = vst [vmem:[#allocation49_spill] sm:$0xff] %v4735_v60  ;;  %7241 = vst [vmem:[#allocation50_spill] sm:$0xff] %v4737_v37  ;;  %v1409_v37 = vmul.f32 %v4645_v40, %v1406_v32 }
 0x170   : > { %1395 = vrot.lane.b32.xlu1 %v1384_v63, %s4003_s30  ;;  %1393 = vrot.lane.b32.xlu0 %v1383_v25, %s4003_s30  ;;  %v1432_v63 = vstv %s3601_s26  ;;  %s3632_s26 = sld [smem:[#allocation2 + $0x114]] }
 0x171   : > { %v1436_v32 = vmul.f32 %v4642_v3, %v1432_v63 }
 0x172   : > { %v4743_v13 = vpop.permute.xlu1 %942  ;;  %v4745_v46 = vpop.permute.xlu0 %940 }
 0x173   : > { %7242 = vst [vmem:[#allocation51_spill] sm:$0xff] %v4743_v13  ;;  %7243 = vst [vmem:[#allocation52_spill] sm:$0xff] %v4745_v46 }
 0x174   : > { %1417 = vrot.lane.b32.xlu1 %v1408_v18, %s4003_s30  ;;  %1415 = vrot.lane.b32.xlu0 %v1407_v4, %s4003_s30  ;;  %v1434_v18 = vmul.f32 %v4628_v50, %v1432_v63  ;;  %v1433_v4 = vmul.f32 %v4631_v48, %v1432_v63  ;;  %v4771_v50 = vld [vmem:[%s4115_s24 + $0x2a] sm:$0xff] }
 0x176   : > { %v4751_v25 = vpop.permute.xlu1 %1009  ;;  %v4753_v60 = vpop.permute.xlu0 %1007 }
 0x177   : > { %7244 = vst [vmem:[#allocation53_spill] sm:$0xff] %v4751_v25  ;;  %7245 = vst [vmem:[#allocation54_spill] sm:$0xff] %v4753_v60  ;;  %v4768_v60 = vld [vmem:[%s4115_s24 + $0x32] sm:$0xff] }
 0x178   : > { %1421 = vrot.lane.b32.xlu1 %v1410_v51, %s4003_s30  ;;  %1419 = vrot.lane.b32.xlu0 %v1409_v37, %s4003_s30  ;;  %v1435_v51 = vmul.f32 %v4645_v40, %v1432_v63  ;;  %v1502_v37 = vstv %s3610_s27  ;;  %v4785_v40 = vld [vmem:[%s4115_s24 + $0x3a] sm:$0xff]  ;;  %s3633_s27 = sld [smem:[#allocation2 + $0x194]] }
 0x179   : > { %v1503_v3 = vmul.f32 %v4771_v50, %v1502_v37 }
 0x17a   : > { %v4759_v46 = vpop.permute.xlu1 %1013  ;;  %v4761_v13 = vpop.permute.xlu0 %1011 }
 0x17b   : > { %7246 = vst [vmem:[#allocation55_spill] sm:$0xff] %v4759_v46  ;;  %7247 = vst [vmem:[#allocation56_spill] sm:$0xff] %v4761_v13 }
 0x17c   : > { %1443 = vrot.lane.b32.xlu1 %v1434_v18, %s4003_s30  ;;  %1441 = vrot.lane.b32.xlu0 %v1433_v4, %s4003_s30  ;;  %v1504_v18 = vmul.f32 %v4768_v60, %v1502_v37  ;;  %v4782_v4 = vld [vmem:[%s4115_s24 + $0x42] sm:$0xff] }
 0x17e   : > { %v4773_v48 = vpop.permute.xlu1 %1035  ;;  %v4775_v46 = vpop.permute.xlu0 %1033 }
 0x17f   : > { %7248 = vst [vmem:[#allocation57_spill] sm:$0xff] %v4773_v48  ;;  %7249 = vst [vmem:[#allocation58_spill] sm:$0xff] %v4775_v46  ;;  %v1528_v46 = vstv %s3611_s28  ;;  %s3642_s28 = sld [smem:[#allocation2 + $0x16]] }
 0x180   : > { %1447 = vrot.lane.b32.xlu1 %v1436_v32, %s4003_s30  ;;  %1445 = vrot.lane.b32.xlu0 %v1435_v51, %s4003_s30  ;;  %v1506_v32 = vmul.f32 %v4782_v4, %v1502_v37  ;;  %v1505_v51 = vmul.f32 %v4785_v40, %v1502_v37  ;;  %v1532_v37 = vmul.f32 %v4782_v4, %v1528_v46 }
 0x182   : > { %v4787_v63 = vpop.permute.xlu1 %1039  ;;  %v4789_v13 = vpop.permute.xlu0 %1037 }
 0x183   : > { %7250 = vst [vmem:[#allocation59_spill] sm:$0xff] %v4787_v63  ;;  %7251 = vst [vmem:[#allocation60_spill] sm:$0xff] %v4789_v13  ;;  %v1530_v13 = vmul.f32 %v4768_v60, %v1528_v46 }
 0x184   : > { %1513 = vrot.lane.b32.xlu1 %v1504_v18, %s4002_s25  ;;  %1511 = vrot.lane.b32.xlu0 %v1503_v3, %s4002_s25  ;;  %v1529_v18 = vmul.f32 %v4771_v50, %v1528_v46 }
 0x186   : > { %v4795_v48 = vpop.permute.xlu1 %1061  ;;  %v4797_v25 = vpop.permute.xlu0 %1059 }
 0x187   : > { %7252 = vst [vmem:[#allocation61_spill] sm:$0xff] %v4795_v48  ;;  %7253 = vst [vmem:[#allocation62_spill] sm:$0xff] %v4797_v25  ;;  %v1531_v25 = vmul.f32 %v4785_v40, %v1528_v46  ;;  %v1554_v48 = vstv %s3612_s29  ;;  %s3643_s29 = sld [smem:[#allocation2 + $0x96]] }
 0x188   : > { %1517 = vrot.lane.b32.xlu1 %v1506_v32, %s4002_s25  ;;  %1515 = vrot.lane.b32.xlu0 %v1505_v51, %s4002_s25  ;;  %v1558_v46 = vmul.f32 %v4782_v4, %v1554_v48 }
 0x18a   : > { %v4803_v63 = vpop.permute.xlu1 %1065  ;;  %v4805_v3 = vpop.permute.xlu0 %1063 }
 0x18b   : > { %7254 = vst [vmem:[#allocation63_spill] sm:$0xff] %v4803_v63  ;;  %7255 = vst [vmem:[#allocation64_spill] sm:$0xff] %v4805_v3  ;;  %v1556_v3 = vmul.f32 %v4768_v60, %v1554_v48 }
 0x18c   : > { %1539 = vrot.lane.b32.xlu1 %v1530_v13, %s4002_s25  ;;  %1537 = vrot.lane.b32.xlu0 %v1529_v18, %s4002_s25  ;;  %v1555_v13 = vmul.f32 %v4771_v50, %v1554_v48 }
 0x18e   : > { %v4811_v32 = vpop.permute.xlu1 %1087  ;;  %v4813_v51 = vpop.permute.xlu0 %1085 }
 0x18f   : > { %7256 = vst [vmem:[#allocation65_spill] sm:$0xff] %v4811_v32  ;;  %7257 = vst [vmem:[#allocation66_spill] sm:$0xff] %v4813_v51  ;;  %v1557_v51 = vmul.f32 %v4785_v40, %v1554_v48  ;;  %v1580_v32 = vstv %s3613_s4  ;;  %s3644_s4 = sld [smem:[#allocation2 + $0x116]] }
 0x190   : > { %1543 = vrot.lane.b32.xlu1 %v1532_v37, %s4002_s25  ;;  %1541 = vrot.lane.b32.xlu0 %v1531_v25, %s4002_s25  ;;  %v1584_v48 = vmul.f32 %v4782_v4, %v1580_v32 }
 0x192   : > { %v4819_v63 = vpop.permute.xlu1 %1091  ;;  %v4821_v18 = vpop.permute.xlu0 %1089 }
 0x193   : > { %7258 = vst [vmem:[#allocation67_spill] sm:$0xff] %v4819_v63  ;;  %7259 = vst [vmem:[#allocation68_spill] sm:$0xff] %v4821_v18  ;;  %v1582_v18 = vmul.f32 %v4768_v60, %v1580_v32 }
 0x194   : > { %1565 = vrot.lane.b32.xlu1 %v1556_v3, %s4002_s25  ;;  %1563 = vrot.lane.b32.xlu0 %v1555_v13, %s4002_s25  ;;  %v1581_v3 = vmul.f32 %v4771_v50, %v1580_v32 }
 0x196   : > { %v4827_v37 = vpop.permute.xlu1 %1113  ;;  %v4829_v25 = vpop.permute.xlu0 %1111 }
 0x197   : > { %7260 = vst [vmem:[#allocation69_spill] sm:$0xff] %v4827_v37  ;;  %7261 = vst [vmem:[#allocation70_spill] sm:$0xff] %v4829_v25  ;;  %v1583_v25 = vmul.f32 %v4785_v40, %v1580_v32  ;;  %v1606_v37 = vstv %s3614_s5  ;;  %s3645_s5 = sld [smem:[#allocation2 + $0x196]] }
 0x198   : > { %1569 = vrot.lane.b32.xlu1 %v1558_v46, %s4002_s25  ;;  %1567 = vrot.lane.b32.xlu0 %v1557_v51, %s4002_s25  ;;  %v1610_v32 = vmul.f32 %v4782_v4, %v1606_v37 }
 0x19a   : > { %v4835_v63 = vpop.permute.xlu1 %1117  ;;  %v4837_v13 = vpop.permute.xlu0 %1115 }
 0x19b   : > { %7262 = vst [vmem:[#allocation71_spill] sm:$0xff] %v4835_v63  ;;  %7263 = vst [vmem:[#allocation72_spill] sm:$0xff] %v4837_v13  ;;  %v1608_v13 = vmul.f32 %v4768_v60, %v1606_v37 }
 0x19c   : > { %1591 = vrot.lane.b32.xlu1 %v1582_v18, %s4002_s25  ;;  %1589 = vrot.lane.b32.xlu0 %v1581_v3, %s4002_s25  ;;  %v1607_v18 = vmul.f32 %v4771_v50, %v1606_v37 }
 0x19e   : > { %v4843_v46 = vpop.permute.xlu1 %1139  ;;  %v4845_v51 = vpop.permute.xlu0 %1137 }
 0x19f   : > { %7264 = vst [vmem:[#allocation73_spill] sm:$0xff] %v4843_v46  ;;  %7265 = vst [vmem:[#allocation74_spill] sm:$0xff] %v4845_v51  ;;  %v1609_v51 = vmul.f32 %v4785_v40, %v1606_v37  ;;  %v1632_v46 = vstv %s3615_s6  ;;  %s3646_s6 = sld [smem:[#allocation2 + $0x17]] }
 0x1a0   : > { %1595 = vrot.lane.b32.xlu1 %v1584_v48, %s4002_s25  ;;  %1593 = vrot.lane.b32.xlu0 %v1583_v25, %s4002_s25  ;;  %v1636_v37 = vmul.f32 %v4782_v4, %v1632_v46 }
 0x1a2   : > { %v4851_v63 = vpop.permute.xlu1 %1143  ;;  %v4853_v3 = vpop.permute.xlu0 %1141 }
 0x1a3   : > { %7266 = vst [vmem:[#allocation75_spill] sm:$0xff] %v4851_v63  ;;  %7267 = vst [vmem:[#allocation76_spill] sm:$0xff] %v4853_v3  ;;  %v1634_v3 = vmul.f32 %v4768_v60, %v1632_v46 }
 0x1a4   : > { %1617 = vrot.lane.b32.xlu1 %v1608_v13, %s4003_s30  ;;  %1615 = vrot.lane.b32.xlu0 %v1607_v18, %s4003_s30  ;;  %v1633_v13 = vmul.f32 %v4771_v50, %v1632_v46 }
 0x1a6   : > { %v4859_v48 = vpop.permute.xlu1 %1165  ;;  %v4861_v25 = vpop.permute.xlu0 %1163 }
 0x1a7   : > { %7268 = vst [vmem:[#allocation77_spill] sm:$0xff] %v4859_v48  ;;  %7269 = vst [vmem:[#allocation78_spill] sm:$0xff] %v4861_v25  ;;  %v1635_v25 = vmul.f32 %v4785_v40, %v1632_v46  ;;  %v1658_v48 = vstv %s3616_s7  ;;  %s3647_s7 = sld [smem:[#allocation2 + $0x97]] }
 0x1a8   : > { %1621 = vrot.lane.b32.xlu1 %v1610_v32, %s4003_s30  ;;  %1619 = vrot.lane.b32.xlu0 %v1609_v51, %s4003_s30  ;;  %v1662_v46 = vmul.f32 %v4782_v4, %v1658_v48 }
 0x1aa   : > { %v4867_v63 = vpop.permute.xlu1 %1169  ;;  %v4869_v18 = vpop.permute.xlu0 %1167 }
 0x1ab   : > { %7270 = vst [vmem:[#allocation79_spill] sm:$0xff] %v4867_v63  ;;  %7271 = vst [vmem:[#allocation80_spill] sm:$0xff] %v4869_v18  ;;  %v1660_v18 = vmul.f32 %v4768_v60, %v1658_v48 }
 0x1ac   : > { %1643 = vrot.lane.b32.xlu1 %v1634_v3, %s4003_s30  ;;  %1641 = vrot.lane.b32.xlu0 %v1633_v13, %s4003_s30  ;;  %v1659_v3 = vmul.f32 %v4771_v50, %v1658_v48 }
 0x1ae   : > { %v4875_v32 = vpop.permute.xlu1 %1191  ;;  %v4877_v51 = vpop.permute.xlu0 %1189 }
 0x1af   : > { %7272 = vst [vmem:[#allocation81_spill] sm:$0xff] %v4875_v32  ;;  %7273 = vst [vmem:[#allocation82_spill] sm:$0xff] %v4877_v51  ;;  %v1661_v51 = vmul.f32 %v4785_v40, %v1658_v48 }
 0x1b0   : > { %1647 = vrot.lane.b32.xlu1 %v1636_v37, %s4003_s30  ;;  %1645 = vrot.lane.b32.xlu0 %v1635_v25, %s4003_s30  ;;  %v1684_v37 = vstv %s3617_s8  ;;  %s3648_s8 = sld [smem:[#allocation2 + $0x117]] }
 0x1b1   : > { %v1688_v48 = vmul.f32 %v4782_v4, %v1684_v37 }
 0x1b2   : > { %v4883_v63 = vpop.permute.xlu1 %1195  ;;  %v4885_v13 = vpop.permute.xlu0 %1193 }
 0x1b3   : > { %7274 = vst [vmem:[#allocation83_spill] sm:$0xff] %v4883_v63  ;;  %7275 = vst [vmem:[#allocation84_spill] sm:$0xff] %v4885_v13 }
 0x1b4   : > { %1669 = vrot.lane.b32.xlu1 %v1660_v18, %s4003_s30  ;;  %1667 = vrot.lane.b32.xlu0 %v1659_v3, %s4003_s30  ;;  %v1686_v18 = vmul.f32 %v4768_v60, %v1684_v37  ;;  %v1685_v3 = vmul.f32 %v4771_v50, %v1684_v37  ;;  %v4911_v60 = vld [vmem:[%s4115_s24 + $0x50] sm:$0xff] }
 0x1b6   : > { %v4891_v25 = vpop.permute.xlu1 %1261  ;;  %v4893_v32 = vpop.permute.xlu0 %1259 }
 0x1b7   : > { %7276 = vst [vmem:[#allocation85_spill] sm:$0xff] %v4891_v25  ;;  %7277 = vst [vmem:[#allocation86_spill] sm:$0xff] %v4893_v32  ;;  %v4908_v32 = vld [vmem:[%s4115_s24 + $0x58] sm:$0xff] }
 0x1b8   : > { %1673 = vrot.lane.b32.xlu1 %v1662_v46, %s4003_s30  ;;  %1671 = vrot.lane.b32.xlu0 %v1661_v51, %s4003_s30  ;;  %v1687_v46 = vmul.f32 %v4785_v40, %v1684_v37  ;;  %v1755_v51 = vstv %s3626_s9  ;;  %v4925_v40 = vld [vmem:[%s4115_s24 + $0x60] sm:$0xff]  ;;  %s3649_s9 = sld [smem:[#allocation2 + $0x197]] }
 0x1b9   : > { %v1756_v4 = vmul.f32 %v4911_v60, %v1755_v51 }
 0x1ba   : > { %v4899_v13 = vpop.permute.xlu1 %1265  ;;  %v4901_v63 = vpop.permute.xlu0 %1263 }
 0x1bb   : > { %7278 = vst [vmem:[#allocation87_spill] sm:$0xff] %v4899_v13  ;;  %7279 = vst [vmem:[#allocation88_spill] sm:$0xff] %v4901_v63 }
 0x1bc   : > { %1695 = vrot.lane.b32.xlu1 %v1686_v18, %s4003_s30  ;;  %1693 = vrot.lane.b32.xlu0 %v1685_v3, %s4003_s30  ;;  %v1757_v18 = vmul.f32 %v4908_v32, %v1755_v51  ;;  %v4922_v3 = vld [vmem:[%s4115_s24 + $0x68] sm:$0xff] }
 0x1be   : > { %v4913_v50 = vpop.permute.xlu1 %1287  ;;  %v4915_v13 = vpop.permute.xlu0 %1285 }
 0x1bf   : > { %7280 = vst [vmem:[#allocation89_spill] sm:$0xff] %v4913_v50  ;;  %7281 = vst [vmem:[#allocation90_spill] sm:$0xff] %v4915_v13  ;;  %v1781_v13 = vstv %s3627_s10  ;;  %s3658_s10 = sld [smem:[#allocation2 + $0x19]] }
 0x1c0   : > { %1699 = vrot.lane.b32.xlu1 %v1688_v48, %s4003_s30  ;;  %1697 = vrot.lane.b32.xlu0 %v1687_v46, %s4003_s30  ;;  %v1759_v48 = vmul.f32 %v4922_v3, %v1755_v51  ;;  %v1758_v46 = vmul.f32 %v4925_v40, %v1755_v51  ;;  %v1785_v51 = vmul.f32 %v4922_v3, %v1781_v13 }
 0x1c2   : > { %v4927_v37 = vpop.permute.xlu1 %1291  ;;  %v4929_v63 = vpop.permute.xlu0 %1289 }
 0x1c3   : > { %7282 = vst [vmem:[#allocation91_spill] sm:$0xff] %v4927_v37  ;;  %7283 = vst [vmem:[#allocation92_spill] sm:$0xff] %v4929_v63  ;;  %v1783_v63 = vmul.f32 %v4908_v32, %v1781_v13 }
 0x1c4   : > { %1766 = vrot.lane.b32.xlu1 %v1757_v18, %s4002_s25  ;;  %1764 = vrot.lane.b32.xlu0 %v1756_v4, %s4002_s25  ;;  %v1782_v18 = vmul.f32 %v4911_v60, %v1781_v13 }
 0x1c6   : > { %v4935_v50 = vpop.permute.xlu1 %1313  ;;  %v4937_v25 = vpop.permute.xlu0 %1311 }
 0x1c7   : > { %7284 = vst [vmem:[#allocation93_spill] sm:$0xff] %v4935_v50  ;;  %7285 = vst [vmem:[#allocation94_spill] sm:$0xff] %v4937_v25  ;;  %v1784_v25 = vmul.f32 %v4925_v40, %v1781_v13  ;;  %v1807_v50 = vstv %s3628_s11  ;;  %s3659_s11 = sld [smem:[#allocation2 + $0x99]] }
 0x1c8   : > { %1770 = vrot.lane.b32.xlu1 %v1759_v48, %s4002_s25  ;;  %1768 = vrot.lane.b32.xlu0 %v1758_v46, %s4002_s25  ;;  %v1811_v13 = vmul.f32 %v4922_v3, %v1807_v50 }
 0x1ca   : > { %v4943_v37 = vpop.permute.xlu1 %1317  ;;  %v4945_v4 = vpop.permute.xlu0 %1315 }
 0x1cb   : > { %7286 = vst [vmem:[#allocation95_spill] sm:$0xff] %v4943_v37  ;;  %7287 = vst [vmem:[#allocation96_spill] sm:$0xff] %v4945_v4  ;;  %v1809_v4 = vmul.f32 %v4908_v32, %v1807_v50 }
 0x1cc   : > { %1792 = vrot.lane.b32.xlu1 %v1783_v63, %s4002_s25  ;;  %1790 = vrot.lane.b32.xlu0 %v1782_v18, %s4002_s25  ;;  %v1808_v63 = vmul.f32 %v4911_v60, %v1807_v50 }
 0x1ce   : > { %v4951_v48 = vpop.permute.xlu1 %1339  ;;  %v4953_v46 = vpop.permute.xlu0 %1337 }
 0x1cf   : > { %7288 = vst [vmem:[#allocation97_spill] sm:$0xff] %v4951_v48  ;;  %7289 = vst [vmem:[#allocation98_spill] sm:$0xff] %v4953_v46  ;;  %v1810_v46 = vmul.f32 %v4925_v40, %v1807_v50  ;;  %v1833_v48 = vstv %s3629_s17  ;;  %s3660_s17 = sld [smem:[#allocation2 + $0x119]] }
 0x1d0   : > { %1796 = vrot.lane.b32.xlu1 %v1785_v51, %s4002_s25  ;;  %1794 = vrot.lane.b32.xlu0 %v1784_v25, %s4002_s25  ;;  %v1837_v50 = vmul.f32 %v4922_v3, %v1833_v48 }
 0x1d2   : > { %v4959_v37 = vpop.permute.xlu1 %1343  ;;  %v4961_v18 = vpop.permute.xlu0 %1341 }
 0x1d3   : > { %7290 = vst [vmem:[#allocation99_spill] sm:$0xff] %v4959_v37  ;;  %7291 = vst [vmem:[#allocation100_spill] sm:$0xff] %v4961_v18  ;;  %v1835_v18 = vmul.f32 %v4908_v32, %v1833_v48 }
 0x1d4   : > { %1818 = vrot.lane.b32.xlu1 %v1809_v4, %s4002_s25  ;;  %1816 = vrot.lane.b32.xlu0 %v1808_v63, %s4002_s25  ;;  %v1834_v4 = vmul.f32 %v4911_v60, %v1833_v48 }
 0x1d6   : > { %v4967_v51 = vpop.permute.xlu1 %1365  ;;  %v4969_v25 = vpop.permute.xlu0 %1363 }
 0x1d7   : > { %7292 = vst [vmem:[#allocation101_spill] sm:$0xff] %v4967_v51  ;;  %7293 = vst [vmem:[#allocation102_spill] sm:$0xff] %v4969_v25  ;;  %v1836_v25 = vmul.f32 %v4925_v40, %v1833_v48  ;;  %v1859_v51 = vstv %s3630_s19  ;;  %s3661_s19 = sld [smem:[#allocation2 + $0x199]] }
 0x1d8   : > { %1822 = vrot.lane.b32.xlu1 %v1811_v13, %s4002_s25  ;;  %1820 = vrot.lane.b32.xlu0 %v1810_v46, %s4002_s25  ;;  %v1863_v48 = vmul.f32 %v4922_v3, %v1859_v51 }
 0x1da   : > { %v4975_v37 = vpop.permute.xlu1 %1369  ;;  %v4977_v63 = vpop.permute.xlu0 %1367 }
 0x1db   : > { %7294 = vst [vmem:[#allocation103_spill] sm:$0xff] %v4975_v37  ;;  %7295 = vst [vmem:[#allocation104_spill] sm:$0xff] %v4977_v63  ;;  %v1861_v63 = vmul.f32 %v4908_v32, %v1859_v51 }
 0x1dc   : > { %1844 = vrot.lane.b32.xlu1 %v1835_v18, %s4002_s25  ;;  %1842 = vrot.lane.b32.xlu0 %v1834_v4, %s4002_s25  ;;  %v1860_v18 = vmul.f32 %v4911_v60, %v1859_v51 }
 0x1de   : > { %v4983_v13 = vpop.permute.xlu1 %1391  ;;  %v4985_v46 = vpop.permute.xlu0 %1389 }
 0x1df   : > { %7296 = vst [vmem:[#allocation105_spill] sm:$0xff] %v4983_v13  ;;  %7297 = vst [vmem:[#allocation106_spill] sm:$0xff] %v4985_v46  ;;  %v1862_v46 = vmul.f32 %v4925_v40, %v1859_v51  ;;  %v1885_v13 = vstv %s3631_s20  ;;  %s3558_s20 = sld [smem:[#allocation2 + $0x6]] }
 0x1e0   : > { %1848 = vrot.lane.b32.xlu1 %v1837_v50, %s4002_s25  ;;  %1846 = vrot.lane.b32.xlu0 %v1836_v25, %s4002_s25  ;;  %v1889_v51 = vmul.f32 %v4922_v3, %v1885_v13 }
 0x1e2   : > { %v4991_v37 = vpop.permute.xlu1 %1395  ;;  %v4993_v4 = vpop.permute.xlu0 %1393 }
 0x1e3   : > { %7298 = vst [vmem:[#allocation107_spill] sm:$0xff] %v4991_v37  ;;  %7299 = vst [vmem:[#allocation108_spill] sm:$0xff] %v4993_v4  ;;  %v1887_v4 = vmul.f32 %v4908_v32, %v1885_v13 }
 0x1e4   : > { %1870 = vrot.lane.b32.xlu1 %v1861_v63, %s4003_s30  ;;  %1868 = vrot.lane.b32.xlu0 %v1860_v18, %s4003_s30  ;;  %v1886_v63 = vmul.f32 %v4911_v60, %v1885_v13 }
 0x1e6   : > { %v4999_v50 = vpop.permute.xlu1 %1417  ;;  %v5001_v25 = vpop.permute.xlu0 %1415 }
 0x1e7   : > { %7300 = vst [vmem:[#allocation109_spill] sm:$0xff] %v4999_v50  ;;  %7301 = vst [vmem:[#allocation110_spill] sm:$0xff] %v5001_v25  ;;  %v1888_v25 = vmul.f32 %v4925_v40, %v1885_v13  ;;  %v1911_v50 = vstv %s3632_s26  ;;  %s3559_s26 = sld [smem:[#allocation2 + $0x86]] }
 0x1e8   : > { %1874 = vrot.lane.b32.xlu1 %v1863_v48, %s4003_s30  ;;  %1872 = vrot.lane.b32.xlu0 %v1862_v46, %s4003_s30  ;;  %v1915_v13 = vmul.f32 %v4922_v3, %v1911_v50 }
 0x1ea   : > { %v5007_v37 = vpop.permute.xlu1 %1421  ;;  %v5009_v18 = vpop.permute.xlu0 %1419 }
 0x1eb   : > { %7302 = vst [vmem:[#allocation111_spill] sm:$0xff] %v5007_v37  ;;  %7303 = vst [vmem:[#allocation112_spill] sm:$0xff] %v5009_v18  ;;  %v1913_v18 = vmul.f32 %v4908_v32, %v1911_v50 }
 0x1ec   : > { %1896 = vrot.lane.b32.xlu1 %v1887_v4, %s4003_s30  ;;  %1894 = vrot.lane.b32.xlu0 %v1886_v63, %s4003_s30  ;;  %v1912_v4 = vmul.f32 %v4911_v60, %v1911_v50 }
 0x1ee   : > { %v5015_v48 = vpop.permute.xlu1 %1443  ;;  %v5017_v46 = vpop.permute.xlu0 %1441 }
 0x1ef   : > { %7304 = vst [vmem:[#allocation113_spill] sm:$0xff] %v5015_v48  ;;  %7305 = vst [vmem:[#allocation114_spill] sm:$0xff] %v5017_v46  ;;  %v1914_v46 = vmul.f32 %v4925_v40, %v1911_v50 }
 0x1f0   : > { %1900 = vrot.lane.b32.xlu1 %v1889_v51, %s4003_s30  ;;  %1898 = vrot.lane.b32.xlu0 %v1888_v25, %s4003_s30  ;;  %v1937_v51 = vstv %s3633_s27  ;;  %s3662_s27 = sld [smem:[#allocation2 + $0x1a]] }
 0x1f1   : > { %v1941_v50 = vmul.f32 %v4922_v3, %v1937_v51 }
 0x1f2   : > { %v5023_v37 = vpop.permute.xlu1 %1447  ;;  %v5025_v63 = vpop.permute.xlu0 %1445 }
 0x1f3   : > { %7306 = vst [vmem:[#allocation115_spill] sm:$0xff] %v5023_v37  ;;  %7307 = vst [vmem:[#allocation116_spill] sm:$0xff] %v5025_v63 }
 0x1f4   : > { %1922 = vrot.lane.b32.xlu1 %v1913_v18, %s4003_s30  ;;  %1920 = vrot.lane.b32.xlu0 %v1912_v4, %s4003_s30  ;;  %v1939_v18 = vmul.f32 %v4908_v32, %v1937_v51  ;;  %v1938_v4 = vmul.f32 %v4911_v60, %v1937_v51  ;;  %v5051_v32 = vld [vmem:[%s4115_s24 + $0x51] sm:$0xff] }
 0x1f6   : > { %v5031_v25 = vpop.permute.xlu1 %1513  ;;  %v5033_v48 = vpop.permute.xlu0 %1511 }
 0x1f7   : > { %7308 = vst [vmem:[#allocation117_spill] sm:$0xff] %v5031_v25  ;;  %7309 = vst [vmem:[#allocation118_spill] sm:$0xff] %v5033_v48  ;;  %v5048_v48 = vld [vmem:[%s4115_s24 + $0x59] sm:$0xff] }
 0x1f8   : > { %1926 = vrot.lane.b32.xlu1 %v1915_v13, %s4003_s30  ;;  %1924 = vrot.lane.b32.xlu0 %v1914_v46, %s4003_s30  ;;  %v1940_v13 = vmul.f32 %v4925_v40, %v1937_v51  ;;  %v2007_v46 = vstv %s3642_s28  ;;  %v5065_v40 = vld [vmem:[%s4115_s24 + $0x61] sm:$0xff]  ;;  %s3560_s28 = sld [smem:[#allocation2 + $0x106]] }
 0x1f9   : > { %v2008_v3 = vmul.f32 %v5051_v32, %v2007_v46 }
 0x1fa   : > { %v5039_v63 = vpop.permute.xlu1 %1517  ;;  %v5041_v37 = vpop.permute.xlu0 %1515 }
 0x1fb   : > { %7310 = vst [vmem:[#allocation119_spill] sm:$0xff] %v5039_v63  ;;  %7311 = vst [vmem:[#allocation120_spill] sm:$0xff] %v5041_v37 }
 0x1fc   : > { %1948 = vrot.lane.b32.xlu1 %v1939_v18, %s4003_s30  ;;  %1946 = vrot.lane.b32.xlu0 %v1938_v4, %s4003_s30  ;;  %v2009_v18 = vmul.f32 %v5048_v48, %v2007_v46  ;;  %v5062_v4 = vld [vmem:[%s4115_s24 + $0x69] sm:$0xff] }
 0x1fe   : > { %v5053_v60 = vpop.permute.xlu1 %1539  ;;  %v5055_v63 = vpop.permute.xlu0 %1537  ;;  %v725_v58 = vstv %s3560_s28  ;;  %s5567_s28 = sld [smem:[#allocation2 + $0x9c]] }
 0x1ff   : > { %7312 = vst [vmem:[#allocation121_spill] sm:$0xff] %v5053_v60  ;;  %7313 = vst [vmem:[#allocation122_spill] sm:$0xff] %v5055_v63  ;;  %v2033_v63 = vstv %s3643_s29  ;;  %s5251_s29 = sld [smem:[#allocation2 + $0x186]] }
 0x200   : > { %1952 = vrot.lane.b32.xlu1 %v1941_v50, %s4003_s30  ;;  %1950 = vrot.lane.b32.xlu0 %v1940_v13, %s4003_s30  ;;  %v2011_v50 = vmul.f32 %v5062_v4, %v2007_v46  ;;  %v2010_v13 = vmul.f32 %v5065_v40, %v2007_v46  ;;  %v2037_v46 = vmul.f32 %v5062_v4, %v2033_v63 }
 0x202   : > { %v5067_v51 = vpop.permute.xlu1 %1543  ;;  %v5069_v37 = vpop.permute.xlu0 %1541 }
 0x203   : > { %7314 = vst [vmem:[#allocation123_spill] sm:$0xff] %v5067_v51  ;;  %7315 = vst [vmem:[#allocation124_spill] sm:$0xff] %v5069_v37  ;;  %v2035_v37 = vmul.f32 %v5048_v48, %v2033_v63 }
 0x204   : > { %2018 = vrot.lane.b32.xlu1 %v2009_v18, %s4002_s25  ;;  %2016 = vrot.lane.b32.xlu0 %v2008_v3, %s4002_s25  ;;  %v2034_v18 = vmul.f32 %v5051_v32, %v2033_v63 }
 0x205   : > { %v735_v19 = vstv %s5251_s29  ;;  %s5587_s29 = sld [smem:[#allocation2 + $0x8f]] }
 0x206   : > { %v5075_v60 = vpop.permute.xlu1 %1565  ;;  %v5077_v25 = vpop.permute.xlu0 %1563  ;;  %v5315_v39 = vmul.f32 %v3865_v15, %v735_v19 }
 0x207   : > { %7316 = vst [vmem:[#allocation125_spill] sm:$0xff] %v5075_v60  ;;  %7317 = vst [vmem:[#allocation126_spill] sm:$0xff] %v5077_v25  ;;  %v2036_v25 = vmul.f32 %v5065_v40, %v2033_v63  ;;  %v2059_v60 = vstv %s3644_s4  ;;  %s5253_s4 = sld [smem:[#allocation2 + $0x9]] }
 0x208   : > { %2022 = vrot.lane.b32.xlu1 %v2011_v50, %s4002_s25  ;;  %2020 = vrot.lane.b32.xlu0 %v2010_v13, %s4002_s25  ;;  %v2063_v63 = vmul.f32 %v5062_v4, %v2059_v60  ;;  %7374 = vst [vmem:[#allocation183_spill] sm:$0xff] %v5315_v39 }
 0x20a   : > { %v5083_v51 = vpop.permute.xlu1 %1569  ;;  %v5085_v3 = vpop.permute.xlu0 %1567 }
 0x20b   : > { %7318 = vst [vmem:[#allocation127_spill] sm:$0xff] %v5083_v51  ;;  %7319 = vst [vmem:[#allocation128_spill] sm:$0xff] %v5085_v3  ;;  %v2061_v3 = vmul.f32 %v5048_v48, %v2059_v60 }
 0x20c   : > { %2044 = vrot.lane.b32.xlu1 %v2035_v37, %s4002_s25  ;;  %2042 = vrot.lane.b32.xlu0 %v2034_v18, %s4002_s25  ;;  %v2060_v37 = vmul.f32 %v5051_v32, %v2059_v60 }
 0x20d   : > { %v958_v36 = vstv %s5253_s4  ;;  %s5623_s4 = sld [smem:[#allocation2 + $0x10f]] }
 0x20e   : > { %v5091_v50 = vpop.permute.xlu1 %1591  ;;  %v5093_v13 = vpop.permute.xlu0 %1589 }
 0x20f   : > { %7320 = vst [vmem:[#allocation129_spill] sm:$0xff] %v5091_v50  ;;  %7321 = vst [vmem:[#allocation130_spill] sm:$0xff] %v5093_v13  ;;  %v2062_v13 = vmul.f32 %v5065_v40, %v2059_v60  ;;  %v2085_v50 = vstv %s3645_s5  ;;  %s5259_s5 = sld [smem:[#allocation2 + $0x89]] }
 0x210   : > { %2048 = vrot.lane.b32.xlu1 %v2037_v46, %s4002_s25  ;;  %2046 = vrot.lane.b32.xlu0 %v2036_v25, %s4002_s25  ;;  %v2089_v60 = vmul.f32 %v5062_v4, %v2085_v50 }
 0x212   : > { %v5099_v51 = vpop.permute.xlu1 %1595  ;;  %v5101_v18 = vpop.permute.xlu0 %1593 }
 0x213   : > { %7322 = vst [vmem:[#allocation131_spill] sm:$0xff] %v5099_v51  ;;  %7323 = vst [vmem:[#allocation132_spill] sm:$0xff] %v5101_v18  ;;  %v2087_v18 = vmul.f32 %v5048_v48, %v2085_v50 }
 0x214   : > { %2070 = vrot.lane.b32.xlu1 %v2061_v3, %s4002_s25  ;;  %2068 = vrot.lane.b32.xlu0 %v2060_v37, %s4002_s25  ;;  %v2086_v3 = vmul.f32 %v5051_v32, %v2085_v50 }
 0x216   : > { %v5107_v46 = vpop.permute.xlu1 %1617  ;;  %v5109_v25 = vpop.permute.xlu0 %1615 }
 0x217   : > { %7324 = vst [vmem:[#allocation133_spill] sm:$0xff] %v5107_v46  ;;  %7325 = vst [vmem:[#allocation134_spill] sm:$0xff] %v5109_v25  ;;  %v2088_v25 = vmul.f32 %v5065_v40, %v2085_v50  ;;  %v2111_v46 = vstv %s3646_s6  ;;  %s5265_s6 = sld [smem:[#allocation2 + $0x109]] }
 0x218   : > { %2074 = vrot.lane.b32.xlu1 %v2063_v63, %s4002_s25  ;;  %2072 = vrot.lane.b32.xlu0 %v2062_v13, %s4002_s25  ;;  %v2115_v50 = vmul.f32 %v5062_v4, %v2111_v46 }
 0x21a   : > { %v5115_v51 = vpop.permute.xlu1 %1621  ;;  %v5117_v37 = vpop.permute.xlu0 %1619 }
 0x21b   : > { %7326 = vst [vmem:[#allocation135_spill] sm:$0xff] %v5115_v51  ;;  %7327 = vst [vmem:[#allocation136_spill] sm:$0xff] %v5117_v37  ;;  %v2113_v37 = vmul.f32 %v5048_v48, %v2111_v46 }
 0x21c   : > { %2096 = vrot.lane.b32.xlu1 %v2087_v18, %s4002_s25  ;;  %2094 = vrot.lane.b32.xlu0 %v2086_v3, %s4002_s25  ;;  %v2112_v18 = vmul.f32 %v5051_v32, %v2111_v46 }
 0x21e   : > { %v5123_v63 = vpop.permute.xlu1 %1643  ;;  %v5125_v13 = vpop.permute.xlu0 %1641 }
 0x21f   : > { %7328 = vst [vmem:[#allocation137_spill] sm:$0xff] %v5123_v63  ;;  %7329 = vst [vmem:[#allocation138_spill] sm:$0xff] %v5125_v13  ;;  %v2114_v13 = vmul.f32 %v5065_v40, %v2111_v46  ;;  %v2137_v63 = vstv %s3647_s7  ;;  %s5267_s7 = sld [smem:[#allocation2 + $0x189]] }
 0x220   : > { %2100 = vrot.lane.b32.xlu1 %v2089_v60, %s4002_s25  ;;  %2098 = vrot.lane.b32.xlu0 %v2088_v25, %s4002_s25  ;;  %v2141_v46 = vmul.f32 %v5062_v4, %v2137_v63 }
 0x222   : > { %v5131_v51 = vpop.permute.xlu1 %1647  ;;  %v5133_v3 = vpop.permute.xlu0 %1645 }
 0x223   : > { %7330 = vst [vmem:[#allocation139_spill] sm:$0xff] %v5131_v51  ;;  %7331 = vst [vmem:[#allocation140_spill] sm:$0xff] %v5133_v3  ;;  %v2139_v3 = vmul.f32 %v5048_v48, %v2137_v63 }
 0x224   : > { %2122 = vrot.lane.b32.xlu1 %v2113_v37, %s4003_s30  ;;  %2120 = vrot.lane.b32.xlu0 %v2112_v18, %s4003_s30  ;;  %v2138_v37 = vmul.f32 %v5051_v32, %v2137_v63 }
 0x226   : > { %v5139_v60 = vpop.permute.xlu1 %1669  ;;  %v5141_v25 = vpop.permute.xlu0 %1667 }
 0x227   : > { %7332 = vst [vmem:[#allocation141_spill] sm:$0xff] %v5139_v60  ;;  %7333 = vst [vmem:[#allocation142_spill] sm:$0xff] %v5141_v25  ;;  %v2140_v25 = vmul.f32 %v5065_v40, %v2137_v63  ;;  %v2163_v60 = vstv %s3648_s8  ;;  %s5273_s8 = sld [smem:[#allocation2 + $0x9a]] }
 0x228   : > { %2126 = vrot.lane.b32.xlu1 %v2115_v50, %s4003_s30  ;;  %2124 = vrot.lane.b32.xlu0 %v2114_v13, %s4003_s30  ;;  %v2167_v63 = vmul.f32 %v5062_v4, %v2163_v60 }
 0x22a   : > { %v5147_v51 = vpop.permute.xlu1 %1673  ;;  %v5149_v18 = vpop.permute.xlu0 %1671 }
 0x22b   : > { %7334 = vst [vmem:[#allocation143_spill] sm:$0xff] %v5147_v51  ;;  %7335 = vst [vmem:[#allocation144_spill] sm:$0xff] %v5149_v18  ;;  %v2165_v18 = vmul.f32 %v5048_v48, %v2163_v60 }
 0x22c   : > { %2148 = vrot.lane.b32.xlu1 %v2139_v3, %s4003_s30  ;;  %2146 = vrot.lane.b32.xlu0 %v2138_v37, %s4003_s30  ;;  %v2164_v3 = vmul.f32 %v5051_v32, %v2163_v60 }
 0x22e   : > { %v5155_v50 = vpop.permute.xlu1 %1695  ;;  %v5157_v13 = vpop.permute.xlu0 %1693 }
 0x22f   : > { %7336 = vst [vmem:[#allocation145_spill] sm:$0xff] %v5155_v50  ;;  %7337 = vst [vmem:[#allocation146_spill] sm:$0xff] %v5157_v13  ;;  %v2166_v13 = vmul.f32 %v5065_v40, %v2163_v60 }
 0x230   : > { %2152 = vrot.lane.b32.xlu1 %v2141_v46, %s4003_s30  ;;  %2150 = vrot.lane.b32.xlu0 %v2140_v25, %s4003_s30  ;;  %v2189_v46 = vstv %s3649_s9  ;;  %s5333_s9 = sld [smem:[#allocation2 + $0xc]] }
 0x231   : > { %v2193_v60 = vmul.f32 %v5062_v4, %v2189_v46 }
 0x232   : > { %v5163_v51 = vpop.permute.xlu1 %1699  ;;  %v5165_v37 = vpop.permute.xlu0 %1697 }
 0x233   : > { %7338 = vst [vmem:[#allocation147_spill] sm:$0xff] %v5163_v51  ;;  %7339 = vst [vmem:[#allocation148_spill] sm:$0xff] %v5165_v37 }
 0x234   : > { %2174 = vrot.lane.b32.xlu1 %v2165_v18, %s4003_s30  ;;  %2172 = vrot.lane.b32.xlu0 %v2164_v3, %s4003_s30  ;;  %v2191_v18 = vmul.f32 %v5048_v48, %v2189_v46  ;;  %v2190_v3 = vmul.f32 %v5051_v32, %v2189_v46  ;;  %v5191_v48 = vld [vmem:[%s4115_s24 + $0x52] sm:$0xff] }
 0x236   : > { %v5171_v25 = vpop.permute.xlu1 %1766  ;;  %v5173_v50 = vpop.permute.xlu0 %1764 }
 0x237   : > { %7340 = vst [vmem:[#allocation149_spill] sm:$0xff] %v5171_v25  ;;  %7341 = vst [vmem:[#allocation150_spill] sm:$0xff] %v5173_v50  ;;  %v5188_v50 = vld [vmem:[%s4115_s24 + $0x5a] sm:$0xff] }
 0x238   : > { %2178 = vrot.lane.b32.xlu1 %v2167_v63, %s4003_s30  ;;  %2176 = vrot.lane.b32.xlu0 %v2166_v13, %s4003_s30  ;;  %v2192_v63 = vmul.f32 %v5065_v40, %v2189_v46  ;;  %v2259_v13 = vstv %s3658_s10  ;;  %v5205_v40 = vld [vmem:[%s4115_s24 + $0x62] sm:$0xff]  ;;  %s5347_s10 = sld [smem:[#allocation2 + $0x11a]] }
 0x239   : > { %v2260_v4 = vmul.f32 %v5191_v48, %v2259_v13 }
 0x23a   : > { %v5179_v37 = vpop.permute.xlu1 %1770  ;;  %v5181_v51 = vpop.permute.xlu0 %1768 }
 0x23b   : > { %7342 = vst [vmem:[#allocation151_spill] sm:$0xff] %v5179_v37  ;;  %7343 = vst [vmem:[#allocation152_spill] sm:$0xff] %v5181_v51 }
 0x23c   : > { %2200 = vrot.lane.b32.xlu1 %v2191_v18, %s4003_s30  ;;  %2198 = vrot.lane.b32.xlu0 %v2190_v3, %s4003_s30  ;;  %v2261_v18 = vmul.f32 %v5188_v50, %v2259_v13  ;;  %v5202_v3 = vld [vmem:[%s4115_s24 + $0x6a] sm:$0xff] }
 0x23e   : > { %v5193_v32 = vpop.permute.xlu1 %1792  ;;  %v5195_v37 = vpop.permute.xlu0 %1790 }
 0x23f   : > { %7344 = vst [vmem:[#allocation153_spill] sm:$0xff] %v5193_v32  ;;  %7345 = vst [vmem:[#allocation154_spill] sm:$0xff] %v5195_v37  ;;  %v2285_v37 = vstv %s3659_s11  ;;  %s5383_s11 = sld [smem:[#allocation2 + $0x8c]] }
 0x240   : > { %2204 = vrot.lane.b32.xlu1 %v2193_v60, %s4003_s30  ;;  %2202 = vrot.lane.b32.xlu0 %v2192_v63, %s4003_s30  ;;  %v2263_v60 = vmul.f32 %v5202_v3, %v2259_v13  ;;  %v2262_v63 = vmul.f32 %v5205_v40, %v2259_v13  ;;  %v2289_v13 = vmul.f32 %v5202_v3, %v2285_v37 }
 0x242   : > { %v5207_v46 = vpop.permute.xlu1 %1796  ;;  %v5209_v51 = vpop.permute.xlu0 %1794 }
 0x243   : > { %7346 = vst [vmem:[#allocation155_spill] sm:$0xff] %v5207_v46  ;;  %7347 = vst [vmem:[#allocation156_spill] sm:$0xff] %v5209_v51  ;;  %v2287_v51 = vmul.f32 %v5188_v50, %v2285_v37 }
 0x244   : > { %2270 = vrot.lane.b32.xlu1 %v2261_v18, %s4002_s25  ;;  %2268 = vrot.lane.b32.xlu0 %v2260_v4, %s4002_s25  ;;  %v2286_v18 = vmul.f32 %v5191_v48, %v2285_v37 }
 0x246   : > { %v5215_v32 = vpop.permute.xlu1 %1818  ;;  %v5217_v25 = vpop.permute.xlu0 %1816 }
 0x247   : > { %7348 = vst [vmem:[#allocation157_spill] sm:$0xff] %v5215_v32  ;;  %7349 = vst [vmem:[#allocation158_spill] sm:$0xff] %v5217_v25  ;;  %v2288_v25 = vmul.f32 %v5205_v40, %v2285_v37  ;;  %v2311_v32 = vstv %s3660_s17  ;;  %s5416_s17 = sld [smem:[#allocation2 + $0x19a]] }
 0x248   : > { %2274 = vrot.lane.b32.xlu1 %v2263_v60, %s4002_s25  ;;  %2272 = vrot.lane.b32.xlu0 %v2262_v63, %s4002_s25  ;;  %v2315_v37 = vmul.f32 %v5202_v3, %v2311_v32 }
 0x24a   : > { %v5223_v46 = vpop.permute.xlu1 %1822  ;;  %v5225_v4 = vpop.permute.xlu0 %1820 }
 0x24b   : > { %7350 = vst [vmem:[#allocation159_spill] sm:$0xff] %v5223_v46  ;;  %7351 = vst [vmem:[#allocation160_spill] sm:$0xff] %v5225_v4  ;;  %v2313_v4 = vmul.f32 %v5188_v50, %v2311_v32 }
 0x24c   : > { %2296 = vrot.lane.b32.xlu1 %v2287_v51, %s4002_s25  ;;  %2294 = vrot.lane.b32.xlu0 %v2286_v18, %s4002_s25  ;;  %v2312_v51 = vmul.f32 %v5191_v48, %v2311_v32 }
 0x24e   : > { %v5231_v60 = vpop.permute.xlu1 %1844  ;;  %v5233_v63 = vpop.permute.xlu0 %1842 }
 0x24f   : > { %7352 = vst [vmem:[#allocation161_spill] sm:$0xff] %v5231_v60  ;;  %7353 = vst [vmem:[#allocation162_spill] sm:$0xff] %v5233_v63  ;;  %v2337_v63 = vstv %s3661_s19  ;;  %s5425_s19 = sld [smem:[#allocation2 + $0x10c]] }
 0x250   : > { %2300 = vrot.lane.b32.xlu1 %v2289_v13, %s4002_s25  ;;  %2298 = vrot.lane.b32.xlu0 %v2288_v25, %s4002_s25  ;;  %v2314_v13 = vmul.f32 %v5205_v40, %v2311_v32  ;;  %v2338_v32 = vmul.f32 %v5191_v48, %v2337_v63 }
 0x252   : > { %v5239_v46 = vpop.permute.xlu1 %1848  ;;  %v5241_v18 = vpop.permute.xlu0 %1846 }
 0x253   : > { %7354 = vst [vmem:[#allocation163_spill] sm:$0xff] %v5239_v46  ;;  %7355 = vst [vmem:[#allocation164_spill] sm:$0xff] %v5241_v18  ;;  %v715_v46 = vstv %s3559_s26  ;;  %s5499_s26 = sld [smem:[#allocation2 + $0x1c]] }
 0x254   : > { %2322 = vrot.lane.b32.xlu1 %v2313_v4, %s4002_s25  ;;  %2320 = vrot.lane.b32.xlu0 %v2312_v51, %s4002_s25  ;;  %v2339_v4 = vmul.f32 %v5188_v50, %v2337_v63  ;;  %v5294_v54 = vmul.f32 %v3865_v15, %v715_v46 }
 0x256   : > { %v5247_v25 = vpop.permute.xlu1 %1870  ;;  %v5249_v60 = vpop.permute.xlu0 %1868  ;;  %7366 = vst [vmem:[#allocation175_spill] sm:$0xff] %v5294_v54  ;;  %v5307_v54 = vmul.f32 %v3865_v15, %v725_v58 }
 0x257   : > { %7356 = vst [vmem:[#allocation165_spill] sm:$0xff] %v5247_v25  ;;  %7357 = vst [vmem:[#allocation166_spill] sm:$0xff] %v5249_v60  ;;  %v705_v60 = vstv %s3558_s20  ;;  %s5474_s20 = sld [smem:[#allocation2 + $0x18c]] }
 0x258   : > { %2326 = vrot.lane.b32.xlu1 %v2315_v37, %s4002_s25  ;;  %2324 = vrot.lane.b32.xlu0 %v2314_v13, %s4002_s25  ;;  %v2341_v37 = vmul.f32 %v5202_v3, %v2337_v63  ;;  %v2340_v13 = vmul.f32 %v5205_v40, %v2337_v63  ;;  %v5279_v14 = vmul.f32 %v3865_v15, %v705_v60  ;;  %v978_v15 = vstv %s5265_s6  ;;  %s5664_s6 = sld [smem:[#allocation2 + $0x18f]] }
 0x259   : > { %v5289_v63 = vmul.f32 %v3867_v61, %v705_v60  ;;  %7370 = vst [vmem:[#allocation179_spill] sm:$0xff] %v5307_v54  ;;  %v3868_v54 = vld [vmem:[%s4115_s24 + $0x30] sm:$0xff] }
 0x25a   : > { %v5261_v51 = vpop.permute.xlu1 %1874  ;;  %v5263_v18 = vpop.permute.xlu0 %1872  ;;  %7360 = vst [vmem:[#allocation169_spill] sm:$0xff] %v5279_v14 }
 0x25b   : > { %7358 = vst [vmem:[#allocation167_spill] sm:$0xff] %v5261_v51  ;;  %7359 = vst [vmem:[#allocation168_spill] sm:$0xff] %v5263_v18  ;;  %v2363_v51 = vstv %s3662_s27  ;;  %v3864_v18 = vld [vmem:[%s4115_s24 + $0xa] sm:$0xff]  ;;  %s5546_s27 = sld [smem:[#allocation2 + $0xf]] }
 0x25c   : > { %2348 = vrot.lane.b32.xlu1 %v2339_v4, %s4002_s25  ;;  %2346 = vrot.lane.b32.xlu0 %v2338_v32, %s4002_s25  ;;  %v5276_v25 = vmul.f32 %v3864_v18, %v705_v60  ;;  %v3866_v32 = vld [vmem:[%s4115_s24 + $0x1a] sm:$0xff]  ;;  %7364 = vst [vmem:[#allocation173_spill] sm:$0xff] %v5289_v63  ;;  %v5291_v27 = vmul.f32 %v3864_v18, %v715_v46 }
 0x25d   : > { %v5286_v42 = vmul.f32 %v3866_v32, %v705_v60  ;;  %v5303_v60 = vmul.f32 %v3867_v61, %v715_v46  ;;  %v5309_v63 = vmul.f32 %v3866_v32, %v725_v58 }
 0x25e   : > { %v5281_v47 = vpop.permute.xlu1 %1896  ;;  %v5283_v4 = vpop.permute.xlu0 %1894  ;;  %7365 = vst [vmem:[#allocation174_spill] sm:$0xff] %v5291_v27  ;;  %v5305_v27 = vmul.f32 %v3864_v18, %v725_v58 }
 0x25f   : > { %7361 = vst [vmem:[#allocation170_spill] sm:$0xff] %v5281_v47  ;;  %7362 = vst [vmem:[#allocation171_spill] sm:$0xff] %v5283_v4  ;;  %v2365_v47 = vmul.f32 %v5188_v50, %v2363_v51  ;;  %v2364_v4 = vmul.f32 %v5191_v48, %v2363_v51 }
 0x260   : > { %7363 = vst [vmem:[#allocation172_spill] sm:$0xff] %v5286_v42  ;;  %2352 = vrot.lane.b32.xlu1 %v2341_v37, %s4002_s25  ;;  %2350 = vrot.lane.b32.xlu0 %v2340_v13, %s4002_s25  ;;  %v5301_v42 = vmul.f32 %v3866_v32, %v715_v46  ;;  %7368 = vst [vmem:[#allocation177_spill] sm:$0xff] %v5303_v60  ;;  %v5311_v37 = vmul.f32 %v3867_v61, %v725_v58  ;;  %v968_v58 = vstv %s5259_s5  ;;  %s5636_s5 = sld [smem:[#allocation2 + $0x11c]] }
 0x261   : > { %7369 = vst [vmem:[#allocation178_spill] sm:$0xff] %v5305_v27  ;;  %7371 = vst [vmem:[#allocation180_spill] sm:$0xff] %v5309_v63  ;;  %v5313_v13 = vmul.f32 %v3864_v18, %v735_v19  ;;  %v5321_v46 = vmul.f32 %v3866_v32, %v735_v19  ;;  %v5323_v60 = vmul.f32 %v3867_v61, %v735_v19  ;;  %v3869_v18 = vld [vmem:[%s4115_s24 + $0x28] sm:$0xff]  ;;  %v3870_v61 = vld [vmem:[%s4115_s24 + $0x40] sm:$0xff] }
 0x262   : > { %7367 = vst [vmem:[#allocation176_spill] sm:$0xff] %v5301_v42  ;;  %7372 = vst [vmem:[#allocation181_spill] sm:$0xff] %v5311_v37  ;;  %v5317_v6 = vpop.permute.xlu1 %1900  ;;  %v5319_v14 = vpop.permute.xlu0 %1898  ;;  %v5326_v63 = vmul.f32 %v3868_v54, %v958_v36  ;;  %v2367_v32 = vmul.f32 %v5202_v3, %v2363_v51  ;;  %v2366_v19 = vmul.f32 %v5205_v40, %v2363_v51 }
 0x263   : > { %7373 = vst [vmem:[#allocation182_spill] sm:$0xff] %v5313_v13  ;;  %7375 = vst [vmem:[#allocation184_spill] sm:$0xff] %v5317_v6  ;;  %v5330_v13 = vmul.f32 %v3869_v18, %v958_v36  ;;  %v3871_v6 = vld [vmem:[%s4115_s24 + $0x38] sm:$0xff]  ;;  %v5351_v39 = vmul.f32 %v3869_v18, %v968_v58 }
 0x264   : > { %7376 = vst [vmem:[#allocation185_spill] sm:$0xff] %v5319_v14  ;;  %7377 = vst [vmem:[#allocation186_spill] sm:$0xff] %v5321_v46  ;;  %2374 = vrot.lane.b32.xlu1 %v2365_v47, %s4003_s30  ;;  %2372 = vrot.lane.b32.xlu0 %v2364_v4, %s4003_s30  ;;  %v5340_v14 = vmul.f32 %v3870_v61, %v958_v36  ;;  %v2389_v46 = vstv %s5273_s8  ;;  %v5353_v47 = vmul.f32 %v3870_v61, %v968_v58  ;;  %s5730_s8 = sld [smem:[#allocation2 + $0x12]] }
 0x265   : > { %7378 = vst [vmem:[#allocation187_spill] sm:$0xff] %v5323_v60  ;;  %7379 = vst [vmem:[#allocation188_spill] sm:$0xff] %v5326_v63  ;;  %v5343_v63 = vmul.f32 %v3871_v6, %v958_v36  ;;  %v988_v60 = vstv %s5267_s7  ;;  %v5355_v4 = vmul.f32 %v3871_v6, %v968_v58  ;;  %v5363_v36 = vmul.f32 %v3869_v18, %v978_v15  ;;  %s5708_s7 = sld [smem:[#allocation2 + $0x19c]] }
 0x266   : > { %7380 = vst [vmem:[#allocation189_spill] sm:$0xff] %v5330_v13  ;;  %7381 = vst [vmem:[#allocation190_spill] sm:$0xff] %v5340_v14  ;;  %v5349_v13 = vmul.f32 %v3868_v54, %v968_v58  ;;  %v5357_v37 = vpop.permute.xlu1 %1922  ;;  %v5359_v51 = vpop.permute.xlu0 %1920  ;;  %v5361_v14 = vmul.f32 %v3868_v54, %v978_v15  ;;  %v5367_v27 = vmul.f32 %v3871_v6, %v978_v15 }
 0x267   : > { %7382 = vst [vmem:[#allocation191_spill] sm:$0xff] %v5343_v63  ;;  %7383 = vst [vmem:[#allocation192_spill] sm:$0xff] %v5357_v37  ;;  %v5365_v63 = vmul.f32 %v3870_v61, %v978_v15  ;;  %v5369_v42 = vmul.f32 %v3868_v54, %v988_v60  ;;  %v2391_v58 = vmul.f32 %v5188_v50, %v2389_v46 }
 0x268   : > { %7384 = vst [vmem:[#allocation193_spill] sm:$0xff] %v5359_v51  ;;  %7385 = vst [vmem:[#allocation194_spill] sm:$0xff] %v5361_v14  ;;  %2378 = vrot.lane.b32.xlu1 %v2367_v32, %s4003_s30  ;;  %2376 = vrot.lane.b32.xlu0 %v2366_v19, %s4003_s30  ;;  %v2390_v37 = vmul.f32 %v5191_v48, %v2389_v46  ;;  %v515_v51 = vadd.f32 %v4471_v52, %v4362_v38  ;;  %v7396_v19 = vld [vmem:[#allocation12_spill] sm:$0xff] }
 0x269   : > { %7386 = vst [vmem:[#allocation195_spill] sm:$0xff] %v5363_v36  ;;  %7387 = vst [vmem:[#allocation196_spill] sm:$0xff] %v5365_v63  ;;  %v5377_v14 = vmul.f32 %v3869_v18, %v988_v60  ;;  %v5379_v36 = vmul.f32 %v3870_v61, %v988_v60  ;;  %v5381_v63 = vmul.f32 %v3871_v6, %v988_v60 }
 0x26a   : > { %v514_v54 = vadd.f32 %v4473_v57, %v4364_v43  ;;  %v517_v15 = vadd.f32 %v4479_v28, %v4382_v8  ;;  %v516_v32 = vadd.f32 %v4481_v59, %v4384_v9  ;;  %v541_v38 = vadd.f32 %v4493_v34, %v4399_v21  ;;  %v5393_v52 = vpop.permute.xlu1 %1926  ;;  %v5395_v6 = vpop.permute.xlu0 %1924 }
 0x26b   : > { %7388 = vst [vmem:[#allocation197_spill] sm:$0xff] %v5393_v52  ;;  %7389 = vst [vmem:[#allocation198_spill] sm:$0xff] %v5395_v6  ;;  %v540_v60 = vadd.f32 %v4495_v0, %v4401_v22  ;;  %v543_v43 = vadd.f32 %v4507_v2, %v4417_v53  ;;  %v542_v8 = vadd.f32 %v4509_v12, %v4419_v56  ;;  %v1210_v28 = vstv %s5333_s9  ;;  %v7438_v6 = vld [vmem:[#allocation32_spill] sm:$0xff]  ;;  %s5762_s9 = sld [smem:[#allocation2 + $0x92]] }
 0x26c   : > { %v567_v9 = vadd.f32 %v4515_v16, %v4432_v10  ;;  %v566_v57 = vadd.f32 %v4517_v35, %v4434_v11  ;;  %2400 = vrot.lane.b32.xlu1 %v2391_v58, %s4003_s30  ;;  %2398 = vrot.lane.b32.xlu0 %v2390_v37, %s4003_s30  ;;  %v2393_v21 = vmul.f32 %v5202_v3, %v2389_v46  ;;  %v2415_v59 = vstv %s5347_s10  ;;  %v5438_v16 = vld [vmem:[%s4115_s24 + $0x31] sm:$0xff]  ;;  %s5774_s10 = sld [smem:[#allocation2 + $0x1d]] }
 0x26d   : > { %v2392_v22 = vmul.f32 %v5205_v40, %v2389_v46  ;;  %v569_v53 = vadd.f32 %v4523_v55, %v4447_v1  ;;  %v619_v56 = vadd.f32 %v4547_v30, %v515_v51  ;;  %v568_v10 = vadd.f32 %v4525_v17, %v4449_v20  ;;  %v7392_v30 = vld [vmem:[#allocation169_spill] sm:$0xff]  ;;  %v7397_v51 = vld [vmem:[#allocation172_spill] sm:$0xff] }
 0x26e   : > { %v593_v11 = vadd.f32 %v4531_v23, %v4459_v31  ;;  %v592_v34 = vadd.f32 %v4533_v26, %v4461_v33  ;;  %v618_v0 = vadd.f32 %v4549_v41, %v514_v54  ;;  %v5427_v1 = vpop.permute.xlu1 %1948  ;;  %v5429_v2 = vpop.permute.xlu0 %1946  ;;  %v595_v12 = vadd.f32 %v4539_v29, %v4467_v5  ;;  %v5452_v23 = vld [vmem:[%s4115_s24 + $0x29] sm:$0xff] }
 0x26f   : > { %7390 = vst [vmem:[#allocation199_spill] sm:$0xff] %v5427_v1  ;;  %7391 = vst [vmem:[#allocation200_spill] sm:$0xff] %v5429_v2  ;;  %v594_v20 = vadd.f32 %v4541_v44, %v4469_v7  ;;  %v621_v31 = vadd.f32 %v4555_v45, %v517_v15  ;;  %v620_v33 = vadd.f32 %v4557_v49, %v516_v32  ;;  %v1220_v29 = vstv %s5383_s11  ;;  %v5463_v45 = vld [vmem:[%s4115_s24 + $0x41] sm:$0xff]  ;;  %v7398_v54 = vld [vmem:[#allocation173_spill] sm:$0xff]  ;;  %s5791_s11 = sld [smem:[#allocation2 + $0x112]] }
 0x270   : > { %v5441_v35 = vmul.f32 %v5438_v16, %v1210_v28  ;;  %2404 = vrot.lane.b32.xlu1 %v2393_v21, %s4003_s30  ;;  %2402 = vrot.lane.b32.xlu0 %v2392_v22, %s4003_s30  ;;  %v2417_v5 = vmul.f32 %v5188_v50, %v2415_v59  ;;  %v2416_v55 = vmul.f32 %v5191_v48, %v2415_v59 }
 0x271   : > { %v645_v7 = vadd.f32 %v4563_v24, %v541_v38  ;;  %v5449_v17 = vadd.f32 %v5276_v25, %v619_v56  ;;  %v5455_v26 = vmul.f32 %v5452_v23, %v1210_v28  ;;  %v644_v44 = vadd.f32 %v4565_v62, %v540_v60  ;;  %v5469_v24 = vld [vmem:[%s4115_s24 + $0x39] sm:$0xff] }
 0x272   : > { %v5460_v41 = vadd.f32 %v7392_v30, %v618_v0  ;;  %v5466_v49 = vmul.f32 %v5463_v45, %v1210_v28  ;;  %v5472_v25 = vmul.f32 %v5469_v24, %v1210_v28  ;;  %v5476_v37 = vpop.permute.xlu1 %1952  ;;  %v5478_v46 = vpop.permute.xlu0 %1950  ;;  %v7395_v62 = vld [vmem:[#allocation11_spill] sm:$0xff]  ;;  %v646_v61 = vadd.f32 %v7396_v19, %v542_v8  ;;  %v7400_v8 = vld [vmem:[#allocation174_spill] sm:$0xff]  ;;  %v7406_v19 = vld [vmem:[#allocation176_spill] sm:$0xff] }
 0x273   : > { %7393 = vst [vmem:[#allocation169_spill] sm:$0xff] %v5476_v37  ;;  %7394 = vst [vmem:[#allocation201_spill] sm:$0xff] %v5478_v46  ;;  %v647_v18 = vadd.f32 %v7395_v62, %v543_v43  ;;  %v713_v58 = vadd.f32 %v7397_v51, %v621_v31  ;;  %v5484_v15 = vadd.f32 %v7398_v54, %v620_v33  ;;  %v7399_v43 = vld [vmem:[#allocation13_spill] sm:$0xff]  ;;  %v2441_v28 = vstv %s5416_s17  ;;  %v7401_v0 = vld [vmem:[#allocation14_spill] sm:$0xff]  ;;  %s5827_s17 = sld [smem:[#allocation2 + $0x192]] }
 0x274   : > { %v5487_v32 = vmul.f32 %v5438_v16, %v1220_v29  ;;  %2426 = vrot.lane.b32.xlu1 %v2417_v5, %s4003_s30  ;;  %2424 = vrot.lane.b32.xlu0 %v2416_v55, %s4003_s30  ;;  %v2419_v38 = vmul.f32 %v5202_v3, %v2415_v59  ;;  %v2418_v60 = vmul.f32 %v5205_v40, %v2415_v59  ;;  %v7402_v33 = vld [vmem:[#allocation175_spill] sm:$0xff]  ;;  %v1230_v30 = vstv %s5425_s19  ;;  %v7407_v54 = vld [vmem:[#allocation177_spill] sm:$0xff]  ;;  %s5841_s19 = sld [smem:[#allocation2 + $0x9d]] }
 0x275   : > { %v671_v21 = vadd.f32 %v7399_v43, %v567_v9  ;;  %v721_v22 = vadd.f32 %v7400_v8, %v645_v7  ;;  %v5496_v56 = vmul.f32 %v5452_v23, %v1220_v29  ;;  %v670_v31 = vadd.f32 %v7401_v0, %v566_v57  ;;  %v7405_v9 = vld [vmem:[#allocation15_spill] sm:$0xff]  ;;  %v7408_v57 = vld [vmem:[#allocation16_spill] sm:$0xff] }
 0x276   : > { %v720_v5 = vadd.f32 %v7402_v33, %v644_v44  ;;  %v5504_v55 = vmul.f32 %v5463_v45, %v1220_v29  ;;  %v5507_v62 = vpop.permute.xlu1 %2018  ;;  %v5509_v59 = vpop.permute.xlu0 %2016  ;;  %v673_v7 = vadd.f32 %v7405_v9, %v569_v53  ;;  %v723_v51 = vadd.f32 %v7406_v19, %v647_v18  ;;  %v7410_v9 = vld [vmem:[#allocation178_spill] sm:$0xff]  ;;  %v7412_v19 = vld [vmem:[#allocation19_spill] sm:$0xff] }
 0x277   : > { %7403 = vst [vmem:[#allocation11_spill] sm:$0xff] %v5507_v62  ;;  %7404 = vst [vmem:[#allocation12_spill] sm:$0xff] %v5509_v59  ;;  %v722_v43 = vadd.f32 %v7407_v54, %v646_v61  ;;  %v5515_v8 = vmul.f32 %v5469_v24, %v1220_v29  ;;  %v672_v44 = vadd.f32 %v7408_v57, %v568_v10  ;;  %v7409_v59 = vld [vmem:[#allocation17_spill] sm:$0xff]  ;;  %v7411_v61 = vld [vmem:[#allocation18_spill] sm:$0xff]  ;;  %v1240_v57 = vstv %s5474_s20  ;;  %s5891_s20 = sld [smem:[#allocation2 + $0x15]] }
 0x278   : > { %2430 = vrot.lane.b32.xlu1 %v2419_v38, %s4003_s30  ;;  %2428 = vrot.lane.b32.xlu0 %v2418_v60, %s4003_s30  ;;  %v2443_v0 = vmul.f32 %v5188_v50, %v2441_v28  ;;  %v2442_v33 = vmul.f32 %v5191_v48, %v2441_v28  ;;  %v697_v53 = vadd.f32 %v7409_v59, %v593_v11  ;;  %v7413_v54 = vld [vmem:[#allocation179_spill] sm:$0xff]  ;;  %v7416_v11 = vld [vmem:[#allocation20_spill] sm:$0xff] }
 0x279   : > { %v731_v62 = vadd.f32 %v7410_v9, %v671_v21  ;;  %v5525_v18 = vmul.f32 %v5438_v16, %v1230_v30  ;;  %v5528_v29 = vmul.f32 %v5452_v23, %v1230_v30  ;;  %v696_v10 = vadd.f32 %v7411_v61, %v592_v34  ;;  %v7417_v59 = vld [vmem:[#allocation180_spill] sm:$0xff]  ;;  %v7437_v46 = vld [vmem:[#allocation31_spill] sm:$0xff] }
 0x27a   : > { %v699_v38 = vadd.f32 %v7412_v19, %v595_v12  ;;  %v730_v60 = vadd.f32 %v7413_v54, %v670_v31  ;;  %v5534_v50 = vpop.permute.xlu1 %2022  ;;  %v5536_v48 = vpop.permute.xlu0 %2020  ;;  %v698_v21 = vadd.f32 %v7416_v11, %v594_v20  ;;  %v733_v9 = vadd.f32 %v7417_v59, %v673_v7  ;;  %v7418_v12 = vld [vmem:[#allocation181_spill] sm:$0xff]  ;;  %v7419_v19 = vld [vmem:[#allocation182_spill] sm:$0xff]  ;;  %v5561_v11 = vld [vmem:[%s4115_s24 + $0x80] sm:$0xff] }
 0x27b   : > { %7414 = vst [vmem:[#allocation172_spill] sm:$0xff] %v5534_v50  ;;  %7415 = vst [vmem:[#allocation173_spill] sm:$0xff] %v5536_v48  ;;  %v5541_v2 = vmul.f32 %v5463_v45, %v1230_v30  ;;  %v5544_v34 = vmul.f32 %v5469_v24, %v1230_v30  ;;  %v732_v31 = vadd.f32 %v7418_v12, %v672_v44  ;;  %v2512_v59 = vstv %s5499_s26  ;;  %v5565_v44 = vld [vmem:[%s4115_s24 + $0x78] sm:$0xff]  ;;  %v5600_v50 = vld [vmem:[%s4115_s24 + $0x90] sm:$0xff]  ;;  %s5901_s26 = sld [smem:[#allocation2 + $0x11d]] }
 0x27c   : > { %2452 = vrot.lane.b32.xlu1 %v2443_v0, %s4003_s30  ;;  %2450 = vrot.lane.b32.xlu0 %v2442_v33, %s4003_s30  ;;  %v2445_v61 = vmul.f32 %v5202_v3, %v2441_v28  ;;  %v2444_v20 = vmul.f32 %v5205_v40, %v2441_v28  ;;  %v741_v7 = vadd.f32 %v7419_v19, %v697_v53  ;;  %v7420_v0 = vld [vmem:[#allocation183_spill] sm:$0xff]  ;;  %v7421_v3 = vld [vmem:[#allocation186_spill] sm:$0xff]  ;;  %v7426_v53 = vld [vmem:[#allocation21_spill] sm:$0xff] }
 0x27d   : > { %v5555_v54 = vmul.f32 %v5438_v16, %v1240_v57  ;;  %v5558_v30 = vmul.f32 %v5452_v23, %v1240_v57  ;;  %v740_v33 = vadd.f32 %v7420_v0, %v696_v10  ;;  %v743_v12 = vadd.f32 %v7421_v3, %v699_v38  ;;  %v7427_v48 = vld [vmem:[#allocation22_spill] sm:$0xff]  ;;  %v7428_v0 = vld [vmem:[#allocation23_spill] sm:$0xff] }
 0x27e   : > { %v5572_v40 = vmul.f32 %v5463_v45, %v1240_v57  ;;  %v5575_v16 = vmul.f32 %v5469_v24, %v1240_v57  ;;  %v5577_v28 = vpop.permute.xlu1 %2044  ;;  %v5579_v23 = vpop.permute.xlu0 %2042  ;;  %v767_v19 = vadd.f32 %v7426_v53, %v5449_v17  ;;  %v766_v10 = vadd.f32 %v7427_v48, %v5460_v41  ;;  %v7429_v3 = vld [vmem:[#allocation187_spill] sm:$0xff]  ;;  %v7430_v24 = vld [vmem:[#allocation24_spill] sm:$0xff]  ;;  %v7431_v53 = vld [vmem:[#allocation25_spill] sm:$0xff] }
 0x27f   : > { %7424 = vst [vmem:[#allocation14_spill] sm:$0xff] %v5577_v28  ;;  %7425 = vst [vmem:[#allocation175_spill] sm:$0xff] %v5579_v23  ;;  %v769_v38 = vadd.f32 %v7428_v0, %v713_v58  ;;  %v742_v45 = vadd.f32 %v7429_v3, %v698_v21  ;;  %v768_v57 = vadd.f32 %v7430_v24, %v5484_v15  ;;  %v7432_v48 = vld [vmem:[#allocation26_spill] sm:$0xff]  ;;  %v7433_v0 = vld [vmem:[#allocation27_spill] sm:$0xff] }
 0x280   : > { %7422 = vst [vmem:[#allocation13_spill] sm:$0xff] %v5572_v40  ;;  %7423 = vst [vmem:[#allocation174_spill] sm:$0xff] %v5575_v16  ;;  %2456 = vrot.lane.b32.xlu1 %v2445_v61, %s4003_s30  ;;  %2454 = vrot.lane.b32.xlu0 %v2444_v20, %s4003_s30  ;;  %v2514_v23 = vmul.f32 %v5561_v11, %v2512_v59  ;;  %v2513_v17 = vmul.f32 %v5565_v44, %v2512_v59  ;;  %v7434_v3 = vld [vmem:[#allocation28_spill] sm:$0xff]  ;;  %v7435_v61 = vld [vmem:[#allocation29_spill] sm:$0xff] }
 0x281   : > { %v793_v41 = vadd.f32 %v7431_v53, %v721_v22  ;;  %v792_v58 = vadd.f32 %v7432_v48, %v720_v5  ;;  %v795_v21 = vadd.f32 %v7433_v0, %v723_v51  ;;  %v794_v28 = vadd.f32 %v7434_v3, %v722_v43  ;;  %v5603_v15 = vld [vmem:[%s4115_s24 + $0x88] sm:$0xff]  ;;  %v7436_v20 = vld [vmem:[#allocation30_spill] sm:$0xff]  ;;  %v7441_v51 = vld [vmem:[#allocation33_spill] sm:$0xff] }
 0x282   : > { %v819_v24 = vadd.f32 %v7435_v61, %v731_v62  ;;  %v818_v1 = vadd.f32 %v7436_v20, %v730_v60  ;;  %v5608_v37 = vadd.f32 %v7437_v46, %v733_v9  ;;  %v5611_v52 = vadd.f32 %v7438_v6, %v732_v31  ;;  %v5613_v22 = vpop.permute.xlu1 %2048  ;;  %v5615_v5 = vpop.permute.xlu0 %2046  ;;  %v7442_v53 = vld [vmem:[#allocation37_spill] sm:$0xff]  ;;  %v7443_v0 = vld [vmem:[#allocation38_spill] sm:$0xff] }
 0x283   : > { %7439 = vst [vmem:[#allocation15_spill] sm:$0xff] %v5613_v22  ;;  %7440 = vst [vmem:[#allocation176_spill] sm:$0xff] %v5615_v5  ;;  %v5618_v43 = vadd.f32 %v7441_v51, %v741_v7  ;;  %v871_v48 = vadd.f32 %v7442_v53, %v767_v19  ;;  %v870_v62 = vadd.f32 %v7443_v0, %v766_v10  ;;  %v1462_v60 = vstv %s5546_s27  ;;  %v7444_v46 = vld [vmem:[#allocation34_spill] sm:$0xff]  ;;  %v7445_v7 = vld [vmem:[#allocation35_spill] sm:$0xff]  ;;  %s5923_s27 = sld [smem:[#allocation2 + $0x95]] }
 0x284   : > { %v844_v6 = vadd.f32 %v7444_v46, %v740_v33  ;;  %2523 = vrot.lane.b32.xlu1 %v2514_v23, %s4002_s25  ;;  %2521 = vrot.lane.b32.xlu0 %v2513_v17, %s4002_s25  ;;  %v2516_v9 = vmul.f32 %v5600_v50, %v2512_v59  ;;  %v2515_v31 = vmul.f32 %v5603_v15, %v2512_v59  ;;  %v7446_v19 = vld [vmem:[#allocation36_spill] sm:$0xff]  ;;  %v7447_v10 = vld [vmem:[#allocation39_spill] sm:$0xff]  ;;  %v2538_v51 = vstv %s5567_s28  ;;  %v7449_v53 = vld [vmem:[#allocation41_spill] sm:$0xff]  ;;  %s5949_s28 = sld [smem:[#allocation2 + $0x115]] }
 0x285   : > { %v847_v3 = vadd.f32 %v7445_v7, %v743_v12  ;;  %v5632_v61 = vadd.f32 %v7446_v19, %v742_v45  ;;  %v873_v20 = vadd.f32 %v7447_v10, %v769_v38  ;;  %v7448_v33 = vld [vmem:[#allocation40_spill] sm:$0xff]  ;;  %v897_v17 = vadd.f32 %v7449_v53, %v793_v41  ;;  %v5641_v0 = vld [vmem:[%s4115_s24 + $0x32] sm:$0xff] }
 0x286   : > { %v872_v23 = vadd.f32 %v7448_v33, %v768_v57  ;;  %v5644_v59 = vmul.f32 %v5641_v0, %v1462_v60  ;;  %v5647_v12 = vld [vmem:[%s4115_s24 + $0x2a] sm:$0xff]  ;;  %v5652_v46 = vpop.permute.xlu1 %2070  ;;  %v5654_v38 = vpop.permute.xlu0 %2068  ;;  %v7454_v7 = vld [vmem:[#allocation42_spill] sm:$0xff]  ;;  %v1472_v53 = vstv %s5587_s29  ;;  %v3878_v5 = vld [vmem:[%s4115_s24 + $0x42] sm:$0xff]  ;;  %s5959_s29 = sld [smem:[#allocation2 + $0x19d]] }
 0x287   : > { %v5650_v45 = vmul.f32 %v5647_v12, %v1462_v60  ;;  %7452 = vst [vmem:[#allocation17_spill] sm:$0xff] %v5652_v46  ;;  %7453 = vst [vmem:[#allocation178_spill] sm:$0xff] %v5654_v38  ;;  %v896_v19 = vadd.f32 %v7454_v7, %v792_v58  ;;  %v7455_v57 = vld [vmem:[#allocation188_spill] sm:$0xff]  ;;  %v7456_v41 = vld [vmem:[#allocation189_spill] sm:$0xff]  ;;  %v5667_v22 = vmul.f32 %v3878_v5, %v1462_v60 }
 0x288   : > { %7450 = vst [vmem:[#allocation177_spill] sm:$0xff] %v5644_v59  ;;  %v5658_v10 = vadd.f32 %v7455_v57, %v871_v48  ;;  %v5661_v33 = vadd.f32 %v7456_v41, %v870_v62  ;;  %2527 = vrot.lane.b32.xlu1 %v2516_v9, %s4002_s25  ;;  %2525 = vrot.lane.b32.xlu0 %v2515_v31, %s4002_s25  ;;  %v7458_v48 = vld [vmem:[#allocation43_spill] sm:$0xff]  ;;  %v7459_v57 = vld [vmem:[#allocation44_spill] sm:$0xff]  ;;  %v7460_v41 = vld [vmem:[#allocation190_spill] sm:$0xff] }
 0x289   : > { %7451 = vst [vmem:[#allocation16_spill] sm:$0xff] %v5650_v45  ;;  %7457 = vst [vmem:[#allocation18_spill] sm:$0xff] %v5667_v22  ;;  %v2540_v38 = vmul.f32 %v5561_v11, %v2538_v51  ;;  %v2539_v58 = vmul.f32 %v5565_v44, %v2538_v51  ;;  %v899_v7 = vadd.f32 %v7458_v48, %v795_v21  ;;  %v3879_v45 = vld [vmem:[%s4115_s24 + $0x3a] sm:$0xff] }
 0x28a   : > { %v898_v62 = vadd.f32 %v7459_v57, %v794_v28  ;;  %v5676_v46 = vadd.f32 %v7460_v41, %v873_v20  ;;  %v5679_v59 = vmul.f32 %v3879_v45, %v1462_v60  ;;  %v7461_v22 = vld [vmem:[#allocation191_spill] sm:$0xff]  ;;  %v974_v9 = vadd.f32 %v5349_v13, %v897_v17  ;;  %v5689_v21 = vpop.permute.xlu1 %2074  ;;  %v5691_v28 = vpop.permute.xlu0 %2072  ;;  %v7464_v20 = vld [vmem:[#allocation45_spill] sm:$0xff]  ;;  %v7467_v41 = vld [vmem:[#allocation46_spill] sm:$0xff] }
 0x28b   : > { %v965_v16 = vadd.f32 %v7461_v22, %v872_v23  ;;  %v5684_v31 = vmul.f32 %v5641_v0, %v1472_v53  ;;  %v5687_v40 = vmul.f32 %v5647_v12, %v1472_v53  ;;  %7462 = vst [vmem:[#allocation19_spill] sm:$0xff] %v5689_v21  ;;  %7463 = vst [vmem:[#allocation179_spill] sm:$0xff] %v5691_v28  ;;  %v1482_v22 = vstv %s5623_s4  ;;  %s5980_s4 = sld [smem:[#allocation2 + $0x195]] }
 0x28c   : > { %v923_v48 = vadd.f32 %v7464_v20, %v819_v24  ;;  %v973_v60 = vadd.f32 %v5351_v39, %v896_v19  ;;  %v5695_v57 = vmul.f32 %v3878_v5, %v1472_v53  ;;  %v5698_v23 = vmul.f32 %v3879_v45, %v1472_v53  ;;  %2549 = vrot.lane.b32.xlu1 %v2540_v38, %s4002_s25  ;;  %v7468_v53 = vld [vmem:[#allocation47_spill] sm:$0xff]  ;;  %v7469_v38 = vld [vmem:[#allocation48_spill] sm:$0xff] }
 0x28d   : > { %2547 = vrot.lane.b32.xlu0 %v2539_v58, %s4002_s25  ;;  %v2542_v13 = vmul.f32 %v5600_v50, %v2538_v51  ;;  %v2541_v17 = vmul.f32 %v5603_v15, %v2538_v51  ;;  %v922_v28 = vadd.f32 %v7467_v41, %v818_v1  ;;  %v976_v24 = vadd.f32 %v5353_v47, %v899_v7 }
 0x28e   : > { %7465 = vst [vmem:[#allocation20_spill] sm:$0xff] %v5695_v57  ;;  %7466 = vst [vmem:[#allocation180_spill] sm:$0xff] %v5698_v23  ;;  %v975_v39 = vadd.f32 %v5355_v4, %v898_v62  ;;  %v2564_v19 = vstv %s5636_s5  ;;  %v925_v20 = vadd.f32 %v7468_v53, %v5608_v37  ;;  %v924_v58 = vadd.f32 %v7469_v38, %v5611_v52  ;;  %v5720_v1 = vpop.permute.xlu1 %2096  ;;  %v5722_v47 = vpop.permute.xlu0 %2094  ;;  %v7473_v4 = vld [vmem:[#allocation49_spill] sm:$0xff]  ;;  %v7474_v62 = vld [vmem:[#allocation50_spill] sm:$0xff]  ;;  %s6029_s5 = sld [smem:[#allocation2 + $0x1f]] }
 0x28f   : > { %v5715_v21 = vmul.f32 %v5641_v0, %v1482_v22  ;;  %v5718_v51 = vmul.f32 %v5647_v12, %v1482_v22  ;;  %7471 = vst [vmem:[#allocation182_spill] sm:$0xff] %v5720_v1  ;;  %7472 = vst [vmem:[#allocation183_spill] sm:$0xff] %v5722_v47  ;;  %v949_v7 = vadd.f32 %v7473_v4, %v5618_v43  ;;  %v7475_v23 = vld [vmem:[#allocation194_spill] sm:$0xff]  ;;  %v1492_v53 = vstv %s5664_s6  ;;  %v7476_v57 = vld [vmem:[#allocation51_spill] sm:$0xff]  ;;  %s6058_s6 = sld [smem:[#allocation2 + $0x18]] }
 0x290   : > { %v948_v41 = vadd.f32 %v7474_v62, %v844_v6  ;;  %v984_v37 = vadd.f32 %v7475_v23, %v923_v48  ;;  %v951_v52 = vadd.f32 %v7476_v57, %v847_v3  ;;  %2553 = vrot.lane.b32.xlu1 %v2542_v13, %s4002_s25  ;;  %v2566_v38 = vmul.f32 %v5561_v11, %v2564_v19  ;;  %v7477_v1 = vld [vmem:[#allocation52_spill] sm:$0xff]  ;;  %v7478_v4 = vld [vmem:[#allocation195_spill] sm:$0xff] }
 0x291   : > { %7470 = vst [vmem:[#allocation181_spill] sm:$0xff] %v5718_v51  ;;  %2551 = vrot.lane.b32.xlu0 %v2541_v17, %s4002_s25  ;;  %v2565_v47 = vmul.f32 %v5565_v44, %v2564_v19  ;;  %v950_v43 = vadd.f32 %v7477_v1, %v5632_v61  ;;  %v983_v6 = vadd.f32 %v7478_v4, %v922_v28  ;;  %v7479_v3 = vld [vmem:[#allocation196_spill] sm:$0xff] }
 0x292   : > { %v5739_v62 = vmul.f32 %v3878_v5, %v1482_v22  ;;  %v5741_v48 = vmul.f32 %v3879_v45, %v1482_v22  ;;  %v986_v57 = vadd.f32 %v7479_v3, %v925_v20  ;;  %v985_v23 = vadd.f32 %v5367_v27, %v924_v58  ;;  %v5751_v51 = vpop.permute.xlu1 %2100  ;;  %v5753_v61 = vpop.permute.xlu0 %2098 }
 0x293   : > { %v5746_v13 = vmul.f32 %v5641_v0, %v1492_v53  ;;  %v5749_v17 = vmul.f32 %v5647_v12, %v1492_v53  ;;  %7480 = vst [vmem:[#allocation186_spill] sm:$0xff] %v5751_v51  ;;  %7481 = vst [vmem:[#allocation21_spill] sm:$0xff] %v5753_v61  ;;  %v994_v28 = vadd.f32 %v5369_v42, %v949_v7  ;;  %v7484_v42 = vld [vmem:[#allocation53_spill] sm:$0xff]  ;;  %v7486_v7 = vld [vmem:[#allocation55_spill] sm:$0xff] }
 0x294   : > { %v993_v22 = vadd.f32 %v5377_v14, %v948_v41  ;;  %v5757_v1 = vmul.f32 %v3878_v5, %v1492_v53  ;;  %v5759_v20 = vmul.f32 %v3879_v45, %v1492_v53  ;;  %v996_v27 = vadd.f32 %v5379_v36, %v951_v52  ;;  %2575 = vrot.lane.b32.xlu1 %v2566_v38, %s4002_s25  ;;  %v7485_v14 = vld [vmem:[#allocation54_spill] sm:$0xff]  ;;  %v7488_v52 = vld [vmem:[#allocation57_spill] sm:$0xff] }
 0x295   : > { %2573 = vrot.lane.b32.xlu0 %v2565_v47, %s4002_s25  ;;  %v2568_v0 = vmul.f32 %v5600_v50, %v2564_v19  ;;  %v2567_v12 = vmul.f32 %v5603_v15, %v2564_v19  ;;  %v1020_v58 = vadd.f32 %v7484_v42, %v5658_v10  ;;  %v1019_v5 = vadd.f32 %v7485_v14, %v5661_v33  ;;  %v7487_v47 = vld [vmem:[#allocation56_spill] sm:$0xff]  ;;  %v7489_v19 = vld [vmem:[#allocation58_spill] sm:$0xff]  ;;  %v7492_v42 = vld [vmem:[#allocation59_spill] sm:$0xff] }
 0x296   : > { %7482 = vst [vmem:[#allocation22_spill] sm:$0xff] %v5757_v1  ;;  %7483 = vst [vmem:[#allocation23_spill] sm:$0xff] %v5759_v20  ;;  %v995_v45 = vadd.f32 %v5381_v63, %v950_v43  ;;  %v2590_v36 = vstv %s5708_s7  ;;  %v1022_v41 = vadd.f32 %v7486_v7, %v5676_v46  ;;  %v1021_v53 = vadd.f32 %v7487_v47, %v965_v16  ;;  %v5781_v3 = vpop.permute.xlu1 %2122  ;;  %v5783_v10 = vpop.permute.xlu0 %2120  ;;  %v7493_v14 = vld [vmem:[#allocation60_spill] sm:$0xff]  ;;  %v7494_v43 = vld [vmem:[#allocation61_spill] sm:$0xff]  ;;  %s6094_s7 = sld [smem:[#allocation2 + $0x9f]] }
 0x297   : > { %v1046_v38 = vadd.f32 %v7488_v52, %v974_v9  ;;  %v1045_v4 = vadd.f32 %v7489_v19, %v973_v60  ;;  %7490 = vst [vmem:[#allocation187_spill] sm:$0xff] %v5781_v3  ;;  %7491 = vst [vmem:[#allocation24_spill] sm:$0xff] %v5783_v10  ;;  %v1048_v33 = vadd.f32 %v7492_v42, %v976_v24  ;;  %v7495_v51 = vld [vmem:[#allocation62_spill] sm:$0xff]  ;;  %v7496_v1 = vld [vmem:[#allocation69_spill] sm:$0xff]  ;;  %v1715_v7 = vstv %s5730_s8  ;;  %s6102_s8 = sld [smem:[#allocation2 + $0x98]] }
 0x298   : > { %v1047_v63 = vadd.f32 %v7493_v14, %v975_v39  ;;  %v1072_v61 = vadd.f32 %v7494_v43, %v984_v37  ;;  %v1071_v20 = vadd.f32 %v7495_v51, %v983_v6  ;;  %v1124_v46 = vadd.f32 %v7496_v1, %v1020_v58  ;;  %2579 = vrot.lane.b32.xlu1 %v2568_v0, %s4002_s25  ;;  %v7497_v60 = vld [vmem:[#allocation63_spill] sm:$0xff]  ;;  %v7498_v39 = vld [vmem:[#allocation64_spill] sm:$0xff]  ;;  %v7499_v51 = vld [vmem:[#allocation65_spill] sm:$0xff] }
 0x299   : > { %2577 = vrot.lane.b32.xlu0 %v2567_v12, %s4002_s25  ;;  %v2592_v16 = vmul.f32 %v5561_v11, %v2590_v36  ;;  %v2591_v9 = vmul.f32 %v5565_v44, %v2590_v36  ;;  %v1074_v24 = vadd.f32 %v7497_v60, %v986_v57  ;;  %v1073_v37 = vadd.f32 %v7498_v39, %v985_v23  ;;  %v7500_v1 = vld [vmem:[#allocation70_spill] sm:$0xff]  ;;  %v7502_v0 = vld [vmem:[#allocation67_spill] sm:$0xff]  ;;  %v7503_v42 = vld [vmem:[#allocation68_spill] sm:$0xff] }
 0x29a   : > { %v1098_v6 = vadd.f32 %v7499_v51, %v994_v28  ;;  %v1123_v58 = vadd.f32 %v7500_v1, %v1019_v5  ;;  %v7501_v47 = vld [vmem:[#allocation66_spill] sm:$0xff]  ;;  %v1100_v19 = vadd.f32 %v7502_v0, %v996_v27  ;;  %v1099_v12 = vadd.f32 %v7503_v42, %v995_v45  ;;  %v7504_v14 = vld [vmem:[#allocation71_spill] sm:$0xff]  ;;  %v5805_v10 = vpop.permute.xlu1 %2126  ;;  %v5807_v3 = vpop.permute.xlu0 %2124  ;;  %v7507_v57 = vld [vmem:[#allocation72_spill] sm:$0xff] }
 0x29b   : > { %v1097_v52 = vadd.f32 %v7501_v47, %v993_v22  ;;  %v1126_v43 = vadd.f32 %v7504_v14, %v1022_v41  ;;  %7505 = vst [vmem:[#allocation25_spill] sm:$0xff] %v5805_v10  ;;  %7506 = vst [vmem:[#allocation26_spill] sm:$0xff] %v5807_v3  ;;  %v1125_v23 = vadd.f32 %v7507_v57, %v1021_v53  ;;  %v7508_v60 = vld [vmem:[#allocation73_spill] sm:$0xff]  ;;  %v5812_v28 = vld [vmem:[%s4115_s24 + $0x58] sm:$0xff]  ;;  %v1725_v41 = vstv %s5762_s9  ;;  %s6139_s9 = sld [smem:[#allocation2 + $0x118]] }
 0x29c   : > { %v1150_v39 = vadd.f32 %v7508_v60, %v1046_v38  ;;  %v5815_v22 = vmul.f32 %v5812_v28, %v1715_v7  ;;  %v5818_v27 = vld [vmem:[%s4115_s24 + $0x50] sm:$0xff]  ;;  %v5824_v45 = vadd.f32 %v5441_v35, %v1124_v46  ;;  %2601 = vrot.lane.b32.xlu1 %v2592_v16, %s4002_s25  ;;  %v2594_v53 = vmul.f32 %v5600_v50, %v2590_v36  ;;  %v7509_v51 = vld [vmem:[#allocation74_spill] sm:$0xff]  ;;  %v3882_v0 = vld [vmem:[%s4115_s24 + $0x68] sm:$0xff] }
 0x29d   : > { %v5821_v5 = vmul.f32 %v5818_v27, %v1715_v7  ;;  %2599 = vrot.lane.b32.xlu0 %v2591_v9, %s4002_s25  ;;  %v2593_v38 = vmul.f32 %v5603_v15, %v2590_v36  ;;  %v1149_v1 = vadd.f32 %v7509_v51, %v1045_v4  ;;  %v5835_v47 = vadd.f32 %v5455_v26, %v1123_v58  ;;  %v7510_v42 = vld [vmem:[#allocation75_spill] sm:$0xff]  ;;  %v7511_v14 = vld [vmem:[#allocation76_spill] sm:$0xff] }
 0x29e   : > { %v5838_v35 = vmul.f32 %v3882_v0, %v1715_v7  ;;  %v2616_v46 = vstv %s5774_s10  ;;  %v1152_v16 = vadd.f32 %v7510_v42, %v1048_v33  ;;  %v1151_v9 = vadd.f32 %v7511_v14, %v1047_v63  ;;  %v3883_v60 = vld [vmem:[%s4115_s24 + $0x60] sm:$0xff]  ;;  %v5849_v4 = vpop.permute.xlu1 %2148  ;;  %v5851_v26 = vpop.permute.xlu0 %2146  ;;  %v7515_v63 = vld [vmem:[#allocation77_spill] sm:$0xff]  ;;  %s6168_s10 = sld [smem:[#allocation2 + $0x11f]] }
 0x29f   : > { %v1218_v57 = vadd.f32 %v5466_v49, %v1126_v43  ;;  %v5847_v36 = vmul.f32 %v3883_v60, %v1715_v7  ;;  %7512 = vst [vmem:[#allocation27_spill] sm:$0xff] %v5849_v4  ;;  %7513 = vst [vmem:[#allocation28_spill] sm:$0xff] %v5851_v26  ;;  %v1217_v58 = vadd.f32 %v5472_v25, %v1125_v23  ;;  %v1735_v49 = vstv %s5791_s11  ;;  %v7516_v25 = vld [vmem:[#allocation78_spill] sm:$0xff]  ;;  %v7517_v26 = vld [vmem:[#allocation79_spill] sm:$0xff]  ;;  %s6180_s11 = sld [smem:[#allocation2 + $0x198]] }
 0x2a0   : > { %v1226_v51 = vadd.f32 %v5487_v32, %v1150_v39  ;;  %v5856_v3 = vmul.f32 %v5812_v28, %v1725_v41  ;;  %v5859_v33 = vmul.f32 %v5818_v27, %v1725_v41  ;;  %v1176_v42 = vadd.f32 %v7515_v63, %v1072_v61  ;;  %2605 = vrot.lane.b32.xlu1 %v2594_v53, %s4002_s25  ;;  %v7518_v63 = vld [vmem:[#allocation80_spill] sm:$0xff] }
 0x2a1   : > { %2603 = vrot.lane.b32.xlu0 %v2593_v38, %s4002_s25  ;;  %v2618_v7 = vmul.f32 %v5561_v11, %v2616_v46  ;;  %v2617_v43 = vmul.f32 %v5565_v44, %v2616_v46  ;;  %v1175_v32 = vadd.f32 %v7516_v25, %v1071_v20  ;;  %v1225_v23 = vadd.f32 %v5496_v56, %v1149_v1  ;;  %v7521_v20 = vld [vmem:[#allocation81_spill] sm:$0xff]  ;;  %v7522_v56 = vld [vmem:[#allocation82_spill] sm:$0xff] }
 0x2a2   : > { %7514 = vst [vmem:[#allocation29_spill] sm:$0xff] %v5859_v33  ;;  %v5869_v39 = vmul.f32 %v3882_v0, %v1725_v41  ;;  %v5871_v14 = vmul.f32 %v3883_v60, %v1725_v41  ;;  %v1178_v61 = vadd.f32 %v7517_v26, %v1074_v24  ;;  %v1177_v4 = vadd.f32 %v7518_v63, %v1073_v37  ;;  %v5877_v10 = vpop.permute.xlu1 %2152  ;;  %v5879_v33 = vpop.permute.xlu0 %2150 }
 0x2a3   : > { %v1228_v53 = vadd.f32 %v5504_v55, %v1152_v16  ;;  %v1227_v38 = vadd.f32 %v5515_v8, %v1151_v9  ;;  %7519 = vst [vmem:[#allocation30_spill] sm:$0xff] %v5877_v10  ;;  %7520 = vst [vmem:[#allocation31_spill] sm:$0xff] %v5879_v33  ;;  %v1202_v25 = vadd.f32 %v7521_v20, %v1098_v6  ;;  %v1745_v55 = vstv %s5827_s17  ;;  %v7524_v9 = vld [vmem:[#allocation84_spill] sm:$0xff]  ;;  %s6230_s17 = sld [smem:[#allocation2 + $0x19f]] }
 0x2a4   : > { %v1201_v1 = vadd.f32 %v7522_v56, %v1097_v52  ;;  %v5884_v41 = vmul.f32 %v5812_v28, %v1735_v49  ;;  %v5887_v24 = vmul.f32 %v5818_v27, %v1735_v49  ;;  %v1236_v37 = vadd.f32 %v5525_v18, %v1176_v42  ;;  %2627 = vrot.lane.b32.xlu1 %v2618_v7, %s4003_s30  ;;  %v7523_v52 = vld [vmem:[#allocation83_spill] sm:$0xff]  ;;  %v7553_v10 = vld [vmem:[#allocation104_spill] sm:$0xff] }
 0x2a5   : > { %2625 = vrot.lane.b32.xlu0 %v2617_v43, %s4003_s30  ;;  %v2620_v8 = vmul.f32 %v5600_v50, %v2616_v46  ;;  %v2619_v6 = vmul.f32 %v5603_v15, %v2616_v46  ;;  %v1204_v16 = vadd.f32 %v7523_v52, %v1100_v19  ;;  %v1203_v26 = vadd.f32 %v7524_v9, %v1099_v12  ;;  %v7532_v52 = vld [vmem:[#allocation87_spill] sm:$0xff]  ;;  %v7533_v9 = vld [vmem:[#allocation88_spill] sm:$0xff] }
 0x2a6   : > { %v1235_v63 = vadd.f32 %v5528_v29, %v1175_v32  ;;  %v2642_v20 = vstv %s5841_s19  ;;  %v1238_v18 = vadd.f32 %v5541_v2, %v1178_v61  ;;  %v1237_v42 = vadd.f32 %v5544_v34, %v1177_v4  ;;  %v5909_v56 = vpop.permute.xlu1 %2174  ;;  %v5911_v46 = vpop.permute.xlu0 %2172  ;;  %v7529_v61 = vld [vmem:[#allocation174_spill] sm:$0xff]  ;;  %s6249_s19 = sld [smem:[#allocation2 + $0x1b]] }
 0x2a7   : > { %v5905_v7 = vmul.f32 %v3882_v0, %v1735_v49  ;;  %v5907_v43 = vmul.f32 %v3883_v60, %v1735_v49  ;;  %7525 = vst [vmem:[#allocation32_spill] sm:$0xff] %v5909_v56  ;;  %7526 = vst [vmem:[#allocation33_spill] sm:$0xff] %v5911_v46  ;;  %v1246_v19 = vadd.f32 %v5555_v54, %v1202_v25  ;;  %v7534_v46 = vld [vmem:[#allocation89_spill] sm:$0xff] }
 0x2a8   : > { %v1245_v12 = vadd.f32 %v5558_v30, %v1201_v1  ;;  %v5916_v29 = vmul.f32 %v5812_v28, %v1745_v55  ;;  %v5919_v32 = vmul.f32 %v5818_v27, %v1745_v55  ;;  %v5921_v2 = vmul.f32 %v3882_v0, %v1745_v55  ;;  %2631 = vrot.lane.b32.xlu1 %v2620_v8, %s4003_s30  ;;  %v7527_v30 = vld [vmem:[#allocation85_spill] sm:$0xff]  ;;  %v7531_v0 = vld [vmem:[#allocation86_spill] sm:$0xff] }
 0x2a9   : > { %2629 = vrot.lane.b32.xlu0 %v2619_v6, %s4003_s30  ;;  %v2644_v34 = vmul.f32 %v5561_v11, %v2642_v20  ;;  %v2643_v54 = vmul.f32 %v5565_v44, %v2642_v20  ;;  %v1272_v4 = vadd.f32 %v7527_v30, %v5824_v45  ;;  %v7528_v28 = vld [vmem:[#allocation13_spill] sm:$0xff]  ;;  %v1247_v27 = vadd.f32 %v7529_v61, %v1203_v26  ;;  %v7538_v26 = vld [vmem:[#allocation91_spill] sm:$0xff] }
 0x2aa   : > { %v1248_v49 = vadd.f32 %v7528_v28, %v1204_v16  ;;  %v5933_v25 = vmul.f32 %v3883_v60, %v1745_v55  ;;  %v1271_v1 = vadd.f32 %v7531_v0, %v5835_v47  ;;  %v1274_v8 = vadd.f32 %v7532_v52, %v1218_v57  ;;  %v5940_v33 = vpop.permute.xlu1 %2178  ;;  %v5942_v45 = vpop.permute.xlu0 %2176  ;;  %v7537_v16 = vld [vmem:[#allocation90_spill] sm:$0xff]  ;;  %v7539_v55 = vld [vmem:[#allocation92_spill] sm:$0xff]  ;;  %v7540_v61 = vld [vmem:[#allocation93_spill] sm:$0xff] }
 0x2ab   : > { %v1273_v6 = vadd.f32 %v7533_v9, %v1217_v58  ;;  %v1298_v56 = vadd.f32 %v7534_v46, %v1226_v51  ;;  %7535 = vst [vmem:[#allocation38_spill] sm:$0xff] %v5940_v33  ;;  %7536 = vst [vmem:[#allocation34_spill] sm:$0xff] %v5942_v45  ;;  %v1297_v30 = vadd.f32 %v7537_v16, %v1225_v23  ;;  %v7541_v0 = vld [vmem:[#allocation94_spill] sm:$0xff]  ;;  %v7542_v46 = vld [vmem:[#allocation101_spill] sm:$0xff] }
 0x2ac   : > { %7530 = vst [vmem:[#allocation37_spill] sm:$0xff] %v5933_v25  ;;  %v1300_v60 = vadd.f32 %v7538_v26, %v1228_v53  ;;  %v1299_v28 = vadd.f32 %v7539_v55, %v1227_v38  ;;  %v1324_v47 = vadd.f32 %v7540_v61, %v1236_v37  ;;  %v1323_v57 = vadd.f32 %v7541_v0, %v1235_v63  ;;  %v7543_v53 = vld [vmem:[#allocation102_spill] sm:$0xff]  ;;  %v7544_v63 = vld [vmem:[#allocation95_spill] sm:$0xff]  ;;  %v7545_v16 = vld [vmem:[#allocation96_spill] sm:$0xff] }
 0x2ad   : > { %2653 = vrot.lane.b32.xlu1 %v2644_v34, %s4003_s30  ;;  %2651 = vrot.lane.b32.xlu0 %v2643_v54, %s4003_s30  ;;  %v2646_v58 = vmul.f32 %v5600_v50, %v2642_v20  ;;  %v2645_v51 = vmul.f32 %v5603_v15, %v2642_v20  ;;  %v1376_v23 = vadd.f32 %v7542_v46, %v1272_v4  ;;  %v1967_v38 = vstv %s5891_s20  ;;  %v7546_v26 = vld [vmem:[#allocation97_spill] sm:$0xff]  ;;  %v7547_v55 = vld [vmem:[#allocation98_spill] sm:$0xff]  ;;  %v7550_v4 = vld [vmem:[#allocation99_spill] sm:$0xff]  ;;  %s6281_s20 = sld [smem:[#allocation2 + $0x9b]] }
 0x2ae   : > { %v1375_v52 = vadd.f32 %v7543_v53, %v1271_v1  ;;  %v2668_v37 = vstv %s5901_s26  ;;  %v1326_v9 = vadd.f32 %v7544_v63, %v1238_v18  ;;  %v1325_v34 = vadd.f32 %v7545_v16, %v1237_v42  ;;  %v5965_v0 = vpop.permute.xlu1 %2200  ;;  %v5967_v20 = vpop.permute.xlu0 %2198  ;;  %v7551_v46 = vld [vmem:[#allocation100_spill] sm:$0xff]  ;;  %v7552_v45 = vld [vmem:[#allocation103_spill] sm:$0xff]  ;;  %v3885_v16 = vld [vmem:[%s4115_s24 + $0x51] sm:$0xff]  ;;  %s6293_s26 = sld [smem:[#allocation2 + $0x20]] }
 0x2af   : > { %v1350_v54 = vadd.f32 %v7546_v26, %v1246_v19  ;;  %v1349_v61 = vadd.f32 %v7547_v55, %v1245_v12  ;;  %7548 = vst [vmem:[#allocation35_spill] sm:$0xff] %v5965_v0  ;;  %7549 = vst [vmem:[#allocation36_spill] sm:$0xff] %v5967_v20  ;;  %v1352_v1 = vadd.f32 %v7550_v4, %v1248_v49  ;;  %v5974_v18 = vld [vmem:[%s4115_s24 + $0x59] sm:$0xff]  ;;  %v1977_v19 = vstv %s5923_s27  ;;  %v3887_v0 = vld [vmem:[%s4115_s24 + $0x61] sm:$0xff]  ;;  %s6320_s27 = sld [smem:[#allocation2 + $0x11b]] }
 0x2b0   : > { %v1351_v53 = vadd.f32 %v7551_v46, %v1247_v27  ;;  %v1378_v33 = vadd.f32 %v7552_v45, %v1274_v8  ;;  %v1377_v25 = vadd.f32 %v7553_v10, %v1273_v6  ;;  %v5977_v42 = vmul.f32 %v5974_v18, %v1967_v38  ;;  %v7555_v27 = vld [vmem:[#allocation105_spill] sm:$0xff]  ;;  %v7557_v45 = vld [vmem:[#allocation16_spill] sm:$0xff]  ;;  %v7558_v55 = vld [vmem:[#allocation106_spill] sm:$0xff] }
 0x2b1   : > { %2657 = vrot.lane.b32.xlu1 %v2646_v58, %s4003_s30  ;;  %2655 = vrot.lane.b32.xlu0 %v2645_v51, %s4003_s30  ;;  %v2670_v12 = vmul.f32 %v5561_v11, %v2668_v37  ;;  %v2669_v49 = vmul.f32 %v5565_v44, %v2668_v37  ;;  %v1402_v10 = vadd.f32 %v7555_v27, %v1298_v56  ;;  %v7556_v8 = vld [vmem:[#allocation177_spill] sm:$0xff]  ;;  %v7559_v4 = vld [vmem:[#allocation107_spill] sm:$0xff] }
 0x2b2   : > { %7554 = vst [vmem:[#allocation39_spill] sm:$0xff] %v5977_v42  ;;  %v5988_v6 = vadd.f32 %v7556_v8, %v1376_v23  ;;  %v5991_v63 = vadd.f32 %v7557_v45, %v1375_v52  ;;  %v5994_v26 = vmul.f32 %v3885_v16, %v1967_v38  ;;  %v1401_v58 = vadd.f32 %v7558_v55, %v1297_v30  ;;  %v3886_v46 = vld [vmem:[%s4115_s24 + $0x69] sm:$0xff]  ;;  %v6004_v56 = vpop.permute.xlu1 %2204  ;;  %v6006_v23 = vpop.permute.xlu0 %2202  ;;  %v7565_v8 = vld [vmem:[#allocation18_spill] sm:$0xff] }
 0x2b3   : > { %v1404_v51 = vadd.f32 %v7559_v4, %v1300_v60  ;;  %v5999_v20 = vmul.f32 %v3886_v46, %v1967_v38  ;;  %v6002_v42 = vmul.f32 %v3887_v0, %v1967_v38  ;;  %7562 = vst [vmem:[#allocation42_spill] sm:$0xff] %v6004_v56  ;;  %7563 = vst [vmem:[#allocation188_spill] sm:$0xff] %v6006_v23  ;;  %v7564_v52 = vld [vmem:[#allocation108_spill] sm:$0xff]  ;;  %v1987_v38 = vstv %s5949_s28  ;;  %s6329_s28 = sld [smem:[#allocation2 + $0xa0]] }
 0x2b4   : > { %v1403_v27 = vadd.f32 %v7564_v52, %v1299_v28  ;;  %v6010_v45 = vadd.f32 %v7565_v8, %v1378_v33  ;;  %v6013_v30 = vadd.f32 %v5679_v59, %v1377_v25  ;;  %v6016_v60 = vmul.f32 %v5974_v18, %v1977_v19  ;;  %v7568_v52 = vld [vmem:[#allocation109_spill] sm:$0xff]  ;;  %v7569_v8 = vld [vmem:[#allocation110_spill] sm:$0xff] }
 0x2b5   : > { %7560 = vst [vmem:[#allocation40_spill] sm:$0xff] %v5999_v20  ;;  %7561 = vst [vmem:[#allocation41_spill] sm:$0xff] %v6002_v42  ;;  %v6018_v55 = vmul.f32 %v3885_v16, %v1977_v19  ;;  %2679 = vrot.lane.b32.xlu1 %v2670_v12, %s4003_s30  ;;  %2677 = vrot.lane.b32.xlu0 %v2669_v49, %s4003_s30  ;;  %v2672_v4 = vmul.f32 %v5600_v50, %v2668_v37  ;;  %v2694_v23 = vstv %s5959_s29  ;;  %s6377_s29 = sld [smem:[#allocation2 + $0x120]] }
 0x2b6   : > { %7566 = vst [vmem:[#allocation189_spill] sm:$0xff] %v6016_v60  ;;  %v2671_v28 = vmul.f32 %v5603_v15, %v2668_v37  ;;  %v1428_v33 = vadd.f32 %v7568_v52, %v1324_v47  ;;  %v1427_v59 = vadd.f32 %v7569_v8, %v1323_v57  ;;  %v1478_v25 = vadd.f32 %v5684_v31, %v1402_v10  ;;  %v6037_v42 = vpop.permute.xlu1 %2270  ;;  %v6039_v37 = vpop.permute.xlu0 %2268  ;;  %v7573_v47 = vld [vmem:[#allocation111_spill] sm:$0xff]  ;;  %v7574_v57 = vld [vmem:[#allocation112_spill] sm:$0xff] }
 0x2b7   : > { %7567 = vst [vmem:[#allocation43_spill] sm:$0xff] %v6018_v55  ;;  %v1477_v56 = vadd.f32 %v5687_v40, %v1401_v58  ;;  %v7570_v55 = vld [vmem:[#allocation20_spill] sm:$0xff]  ;;  %v6033_v60 = vmul.f32 %v3886_v46, %v1977_v19  ;;  %v6035_v49 = vmul.f32 %v3887_v0, %v1977_v19  ;;  %7571 = vst [vmem:[#allocation44_spill] sm:$0xff] %v6037_v42  ;;  %v7577_v40 = vld [vmem:[#allocation113_spill] sm:$0xff] }
 0x2b8   : > { %v1480_v12 = vadd.f32 %v7570_v55, %v1404_v51  ;;  %7572 = vst [vmem:[#allocation190_spill] sm:$0xff] %v6039_v37  ;;  %v1430_v52 = vadd.f32 %v7573_v47, %v1326_v9  ;;  %v1429_v8 = vadd.f32 %v7574_v57, %v1325_v34  ;;  %v7575_v31 = vld [vmem:[#allocation180_spill] sm:$0xff]  ;;  %v6045_v20 = vmul.f32 %v5974_v18, %v1987_v38  ;;  %v7578_v37 = vld [vmem:[#allocation114_spill] sm:$0xff]  ;;  %v7579_v47 = vld [vmem:[#allocation181_spill] sm:$0xff] }
 0x2b9   : > { %v1479_v10 = vadd.f32 %v7575_v31, %v1403_v27  ;;  %v1454_v58 = vadd.f32 %v7577_v40, %v1350_v54  ;;  %v1997_v51 = vstv %s5980_s4  ;;  %2683 = vrot.lane.b32.xlu1 %v2672_v4, %s4003_s30  ;;  %2681 = vrot.lane.b32.xlu0 %v2671_v28, %s4003_s30  ;;  %v2696_v19 = vmul.f32 %v5561_v11, %v2694_v23  ;;  %v7580_v54 = vld [vmem:[#allocation115_spill] sm:$0xff]  ;;  %v7581_v40 = vld [vmem:[#allocation116_spill] sm:$0xff]  ;;  %s6398_s4 = sld [smem:[#allocation2 + $0x1a0]] }
 0x2ba   : > { %7576 = vst [vmem:[#allocation191_spill] sm:$0xff] %v6045_v20  ;;  %v2695_v55 = vmul.f32 %v5565_v44, %v2694_v23  ;;  %v1453_v9 = vadd.f32 %v7578_v37, %v1349_v61  ;;  %v1488_v34 = vadd.f32 %v5715_v21, %v1428_v33  ;;  %v1487_v27 = vadd.f32 %v7579_v47, %v1427_v59  ;;  %v6066_v20 = vpop.permute.xlu1 %2274  ;;  %v6068_v21 = vpop.permute.xlu0 %2272 }
 0x2bb   : > { %v6056_v57 = vmul.f32 %v3885_v16, %v1987_v38  ;;  %v1456_v31 = vadd.f32 %v7580_v54, %v1352_v1  ;;  %v1455_v4 = vadd.f32 %v7581_v40, %v1351_v53  ;;  %v6062_v42 = vmul.f32 %v3886_v46, %v1987_v38  ;;  %7582 = vst [vmem:[#allocation45_spill] sm:$0xff] %v6066_v20  ;;  %v7600_v20 = vld [vmem:[#allocation126_spill] sm:$0xff] }
 0x2bc   : > { %v6064_v28 = vmul.f32 %v3887_v0, %v1987_v38  ;;  %7583 = vst [vmem:[#allocation46_spill] sm:$0xff] %v6068_v21  ;;  %v1490_v61 = vadd.f32 %v5739_v62, %v1430_v52  ;;  %v1489_v33 = vadd.f32 %v5741_v48, %v1429_v8  ;;  %v6073_v59 = vmul.f32 %v5974_v18, %v1997_v51  ;;  %v6088_v18 = vld [vmem:[%s4115_s24 + $0x81] sm:$0xff]  ;;  %v6092_v52 = vld [vmem:[%s4115_s24 + $0x79] sm:$0xff] }
 0x2bd   : > { %v6075_v1 = vmul.f32 %v3885_v16, %v1997_v51  ;;  %v1498_v53 = vadd.f32 %v5746_v13, %v1454_v58  ;;  %2705 = vrot.lane.b32.xlu1 %v2696_v19, %s4003_s30  ;;  %2703 = vrot.lane.b32.xlu0 %v2695_v55, %s4003_s30  ;;  %v2698_v38 = vmul.f32 %v5600_v50, %v2694_v23  ;;  %v2764_v16 = vstv %s6029_s5  ;;  %v7587_v13 = vld [vmem:[#allocation117_spill] sm:$0xff]  ;;  %v7588_v58 = vld [vmem:[#allocation118_spill] sm:$0xff]  ;;  %s6482_s5 = sld [smem:[#allocation2 + $0x22]] }
 0x2be   : > { %7584 = vst [vmem:[#allocation47_spill] sm:$0xff] %v6073_v59  ;;  %v2697_v37 = vmul.f32 %v5603_v15, %v2694_v23  ;;  %v1497_v47 = vadd.f32 %v5749_v17, %v1453_v9  ;;  %v6083_v62 = vmul.f32 %v3886_v46, %v1997_v51  ;;  %v6085_v48 = vmul.f32 %v3887_v0, %v1997_v51  ;;  %v7589_v23 = vld [vmem:[#allocation22_spill] sm:$0xff]  ;;  %v7590_v17 = vld [vmem:[#allocation23_spill] sm:$0xff]  ;;  %v6104_v0 = vpop.permute.xlu1 %2296  ;;  %v6106_v51 = vpop.permute.xlu0 %2294 }
 0x2bf   : > { %7585 = vst [vmem:[#allocation48_spill] sm:$0xff] %v6075_v1  ;;  %7586 = vst [vmem:[#allocation49_spill] sm:$0xff] %v6088_v18  ;;  %v1524_v8 = vadd.f32 %v7587_v13, %v5988_v6  ;;  %v1523_v19 = vadd.f32 %v7588_v58, %v5991_v63  ;;  %v1500_v55 = vadd.f32 %v7589_v23, %v1456_v31  ;;  %v7593_v9 = vld [vmem:[#allocation119_spill] sm:$0xff]  ;;  %v7594_v6 = vld [vmem:[#allocation120_spill] sm:$0xff] }
 0x2c0   : > { %v1499_v46 = vadd.f32 %v7590_v17, %v1455_v4  ;;  %7591 = vst [vmem:[#allocation50_spill] sm:$0xff] %v6104_v0  ;;  %7592 = vst [vmem:[#allocation194_spill] sm:$0xff] %v6106_v51  ;;  %v1526_v54 = vadd.f32 %v7593_v9, %v6010_v45  ;;  %v1525_v40 = vadd.f32 %v7594_v6, %v6013_v30  ;;  %v7595_v63 = vld [vmem:[#allocation121_spill] sm:$0xff]  ;;  %v7596_v31 = vld [vmem:[#allocation122_spill] sm:$0xff] }
 0x2c1   : > { %v1550_v13 = vadd.f32 %v7595_v63, %v1478_v25  ;;  %v1549_v58 = vadd.f32 %v7596_v31, %v1477_v56  ;;  %v7597_v4 = vld [vmem:[#allocation123_spill] sm:$0xff]  ;;  %2709 = vrot.lane.b32.xlu1 %v2698_v38, %s4003_s30  ;;  %2707 = vrot.lane.b32.xlu0 %v2697_v37, %s4003_s30  ;;  %v2766_v17 = vmul.f32 %v6088_v18, %v2764_v16  ;;  %v7598_v0 = vld [vmem:[#allocation124_spill] sm:$0xff]  ;;  %v7599_v45 = vld [vmem:[#allocation125_spill] sm:$0xff]  ;;  %v2219_v25 = vstv %s6058_s6  ;;  %s6573_s6 = sld [smem:[#allocation2 + $0x19b]] }
 0x2c2   : > { %v1552_v23 = vadd.f32 %v7597_v4, %v1480_v12  ;;  %v2765_v51 = vmul.f32 %v6092_v52, %v2764_v16  ;;  %v1551_v21 = vadd.f32 %v7598_v0, %v1479_v10  ;;  %v1576_v9 = vadd.f32 %v7599_v45, %v1488_v34  ;;  %v6124_v6 = vld [vmem:[%s4115_s24 + $0x91] sm:$0xff]  ;;  %v6127_v56 = vld [vmem:[%s4115_s24 + $0x89] sm:$0xff]  ;;  %v7601_v12 = vld [vmem:[#allocation127_spill] sm:$0xff]  ;;  %v6135_v10 = vpop.permute.xlu1 %2300  ;;  %v6137_v34 = vpop.permute.xlu0 %2298 }
 0x2c3   : > { %v1575_v30 = vadd.f32 %v7600_v20, %v1487_v27  ;;  %v1578_v38 = vadd.f32 %v7601_v12, %v1490_v61  ;;  %v7602_v63 = vld [vmem:[#allocation128_spill] sm:$0xff]  ;;  %v7603_v31 = vld [vmem:[#allocation129_spill] sm:$0xff]  ;;  %7605 = vst [vmem:[#allocation51_spill] sm:$0xff] %v6135_v10  ;;  %7606 = vst [vmem:[#allocation52_spill] sm:$0xff] %v6137_v34  ;;  %v2229_v10 = vstv %s6102_s8  ;;  %s3708_s8 = sld [smem:[#allocation2 + $0x122]] }
 0x2c4   : > { %v1577_v37 = vadd.f32 %v7602_v63, %v1489_v33  ;;  %v6132_v4 = vadd.f32 %v7603_v31, %v1498_v53  ;;  %v7604_v1 = vld [vmem:[#allocation133_spill] sm:$0xff]  ;;  %v7607_v20 = vld [vmem:[#allocation130_spill] sm:$0xff]  ;;  %v7608_v0 = vld [vmem:[#allocation131_spill] sm:$0xff] }
 0x2c5   : > { %v1628_v59 = vadd.f32 %v7604_v1, %v1524_v8  ;;  %v1601_v27 = vadd.f32 %v7607_v20, %v1497_v47  ;;  %v6143_v45 = vadd.f32 %v7608_v0, %v1500_v55  ;;  %v7609_v61 = vld [vmem:[#allocation132_spill] sm:$0xff]  ;;  %v7610_v53 = vld [vmem:[#allocation134_spill] sm:$0xff]  ;;  %2775 = vrot.lane.b32.xlu1 %v2766_v17, %s4002_s25  ;;  %2773 = vrot.lane.b32.xlu0 %v2765_v51, %s4002_s25  ;;  %v7612_v63 = vld [vmem:[#allocation135_spill] sm:$0xff] }
 0x2c6   : > { %v6146_v33 = vadd.f32 %v7609_v61, %v1499_v46  ;;  %v1627_v12 = vadd.f32 %v7610_v53, %v1523_v19  ;;  %v6150_v1 = vld [vmem:[%s4115_s24 + $0x5a] sm:$0xff]  ;;  %v2768_v47 = vmul.f32 %v6124_v6, %v2764_v16  ;;  %v2767_v55 = vmul.f32 %v6127_v56, %v2764_v16  ;;  %v7613_v31 = vld [vmem:[#allocation136_spill] sm:$0xff]  ;;  %v6162_v19 = vld [vmem:[%s4115_s24 + $0x52] sm:$0xff] }
 0x2c7   : > { %v6153_v8 = vmul.f32 %v6150_v1, %v2219_v25  ;;  %v1630_v46 = vadd.f32 %v7612_v63, %v1526_v54  ;;  %v1629_v20 = vadd.f32 %v7613_v31, %v1525_v40  ;;  %v6165_v0 = vmul.f32 %v6162_v19, %v2219_v25  ;;  %v7615_v17 = vld [vmem:[#allocation137_spill] sm:$0xff]  ;;  %v7616_v53 = vld [vmem:[#allocation138_spill] sm:$0xff]  ;;  %v6176_v54 = vpop.permute.xlu1 %2322  ;;  %v6178_v40 = vpop.permute.xlu0 %2320  ;;  %v7619_v63 = vld [vmem:[#allocation139_spill] sm:$0xff] }
 0x2c8   : > { %v2790_v61 = vstv %s6094_s7  ;;  %v1654_v51 = vadd.f32 %v7615_v17, %v1550_v13  ;;  %v1653_v34 = vadd.f32 %v7616_v53, %v1549_v58  ;;  %v6173_v16 = vadd.f32 %v5815_v22, %v1628_v59  ;;  %7617 = vst [vmem:[#allocation53_spill] sm:$0xff] %v6176_v54  ;;  %7618 = vst [vmem:[#allocation54_spill] sm:$0xff] %v6178_v40  ;;  %v3891_v58 = vld [vmem:[%s4115_s24 + $0x62] sm:$0xff]  ;;  %s6590_s7 = sld [smem:[#allocation2 + $0xa2]] }
 0x2c9   : > { %7611 = vst [vmem:[#allocation195_spill] sm:$0xff] %v6153_v8  ;;  %7614 = vst [vmem:[#allocation196_spill] sm:$0xff] %v6165_v0  ;;  %v1656_v31 = vadd.f32 %v7619_v63, %v1552_v23  ;;  %v6184_v0 = vadd.f32 %v5821_v5, %v1627_v12  ;;  %v3890_v8 = vld [vmem:[%s4115_s24 + $0x6a] sm:$0xff]  ;;  %v6190_v17 = vmul.f32 %v3891_v58, %v2219_v25  ;;  %2779 = vrot.lane.b32.xlu1 %v2768_v47, %s4002_s25 }
 0x2ca   : > { %v6187_v13 = vmul.f32 %v3890_v8, %v2219_v25  ;;  %v7621_v22 = vld [vmem:[#allocation140_spill] sm:$0xff]  ;;  %2777 = vrot.lane.b32.xlu0 %v2767_v55, %s4002_s25  ;;  %v2792_v53 = vmul.f32 %v6088_v18, %v2790_v61  ;;  %v2791_v23 = vmul.f32 %v6092_v52, %v2790_v61  ;;  %v1723_v5 = vadd.f32 %v5838_v35, %v1630_v46  ;;  %v7627_v35 = vld [vmem:[#allocation141_spill] sm:$0xff]  ;;  %v7628_v46 = vld [vmem:[#allocation142_spill] sm:$0xff] }
 0x2cb   : > { %7620 = vst [vmem:[#allocation55_spill] sm:$0xff] %v6190_v17  ;;  %v1655_v59 = vadd.f32 %v7621_v22, %v1551_v21  ;;  %v1722_v12 = vadd.f32 %v5847_v36, %v1629_v20  ;;  %v6200_v63 = vmul.f32 %v6150_v1, %v2229_v10  ;;  %v6203_v25 = vmul.f32 %v6162_v19, %v2229_v10  ;;  %v7624_v22 = vld [vmem:[#allocation29_spill] sm:$0xff]  ;;  %v6210_v54 = vpop.permute.xlu1 %2326  ;;  %v6212_v17 = vpop.permute.xlu0 %2324 }
 0x2cc   : > { %v1731_v21 = vadd.f32 %v5856_v3, %v1654_v51  ;;  %v1730_v47 = vadd.f32 %v7624_v22, %v1653_v34  ;;  %v6207_v40 = vmul.f32 %v3890_v8, %v2229_v10  ;;  %v2239_v55 = vstv %s6139_s9  ;;  %7625 = vst [vmem:[#allocation58_spill] sm:$0xff] %v6210_v54  ;;  %7626 = vst [vmem:[#allocation59_spill] sm:$0xff] %v6212_v17  ;;  %v7629_v22 = vld [vmem:[#allocation143_spill] sm:$0xff]  ;;  %s3709_s9 = sld [smem:[#allocation2 + $0x1a2]] }
 0x2cd   : > { %7622 = vst [vmem:[#allocation56_spill] sm:$0xff] %v6200_v63  ;;  %7623 = vst [vmem:[#allocation57_spill] sm:$0xff] %v6203_v25  ;;  %v1680_v36 = vadd.f32 %v7627_v35, %v1576_v9  ;;  %v1679_v20 = vadd.f32 %v7628_v46, %v1575_v30  ;;  %v1733_v63 = vadd.f32 %v5869_v39, %v1656_v31  ;;  %2801 = vrot.lane.b32.xlu1 %v2792_v53, %s4002_s25  ;;  %v7630_v9 = vld [vmem:[#allocation144_spill] sm:$0xff]  ;;  %v7633_v31 = vld [vmem:[#allocation146_spill] sm:$0xff] }
 0x2ce   : > { %v6217_v25 = vmul.f32 %v3891_v58, %v2229_v10  ;;  %v1732_v3 = vadd.f32 %v5871_v14, %v1655_v59  ;;  %2799 = vrot.lane.b32.xlu0 %v2791_v23, %s4002_s25  ;;  %v2794_v34 = vmul.f32 %v6124_v6, %v2790_v61  ;;  %v2793_v51 = vmul.f32 %v6127_v56, %v2790_v61  ;;  %v7632_v14 = vld [vmem:[#allocation145_spill] sm:$0xff] }
 0x2cf   : > { %v1682_v17 = vadd.f32 %v7629_v22, %v1578_v38  ;;  %v1681_v35 = vadd.f32 %v7630_v9, %v1577_v37  ;;  %v6227_v30 = vmul.f32 %v6150_v1, %v2239_v55  ;;  %v2816_v39 = vstv %s6168_s10  ;;  %v6239_v61 = vpop.permute.xlu1 %2348  ;;  %v6241_v38 = vpop.permute.xlu0 %2346  ;;  %v7637_v37 = vld [vmem:[#allocation147_spill] sm:$0xff]  ;;  %v7638_v22 = vld [vmem:[#allocation148_spill] sm:$0xff]  ;;  %s3710_s10 = sld [smem:[#allocation2 + $0x23]] }
 0x2d0   : > { %v1706_v10 = vadd.f32 %v7632_v14, %v6132_v4  ;;  %v1705_v59 = vadd.f32 %v7633_v31, %v1601_v27  ;;  %v6236_v53 = vmul.f32 %v6162_v19, %v2239_v55  ;;  %v2249_v23 = vstv %s6180_s11  ;;  %7635 = vst [vmem:[#allocation62_spill] sm:$0xff] %v6239_v61  ;;  %7636 = vst [vmem:[#allocation69_spill] sm:$0xff] %v6241_v38  ;;  %s3711_s11 = sld [smem:[#allocation2 + $0xa3]] }
 0x2d1   : > { %7631 = vst [vmem:[#allocation60_spill] sm:$0xff] %v6227_v30  ;;  %v1708_v46 = vadd.f32 %v7637_v37, %v6143_v45  ;;  %v1707_v9 = vadd.f32 %v7638_v22, %v6146_v33  ;;  %v1741_v54 = vadd.f32 %v5884_v41, %v1680_v36  ;;  %v1740_v4 = vadd.f32 %v5887_v24, %v1679_v20 }
 0x2d2   : > { %7634 = vst [vmem:[#allocation61_spill] sm:$0xff] %v6236_v53  ;;  %v6251_v27 = vmul.f32 %v3890_v8, %v2239_v55  ;;  %2805 = vrot.lane.b32.xlu1 %v2794_v34, %s4002_s25  ;;  %2803 = vrot.lane.b32.xlu0 %v2793_v51, %s4002_s25  ;;  %v2818_v14 = vmul.f32 %v6088_v18, %v2816_v39  ;;  %v2842_v22 = vstv %s6230_s17  ;;  %v7672_v53 = vld [vmem:[#allocation189_spill] sm:$0xff]  ;;  %s3686_s17 = sld [smem:[#allocation2 + $0x1e]] }
 0x2d3   : > { %v2817_v31 = vmul.f32 %v6092_v52, %v2816_v39  ;;  %v1743_v45 = vadd.f32 %v5905_v7, %v1682_v17  ;;  %v1742_v33 = vadd.f32 %v5907_v43, %v1681_v35  ;;  %v6259_v37 = vmul.f32 %v3891_v58, %v2239_v55  ;;  %v6271_v51 = vpop.permute.xlu1 %2352  ;;  %v6273_v7 = vpop.permute.xlu0 %2350  ;;  %v7643_v43 = vld [vmem:[#allocation149_spill] sm:$0xff] }
 0x2d4   : > { %7639 = vst [vmem:[#allocation63_spill] sm:$0xff] %v6251_v27  ;;  %v6262_v41 = vmul.f32 %v6150_v1, %v2249_v23  ;;  %v1751_v24 = vadd.f32 %v5916_v29, %v1706_v10  ;;  %v1750_v36 = vadd.f32 %v5919_v32, %v1705_v59  ;;  %v6267_v20 = vmul.f32 %v6162_v19, %v2249_v23  ;;  %v7644_v55 = vld [vmem:[#allocation37_spill] sm:$0xff]  ;;  %v7645_v32 = vld [vmem:[#allocation150_spill] sm:$0xff]  ;;  %v7646_v10 = vld [vmem:[#allocation151_spill] sm:$0xff] }
 0x2d5   : > { %7640 = vst [vmem:[#allocation64_spill] sm:$0xff] %v6259_v37  ;;  %v6269_v34 = vmul.f32 %v3890_v8, %v2249_v23  ;;  %v1777_v17 = vadd.f32 %v7643_v43, %v6173_v16  ;;  %v1753_v1 = vadd.f32 %v5921_v2, %v1708_v46  ;;  %v1752_v35 = vadd.f32 %v7644_v55, %v1707_v9  ;;  %v7647_v59 = vld [vmem:[#allocation152_spill] sm:$0xff]  ;;  %v7649_v9 = vld [vmem:[#allocation154_spill] sm:$0xff]  ;;  %v7650_v43 = vld [vmem:[#allocation155_spill] sm:$0xff] }
 0x2d6   : > { %7641 = vst [vmem:[#allocation65_spill] sm:$0xff] %v6262_v41  ;;  %7642 = vst [vmem:[#allocation70_spill] sm:$0xff] %v6267_v20  ;;  %v6279_v29 = vmul.f32 %v3891_v58, %v2249_v23  ;;  %v1776_v8 = vadd.f32 %v7645_v32, %v6184_v0  ;;  %2827 = vrot.lane.b32.xlu1 %v2818_v14, %s4002_s25  ;;  %2825 = vrot.lane.b32.xlu0 %v2817_v31, %s4002_s25  ;;  %v7648_v58 = vld [vmem:[#allocation153_spill] sm:$0xff]  ;;  %v7651_v55 = vld [vmem:[#allocation156_spill] sm:$0xff]  ;;  %v2472_v20 = vstv %s6249_s19  ;;  %s3713_s19 = sld [smem:[#allocation2 + $0x1a3]] }
 0x2d7   : > { %v2820_v19 = vmul.f32 %v6124_v6, %v2816_v39  ;;  %v2819_v16 = vmul.f32 %v6127_v56, %v2816_v39  ;;  %v1779_v2 = vadd.f32 %v7646_v10, %v1723_v5  ;;  %v1778_v46 = vadd.f32 %v7647_v59, %v1722_v12  ;;  %v7652_v32 = vld [vmem:[#allocation157_spill] sm:$0xff]  ;;  %v6299_v61 = vpop.permute.xlu1 %2374  ;;  %v6301_v39 = vpop.permute.xlu0 %2372  ;;  %v7653_v5 = vld [vmem:[#allocation158_spill] sm:$0xff]  ;;  %v7654_v12 = vld [vmem:[#allocation159_spill] sm:$0xff] }
 0x2d8   : > { %v1803_v23 = vadd.f32 %v7648_v58, %v1731_v21  ;;  %v1802_v0 = vadd.f32 %v7649_v9, %v1730_v47  ;;  %v1805_v14 = vadd.f32 %v7650_v43, %v1733_v63  ;;  %v1804_v31 = vadd.f32 %v7651_v55, %v1732_v3  ;;  %v7655_v21 = vld [vmem:[#allocation160_spill] sm:$0xff]  ;;  %v7656_v41 = vld [vmem:[#allocation165_spill] sm:$0xff]  ;;  %v7660_v43 = vld [vmem:[#allocation166_spill] sm:$0xff] }
 0x2d9   : > { %v1829_v38 = vadd.f32 %v7652_v32, %v1741_v54  ;;  %v1828_v10 = vadd.f32 %v7653_v5, %v1740_v4  ;;  %v1831_v59 = vadd.f32 %v7654_v12, %v1743_v45  ;;  %v1830_v58 = vadd.f32 %v7655_v21, %v1742_v33  ;;  %v7657_v47 = vld [vmem:[#allocation161_spill] sm:$0xff]  ;;  %v7658_v4 = vld [vmem:[#allocation162_spill] sm:$0xff]  ;;  %v7659_v45 = vld [vmem:[#allocation163_spill] sm:$0xff] }
 0x2da   : > { %v1881_v37 = vadd.f32 %v7656_v41, %v1777_v17  ;;  %2831 = vrot.lane.b32.xlu1 %v2820_v19, %s4002_s25  ;;  %2829 = vrot.lane.b32.xlu0 %v2819_v16, %s4002_s25  ;;  %v2844_v63 = vmul.f32 %v6088_v18, %v2842_v22  ;;  %v2843_v54 = vmul.f32 %v6092_v52, %v2842_v22  ;;  %v7661_v41 = vld [vmem:[#allocation164_spill] sm:$0xff]  ;;  %v7662_v19 = vld [vmem:[#allocation167_spill] sm:$0xff] }
 0x2db   : > { %v6313_v3 = vadd.f32 %v7657_v47, %v1751_v24  ;;  %v6316_v9 = vadd.f32 %v7658_v4, %v1750_v36  ;;  %v1857_v33 = vadd.f32 %v7659_v45, %v1753_v1  ;;  %v1880_v55 = vadd.f32 %v7660_v43, %v1776_v8  ;;  %v7663_v32 = vld [vmem:[#allocation168_spill] sm:$0xff]  ;;  %v6325_v12 = vpop.permute.xlu1 %2378  ;;  %v6327_v24 = vpop.permute.xlu0 %2376  ;;  %v7664_v1 = vld [vmem:[#allocation170_spill] sm:$0xff]  ;;  %v7665_v21 = vld [vmem:[#allocation171_spill] sm:$0xff] }
 0x2dc   : > { %v1856_v17 = vadd.f32 %v7661_v41, %v1752_v35  ;;  %v1883_v16 = vadd.f32 %v7662_v19, %v1779_v2  ;;  %v1882_v5 = vadd.f32 %v7663_v32, %v1778_v46  ;;  %v6332_v36 = vmul.f32 %v5561_v11, %v2472_v20  ;;  %v7666_v4 = vld [vmem:[#allocation39_spill] sm:$0xff]  ;;  %v7668_v32 = vld [vmem:[#allocation184_spill] sm:$0xff] }
 0x2dd   : > { %v1907_v8 = vadd.f32 %v7664_v1, %v1803_v23  ;;  %v1906_v47 = vadd.f32 %v7665_v21, %v1802_v0  ;;  %v6337_v35 = vmul.f32 %v5565_v44, %v2472_v20  ;;  %v2482_v2 = vstv %s6281_s20  ;;  %s3687_s20 = sld [smem:[#allocation2 + $0x9e]] }
 0x2de   : > { %v1973_v45 = vadd.f32 %v7666_v4, %v1881_v37  ;;  %2853 = vrot.lane.b32.xlu1 %v2844_v63, %s4002_s25  ;;  %2851 = vrot.lane.b32.xlu0 %v2843_v54, %s4002_s25  ;;  %v2846_v46 = vmul.f32 %v6124_v6, %v2842_v22  ;;  %v2845_v43 = vmul.f32 %v6127_v56, %v2842_v22  ;;  %v2868_v19 = vstv %s6293_s26  ;;  %v7669_v37 = vld [vmem:[#allocation40_spill] sm:$0xff]  ;;  %v7670_v63 = vld [vmem:[#allocation41_spill] sm:$0xff]  ;;  %s3688_s26 = sld [smem:[#allocation2 + $0x11e]] }
 0x2df   : > { %v1972_v41 = vadd.f32 %v5994_v26, %v1880_v55  ;;  %v6348_v23 = vmul.f32 %v5600_v50, %v2472_v20  ;;  %v6351_v0 = vmul.f32 %v5603_v15, %v2472_v20  ;;  %v1909_v1 = vadd.f32 %v7668_v32, %v1805_v14  ;;  %v6356_v54 = vpop.permute.xlu1 %2400  ;;  %v6358_v27 = vpop.permute.xlu0 %2398  ;;  %v7671_v22 = vld [vmem:[#allocation185_spill] sm:$0xff]  ;;  %v7673_v20 = vld [vmem:[#allocation43_spill] sm:$0xff] }
 0x2e0   : > { %v1975_v21 = vadd.f32 %v7669_v37, %v1883_v16  ;;  %v1974_v4 = vadd.f32 %v7670_v63, %v1882_v5  ;;  %v6361_v26 = vmul.f32 %v5561_v11, %v2482_v2  ;;  %v1908_v55 = vadd.f32 %v7671_v22, %v1804_v31  ;;  %v7675_v31 = vld [vmem:[#allocation192_spill] sm:$0xff]  ;;  %v7680_v37 = vld [vmem:[#allocation198_spill] sm:$0xff] }
 0x2e1   : > { %7667 = vst [vmem:[#allocation66_spill] sm:$0xff] %v6351_v0  ;;  %v6365_v30 = vadd.f32 %v7672_v53, %v1907_v8  ;;  %v6368_v0 = vadd.f32 %v7673_v20, %v1906_v47  ;;  %v6371_v14 = vmul.f32 %v5565_v44, %v2482_v2  ;;  %v2870_v16 = vmul.f32 %v6088_v18, %v2868_v19  ;;  %v7676_v8 = vld [vmem:[#allocation193_spill] sm:$0xff] }
 0x2e2   : > { %2857 = vrot.lane.b32.xlu1 %v2846_v46, %s4002_s25  ;;  %2855 = vrot.lane.b32.xlu0 %v2845_v43, %s4002_s25  ;;  %v2869_v11 = vmul.f32 %v6092_v52, %v2868_v19  ;;  %v6380_v53 = vmul.f32 %v5600_v50, %v2482_v2  ;;  %v1933_v5 = vadd.f32 %v7675_v31, %v1829_v38  ;;  %v6388_v46 = vstv %s6320_s27  ;;  %v7679_v43 = vld [vmem:[#allocation197_spill] sm:$0xff]  ;;  %s3689_s27 = sld [smem:[#allocation2 + $0x19e]] }
 0x2e3   : > { %v1932_v47 = vadd.f32 %v7676_v8, %v1828_v10  ;;  %v6385_v44 = vmul.f32 %v5603_v15, %v2482_v2  ;;  %7678 = vst [vmem:[#allocation71_spill] sm:$0xff] %v6388_v46  ;;  %v1935_v32 = vadd.f32 %v7679_v43, %v1831_v59  ;;  %v1934_v63 = vadd.f32 %v7680_v37, %v1830_v58  ;;  %v6393_v20 = vpop.permute.xlu1 %2404  ;;  %v6395_v50 = vpop.permute.xlu0 %2402  ;;  %v7681_v10 = vld [vmem:[#allocation169_spill] sm:$0xff]  ;;  %v6410_v58 = vld [vmem:[%s4115_s24 + $0x80] sm:$0xff] }
 0x2e4   : > { %7674 = vst [vmem:[#allocation67_spill] sm:$0xff] %v6380_v53  ;;  %v1985_v22 = vadd.f32 %v6033_v60, %v1909_v1  ;;  %v2894_v38 = vstv %s6329_s28  ;;  %v1961_v15 = vadd.f32 %v7681_v10, %v1857_v33  ;;  %v7682_v2 = vld [vmem:[#allocation201_spill] sm:$0xff]  ;;  %v6403_v8 = vadd.f32 %v6035_v49, %v1908_v55  ;;  %7683 = vst [vmem:[#allocation72_spill] sm:$0xff] %v6410_v58  ;;  %v6417_v33 = vld [vmem:[%s4115_s24 + $0x78] sm:$0xff]  ;;  %s3704_s28 = sld [smem:[#allocation2 + $0x121]] }
 0x2e5   : > { %7677 = vst [vmem:[#allocation68_spill] sm:$0xff] %v6385_v44  ;;  %v1960_v31 = vadd.f32 %v7682_v2, %v1856_v17  ;;  %v2872_v59 = vmul.f32 %v6124_v6, %v2868_v19  ;;  %v2871_v60 = vmul.f32 %v6127_v56, %v2868_v19  ;;  %v6414_v1 = vmul.f32 %v6410_v58, %v6388_v46  ;;  %v7687_v17 = vld [vmem:[#allocation191_spill] sm:$0xff]  ;;  %v7689_v10 = vld [vmem:[#allocation200_spill] sm:$0xff] }
 0x2e6   : > { %2879 = vrot.lane.b32.xlu1 %v2870_v16, %s4003_s30  ;;  %2877 = vrot.lane.b32.xlu0 %v2869_v11, %s4003_s30  ;;  %7685 = vst [vmem:[#allocation74_spill] sm:$0xff] %v6417_v33  ;;  %v6421_v49 = vmul.f32 %v6417_v33, %v6388_v46  ;;  %v6424_v55 = vadd.f32 %v7687_v17, %v1933_v5  ;;  %v7688_v43 = vld [vmem:[#allocation199_spill] sm:$0xff] }
 0x2e7   : > { %7684 = vst [vmem:[#allocation73_spill] sm:$0xff] %v6414_v1  ;;  %v6427_v16 = vadd.f32 %v6056_v57, %v1932_v47  ;;  %v2896_v19 = vmul.f32 %v6088_v18, %v2894_v38  ;;  %v2895_v11 = vmul.f32 %v6092_v52, %v2894_v38  ;;  %v1959_v37 = vadd.f32 %v7688_v43, %v6313_v3  ;;  %v6441_v17 = vpop.permute.xlu1 %2426  ;;  %v6443_v57 = vpop.permute.xlu0 %2424  ;;  %v7691_v47 = vld [vmem:[#allocation11_spill] sm:$0xff]  ;;  %v7693_v43 = vld [vmem:[#allocation172_spill] sm:$0xff] }
 0x2e8   : > { %7686 = vst [vmem:[#allocation75_spill] sm:$0xff] %v6421_v49  ;;  %v1958_v2 = vadd.f32 %v7689_v10, %v6316_v9  ;;  %v6436_v33 = vadd.f32 %v6062_v42, %v1935_v32  ;;  %v6439_v5 = vadd.f32 %v6064_v28, %v1934_v63  ;;  %7690 = vst [vmem:[#allocation76_spill] sm:$0xff] %v6443_v57  ;;  %v7692_v49 = vld [vmem:[#allocation12_spill] sm:$0xff]  ;;  %v2920_v32 = vstv %s6377_s29  ;;  %v7694_v63 = vld [vmem:[#allocation186_spill] sm:$0xff]  ;;  %s3705_s29 = sld [smem:[#allocation2 + $0x1a1]] }
 0x2e9   : > { %v2029_v58 = vadd.f32 %v7691_v47, %v1973_v45  ;;  %v2028_v1 = vadd.f32 %v7692_v49, %v1972_v41  ;;  %v2005_v46 = vadd.f32 %v6083_v62, %v1961_v15  ;;  %v2004_v3 = vadd.f32 %v6085_v48, %v1960_v31  ;;  %v7695_v10 = vld [vmem:[#allocation21_spill] sm:$0xff]  ;;  %v7696_v49 = vld [vmem:[#allocation187_spill] sm:$0xff]  ;;  %v7697_v15 = vld [vmem:[#allocation24_spill] sm:$0xff] }
 0x2ea   : > { %v2031_v9 = vadd.f32 %v7693_v43, %v1975_v21  ;;  %2883 = vrot.lane.b32.xlu1 %v2872_v59, %s4003_s30  ;;  %2881 = vrot.lane.b32.xlu0 %v2871_v60, %s4003_s30  ;;  %v2898_v42 = vmul.f32 %v6124_v6, %v2894_v38  ;;  %v2897_v28 = vmul.f32 %v6127_v56, %v2894_v38  ;;  %v7698_v31 = vld [vmem:[#allocation173_spill] sm:$0xff]  ;;  %v7699_v21 = vld [vmem:[#allocation47_spill] sm:$0xff]  ;;  %v6469_v38 = vstv %s6398_s4  ;;  %v7715_v57 = vld [vmem:[#allocation28_spill] sm:$0xff]  ;;  %s6879_s4 = sld [smem:[#allocation5]] }
 0x2eb   : > { %v2109_v45 = vadd.f32 %v7694_v63, %v2005_v46  ;;  %v2108_v41 = vadd.f32 %v7695_v10, %v2004_v3  ;;  %v2133_v62 = vadd.f32 %v7696_v49, %v2029_v58  ;;  %v2132_v48 = vadd.f32 %v7697_v15, %v2028_v1  ;;  %v7700_v59 = vld [vmem:[#allocation25_spill] sm:$0xff]  ;;  %v6464_v44 = vpop.permute.xlu1 %2430  ;;  %v6466_v53 = vpop.permute.xlu0 %2428  ;;  %v7703_v46 = vld [vmem:[#allocation48_spill] sm:$0xff]  ;;  %v7704_v3 = vld [vmem:[#allocation42_spill] sm:$0xff] }
 0x2ec   : > { %v2030_v47 = vadd.f32 %v7698_v31, %v1974_v4  ;;  %v6461_v43 = vadd.f32 %v7699_v21, %v1959_v37  ;;  %v2135_v60 = vadd.f32 %v7700_v59, %v2031_v9  ;;  %7701 = vst [vmem:[#allocation77_spill] sm:$0xff] %v6464_v44  ;;  %7702 = vst [vmem:[#allocation78_spill] sm:$0xff] %v6466_v53  ;;  %v7705_v10 = vld [vmem:[#allocation188_spill] sm:$0xff]  ;;  %v7706_v49 = vld [vmem:[#allocation26_spill] sm:$0xff] }
 0x2ed   : > { %v6472_v63 = vadd.f32 %v7703_v46, %v1958_v2  ;;  %v2213_v58 = vadd.f32 %v7704_v3, %v2109_v45  ;;  %v2212_v1 = vadd.f32 %v7705_v10, %v2108_v41  ;;  %v2922_v4 = vmul.f32 %v6088_v18, %v2920_v32  ;;  %v7707_v2 = vld [vmem:[#allocation195_spill] sm:$0xff]  ;;  %v7708_v21 = vld [vmem:[#allocation196_spill] sm:$0xff] }
 0x2ee   : > { %v2134_v37 = vadd.f32 %v7706_v49, %v2030_v47  ;;  %2905 = vrot.lane.b32.xlu1 %v2896_v19, %s4003_s30  ;;  %2903 = vrot.lane.b32.xlu0 %v2895_v11, %s4003_s30  ;;  %v2921_v9 = vmul.f32 %v6092_v52, %v2920_v32  ;;  %v2924_v15 = vmul.f32 %v6124_v6, %v2920_v32  ;;  %v7709_v19 = vld [vmem:[#allocation14_spill] sm:$0xff]  ;;  %v7710_v11 = vld [vmem:[#allocation175_spill] sm:$0xff] }
 0x2ef   : > { %v2225_v31 = vadd.f32 %v7707_v2, %v2133_v62  ;;  %v2224_v45 = vadd.f32 %v7708_v21, %v2132_v48  ;;  %v2923_v41 = vmul.f32 %v6127_v56, %v2920_v32  ;;  %v6489_v59 = vmul.f32 %v6088_v18, %v6469_v38  ;;  %v7711_v3 = vld [vmem:[#allocation15_spill] sm:$0xff]  ;;  %v6497_v53 = vpop.permute.xlu1 %2452  ;;  %v6499_v62 = vpop.permute.xlu0 %2450  ;;  %v7712_v48 = vld [vmem:[#allocation44_spill] sm:$0xff]  ;;  %v7713_v2 = vld [vmem:[#allocation190_spill] sm:$0xff] }
 0x2f0   : > { %v2055_v47 = vadd.f32 %v7709_v19, %v6365_v30  ;;  %v2054_v46 = vadd.f32 %v7710_v11, %v6368_v0  ;;  %v2057_v10 = vadd.f32 %v7711_v3, %v1985_v22  ;;  %v2227_v49 = vadd.f32 %v6187_v13, %v2135_v60  ;;  %v7714_v30 = vld [vmem:[#allocation27_spill] sm:$0xff] }
 0x2f1   : > { %v2281_v32 = vadd.f32 %v7712_v48, %v2225_v31  ;;  %v2280_v21 = vadd.f32 %v7713_v2, %v2224_v45  ;;  %v2257_v18 = vadd.f32 %v6269_v34, %v2213_v58  ;;  %v2256_v44 = vadd.f32 %v6279_v29, %v2212_v1  ;;  %v7716_v11 = vld [vmem:[#allocation55_spill] sm:$0xff]  ;;  %v7717_v29 = vld [vmem:[#allocation176_spill] sm:$0xff]  ;;  %v7718_v1 = vld [vmem:[#allocation30_spill] sm:$0xff] }
 0x2f2   : > { %v2159_v19 = vadd.f32 %v7714_v30, %v2055_v47  ;;  %v2158_v0 = vadd.f32 %v7715_v57, %v2054_v46  ;;  %v2226_v22 = vadd.f32 %v7716_v11, %v2134_v37  ;;  %2909 = vrot.lane.b32.xlu1 %v2898_v42, %s4003_s30  ;;  %2907 = vrot.lane.b32.xlu0 %v2897_v28, %s4003_s30  ;;  %v7722_v46 = vld [vmem:[#allocation56_spill] sm:$0xff]  ;;  %v7724_v11 = vld [vmem:[#allocation17_spill] sm:$0xff] }
 0x2f3   : > { %v2361_v13 = vadd.f32 %v6271_v51, %v2257_v18  ;;  %v2360_v60 = vadd.f32 %v6273_v7, %v2256_v44  ;;  %v2385_v31 = vadd.f32 %v6299_v61, %v2281_v32  ;;  %v2384_v34 = vadd.f32 %v6301_v39, %v2280_v21  ;;  %v2457_v45 = vpop.permute.xlu1 %2456  ;;  %v2455_v37 = vpop.permute.xlu0 %2454  ;;  %v7719_v51 = vld [vmem:[#allocation45_spill] sm:$0xff]  ;;  %v7720_v61 = vld [vmem:[#allocation46_spill] sm:$0xff] }
 0x2f4   : > { %v2056_v58 = vadd.f32 %v7717_v29, %v6403_v8  ;;  %v2161_v57 = vadd.f32 %v7718_v1, %v2057_v10  ;;  %v2947_v42 = vmul.f32 %v6092_v52, %v6469_v38  ;;  %v6521_v18 = vmul.f32 %v6124_v6, %v6469_v38  ;;  %v7721_v8 = vld [vmem:[#allocation31_spill] sm:$0xff]  ;;  %v7723_v10 = vld [vmem:[#allocation57_spill] sm:$0xff] }
 0x2f5   : > { %v2283_v7 = vadd.f32 %v7719_v51, %v2227_v49  ;;  %v2282_v44 = vadd.f32 %v7720_v61, %v2226_v22  ;;  %v6525_v39 = vadd.f32 %v2457_v45, %v2361_v13  ;;  %v6527_v28 = vadd.f32 %v2455_v37, %v2360_v60  ;;  %v7731_v51 = vld [vmem:[#allocation66_spill] sm:$0xff]  ;;  %v7732_v61 = vld [vmem:[#allocation179_spill] sm:$0xff] }
 0x2f6   : > { %v2160_v47 = vadd.f32 %v7721_v8, %v2056_v58  ;;  %v2235_v3 = vadd.f32 %v7722_v46, %v2159_v19  ;;  %v2234_v48 = vadd.f32 %v7723_v10, %v2158_v0  ;;  %2931 = vrot.lane.b32.xlu1 %v2922_v4, %s4003_s30  ;;  %2929 = vrot.lane.b32.xlu0 %v2921_v9, %s4003_s30  ;;  %v6535_v32 = vstv %s6482_s5  ;;  %v7725_v0 = vld [vmem:[#allocation178_spill] sm:$0xff]  ;;  %v7726_v4 = vld [vmem:[#allocation19_spill] sm:$0xff]  ;;  %s6886_s5 = sld [smem:[#allocation5 + $0x1]] }
 0x2f7   : > { %v2387_v49 = vadd.f32 %v6325_v12, %v2283_v7  ;;  %v2386_v2 = vadd.f32 %v6327_v24, %v2282_v44  ;;  %v2478_v21 = vadd.f32 %v6332_v36, %v2385_v31  ;;  %v2477_v30 = vadd.f32 %v6337_v35, %v2384_v34  ;;  %v2524_v60 = vpop.permute.xlu1 %2523  ;;  %v2522_v29 = vpop.permute.xlu0 %2521  ;;  %v7727_v12 = vld [vmem:[#allocation50_spill] sm:$0xff]  ;;  %v6555_v31 = vld [vmem:[%s4115_s24 + $0x82] sm:$0xff] }
 0x2f8   : > { %v2081_v19 = vadd.f32 %v7724_v11, %v6424_v55  ;;  %v2080_v22 = vadd.f32 %v7725_v0, %v6427_v16  ;;  %v2083_v9 = vadd.f32 %v7726_v4, %v6436_v33  ;;  %v2237_v13 = vadd.f32 %v6207_v40, %v2161_v57  ;;  %v7728_v24 = vld [vmem:[#allocation194_spill] sm:$0xff]  ;;  %v7729_v55 = vld [vmem:[#allocation32_spill] sm:$0xff]  ;;  %v7730_v16 = vld [vmem:[#allocation33_spill] sm:$0xff] }
 0x2f9   : > { %v2307_v58 = vadd.f32 %v7727_v12, %v2235_v3  ;;  %v2306_v1 = vadd.f32 %v7728_v24, %v2234_v48  ;;  %v6550_v36 = vadd.f32 %v2524_v60, %v2478_v21  ;;  %v6552_v35 = vadd.f32 %v2522_v29, %v2477_v30  ;;  %v7733_v8 = vld [vmem:[#allocation38_spill] sm:$0xff]  ;;  %v7737_v21 = vld [vmem:[#allocation60_spill] sm:$0xff]  ;;  %v7740_v60 = vld [vmem:[#allocation183_spill] sm:$0xff] }
 0x2fa   : > { %v2185_v34 = vadd.f32 %v7729_v55, %v2081_v19  ;;  %v2184_v45 = vadd.f32 %v7730_v16, %v2080_v22  ;;  %v2236_v33 = vadd.f32 %v6217_v25, %v2160_v47  ;;  %2935 = vrot.lane.b32.xlu1 %v2924_v15, %s4003_s30  ;;  %2933 = vrot.lane.b32.xlu0 %v2923_v41, %s4003_s30  ;;  %v7742_v24 = vld [vmem:[#allocation53_spill] sm:$0xff]  ;;  %v7745_v16 = vld [vmem:[#allocation36_spill] sm:$0xff] }
 0x2fb   : > { %v2411_v40 = vadd.f32 %v6356_v54, %v2307_v58  ;;  %v2410_v57 = vadd.f32 %v6358_v27, %v2306_v1  ;;  %v2480_v37 = vadd.f32 %v6348_v23, %v2387_v49  ;;  %v2479_v7 = vadd.f32 %v7731_v51, %v2386_v2  ;;  %v2528_v3 = vpop.permute.xlu1 %2527  ;;  %v2526_v25 = vpop.permute.xlu0 %2525  ;;  %v7734_v27 = vld [vmem:[#allocation51_spill] sm:$0xff]  ;;  %v7735_v23 = vld [vmem:[#allocation52_spill] sm:$0xff]  ;;  %v7736_v49 = vld [vmem:[#allocation34_spill] sm:$0xff] }
 0x2fc   : > { %v2082_v44 = vadd.f32 %v7732_v61, %v6439_v5  ;;  %v2187_v46 = vadd.f32 %v7733_v8, %v2083_v9  ;;  %v2949_v15 = vmul.f32 %v6127_v56, %v6469_v38  ;;  %v3018_v41 = vmul.f32 %v6555_v31, %v6535_v32  ;;  %v6582_v5 = vld [vmem:[%s4115_s24 + $0x7a] sm:$0xff]  ;;  %v7738_v38 = vld [vmem:[#allocation61_spill] sm:$0xff] }
 0x2fd   : > { %v2309_v54 = vadd.f32 %v7734_v27, %v2237_v13  ;;  %v2308_v47 = vadd.f32 %v7735_v23, %v2236_v33  ;;  %v6577_v10 = vadd.f32 %v2528_v3, %v2480_v37  ;;  %v6579_v48 = vadd.f32 %v2526_v25, %v2479_v7  ;;  %v7739_v9 = vld [vmem:[#allocation182_spill] sm:$0xff]  ;;  %v7746_v33 = vld [vmem:[#allocation64_spill] sm:$0xff]  ;;  %v7748_v7 = vld [vmem:[#allocation67_spill] sm:$0xff] }
 0x2fe   : > { %v2186_v2 = vadd.f32 %v7736_v49, %v2082_v44  ;;  %v2245_v30 = vadd.f32 %v7737_v21, %v2185_v34  ;;  %v2244_v11 = vadd.f32 %v7738_v38, %v2184_v45  ;;  %2957 = vrot.lane.b32.xlu1 %v6489_v59, %s4003_s30  ;;  %2955 = vrot.lane.b32.xlu0 %v2947_v42, %s4003_s30  ;;  %v7741_v59 = vld [vmem:[#allocation63_spill] sm:$0xff]  ;;  %v7743_v1 = vld [vmem:[#allocation54_spill] sm:$0xff]  ;;  %v7747_v37 = vld [vmem:[#allocation76_spill] sm:$0xff] }
 0x2ff   : > { %v2413_v19 = vadd.f32 %v6393_v20, %v2309_v54  ;;  %v2412_v0 = vadd.f32 %v6395_v50, %v2308_v47  ;;  %v2488_v22 = vadd.f32 %v6361_v26, %v2411_v40  ;;  %v2487_v4 = vadd.f32 %v6371_v14, %v2410_v57  ;;  %v2550_v42 = vpop.permute.xlu1 %2549  ;;  %v2548_v58 = vpop.permute.xlu0 %2547  ;;  %v7749_v44 = vld [vmem:[#allocation68_spill] sm:$0xff]  ;;  %v3894_v54 = vld [vmem:[%s4115_s24 + $0x90] sm:$0xff]  ;;  %v7751_v49 = vld [vmem:[#allocation58_spill] sm:$0xff] }
 0x300   : > { %v2107_v13 = vadd.f32 %v7739_v9, %v6461_v43  ;;  %v2106_v29 = vadd.f32 %v7740_v60, %v6472_v63  ;;  %v2247_v12 = vadd.f32 %v7741_v59, %v2187_v46  ;;  %v3017_v20 = vmul.f32 %v6582_v5, %v6535_v32  ;;  %v6610_v43 = vld [vmem:[%s4115_s24 + $0x92] sm:$0xff]  ;;  %v7744_v63 = vld [vmem:[#allocation35_spill] sm:$0xff]  ;;  %v6623_v46 = vld [vmem:[%s4115_s24 + $0x8a] sm:$0xff] }
 0x301   : > { %v2333_v50 = vadd.f32 %v7742_v24, %v2245_v30  ;;  %v2332_v26 = vadd.f32 %v7743_v1, %v2244_v11  ;;  %v6605_v55 = vadd.f32 %v2550_v42, %v2488_v22  ;;  %v6607_v14 = vadd.f32 %v2548_v58, %v2487_v4  ;;  %v7752_v21 = vld [vmem:[#allocation59_spill] sm:$0xff]  ;;  %v7754_v22 = vld [vmem:[#allocation70_spill] sm:$0xff]  ;;  %v7755_v60 = vld [vmem:[#allocation77_spill] sm:$0xff] }
 0x302   : > { %v2211_v34 = vadd.f32 %v7744_v63, %v2107_v13  ;;  %v2210_v45 = vadd.f32 %v7745_v16, %v2106_v29  ;;  %v2246_v40 = vadd.f32 %v7746_v33, %v2186_v2  ;;  %2961 = vrot.lane.b32.xlu1 %v6521_v18, %s4003_s30  ;;  %2959 = vrot.lane.b32.xlu0 %v2949_v15, %s4003_s30  ;;  %v7750_v18 = vld [vmem:[#allocation71_spill] sm:$0xff]  ;;  %v3895_v15 = vld [vmem:[%s4115_s24 + $0x88] sm:$0xff]  ;;  %v2502_v47 = vstv %s6573_s6  ;;  %v7756_v59 = vld [vmem:[#allocation78_spill] sm:$0xff]  ;;  %s6892_s6 = sld [smem:[#allocation5 + $0x2]] }
 0x303   : > { %v2437_v57 = vadd.f32 %v6441_v17, %v2333_v50  ;;  %v2436_v51 = vadd.f32 %v7747_v37, %v2332_v26  ;;  %v2490_v61 = vadd.f32 %v7748_v7, %v2413_v19  ;;  %v2489_v8 = vadd.f32 %v7749_v44, %v2412_v0  ;;  %v2554_v3 = vpop.permute.xlu1 %2553  ;;  %v2552_v25 = vpop.permute.xlu0 %2551  ;;  %v7753_v19 = vld [vmem:[#allocation65_spill] sm:$0xff]  ;;  %v7758_v24 = vld [vmem:[#allocation75_spill] sm:$0xff]  ;;  %v7759_v63 = vld [vmem:[#allocation72_spill] sm:$0xff] }
 0x304   : > { %v3020_v27 = vmul.f32 %v6610_v43, %v6535_v32  ;;  %v2496_v23 = vmul.f32 %v3894_v54, %v7750_v18  ;;  %v2495_v17 = vmul.f32 %v3895_v15, %v7750_v18  ;;  %v2335_v2 = vadd.f32 %v7751_v49, %v2247_v12  ;;  %v7757_v42 = vld [vmem:[#allocation73_spill] sm:$0xff]  ;;  %v7762_v37 = vld [vmem:[#allocation74_spill] sm:$0xff] }
 0x305   : > { %v2334_v30 = vadd.f32 %v7752_v21, %v2246_v40  ;;  %v6634_v38 = vadd.f32 %v2554_v3, %v2490_v61  ;;  %v6636_v11 = vadd.f32 %v2552_v25, %v2489_v8  ;;  %v2255_v0 = vadd.f32 %v7753_v19, %v2211_v34 }
 0x306   : > { %v2254_v4 = vadd.f32 %v7754_v22, %v2210_v45  ;;  %3027 = vrot.lane.b32.xlu1 %v3018_v41, %s4002_s25  ;;  %3025 = vrot.lane.b32.xlu0 %v3017_v20, %s4002_s25  ;;  %v3019_v9 = vmul.f32 %v6623_v46, %v6535_v32  ;;  %v3042_v13 = vstv %s6590_s7  ;;  %v2439_v29 = vadd.f32 %v7755_v60, %v2335_v2  ;;  %v7760_v41 = vld [vmem:[#allocation62_spill] sm:$0xff]  ;;  %v7761_v20 = vld [vmem:[#allocation69_spill] sm:$0xff]  ;;  %s6897_s7 = sld [smem:[#allocation5 + $0x3]] }
 0x307   : > { %v2438_v12 = vadd.f32 %v7756_v59, %v2334_v30  ;;  %v2498_v58 = vadd.f32 %v7757_v42, %v2437_v57  ;;  %v2497_v50 = vadd.f32 %v7758_v24, %v2436_v51  ;;  %v2576_v1 = vpop.permute.xlu1 %2575  ;;  %v2574_v26 = vpop.permute.xlu0 %2573  ;;  %v2504_v34 = vmul.f32 %v7759_v63, %v2502_v47 }
 0x308   : > { %v2359_v16 = vadd.f32 %v7760_v41, %v2255_v0  ;;  %v2358_v45 = vadd.f32 %v7761_v20, %v2254_v4  ;;  %v3044_v40 = vmul.f32 %v6555_v31, %v3042_v13  ;;  %v3043_v57 = vmul.f32 %v6582_v5, %v3042_v13 }
 0x309   : > { %v6652_v33 = vadd.f32 %v2576_v1, %v2498_v58  ;;  %v6654_v32 = vadd.f32 %v2574_v26, %v2497_v50  ;;  %v2503_v51 = vmul.f32 %v7762_v37, %v2502_v47  ;;  %v2500_v44 = vadd.f32 %v2496_v23, %v2439_v29 }
 0x30a   : > { %3031 = vrot.lane.b32.xlu1 %v3020_v27, %s4002_s25  ;;  %3029 = vrot.lane.b32.xlu0 %v3019_v9, %s4002_s25  ;;  %v2463_v7 = vadd.f32 %v6497_v53, %v2359_v16  ;;  %v2462_v61 = vadd.f32 %v6499_v62, %v2358_v45  ;;  %v2499_v8 = vadd.f32 %v2495_v17, %v2438_v12  ;;  %v3068_v23 = vstv %s3708_s8  ;;  %s188_s8 = sand.u32 1, %s3990_s13  }
 0x30b   : > { %v2580_v3 = vpop.permute.xlu1 %2579  ;;  %v2578_v25 = vpop.permute.xlu0 %2577  ;;  %v3046_v27 = vmul.f32 %v6610_v43, %v3042_v13  ;;  %v3045_v2 = vmul.f32 %v6623_v46, %v3042_v13  ;;  %v2506_v21 = vmul.f32 %v3894_v54, %v2502_v47  ;;  %v2505_v62 = vmul.f32 %v3895_v15, %v2502_v47 }
 0x30c   : > { %v6663_v18 = vadd.f32 %v2580_v3, %v2500_v44  ;;  %v6665_v49 = vadd.f32 %v2578_v25, %v2499_v8  ;;  %v2508_v53 = vadd.f32 %v2504_v34, %v2463_v7  ;;  %v2507_v30 = vadd.f32 %v2503_v51, %v2462_v61 }
 0x30d   : > { %v3070_v4 = vmul.f32 %v6555_v31, %v3068_v23  ;;  %v3069_v9 = vmul.f32 %v6582_v5, %v3068_v23  ;;  %v2510_v54 = vadd.f32 %v2506_v21, %v6525_v39  ;;  %v2509_v15 = vadd.f32 %v2505_v62, %v6527_v28 }
 0x30e   : > { %3053 = vrot.lane.b32.xlu1 %v3044_v40, %s4002_s25  ;;  %3051 = vrot.lane.b32.xlu0 %v3043_v57, %s4002_s25  ;;  %v3072_v59 = vmul.f32 %v6610_v43, %v3068_v23  ;;  %v3071_v12 = vmul.f32 %v6623_v46, %v3068_v23  ;;  %v3094_v42 = vstv %s3709_s9  ;;  %v3120_v16 = vstv %s3710_s10  ;;  %s3533_s9 = sshll.u32 %s188_s8, 7 }
 0x30f   : > { %v2602_v17 = vpop.permute.xlu1 %2601  ;;  %v2600_v19 = vpop.permute.xlu0 %2599  ;;  %v3096_v50 = vmul.f32 %v6555_v31, %v3094_v42  ;;  %v3095_v1 = vmul.f32 %v6582_v5, %v3094_v42  ;;  %v3121_v57 = vmul.f32 %v6582_v5, %v3120_v16  ;;  %v3146_v44 = vstv %s3711_s11  ;;  %s7073_s10 = scalar_lea.vmem [#allocation7], %s3533_s9  ;;  %s3734_s11 = sshll.u32 %s4048_s16, 11 }
 0x310   : > { %v6671_v0 = vadd.f32 %v2602_v17, %v2508_v53  ;;  %v6673_v22 = vadd.f32 %v2600_v19, %v2507_v30  ;;  %v2724_v19 = vstv %s3686_s17  ;;  %s7141_s16 = scalar_lea.sflag [#allocation3], %s188_s8 }
 0x312   : > { %3057 = vrot.lane.b32.xlu1 %v3046_v27, %s4002_s25  ;;  %3055 = vrot.lane.b32.xlu0 %v3045_v2, %s4002_s25  ;;  %v3147_v27 = vmul.f32 %v6582_v5, %v3146_v44 }
 0x313   : > { %v2606_v47 = vpop.permute.xlu1 %2605  ;;  %v2604_v13 = vpop.permute.xlu0 %2603 }
 0x314   : > { %v6681_v60 = vadd.f32 %v2606_v47, %v2510_v54  ;;  %v6683_v29 = vadd.f32 %v2604_v13, %v2509_v15  ;;  %v7763_v54 = vld [vmem:[#allocation49_spill] sm:$0xff]  ;;  %v2725_v47 = vmul.f32 %v6092_v52, %v2724_v19 }
 0x315   : > { %v2726_v15 = vmul.f32 %v7763_v54, %v2724_v19  ;;  %v3898_v54 = vld [vmem:[%s4115_s24 + $0x91] sm:$0xff] }
 0x316   : > { %3079 = vrot.lane.b32.xlu1 %v3070_v4, %s4002_s25  ;;  %3077 = vrot.lane.b32.xlu0 %v3069_v9, %s4002_s25 }
 0x317   : > { %v2628_v58 = vpop.permute.xlu1 %2627  ;;  %v2626_v39 = vpop.permute.xlu0 %2625 }
 0x318   : > { %v6690_v28 = vadd.f32 %v2628_v58, %v6550_v36  ;;  %v6693_v24 = vadd.f32 %v2626_v39, %v6552_v35  ;;  %v3098_v36 = vmul.f32 %v6610_v43, %v3094_v42  ;;  %v3097_v35 = vmul.f32 %v6623_v46, %v3094_v42 }
 0x319   : > { %v2728_v58 = vmul.f32 %v6124_v6, %v2724_v19 }
 0x31a   : > { %3083 = vrot.lane.b32.xlu1 %v3072_v59, %s4002_s25  ;;  %3081 = vrot.lane.b32.xlu0 %v3071_v12, %s4002_s25  ;;  %v2730_v52 = vadd.f32 %v2726_v15, %v6690_v28  ;;  %v2729_v39 = vadd.f32 %v2725_v47, %v6693_v24  ;;  %v3899_v47 = vld [vmem:[%s4115_s24 + $0x89] sm:$0xff] }
 0x31b   : > { %v2632_v26 = vpop.permute.xlu1 %2631  ;;  %v2630_v63 = vpop.permute.xlu0 %2629 }
 0x31c   : > { %v6700_v34 = vadd.f32 %v2632_v26, %v6577_v10  ;;  %v6703_v41 = vadd.f32 %v2630_v63, %v6579_v48  ;;  %v3122_v48 = vmul.f32 %v6555_v31, %v3120_v16  ;;  %v2734_v26 = vstv %s3687_s20  ;;  %s7130_s20 = scalar_lea.hbm %s7184_s3, %s3734_s11 }
 0x31e   : > { %3105 = vrot.lane.b32.xlu1 %v3096_v50, %s4002_s25  ;;  %3103 = vrot.lane.b32.xlu0 %v3095_v1, %s4002_s25 }
 0x31f   : > { %v2654_v20 = vpop.permute.xlu1 %2653  ;;  %v2652_v45 = vpop.permute.xlu0 %2651 }
 0x320   : > { %v6710_v40 = vadd.f32 %v2654_v20, %v6605_v55  ;;  %v6713_v10 = vadd.f32 %v2652_v45, %v6607_v14  ;;  %v3124_v55 = vmul.f32 %v6610_v43, %v3120_v16  ;;  %v3123_v14 = vmul.f32 %v6623_v46, %v3120_v16  ;;  %v3896_v20 = vld [vmem:[%s4115_s24 + $0x81] sm:$0xff] }
 0x321   : > { %v2736_v45 = vmul.f32 %v3896_v20, %v2734_v26 }
 0x322   : > { %3109 = vrot.lane.b32.xlu1 %v3098_v36, %s4002_s25  ;;  %3107 = vrot.lane.b32.xlu0 %v3097_v35, %s4002_s25  ;;  %s3712_s25 = sld [smem:[#allocation2 + $0x123]]  ;;  %v2732_v35 = vadd.f32 %v2728_v58, %v6700_v34 }
 0x323   : > { %v2658_v37 = vpop.permute.xlu1 %2657  ;;  %v2656_v51 = vpop.permute.xlu0 %2655 }
 0x324   : > { %v6720_v7 = vadd.f32 %v2658_v37, %v6634_v38  ;;  %v6723_v61 = vadd.f32 %v2656_v51, %v6636_v11  ;;  %v3148_v11 = vmul.f32 %v6555_v31, %v3146_v44 }
 0x326   : > { %3131 = vrot.lane.b32.xlu1 %v3122_v48, %s4003_s30  ;;  %3129 = vrot.lane.b32.xlu0 %v3121_v57, %s4003_s30  ;;  %v3897_v48 = vld [vmem:[%s4115_s24 + $0x79] sm:$0xff]  ;;  %s3702_s24 = sld [smem:[#allocation2 + $0x21]] }
 0x327   : > { %v2680_v8 = vpop.permute.xlu1 %2679  ;;  %v2678_v3 = vpop.permute.xlu0 %2677  ;;  %v2735_v57 = vmul.f32 %v3897_v48, %v2734_v26 }
 0x328   : > { %v6730_v25 = vadd.f32 %v2680_v8, %v6652_v33  ;;  %v6733_v38 = vadd.f32 %v2678_v3, %v6654_v32  ;;  %v3150_v33 = vmul.f32 %v6610_v43, %v3146_v44  ;;  %v3149_v32 = vmul.f32 %v6623_v46, %v3146_v44 }
 0x329   : > { %v3172_v62 = vstv %s3712_s25  ;;  %v2739_v8 = vadd.f32 %v2735_v57, %v6713_v10  ;;  %v2738_v3 = vmul.f32 %v6124_v6, %v2734_v26  ;;  %s3441_s25 = sshll.u32 %s7073_s10, 4  ;;  %s7132_s25 = int_to_ptr.vmem [resolvable:$true] %s3441_s25 }
 0x32a   : > { %3135 = vrot.lane.b32.xlu1 %v3124_v55, %s4003_s30  ;;  %3133 = vrot.lane.b32.xlu0 %v3123_v14, %s4003_s30  ;;  %v3174_v4 = vmul.f32 %v6555_v31, %v3172_v62  ;;  %v3173_v9 = vmul.f32 %v6582_v5, %v3172_v62  ;;  %v3176_v12 = vmul.f32 %v6610_v43, %v3172_v62 }
 0x32b   : > { %v2684_v2 = vpop.permute.xlu1 %2683  ;;  %v2682_v21 = vpop.permute.xlu0 %2681  ;;  %v3175_v42 = vmul.f32 %v6623_v46, %v3172_v62 }
 0x32c   : > { %v6740_v53 = vadd.f32 %v2684_v2, %v6663_v18  ;;  %v6743_v30 = vadd.f32 %v2682_v21, %v6665_v49  ;;  %v2744_v21 = vstv %s3688_s26  ;;  %s3930_s26 = scalar_lea.vmem %s7132_s25, 2048 }
 0x32d   : > { %v2746_v10 = vmul.f32 %v3896_v20, %v2744_v21  ;;  %v2748_v15 = vmul.f32 %v3898_v54, %v2744_v21  ;;  %p3931_p10 = scmp.ne.s32.totalorder %s7132_s25, %s3930_s26 }
 0x32e   : > { %3157 = vrot.lane.b32.xlu1 %v3148_v11, %s4003_s30  ;;  %3155 = vrot.lane.b32.xlu0 %v3147_v27, %s4003_s30  ;;  %v2737_v11 = vmul.f32 %v6127_v56, %v2734_v26 }
 0x32f   : > { %v2706_v23 = vpop.permute.xlu1 %2705  ;;  %v2704_v17 = vpop.permute.xlu0 %2703  ;;  %v2752_v58 = vadd.f32 %v2748_v15, %v6740_v53  ;;  %p3932_p0 = pnand %p3931_p10, %p7778_p12 }
 0x330   : > { %v6750_v18 = vadd.f32 %v2706_v23, %v6671_v0  ;;  %v6753_v49 = vadd.f32 %v2704_v17, %v6673_v22  ;;  %v2741_v6 = vadd.f32 %v2737_v11, %v6723_v61 }
 0x331   : > { %p3933_p7 = pneg %p3932_p0 }
 0x332   : > { %3161 = vrot.lane.b32.xlu1 %v3150_v33, %s4003_s30  ;;  %3159 = vrot.lane.b32.xlu0 %v3149_v32, %s4003_s30 }
 0x333   : > { %v2710_v13 = vpop.permute.xlu1 %2709  ;;  %v2708_v59 = vpop.permute.xlu0 %2707 }
 0x334   : > { %v6762_v0 = vadd.f32 %v2710_v13, %v6681_v60  ;;  %v6765_v22 = vadd.f32 %v2708_v59, %v6683_v29  ;;  %v2727_v60 = vmul.f32 %v6127_v56, %v2724_v19  ;;  %v3198_v29 = vstv %s3713_s19 }
 0x335   : > { %v3200_v28 = vmul.f32 %v6555_v31, %v3198_v29  ;;  %v3199_v24 = vmul.f32 %v6582_v5, %v3198_v29  ;;  %v3202_v44 = vmul.f32 %v6610_v43, %v3198_v29  ;;  %v3201_v34 = vmul.f32 %v6623_v46, %v3198_v29 }
 0x336   : > { %3183 = vrot.lane.b32.xlu1 %v3174_v4, %s4003_s30  ;;  %3181 = vrot.lane.b32.xlu0 %v3173_v9, %s4003_s30  ;;  %v2731_v16 = vadd.f32 %v2727_v60, %v6703_v41  ;;  %v2740_v41 = vadd.f32 %v2736_v45, %v6710_v40  ;;  %v2742_v40 = vadd.f32 %v2738_v3, %v6720_v7 }
 0x337   : > { %v2776_v50 = vpop.permute.xlu1 %2775  ;;  %v2774_v1 = vpop.permute.xlu0 %2773  ;;  %v2745_v56 = vmul.f32 %v3897_v48, %v2744_v21  ;;  %v2750_v4 = vadd.f32 %v2746_v10, %v6730_v25  ;;  %v2747_v13 = vmul.f32 %v3899_v47, %v2744_v21 }
 0x338   : > { %v6775_v63 = vadd.f32 %v2776_v50, %v2730_v52  ;;  %v6777_v36 = vadd.f32 %v2774_v1, %v2729_v39 }
 0x339   : > { %v2749_v9 = vadd.f32 %v2745_v56, %v6733_v38  ;;  %v2751_v52 = vadd.f32 %v2747_v13, %v6743_v30 }
 0x33a   : > { %3187 = vrot.lane.b32.xlu1 %v3176_v12, %s4003_s30  ;;  %3185 = vrot.lane.b32.xlu0 %v3175_v42, %s4003_s30  ;;  %v2754_v12 = vstv %s3689_s27  ;;  %s4004_s27 = smov [#allocation7]  }
 0x33b   : > { %v2780_v37 = vpop.permute.xlu1 %2779  ;;  %v2756_v39 = vmul.f32 %v3896_v20, %v2754_v12  ;;  %v2755_v60 = vmul.f32 %v3897_v48, %v2754_v12 }
 0x33c   : > { %v2778_v51 = vpop.permute.xlu0 %2777  ;;  %v6787_v55 = vadd.f32 %v2780_v37, %v2732_v35 }
 0x33d   : > { %v6789_v14 = vadd.f32 %v2778_v51, %v2731_v16  ;;  %v2760_v1 = vadd.f32 %v2756_v39, %v6750_v18  ;;  %v2759_v26 = vadd.f32 %v2755_v60, %v6753_v49 }
 0x33e   : > { %3209 = vrot.lane.b32.xlu1 %v3200_v28, %s4003_s30  ;;  %3207 = vrot.lane.b32.xlu0 %v3199_v24, %s4003_s30  ;;  %v2758_v28 = vmul.f32 %v3898_v54, %v2754_v12  ;;  %v2757_v24 = vmul.f32 %v3899_v47, %v2754_v12 }
 0x33f   : > { %v2802_v27 = vpop.permute.xlu1 %2801 }
 0x340   : > { %v2800_v2 = vpop.permute.xlu0 %2799  ;;  %v6799_v33 = vadd.f32 %v2802_v27, %v2740_v41  ;;  %v2762_v30 = vadd.f32 %v2758_v28, %v6762_v0  ;;  %v2761_v20 = vadd.f32 %v2757_v24, %v6765_v22  ;;  %v2996_v28 = vstv %s3704_s28 }
 0x341   : > { %v6801_v32 = vadd.f32 %v2800_v2, %v2739_v8 }
 0x342   : > { %3213 = vrot.lane.b32.xlu1 %v3202_v44, %s4003_s30  ;;  %3211 = vrot.lane.b32.xlu0 %v3201_v34, %s4003_s30  ;;  %s3703_s30 = sld [smem:[#allocation2 + $0xa1]] }
 0x344   : > { %v2806_v62 = vpop.permute.xlu1 %2805  ;;  %v2804_v23 = vpop.permute.xlu0 %2803 }
 0x345   : > { %v6807_v17 = vadd.f32 %v2806_v62, %v2742_v40  ;;  %v6809_v19 = vadd.f32 %v2804_v23, %v2741_v6 }
 0x348   : > { %v2828_v59 = vpop.permute.xlu1 %2827  ;;  %v2826_v7 = vpop.permute.xlu0 %2825  ;;  %v2986_v39 = vstv %s3703_s30 }
 0x349   : > { %v6815_v61 = vadd.f32 %v2828_v59, %v2750_v4  ;;  %v6817_v42 = vadd.f32 %v2826_v7, %v2749_v9 }
 0x34c   : > { %v2832_v25 = vpop.permute.xlu1 %2831  ;;  %v2830_v29 = vpop.permute.xlu0 %2829 }
 0x34d   : > { %v6821_v38 = vadd.f32 %v2832_v25, %v2752_v58  ;;  %v6823_v50 = vadd.f32 %v2830_v29, %v2751_v52  ;;  %v2976_v58 = vstv %s3702_s24  ;;  %s3934_s24 = sshll.u32 %s4004_s27, 4  ;;  %s3935_s24 = int_to_ptr.vmem [resolvable:$false] %s3934_s24 }
 0x34e   : > { %v2978_v52 = vmul.f32 %v6555_v31, %v2976_v58  ;;  %v2980_v24 = vmul.f32 %v6610_v43, %v2976_v58  ;;  %s3936_s30 = scalar_lea.vmem %s3935_s24, 4096  ;;  %p3937_p8 = scmp.lt.s32.totalorder %s7132_s25, %s3935_s24 }
 0x34f   : > { %p3938_p11 = scmp.lt.s32.totalorder %s3936_s30, %s3930_s26 }
 0x350   : > { %v2854_v35 = vpop.permute.xlu1 %2853  ;;  %v2852_v16 = vpop.permute.xlu0 %2851 }
 0x351   : > { %v6827_v45 = vadd.f32 %v2854_v35, %v2760_v1  ;;  %v6829_v53 = vadd.f32 %v2852_v16, %v2759_v26  ;;  %v2977_v26 = vmul.f32 %v6582_v5, %v2976_v58  ;;  %v2979_v35 = vmul.f32 %v6623_v46, %v2976_v58  ;;  %p3939_p13 = por %p3938_p11, %p3937_p8 }
 0x352   : > { %v2988_v16 = vmul.f32 %v6555_v31, %v2986_v39 }
 0x353   : > { %p3940_p1 = pnand %p3939_p13, %p3933_p7 }
 0x354   : > { %v2858_v48 = vpop.permute.xlu1 %2857  ;;  %v2856_v57 = vpop.permute.xlu0 %2855 }
 0x355   : > { %v6833_v37 = vadd.f32 %v2858_v48, %v2762_v30  ;;  %v6835_v51 = vadd.f32 %v2856_v57, %v2761_v20  ;;  %v2987_v30 = vmul.f32 %v6582_v5, %v2986_v39  ;;  %v3006_v20 = vstv %s3705_s29 }
 0x356   : > { %v2998_v48 = vmul.f32 %v6555_v31, %v2996_v28  ;;  %v2997_v57 = vmul.f32 %v6582_v5, %v2996_v28 }
 0x358   : > { %v2880_v18 = vpop.permute.xlu1 %2879  ;;  %v2878_v49 = vpop.permute.xlu0 %2877 }
 0x359   : > { %v2890_v29 = vadd.f32 %v2880_v18, %v6775_v63  ;;  %v2889_v1 = vadd.f32 %v2878_v49, %v6777_v36  ;;  %v2990_v63 = vmul.f32 %v6610_v43, %v2986_v39  ;;  %v2989_v36 = vmul.f32 %v6623_v46, %v2986_v39 }
 0x35b   : > { %v2982_v58 = vadd.f32 %v2978_v52, %v2890_v29 }
 0x35c   : > { %v2884_v44 = vpop.permute.xlu1 %2883  ;;  %v2882_v34 = vpop.permute.xlu0 %2881 }
 0x35d   : > { %v2891_v39 = vadd.f32 %v2882_v34, %v6789_v14 }
 0x360   : > { %v2906_v41 = vpop.permute.xlu1 %2905  ;;  %v6837_v8 = vpop.permute.xlu0 %2903 }
 0x364   : > { %v6839_v3 = vpop.permute.xlu1 %2909  ;;  %v6841_v11 = vpop.permute.xlu0 %2907 }
 0x365   : > { %v2917_v34 = vadd.f32 %v6841_v11, %v6809_v19 }
 0x368   : > { %v6843_v0 = vpop.permute.xlu1 %2931  ;;  %v6845_v22 = vpop.permute.xlu0 %2929 }
 0x36c   : > { %v6847_v27 = vpop.permute.xlu1 %2935  ;;  %v6849_v2 = vpop.permute.xlu0 %2933 }
 0x370   : > { %v6851_v21 = vpop.permute.xlu1 %2957  ;;  %v6853_v40 = vpop.permute.xlu0 %2955 }
 0x374   : > { %v6855_v6 = vpop.permute.xlu1 %2961  ;;  %v6857_v10 = vpop.permute.xlu0 %2959 }
 0x375   : > { %7764 = vst [vmem:[#allocation79_spill] sm:$0xff] %v6857_v10  ;;  %v6914_v10 = vmul.f32 %v6555_v31, %v3006_v20  ;;  %v3224_v31 = vstv %s6879_s4 }
 0x378   : > { %v3028_v56 = vpop.permute.xlu1 %3027  ;;  %v3026_v62 = vpop.permute.xlu0 %3025 }
 0x379   : > { %v3038_v52 = vadd.f32 %v3028_v56, %v2982_v58  ;;  %v6939_v56 = vstv %s6892_s6 }
 0x37c   : > { %v6859_v23 = vpop.permute.xlu1 %3031  ;;  %v6861_v4 = vpop.permute.xlu0 %3029 }
 0x380   : > { %v6863_v9 = vpop.permute.xlu1 %3053  ;;  %v6865_v54 = vpop.permute.xlu0 %3051 }
 0x384   : > { %v6867_v15 = vpop.permute.xlu1 %3057  ;;  %v6869_v47 = vpop.permute.xlu0 %3055 }
 0x388   : > { %v6871_v13 = vpop.permute.xlu1 %3079  ;;  %v6873_v59 = vpop.permute.xlu0 %3077 }
 0x38c   : > { %v6875_v7 = vpop.permute.xlu1 %3083  ;;  %v6877_v12 = vpop.permute.xlu0 %3081 }
 0x38d   : > { %7765 = vst [vmem:[#allocation80_spill] sm:$0xff] %v6875_v7  ;;  %7766 = vst [vmem:[#allocation81_spill] sm:$0xff] %v6877_v12  ;;  %v6909_v12 = vmul.f32 %v6623_v46, %v2996_v28  ;;  %v2892_v7 = vadd.f32 %v2884_v44, %v6787_v55  ;;  %v6926_v55 = vmul.f32 %v6623_v46, %v3006_v20 }
 0x38e   : > { %v2983_v46 = vadd.f32 %v2979_v35, %v2891_v39 }
 0x390   : > { %v6882_v60 = vpop.permute.xlu1 %3105  ;;  %v6884_v25 = vpop.permute.xlu0 %3103 }
 0x391   : > { %7767 = vst [vmem:[#allocation82_spill] sm:$0xff] %v6882_v60  ;;  %7768 = vst [vmem:[#allocation83_spill] sm:$0xff] %v6884_v25  ;;  %v2981_v25 = vadd.f32 %v2977_v26, %v2889_v1  ;;  %v3000_v60 = vmul.f32 %v6610_v43, %v2996_v28  ;;  %v6921_v1 = vmul.f32 %v6610_v43, %v3006_v20 }
 0x392   : > { %v2915_v26 = vadd.f32 %v6837_v8, %v6801_v32  ;;  %v2942_v32 = vadd.f32 %v6843_v0, %v6815_v61  ;;  %v2984_v8 = vadd.f32 %v2980_v24, %v2892_v7  ;;  %v2993_v24 = vadd.f32 %v2989_v36, %v2917_v34 }
 0x393   : > { %v3037_v29 = vadd.f32 %v3026_v62, %v2981_v25 }
 0x394   : > { %v6903_v18 = vpop.permute.xlu1 %3109  ;;  %v6905_v49 = vpop.permute.xlu0 %3107  ;;  %v3040_v19 = vadd.f32 %v6859_v23, %v2984_v8  ;;  %v2991_v11 = vadd.f32 %v2987_v30, %v2915_v26  ;;  %v3002_v58 = vadd.f32 %v2998_v48, %v2942_v32  ;;  %v2943_v30 = vadd.f32 %v6849_v2, %v6823_v50 }
 0x395   : > { %7769 = vst [vmem:[#allocation84_spill] sm:$0xff] %v6903_v18  ;;  %7770 = vst [vmem:[#allocation85_spill] sm:$0xff] %v6905_v49  ;;  %v6917_v18 = vmul.f32 %v6582_v5, %v3006_v20  ;;  %v2916_v49 = vadd.f32 %v2906_v41, %v6799_v33  ;;  %v6930_v5 = vstv %s6886_s5  ;;  %v2918_v33 = vadd.f32 %v6839_v3, %v6807_v17 }
 0x396   : > { %v6946_v20 = vstv %s6897_s7  ;;  %v2941_v17 = vadd.f32 %v6845_v22, %v6817_v42  ;;  %v3039_v3 = vadd.f32 %v6861_v4, %v2983_v46  ;;  %v3063_v22 = vadd.f32 %v6865_v54, %v2991_v11 }
 0x397   : > { %v2992_v62 = vadd.f32 %v2988_v16, %v2916_v49  ;;  %v2994_v7 = vadd.f32 %v2990_v63, %v2918_v33  ;;  %v2944_v49 = vadd.f32 %v6847_v27, %v6821_v38  ;;  %v3003_v32 = vadd.f32 %v6909_v12, %v2943_v30 }
 0x398   : > { %v3132_v14 = vpop.permute.xlu1 %3131  ;;  %v3130_v44 = vpop.permute.xlu0 %3129  ;;  %v3001_v63 = vadd.f32 %v2997_v57, %v2941_v17 }
 0x399   : > { %v3142_v43 = vadd.f32 %v3132_v14, %v3038_v52  ;;  %v3141_v41 = vadd.f32 %v3130_v44, %v3037_v29  ;;  %v3064_v42 = vadd.f32 %v6863_v9, %v2992_v62  ;;  %v2968_v9 = vadd.f32 %v6851_v21, %v6827_v45 }
 0x39a   : > { %v3004_v54 = vadd.f32 %v3000_v60, %v2944_v49  ;;  %v3066_v50 = vadd.f32 %v6867_v15, %v2994_v7  ;;  %v2967_v60 = vadd.f32 %v6853_v40, %v6829_v53 }
 0x39b   : > { %v6941_v25 = vadd.f32 %v3224_v31, %v3142_v43  ;;  %v6943_v28 = vadd.f32 %v3224_v31, %v3141_v41 }
 0x39c   : > { %v3136_v61 = vpop.permute.xlu1 %3135  ;;  %v3134_v0 = vpop.permute.xlu0 %3133 }
 0x39d   : > { %v3230_v35 = vand.u32 2147483647, %v6941_v25  ;;  %v3229_v16 = vand.u32 2147483647, %v6943_v28  ;;  %v3144_v39 = vadd.f32 %v3136_v61, %v3040_v19  ;;  %v3143_v52 = vadd.f32 %v3134_v0, %v3039_v3 }
 0x39e   : > { %v3012_v3 = vadd.f32 %v6914_v10, %v2968_v9  ;;  %v3089_v0 = vadd.f32 %v6873_v59, %v3001_v63  ;;  %v2970_v10 = vadd.f32 %v6855_v6, %v6833_v37  ;;  %vm3246_vm1 = vcmp.ge.f32.partialorder %v6941_v25, 0.0 }
 0x39f   : > { %v3234_v23 = vsub.f32 0.0, %v3230_v35  ;;  %v3233_v4 = vsub.f32 0.0, %v3229_v16  ;;  %v6960_v36 = vadd.f32 %v3224_v31, %v3144_v39  ;;  %v6962_v29 = vadd.f32 %v3224_v31, %v3143_v52  ;;  %v7772_v39 = vld [vmem:[#allocation80_spill] sm:$0xff] }
 0x3a0   : > { %v3158_v26 = vpop.permute.xlu1 %3157  ;;  %v3156_v14 = vpop.permute.xlu0 %3155  ;;  %v3065_v31 = vadd.f32 %v6869_v47, %v2993_v24  ;;  %v3090_v47 = vadd.f32 %v6871_v13, %v3002_v58  ;;  %v7771_v13 = vld [vmem:[#allocation79_spill] sm:$0xff]  ;;  %v3092_v52 = vadd.f32 %v7772_v39, %v3004_v54  ;;  %vm3245_vm2 = vcmp.ge.f32.partialorder %v6943_v28, 0.0 }
 0x3a1   : > { %v3239_v38 = vmul.f32 1.442695, %v3234_v23  ;;  %v3237_v27 = vmul.f32 1.442695, %v3233_v4  ;;  %v3168_v48 = vadd.f32 %v3158_v26, %v3064_v42  ;;  %v3167_v44 = vadd.f32 %v3156_v14, %v3063_v22  ;;  %v7773_v22 = vld [vmem:[#allocation81_spill] sm:$0xff] }
 0x3a2   : > { %v3232_v33 = vand.u32 2147483647, %v6960_v36  ;;  %v3231_v34 = vand.u32 2147483647, %v6962_v29  ;;  %v2969_v49 = vadd.f32 %v7771_v13, %v6835_v51  ;;  %v3091_v23 = vadd.f32 %v7773_v22, %v3003_v32 }
 0x3a3   : > { %3800 = vpow2.f32 %v3239_v38  ;;  %v6970_v2 = vadd.f32 %v6930_v5, %v3168_v48  ;;  %v6973_v57 = vadd.f32 %v6930_v5, %v3167_v44  ;;  %v3011_v51 = vadd.f32 %v6917_v18, %v2967_v60 }
 0x3a4   : > { %3802 = vpow2.f32 %v3237_v27  ;;  %v3236_v43 = vsub.f32 0.0, %v3232_v33  ;;  %v3235_v41 = vsub.f32 0.0, %v3231_v34  ;;  %v3162_v45 = vpop.permute.xlu1 %3161  ;;  %v3160_v21 = vpop.permute.xlu0 %3159  ;;  %v3014_v38 = vadd.f32 %v6921_v1, %v2970_v10 }
 0x3a5   : > { %v3281_v15 = vand.u32 2147483647, %v6970_v2  ;;  %v3280_v8 = vand.u32 2147483647, %v6973_v57  ;;  %v3170_v17 = vadd.f32 %v3162_v45, %v3066_v50  ;;  %v3169_v19 = vadd.f32 %v3160_v21, %v3065_v31  ;;  %v7774_v50 = vld [vmem:[#allocation82_spill] sm:$0xff] }
 0x3a6   : > { %v3243_v46 = vmul.f32 1.442695, %v3236_v43  ;;  %v3241_v62 = vmul.f32 1.442695, %v3235_v41  ;;  %v3013_v9 = vadd.f32 %v6926_v55, %v2969_v49  ;;  %v3116_v31 = vadd.f32 %v7774_v50, %v3012_v3  ;;  %v7775_v43 = vld [vmem:[#allocation83_spill] sm:$0xff] }
 0x3a7   : > { %v3285_v11 = vsub.f32 0.0, %v3281_v15  ;;  %v3284_v61 = vsub.f32 0.0, %v3280_v8  ;;  %v6985_v53 = vadd.f32 %v6930_v5, %v3170_v17  ;;  %v6988_v40 = vadd.f32 %v6930_v5, %v3169_v19  ;;  %v7776_v8 = vld [vmem:[#allocation84_spill] sm:$0xff] }
 0x3a8   : > { %3804 = vpow2.f32 %v3243_v46  ;;  %v3184_v12 = vpop.permute.xlu1 %3183  ;;  %v3182_v7 = vpop.permute.xlu0 %3181  ;;  %v3115_v41 = vadd.f32 %v7775_v43, %v3011_v51  ;;  %v3118_v46 = vadd.f32 %v7776_v8, %v3014_v38  ;;  %vm3248_vm3 = vcmp.ge.f32.partialorder %v6960_v36, 0.0 }
 0x3a9   : > { %3806 = vpow2.f32 %v3241_v62  ;;  %v3290_v24 = vmul.f32 1.442695, %v3285_v11  ;;  %v3288_v35 = vmul.f32 1.442695, %v3284_v61  ;;  %v3194_v16 = vadd.f32 %v3184_v12, %v3090_v47  ;;  %v7777_v47 = vld [vmem:[#allocation85_spill] sm:$0xff] }
 0x3aa   : > { %v3283_v59 = vand.u32 2147483647, %v6985_v53  ;;  %v3282_v58 = vand.u32 2147483647, %v6988_v40  ;;  %v3193_v42 = vadd.f32 %v3182_v7, %v3089_v0  ;;  %vm3247_vm4 = vcmp.ge.f32.partialorder %v6962_v29, 0.0 }
 0x3ab   : > { %3808 = vpow2.f32 %v3290_v24  ;;  %v6998_v5 = vadd.f32 %v6939_v56, %v3194_v16  ;;  %vm3297_vm5 = vcmp.ge.f32.partialorder %v6970_v2, 0.0  ;;  %vm3296_vm6 = vcmp.ge.f32.partialorder %v6973_v57, 0.0 }
 0x3ac   : > { %3810 = vpow2.f32 %v3288_v35  ;;  %v3287_v4 = vsub.f32 0.0, %v3283_v59  ;;  %v3286_v30 = vsub.f32 0.0, %v3282_v58  ;;  %v3188_v37 = vpop.permute.xlu1 %3187  ;;  %v3186_v6 = vpop.permute.xlu0 %3185  ;;  %v7004_v26 = vadd.f32 %v6939_v56, %v3193_v42 }
 0x3ad   : > { %v3332_v63 = vand.u32 2147483647, %v6998_v5  ;;  %v3196_v14 = vadd.f32 %v3188_v37, %v3092_v52  ;;  %v3195_v44 = vadd.f32 %v3186_v6, %v3091_v23  ;;  %vm3299_vm7 = vcmp.ge.f32.partialorder %v6985_v53, 0.0 }
 0x3ae   : > { %v3294_v27 = vmul.f32 1.442695, %v3287_v4  ;;  %v3292_v48 = vmul.f32 1.442695, %v3286_v30  ;;  %v3331_v33 = vand.u32 2147483647, %v7004_v26 }
 0x3af   : > { %v3336_v54 = vsub.f32 0.0, %v3332_v63  ;;  %v7010_v34 = vadd.f32 %v6939_v56, %v3196_v14  ;;  %v7017_v1 = vadd.f32 %v6939_v56, %v3195_v44  ;;  %v3117_v56 = vadd.f32 %v7777_v47, %v3013_v9 }
 0x3b0   : > { %v7012_v18 = vpop.eup %3800  ;;  %3812 = vpow2.f32 %v3294_v27  ;;  %v3210_v45 = vpop.permute.xlu1 %3209  ;;  %v3335_v15 = vsub.f32 0.0, %v3331_v33  ;;  %vm3298_vm8 = vcmp.ge.f32.partialorder %v6988_v40, 0.0  ;;  %vm3348_vm9 = vcmp.ge.f32.partialorder %v6998_v5, 0.0 }
 0x3b1   : > { %v3208_v21 = vpop.permute.xlu0 %3207  ;;  %v7019_v60 = vpop.eup %3802  ;;  %v3250_v55 = vadd.f32 1.0, %v7012_v18  ;;  %3814 = vpow2.f32 %v3292_v48  ;;  %v3341_v32 = vmul.f32 1.442695, %v3336_v54  ;;  %v3334_v17 = vand.u32 2147483647, %v7010_v34 }
 0x3b2   : > { %v3249_v62 = vadd.f32 1.0, %v7019_v60  ;;  %v3333_v19 = vand.u32 2147483647, %v7017_v1  ;;  %v3339_v3 = vmul.f32 1.442695, %v3335_v15  ;;  %v3220_v11 = vadd.f32 %v3210_v45, %v3116_v31 }
 0x3b3   : > { %3816 = vrcp.f32 %v3250_v55  ;;  %v3338_v61 = vsub.f32 0.0, %v3334_v17  ;;  %v3219_v12 = vadd.f32 %v3208_v21, %v3115_v41  ;;  %vm3347_vm10 = vcmp.ge.f32.partialorder %v7004_v26, 0.0 }
 0x3b4   : > { %3818 = vrcp.f32 %v3249_v62  ;;  %v3337_v0 = vsub.f32 0.0, %v3333_v19  ;;  %v3214_v7 = vpop.permute.xlu1 %3213  ;;  %v7030_v16 = vadd.f32 %v6946_v20, %v3220_v11  ;;  %vm3350_vm11 = vcmp.ge.f32.partialorder %v7010_v34, 0.0 }
 0x3b5   : > { %v3212_v24 = vpop.permute.xlu0 %3211  ;;  %v7027_v35 = vpop.eup %3804  ;;  %3820 = vpow2.f32 %v3341_v32  ;;  %v3222_v10 = vadd.f32 %v3214_v7, %v3118_v46  ;;  %v3345_v58 = vmul.f32 1.442695, %v3338_v61  ;;  %v7038_v42 = vadd.f32 %v6946_v20, %v3219_v12 }
 0x3b6   : > { %v3221_v13 = vadd.f32 %v3212_v24, %v3117_v56  ;;  %v7032_v49 = vpop.eup %3806  ;;  %v3252_v59 = vadd.f32 1.0, %v7027_v35  ;;  %3822 = vpow2.f32 %v3339_v3  ;;  %v3383_v52 = vand.u32 2147483647, %v7030_v16 }
 0x3b7   : > { %v3251_v39 = vadd.f32 1.0, %v7032_v49  ;;  %v3343_v23 = vmul.f32 1.442695, %v3337_v0  ;;  %v7043_v4 = vadd.f32 %v6946_v20, %v3222_v10  ;;  %v3382_v63 = vand.u32 2147483647, %v7038_v42 }
 0x3b8   : > { %v7040_v22 = vpop.eup %3808  ;;  %3824 = vrcp.f32 %v3252_v59  ;;  %v7046_v30 = vadd.f32 %v6946_v20, %v3221_v13  ;;  %v3387_v51 = vsub.f32 0.0, %v3383_v52  ;;  %vm3349_vm12 = vcmp.ge.f32.partialorder %v7017_v1, 0.0 }
 0x3b9   : > { %v7048_v37 = vpop.eup %3810  ;;  %3826 = vrcp.f32 %v3251_v39  ;;  %v3301_v6 = vadd.f32 1.0, %v7040_v22  ;;  %v3385_v38 = vand.u32 2147483647, %v7043_v4  ;;  %v3386_v48 = vsub.f32 0.0, %v3382_v63 }
 0x3ba   : > { %v3300_v14 = vadd.f32 1.0, %v7048_v37  ;;  %3828 = vpow2.f32 %v3345_v58  ;;  %v3392_v27 = vmul.f32 1.442695, %v3387_v51  ;;  %v3384_v44 = vand.u32 2147483647, %v7046_v30 }
 0x3bb   : > { %3830 = vrcp.f32 %v3301_v6  ;;  %v3389_v20 = vsub.f32 0.0, %v3385_v38  ;;  %v3390_v54 = vmul.f32 1.442695, %v3386_v48  ;;  %vm3399_vm13 = vcmp.ge.f32.partialorder %v7030_v16, 0.0 }
 0x3bc   : > { %3832 = vrcp.f32 %v3300_v14  ;;  %v3388_v43 = vsub.f32 0.0, %v3384_v44  ;;  %vm3398_vm14 = vcmp.ge.f32.partialorder %v7038_v42, 0.0  ;;  %vm3401_vm15 = vcmp.ge.f32.partialorder %v7043_v4, 0.0 }
 0x3bd   : > { %v7056_v9 = vpop.eup %3812  ;;  %3834 = vpow2.f32 %v3343_v23  ;;  %v3396_v31 = vmul.f32 1.442695, %v3389_v20 }
 0x3be   : > { %v7058_v33 = vpop.eup %3814  ;;  %v3303_v50 = vadd.f32 1.0, %v7056_v9  ;;  %3836 = vpow2.f32 %v3392_v27  ;;  %v3394_v21 = vmul.f32 1.442695, %v3388_v43 }
 0x3bf   : > { %v3302_v41 = vadd.f32 1.0, %v7058_v33  ;;  %3838 = vpow2.f32 %v3390_v54 }
 0x3c0   : > { %v3817_v45 = vpop.eup %3816  ;;  %3840 = vrcp.f32 %v3303_v50 }
 0x3c1   : > { %v3819_v55 = vpop.eup %3818  ;;  %v3262_v32 = vmul.f32 %v3817_v45, %v7012_v18  ;;  %3842 = vrcp.f32 %v3302_v41 }
 0x3c2   : > { %v7065_v15 = vpop.eup %3820  ;;  %v3261_v8 = vmul.f32 %v3819_v55, %v7019_v60  ;;  %3844 = vpow2.f32 %v3396_v31 }
 0x3c3   : > { %v7069_v46 = vpop.eup %3822  ;;  %v3266_v62 = vsel %vm3246_vm1, %v3817_v45, %v3262_v32  ;;  %v3352_v17 = vadd.f32 1.0, %v7065_v15  ;;  %3846 = vpow2.f32 %v3394_v21  ;;  %vm3400_vm1 = vcmp.ge.f32.partialorder %v7046_v30, 0.0 }
 0x3c4   : > { %3271 = vst.msk [vmem:[%s7073_s10 + $0x8] sm:$0xff] %vm3269_vm0, %v3266_v62  ;;  %v3265_v18 = vsel %vm3245_vm2, %v3819_v55, %v3261_v8  ;;  %v3351_v25 = vadd.f32 1.0, %v7069_v46 }
 0x3c5   : > { %v3825_v60 = vpop.eup %3824  ;;  %3270 = vst.msk [vmem:[%s7073_s10] sm:$0xff] %vm3269_vm0, %v3265_v18  ;;  %3848 = vrcp.f32 %v3352_v17 }
 0x3c6   : > { %v3827_v19 = vpop.eup %3826  ;;  %v3264_v28 = vmul.f32 %v3825_v60, %v7027_v35  ;;  %3850 = vrcp.f32 %v3351_v25 }
 0x3c7   : > { %v3829_v47 = vpop.eup %3828  ;;  %v3263_v56 = vmul.f32 %v3827_v19, %v7032_v49 }
 0x3c8   : > { %v3831_v3 = vpop.eup %3830  ;;  %v3268_v11 = vsel %vm3248_vm3, %v3825_v60, %v3264_v28  ;;  %v3354_v61 = vadd.f32 1.0, %v3829_v47 }
 0x3c9   : > { %v3833_v0 = vpop.eup %3832  ;;  %3273 = vst.msk [vmem:[%s7073_s10 + $0x18] sm:$0xff] %vm3269_vm0, %v3268_v11  ;;  %v3267_v12 = vsel %vm3247_vm4, %v3827_v19, %v3263_v56  ;;  %v3313_v7 = vmul.f32 %v3831_v3, %v7040_v22 }
 0x3ca   : > { %v3835_v24 = vpop.eup %3834  ;;  %3272 = vst.msk [vmem:[%s7073_s10 + $0x10] sm:$0xff] %vm3269_vm0, %v3267_v12  ;;  %v3312_v36 = vmul.f32 %v3833_v0, %v7048_v37  ;;  %3852 = vrcp.f32 %v3354_v61 }
 0x3cb   : > { %v3837_v35 = vpop.eup %3836  ;;  %v3317_v10 = vsel %vm3297_vm5, %v3831_v3, %v3313_v7  ;;  %v3353_v29 = vadd.f32 1.0, %v3835_v24 }
 0x3cc   : > { %v3839_v13 = vpop.eup %3838  ;;  %3716 = vst.msk [vmem:[%s7073_s10 + $0x28] sm:$0xff] %vm3269_vm0, %v3317_v10  ;;  %v3316_v49 = vsel %vm3296_vm6, %v3833_v0, %v3312_v36  ;;  %v3403_v59 = vadd.f32 1.0, %v3837_v35 }
 0x3cd   : > { %v3841_v58 = vpop.eup %3840  ;;  %3715 = vst.msk [vmem:[%s7073_s10 + $0x20] sm:$0xff] %vm3269_vm0, %v3316_v49  ;;  %3854 = vrcp.f32 %v3353_v29  ;;  %v3402_v39 = vadd.f32 1.0, %v3839_v13 }
 0x3ce   : > { %v3843_v2 = vpop.eup %3842  ;;  %v3315_v52 = vmul.f32 %v3841_v58, %v7056_v9  ;;  %3856 = vrcp.f32 %v3403_v59 }
 0x3cf   : > { %v3845_v22 = vpop.eup %3844  ;;  %v3314_v57 = vmul.f32 %v3843_v2, %v7058_v33  ;;  %3858 = vrcp.f32 %v3402_v39 }
 0x3d0   : > { %v3847_v23 = vpop.eup %3846  ;;  %v3319_v37 = vsel %vm3299_vm7, %v3841_v58, %v3315_v52  ;;  %v3405_v6 = vadd.f32 1.0, %v3845_v22 }
 0x3d1   : > { %3718 = vst.msk [vmem:[%s7073_s10 + $0x38] sm:$0xff] %vm3269_vm0, %v3319_v37  ;;  %v3318_v51 = vsel %vm3298_vm8, %v3843_v2, %v3314_v57  ;;  %v3404_v63 = vadd.f32 1.0, %v3847_v23 }
 0x3d2   : > { %v3849_v14 = vpop.eup %3848  ;;  %3717 = vst.msk [vmem:[%s7073_s10 + $0x30] sm:$0xff] %vm3269_vm0, %v3318_v51  ;;  %3860 = vrcp.f32 %v3405_v6 }
 0x3d3   : > { %v3851_v38 = vpop.eup %3850  ;;  %v3364_v53 = vmul.f32 %v3849_v14, %v7065_v15  ;;  %3862 = vrcp.f32 %v3404_v63 }
 0x3d4   : > { %v3363_v27 = vmul.f32 %v3851_v38, %v7069_v46 }
 0x3d5   : > { %v3368_v40 = vsel %vm3348_vm9, %v3849_v14, %v3364_v53 }
 0x3d6   : > { %3721 = vst.msk [vmem:[%s7073_s10 + $0x48] sm:$0xff] %vm3269_vm0, %v3368_v40  ;;  %v3367_v48 = vsel %vm3347_vm10, %v3851_v38, %v3363_v27 }
 0x3d7   : > { %v3853_v20 = vpop.eup %3852  ;;  %3720 = vst.msk [vmem:[%s7073_s10 + $0x40] sm:$0xff] %vm3269_vm0, %v3367_v48 }
 0x3d8   : > { %v3366_v44 = vmul.f32 %v3853_v20, %v3829_v47 }
 0x3da   : > { %v3855_v9 = vpop.eup %3854  ;;  %v3370_v54 = vsel %vm3350_vm11, %v3853_v20, %v3366_v44 }
 0x3db   : > { %v3857_v5 = vpop.eup %3856  ;;  %3723 = vst.msk [vmem:[%s7073_s10 + $0x58] sm:$0xff] %vm3269_vm0, %v3370_v54  ;;  %v3365_v33 = vmul.f32 %v3855_v9, %v3835_v24 }
 0x3dc   : > { %v3859_v26 = vpop.eup %3858  ;;  %v3415_v50 = vmul.f32 %v3857_v5, %v3837_v35 }
 0x3dd   : > { %v3369_v31 = vsel %vm3349_vm12, %v3855_v9, %v3365_v33  ;;  %v3414_v43 = vmul.f32 %v3859_v26, %v3839_v13 }
 0x3de   : > { %3722 = vst.msk [vmem:[%s7073_s10 + $0x50] sm:$0xff] %vm3269_vm0, %v3369_v31  ;;  %v3419_v34 = vsel %vm3399_vm13, %v3857_v5, %v3415_v50 }
 0x3df   : > { %v3861_v41 = vpop.eup %3860  ;;  %3726 = vst.msk [vmem:[%s7073_s10 + $0x68] sm:$0xff] %vm3269_vm0, %v3419_v34  ;;  %v3418_v45 = vsel %vm3398_vm14, %v3859_v26, %v3414_v43 }
 0x3e0   : > { %v3863_v1 = vpop.eup %3862  ;;  %3725 = vst.msk [vmem:[%s7073_s10 + $0x60] sm:$0xff] %vm3269_vm0, %v3418_v45  ;;  %v3417_v16 = vmul.f32 %v3861_v41, %v3845_v22 }
 0x3e1   : > { %v3416_v21 = vmul.f32 %v3863_v1, %v3847_v23 }
 0x3e2   : > { %v3421_v42 = vsel %vm3401_vm15, %v3861_v41, %v3417_v16 }
 0x3e3   : > { %3728 = vst.msk [vmem:[%s7073_s10 + $0x78] sm:$0xff] %vm3269_vm0, %v3421_v42  ;;  %v3420_v55 = vsel %vm3400_vm1, %v3863_v1, %v3416_v21 }
 0x3e4   : > { %3727 = vst.msk [vmem:[%s7073_s10 + $0x70] sm:$0xff] %vm3269_vm0, %v3420_v55 }
 0x3e5   : > { %3943 = shalt.err (!%p3940_p1)
}
 0x3e6   : > { %s3944_s28 = scalar_lea.hbm %s7130_s20, 2048  ;;  %s3948_s5 = scalar_lea.hbm %s7184_s3, 4096 }
 0x3e7   : > { %p3945_p2 = scmp.ne.s32.totalorder %s7130_s20, %s3944_s28  ;;  %p3949_p9 = scmp.lt.s32.totalorder %s7130_s20, %s7184_s3 }
 0x3e8   : > { %p3950_p5 = scmp.lt.s32.totalorder %s3948_s5, %s3944_s28 }
 0x3e9   : > { %p3946_p3 = pnand %p3945_p2, %p7778_p12 }
 0x3ea   : > { %p3951_p6 = por %p3950_p5, %p3949_p9 }
 0x3eb   : > { %p3947_p4 = pneg %p3946_p3 }
 0x3ed   : > { %p3952_p10 = pnand %p3951_p6, %p3947_p4 }
 0x3ef   : > { %3955 = shalt.err (!%p3952_p10)
}
 0x3f0   : > { %s4005_s8 = smov 128   ;;  %s4006_s9 = smov 8  }
 0x3f1   : > { %3744 = dma.vmem_to_hbm [thread:$0]  (%p7778_p12), %s7132_s25, 2048, %s7130_s20, %s7141_s16, %s4005_s8, %s4005_s8, %s4006_s9  }
 0x3f2 PF: > { %p3761_p0 = scmp.ge.s32.totalorder %s3998_s15, 2  ;;  %s3456_s10 = sand.u32 1, %s3986_s12  }
 0x3f3   : > { %p7779_p7 = scmp.ne.s32.totalorder %s7194_s23, 0  ;;  %s3457_s11 = scalar_lea.sflag [#allocation3], %s3456_s10 }
 0x3f5   : > { %p3754_p8 = pnand %p3761_p0, %p7779_p7 }
 0x3f7   : > { %p3755_p11 = pneg %p3754_p8 }
 0x3f9   : > { %3981 = dma.done.wait (%p3755_p11), %s3457_s11, 2048  }
 0x3fa   : > { %3983 = vsyncadd (%p3755_p11), %s3457_s11, 4294965248  ;;  %p15_p13 = scmp.ge.s32.totalorder %s4052_s18, 4   ;;  %s7780_s12 = smov %s3990_s13 }
 0x3fb   : > { %s7781_s13 = smov %s3994_s14  ;;  %s7782_s14 = smov %s4063_s21 }
 0x3fc   : > { %s7783_s15 = smov %s4052_s18  ;;  %17 = sbr.rel (!%p15_p13) target bundleno = 5 (0x5), region = 82 }
 0x401   :  { %3462 = vsyncpa [#allocation3], 1 }
 0x402   :  { %3464 = vsyncpa [#allocation3 + $0x1], 1 }
 0x403   :  { %3465 = vsyncpa [#allocation4], 1 }
 0x404   :  { %3467 = vsyncpa [#allocation4 + $0x1], 1 }
 0x405   :  { %3468 = vsyncpa [#allocation6], 1 }

</bundles_post_ra>
